<compile_context>
chip_gen: v6e
topology: v6e:2x2x1
jax: 0.10.0
libtpu: 0.0.40
codegen_flags: <defaults>
</compile_context>

<pallas_src>
import jax
import jax.numpy as jnp
from jax.experimental import pallas as pl
from jax.experimental.pallas import tpu as pltpu


def _round_up(n, m):
    return ((n + m - 1) // m) * m


def _pick_tb(bp):
    """MLP rows per grid step; must divide bp and be a multiple of 16 (bf16 tile)."""
    if bp <= 16:
        return bp                      # single step; work is tiny anyway
    if bp <= 512:
        half = bp // 2                 # >=2 steps so both v7x TCs get work
        return half if half % 16 == 0 else bp
    for tb in (256, 128, 64, 32, 16):
        if bp % tb == 0:
            return tb
    return bp


# ---------------------------------------------------------------------------
# Kernel 1: fused conv(3x3, pad=1, 1->32) + maxpool(2x2) + bias + ReLU.
# One grid step handles BS samples with ONE matmul:
#   p_ref : (BS*196, 16)  bf16  4x4 stride-2 windows, rows = (sample, pooled px)
#   w_ref : (16, 128)     bf16  block-structured conv weight (4 groups x 32 ch)
#   b_ref : (1, 32)       f32   conv bias
#   out   : (BS*196, 32)  bf16  pooled+ReLU features, rows (sample, pixel)
# ---------------------------------------------------------------------------
def conv_relu_pool_kernel(p_ref, w_ref, b_ref, out_ref):
    m = jnp.dot(p_ref[...], w_ref[...],
                preferred_element_type=jnp.float32)          # (BS*196, 128) f32
    # maxpool over the four 2x2 positions = max over the four 32-lane chunks
    m = jnp.maximum(jnp.maximum(m[:, 0:32], m[:, 32:64]),
                    jnp.maximum(m[:, 64:96], m[:, 96:128]))  # (BS*196, 32)
    # relu(max_g s_g + b) == max_g relu(s_g + b)  (bias/ReLU once, after the max)
    out_ref[...] = jnp.maximum(m + b_ref[...], 0.0).astype(out_ref.dtype)


# ---------------------------------------------------------------------------
# Kernel 2: Linear(6272->64) + ReLU + Linear(64->n_classes), batch-tiled.
# Weights use constant index maps so they stay resident across grid steps.
# ---------------------------------------------------------------------------
def mlp_kernel(x_ref, w1_ref, b1_ref, w2_ref, b2_ref, out_ref):
    h = jnp.dot(x_ref[...], w1_ref[...], preferred_element_type=jnp.float32)
    h = jnp.maximum(h + b1_ref[...], 0.0)
    o = jnp.dot(h, w2_ref[...], preferred_element_type=jnp.float32) + b2_ref[...]
    out_ref[...] = o.astype(out_ref.dtype)


# ---------------------------------------------------------------------------
# One-time parameter preparation (hoisted out of the per-call forward path).
# ---------------------------------------------------------------------------
def prepare_params(params):
    conv_w, conv_b, fc1_w, fc1_b, fc2_w, fc2_b = params
    n_classes = fc2_w.shape[0]

    # (16, 128) conv weight: column chunk g=(a,b) holds the 3x3 taps placed at
    # rows (a+dy)*4 + (b+dx) of the 4x4 stride-2 window; other rows are zero.
    w_t = conv_w.reshape(32, 3, 3).transpose(1, 2, 0)          # (dy, dx, c)
    blocks = []
    for a in range(2):
        for b in range(2):
            canvas = jnp.zeros((4, 4, 32), jnp.float32)
            canvas = canvas.at[a:a + 3, b:b + 3, :].set(w_t)
            blocks.append(canvas.reshape(16, 32))
    w16 = jnp.concatenate(blocks, axis=1).astype(jnp.bfloat16)  # (16, 128)
    b_mat = conv_b.reshape(1, 32)                               # f32

    # permute fc1 weight from PyTorch flatten order (c*196 + s) to our
    # spatial-major order (s*32 + c) so feat @ w1 matches the reference.
    w1 = (fc1_w.reshape(64, 32, 196).transpose(0, 2, 1)
          .reshape(64, 6272).T).astype(jnp.bfloat16)            # (6272, 64) bf16
    b1 = fc1_b.reshape(1, 64)
    w2 = fc2_w.T                                                # (64, n_classes)
    b2 = fc2_b.reshape(1, n_classes)
    return w16, b_mat, w1, b1, w2, b2


# ---------------------------------------------------------------------------
# Forward pass wrapper (glue: one pad, one window-stack, flatten).
# ---------------------------------------------------------------------------
def cnn_forward(x, prepared):
    w16, b_mat, w1, b1, w2, b2 = prepared
    B = x.shape[0]
    n_classes = w2.shape[1]

    BS = 8 if B <= 16 else (16 if B <= 64 else 32)   # conv samples / grid step
    Bp = _round_up(B, BS)                            # pad only to BS multiple
    TB = _pick_tb(Bp)                                # MLP rows / grid step

    # -- glue: pad batch + spatial in ONE pad, BEFORE any expansion ----------
    xp = jnp.pad(x[:, 0].astype(jnp.bfloat16),
                 ((0, Bp - B), (1, 1), (1, 1)))                  # (Bp, 30, 30)
    # single pass emitting the kernel layout: win[b,i,j,r*4+c] = xp[b, 2i+r, 2j+c]
    win = jnp.stack([xp[:, r:r + 28:2, c:c + 28:2]
                     for r in range(4) for c in range(4)], axis=-1)  # (Bp,14,14,16)
    patches = win.reshape(Bp * 196, 16)                          # bf16, contiguous

    pooled = pl.pallas_call(
        conv_relu_pool_kernel,
        out_shape=jax.ShapeDtypeStruct((Bp * 196, 32), jnp.bfloat16),
        grid_spec=pltpu.PrefetchScalarGridSpec(
            num_scalar_prefetch=0,
            grid=(Bp // BS,),
            in_specs=[
                pl.BlockSpec((BS * 196, 16), lambda i: (i, 0)),
                pl.BlockSpec((16, 128), lambda i: (0, 0)),
                pl.BlockSpec((1, 32), lambda i: (0, 0)),
            ],
            out_specs=pl.BlockSpec((BS * 196, 32), lambda i: (i, 0)),
        ),
        compiler_params=pltpu.CompilerParams(
            dimension_semantics=("parallel",),
            vmem_limit_bytes=32 * 1024 * 1024,
        ),
    )(patches, w16, b_mat)

    # -- flatten: row-major (b, s, c) contiguity => free reshape -------------
    feat = pooled.reshape(Bp, 6272)                              # bf16

    out = pl.pallas_call(
        mlp_kernel,
        out_shape=jax.ShapeDtypeStruct((Bp, n_classes), jnp.float32),
        grid_spec=pltpu.PrefetchScalarGridSpec(
            num_scalar_prefetch=0,
            grid=(Bp // TB,),
            in_specs=[
                pl.BlockSpec((TB, 6272), lambda i: (i, 0)),
                pl.BlockSpec((6272, 64), lambda i: (0, 0)),
                pl.BlockSpec((1, 64), lambda i: (0, 0)),
                pl.BlockSpec((64, n_classes), lambda i: (0, 0)),
                pl.BlockSpec((1, n_classes), lambda i: (0, 0)),
            ],
            out_specs=pl.BlockSpec((TB, n_classes), lambda i: (i, 0)),
        ),
        compiler_params=pltpu.CompilerParams(
            dimension_semantics=("parallel",),
            vmem_limit_bytes=32 * 1024 * 1024,
        ),
    )(feat, w1, b1, w2, b2)
    return out[:B]


# ---------------------------------------------------------------------------
# Deterministic parameter init (PyTorch-style uniform(+-1/sqrt(fan_in))).
# ---------------------------------------------------------------------------
def init_params(key, n_classes):
    ks = jax.random.split(key, 6)

    def u(k, shape, fan_in):
        bound = 1.0 / jnp.sqrt(jnp.float32(fan_in))
        return jax.random.uniform(k, shape, jnp.float32, -bound, bound)

    conv_w = u(ks[0], (32, 1, 3, 3), 9)          # Conv2d(1, 32, 3)
    conv_b = u(ks[1], (32,), 9)
    fc1_w = u(ks[2], (64, 6272), 6272)           # Linear(6272, 64)
    fc1_b = u(ks[3], (64,), 6272)
    fc2_w = u(ks[4], (n_classes, 64), 64)        # Linear(64, n_classes)
    fc2_b = u(ks[5], (n_classes,), 64)
    return conv_w, conv_b, fc1_w, fc1_b, fc2_w, fc2_b


if __name__ == "__main__":
    key = jax.random.PRNGKey(0)
    kx, kp = jax.random.split(key)
    n_classes = 10
    B = 2
    # Linear(in_features=6272) forces 28x28 single-channel input (6272 = 32*14*14).
    x = jax.random.normal(kx, (B, 1, 28, 28), jnp.float32)   # NCHW like PyTorch
    params = init_params(kp, n_classes)

    prepared = prepare_params(params)            # one-time weight re-layout (hoisted)
    fwd = jax.jit(cnn_forward)
    out = fwd(x, prepared)
    jax.block_until_ready(out)
    assert out.shape == (B, n_classes)
    # TODO(synk): `predict`'s argmax is a trivial host-side jnp.argmax reduction, not a kernel.
    print("KERNEL_OK")
</pallas_src>

<mosaic_0001>
module attributes {stable_mosaic.version = 11 : i64} {
  func.func @conv_relu_pool_kernel(%arg0: i32, %arg1: memref<1568x16xbf16, #tpu.memory_space<vmem>>, %arg2: memref<16x128xbf16, #tpu.memory_space<vmem>>, %arg3: memref<1x32xf32, #tpu.memory_space<vmem>>, %arg4: memref<1568x32xbf16, #tpu.memory_space<vmem>>) attributes {dimension_semantics = [#tpu.dimension_semantics<parallel>], iteration_bounds = array<i64: 1>, scalar_prefetch = 0 : i64, scratch_operands = 0 : i64, tpu.core_type = #tpu.core_type<tc>, window_params = [{transform_indices = @transform_0, window_bounds = array<i64: 1568, 16>}, {pipeline_mode = #tpu.pipeline_mode<synchronous>, transform_indices = @transform_1, window_bounds = array<i64: 16, 128>}, {pipeline_mode = #tpu.pipeline_mode<synchronous>, transform_indices = @transform_2, window_bounds = array<i64: 1, 32>}, {transform_indices = @transform_3, window_bounds = array<i64: 1568, 32>}]} {
    %c0 = arith.constant 0 : index
    %c0_0 = arith.constant 0 : index
    %0 = vector.load %arg1[%c0, %c0_0] : memref<1568x16xbf16, #tpu.memory_space<vmem>>, vector<1568x16xbf16>
    %c0_1 = arith.constant 0 : index
    %c0_2 = arith.constant 0 : index
    %1 = vector.load %arg2[%c0_1, %c0_2] : memref<16x128xbf16, #tpu.memory_space<vmem>>, vector<16x128xbf16>
    %cst = arith.constant dense<0.000000e+00> : vector<1568x128xf32>
    %2 = tpu.matmul %0, %1, %cst {dimension_numbers = #tpu.dot_dimension_numbers<[1], [0], [0], [1], [0, 0, 1, 1], [], []>} : vector<1568x16xbf16>, vector<16x128xbf16>, vector<1568x128xf32> -> vector<1568x128xf32>
    %3 = vector.extract_strided_slice %2 {offsets = [0, 0], sizes = [1568, 32], strides = [1, 1]} : vector<1568x128xf32> to vector<1568x32xf32>
    %4 = vector.extract_strided_slice %2 {offsets = [0, 32], sizes = [1568, 32], strides = [1, 1]} : vector<1568x128xf32> to vector<1568x32xf32>
    %5 = arith.maximumf %3, %4 : vector<1568x32xf32>
    %6 = vector.extract_strided_slice %2 {offsets = [0, 64], sizes = [1568, 32], strides = [1, 1]} : vector<1568x128xf32> to vector<1568x32xf32>
    %7 = vector.extract_strided_slice %2 {offsets = [0, 96], sizes = [1568, 32], strides = [1, 1]} : vector<1568x128xf32> to vector<1568x32xf32>
    %8 = arith.maximumf %6, %7 : vector<1568x32xf32>
    %9 = arith.maximumf %5, %8 : vector<1568x32xf32>
    %c0_3 = arith.constant 0 : index
    %c0_4 = arith.constant 0 : index
    %10 = vector.load %arg3[%c0_3, %c0_4] : memref<1x32xf32, #tpu.memory_space<vmem>>, vector<1x32xf32>
    %11 = vector.broadcast %10 : vector<1x32xf32> to vector<1568x32xf32>
    %12 = arith.addf %9, %11 : vector<1568x32xf32>
    %cst_5 = arith.constant 0.000000e+00 : f32
    %13 = vector.broadcast %cst_5 : f32 to vector<1568x32xf32>
    %14 = arith.maximumf %12, %13 : vector<1568x32xf32>
    %15 = arith.truncf %14 : vector<1568x32xf32> to vector<1568x32xbf16>
    %c0_6 = arith.constant 0 : index
    %c0_7 = arith.constant 0 : index
    %16 = vector.load %arg4[%c0_6, %c0_7] : memref<1568x32xbf16, #tpu.memory_space<vmem>>, vector<1568x32xbf16>
    tpu.vector_store %arg4[%c0_6, %c0_7], %15 {strides = array<i32>} : memref<1568x32xbf16, #tpu.memory_space<vmem>>, vector<1568x32xbf16>,
    return
  }
  func.func @transform_0(%arg0: i32) -> (i32, i32) {
    %c0_i32 = arith.constant 0 : i32
    %c0_i32_0 = arith.constant 0 : i32
    return %arg0, %c0_i32 : i32, i32
  }
  func.func @transform_1(%arg0: i32) -> (i32, i32) {
    %c0_i32 = arith.constant 0 : i32
    %c0_i32_0 = arith.constant 0 : i32
    %c0_i32_1 = arith.constant 0 : i32
    return %c0_i32, %c0_i32_0 : i32, i32
  }
  func.func @transform_2(%arg0: i32) -> (i32, i32) {
    %c0_i32 = arith.constant 0 : i32
    %c0_i32_0 = arith.constant 0 : i32
    %c0_i32_1 = arith.constant 0 : i32
    return %c0_i32, %c0_i32_0 : i32, i32
  }
  func.func @transform_3(%arg0: i32) -> (i32, i32) {
    %c0_i32 = arith.constant 0 : i32
    %c0_i32_0 = arith.constant 0 : i32
    return %arg0, %c0_i32 : i32, i32
  }
}

module attributes {stable_mosaic.version = 11 : i64} {
  func.func @mlp_kernel(%arg0: i32, %arg1: memref<8x6272xbf16, #tpu.memory_space<vmem>>, %arg2: memref<6272x64xbf16, #tpu.memory_space<vmem>>, %arg3: memref<1x64xf32, #tpu.memory_space<vmem>>, %arg4: memref<64x10xf32, #tpu.memory_space<vmem>>, %arg5: memref<1x10xf32, #tpu.memory_space<vmem>>, %arg6: memref<8x10xf32, #tpu.memory_space<vmem>>) attributes {dimension_semantics = [#tpu.dimension_semantics<parallel>], iteration_bounds = array<i64: 1>, scalar_prefetch = 0 : i64, scratch_operands = 0 : i64, tpu.core_type = #tpu.core_type<tc>, window_params = [{transform_indices = @transform_0, window_bounds = array<i64: 8, 6272>}, {pipeline_mode = #tpu.pipeline_mode<synchronous>, transform_indices = @transform_1, window_bounds = array<i64: 6272, 64>}, {pipeline_mode = #tpu.pipeline_mode<synchronous>, transform_indices = @transform_2, window_bounds = array<i64: 1, 64>}, {pipeline_mode = #tpu.pipeline_mode<synchronous>, transform_indices = @transform_3, window_bounds = array<i64: 64, 10>}, {pipeline_mode = #tpu.pipeline_mode<synchronous>, transform_indices = @transform_4, window_bounds = array<i64: 1, 10>}, {transform_indices = @transform_5, window_bounds = array<i64: 8, 10>}]} {
    %c0 = arith.constant 0 : index
    %c0_0 = arith.constant 0 : index
    %0 = vector.load %arg1[%c0, %c0_0] : memref<8x6272xbf16, #tpu.memory_space<vmem>>, vector<8x6272xbf16>
    %c0_1 = arith.constant 0 : index
    %c0_2 = arith.constant 0 : index
    %1 = vector.load %arg2[%c0_1, %c0_2] : memref<6272x64xbf16, #tpu.memory_space<vmem>>, vector<6272x64xbf16>
    %cst = arith.constant dense<0.000000e+00> : vector<8x64xf32>
    %2 = tpu.matmul %0, %1, %cst {dimension_numbers = #tpu.dot_dimension_numbers<[1], [0], [0], [1], [0, 0, 1, 1], [], []>} : vector<8x6272xbf16>, vector<6272x64xbf16>, vector<8x64xf32> -> vector<8x64xf32>
    %c0_3 = arith.constant 0 : index
    %c0_4 = arith.constant 0 : index
    %3 = vector.load %arg3[%c0_3, %c0_4] : memref<1x64xf32, #tpu.memory_space<vmem>>, vector<1x64xf32>
    %4 = vector.broadcast %3 : vector<1x64xf32> to vector<8x64xf32>
    %5 = arith.addf %2, %4 : vector<8x64xf32>
    %cst_5 = arith.constant 0.000000e+00 : f32
    %6 = vector.broadcast %cst_5 : f32 to vector<8x64xf32>
    %7 = arith.maximumf %5, %6 : vector<8x64xf32>
    %c0_6 = arith.constant 0 : index
    %c0_7 = arith.constant 0 : index
    %8 = vector.load %arg4[%c0_6, %c0_7] : memref<64x10xf32, #tpu.memory_space<vmem>>, vector<64x10xf32>
    %cst_8 = arith.constant dense<0.000000e+00> : vector<8x10xf32>
    %9 = tpu.matmul %7, %8, %cst_8 {dimension_numbers = #tpu.dot_dimension_numbers<[1], [0], [0], [1], [0, 0, 1, 1], [], []>} : vector<8x64xf32>, vector<64x10xf32>, vector<8x10xf32> -> vector<8x10xf32>
    %c0_9 = arith.constant 0 : index
    %c0_10 = arith.constant 0 : index
    %10 = vector.load %arg5[%c0_9, %c0_10] : memref<1x10xf32, #tpu.memory_space<vmem>>, vector<1x10xf32>
    %11 = vector.broadcast %10 : vector<1x10xf32> to vector<8x10xf32>
    %12 = arith.addf %9, %11 : vector<8x10xf32>
    %c0_11 = arith.constant 0 : index
    %c0_12 = arith.constant 0 : index
    %13 = vector.load %arg6[%c0_11, %c0_12] : memref<8x10xf32, #tpu.memory_space<vmem>>, vector<8x10xf32>
    tpu.vector_store %arg6[%c0_11, %c0_12], %12 {strides = array<i32>} : memref<8x10xf32, #tpu.memory_space<vmem>>, vector<8x10xf32>,
    return
  }
  func.func @transform_0(%arg0: i32) -> (i32, i32) {
    %c0_i32 = arith.constant 0 : i32
    %c0_i32_0 = arith.constant 0 : i32
    return %arg0, %c0_i32 : i32, i32
  }
  func.func @transform_1(%arg0: i32) -> (i32, i32) {
    %c0_i32 = arith.constant 0 : i32
    %c0_i32_0 = arith.constant 0 : i32
    %c0_i32_1 = arith.constant 0 : i32
    return %c0_i32, %c0_i32_0 : i32, i32
  }
  func.func @transform_2(%arg0: i32) -> (i32, i32) {
    %c0_i32 = arith.constant 0 : i32
    %c0_i32_0 = arith.constant 0 : i32
    %c0_i32_1 = arith.constant 0 : i32
    return %c0_i32, %c0_i32_0 : i32, i32
  }
  func.func @transform_3(%arg0: i32) -> (i32, i32) {
    %c0_i32 = arith.constant 0 : i32
    %c0_i32_0 = arith.constant 0 : i32
    %c0_i32_1 = arith.constant 0 : i32
    return %c0_i32, %c0_i32_0 : i32, i32
  }
  func.func @transform_4(%arg0: i32) -> (i32, i32) {
    %c0_i32 = arith.constant 0 : i32
    %c0_i32_0 = arith.constant 0 : i32
    %c0_i32_1 = arith.constant 0 : i32
    return %c0_i32, %c0_i32_0 : i32, i32
  }
  func.func @transform_5(%arg0: i32) -> (i32, i32) {
    %c0_i32 = arith.constant 0 : i32
    %c0_i32_0 = arith.constant 0 : i32
    return %arg0, %c0_i32 : i32, i32
  }
}

</mosaic_0001>

<bundles_post_ra>
// kernel: cnn_forward.2
= control target key start
LH: loop header
LB: loop body
LE: loop exit
PB: predicated region body
PF: predicated region fallthrough
CT: control target
= control target key end

     0   :  { %vm709_vm0 = vcmask 130048   ;;  %s6158_s14 = smov 96   ;;  %vm4964_vm1 = vcmask 257024   ;;  %s10123_s1 = inlined_call_operand.vmem [shape: bf16[16,128], index: 1, kind: input, shape index: {}]   ;;  %s10124_s0 = inlined_call_operand.vmem [shape: bf16[1568,16], index: 0, kind: input, shape index: {}]   ;;  %s10125_s2 = inlined_call_operand.vmem [shape: f32[1,32], index: 2, kind: input, shape index: {}]   ;;  %s10126_s3 = inlined_call_operand.vmem [shape: bf16[1568,32], index: 3, kind: output, shape index: {}]  }
   0x1   :  { %v6056_v0 = vld [vmem:[%s10123_s1] sm:$0xff]   ;;  %v6058_v2 = vld [vmem:[%s10124_s0 + $0x190] sm:$0xff]   ;;  %v6059_v3 = vld [vmem:[%s10124_s0 + $0x8] sm:$0xff]  }
   0x2   :  { %v6057_v1 = vld [vmem:[%s10124_s0] sm:$0xff]   ;;  %5854 = vmatprep.subr.bf16.mxu0 %v6056_v0  ;;  %6052 = vmatprep.subr.bf16.mxu1 %v6056_v0  ;;  %v6060_v4 = vld [vmem:[%s10124_s0 + $0x198] sm:$0xff]   ;;  %v6061_v5 = vld [vmem:[%s10124_s0 + $0x10] sm:$0xff]  }
   0x3   :  { %5855 = vmatpush3.bf16.msra.mxu0 %v6056_v0  ;;  %6053 = vmatpush3.bf16.msra.mxu1 %v6056_v0  ;;  %v6063_v6 = vld [vmem:[%s10124_s0 + $0x1a0] sm:$0xff]   ;;  %v6062_v7 = vld [vmem:[%s10124_s0 + $0x18] sm:$0xff]   ;;  %v6064_v8 = vld [vmem:[%s10124_s0 + $0x1a8] sm:$0xff]  }
   0x4   :  { %5856 = vmatprep.mubr.msk.bf16.mxu0 %vm709_vm0, %v6057_v1  ;;  %5956 = vmatprep.mubr.msk.bf16.mxu1 %vm709_vm0, %v6058_v2  ;;  %v6065_v9 = vld [vmem:[%s10124_s0 + $0x20] sm:$0xff]   ;;  %v6067_v10 = vld [vmem:[%s10124_s0 + $0x1b0] sm:$0xff]   ;;  %v6066_v11 = vld [vmem:[%s10124_s0 + $0x28] sm:$0xff]  }
   0x5   :  { %v6068_v12 = vld [vmem:[%s10124_s0 + $0x1b8] sm:$0xff]   ;;  %v6069_v13 = vld [vmem:[%s10124_s0 + $0x30] sm:$0xff]   ;;  %v6071_v14 = vld [vmem:[%s10124_s0 + $0x1c0] sm:$0xff]  }
   0x6   :  { %5857 = vmatmul.mubr.msk.bf16.vlgmr.msra.gmra.mxu0 %vm709_vm0, %v6059_v3  ;;  %5957 = vmatmul.mubr.msk.bf16.vlgmr.msra.gmra.mxu1 %vm709_vm0, %v6060_v4  ;;  %v6070_v15 = vld [vmem:[%s10124_s0 + $0x38] sm:$0xff]   ;;  %v6072_v16 = vld [vmem:[%s10124_s0 + $0x1c8] sm:$0xff]   ;;  %v6073_v17 = vld [vmem:[%s10124_s0 + $0x40] sm:$0xff]  }
   0x7   :  { %5860 = vmatprep.mubr.msk.bf16.mxu0 %vm709_vm0, %v6061_v5  ;;  %5960 = vmatprep.mubr.msk.bf16.mxu1 %vm709_vm0, %v6063_v6  ;;  %v6075_v18 = vld [vmem:[%s10124_s0 + $0x1d0] sm:$0xff]   ;;  %v6074_v19 = vld [vmem:[%s10124_s0 + $0x48] sm:$0xff]   ;;  %v6076_v20 = vld [vmem:[%s10124_s0 + $0x1d8] sm:$0xff]  }
   0x8   :  { %v6077_v21 = vld [vmem:[%s10124_s0 + $0x50] sm:$0xff]   ;;  %v6079_v22 = vld [vmem:[%s10124_s0 + $0x1e0] sm:$0xff]   ;;  %v6078_v23 = vld [vmem:[%s10124_s0 + $0x58] sm:$0xff]  }
   0x9   :  { %v6080_v24 = vld [vmem:[%s10124_s0 + $0x1e8] sm:$0xff]   ;;  %v6081_v25 = vld [vmem:[%s10124_s0 + $0x60] sm:$0xff]   ;;  %v6083_v26 = vld [vmem:[%s10124_s0 + $0x1f0] sm:$0xff]  }
   0xa   :  { %v6082_v27 = vld [vmem:[%s10124_s0 + $0x68] sm:$0xff]   ;;  %v6084_v28 = vld [vmem:[%s10124_s0 + $0x1f8] sm:$0xff]   ;;  %v6085_v29 = vld [vmem:[%s10124_s0 + $0x70] sm:$0xff]  }
   0xb   :  { %v6087_v30 = vld [vmem:[%s10124_s0 + $0x200] sm:$0xff]   ;;  %v6086_v31 = vld [vmem:[%s10124_s0 + $0x78] sm:$0xff]   ;;  %v6088_v32 = vld [vmem:[%s10124_s0 + $0x208] sm:$0xff]  }
   0xc   :  { %v6089_v33 = vld [vmem:[%s10124_s0 + $0x80] sm:$0xff]   ;;  %v6091_v34 = vld [vmem:[%s10124_s0 + $0x210] sm:$0xff]   ;;  %v6090_v35 = vld [vmem:[%s10124_s0 + $0x88] sm:$0xff]  }
   0xd   :  { %v6092_v36 = vld [vmem:[%s10124_s0 + $0x218] sm:$0xff]   ;;  %v6093_v37 = vld [vmem:[%s10124_s0 + $0x90] sm:$0xff]   ;;  %v6095_v38 = vld [vmem:[%s10124_s0 + $0x220] sm:$0xff]  }
   0xe   :  { %5861 = vmatmul.mubr.msk.bf16.gmra.mxu0 %vm709_vm0, %v6062_v7  ;;  %5961 = vmatmul.mubr.msk.bf16.gmra.mxu1 %vm709_vm0, %v6064_v8  ;;  %v6094_v39 = vld [vmem:[%s10124_s0 + $0x98] sm:$0xff]   ;;  %v6096_v40 = vld [vmem:[%s10124_s0 + $0x228] sm:$0xff]   ;;  %v6097_v41 = vld [vmem:[%s10124_s0 + $0xa0] sm:$0xff]  }
   0xf   :  { %5864 = vmatprep.mubr.msk.bf16.mxu0 %vm709_vm0, %v6065_v9  ;;  %5964 = vmatprep.mubr.msk.bf16.mxu1 %vm709_vm0, %v6067_v10  ;;  %v6099_v42 = vld [vmem:[%s10124_s0 + $0x230] sm:$0xff]   ;;  %v6098_v43 = vld [vmem:[%s10124_s0 + $0xa8] sm:$0xff]   ;;  %v6100_v44 = vld [vmem:[%s10124_s0 + $0x238] sm:$0xff]  }
  0x10   :  { %v6101_v45 = vld [vmem:[%s10124_s0 + $0xb0] sm:$0xff]   ;;  %v6103_v46 = vld [vmem:[%s10124_s0 + $0x240] sm:$0xff]   ;;  %v6102_v47 = vld [vmem:[%s10124_s0 + $0xb8] sm:$0xff]  }
  0x11   :  { %v6104_v48 = vld [vmem:[%s10124_s0 + $0x248] sm:$0xff]   ;;  %v6105_v49 = vld [vmem:[%s10124_s0 + $0xc0] sm:$0xff]   ;;  %v6107_v50 = vld [vmem:[%s10124_s0 + $0x250] sm:$0xff]  }
  0x12   :  { %v6106_v51 = vld [vmem:[%s10124_s0 + $0xc8] sm:$0xff]   ;;  %v6108_v52 = vld [vmem:[%s10124_s0 + $0x258] sm:$0xff]   ;;  %v6109_v53 = vld [vmem:[%s10124_s0 + $0xd0] sm:$0xff]  }
  0x13   :  { %v6111_v54 = vld [vmem:[%s10124_s0 + $0x260] sm:$0xff]   ;;  %v6110_v55 = vld [vmem:[%s10124_s0 + $0xd8] sm:$0xff]   ;;  %v6112_v56 = vld [vmem:[%s10124_s0 + $0x268] sm:$0xff]  }
  0x14   :  { %v6113_v57 = vld [vmem:[%s10124_s0 + $0xe0] sm:$0xff]   ;;  %v6115_v58 = vld [vmem:[%s10124_s0 + $0x270] sm:$0xff]   ;;  %v6114_v59 = vld [vmem:[%s10124_s0 + $0xe8] sm:$0xff]  }
  0x15   :  { %v6116_v60 = vld [vmem:[%s10124_s0 + $0x278] sm:$0xff]   ;;  %v6117_v61 = vld [vmem:[%s10124_s0 + $0xf0] sm:$0xff]   ;;  %v6119_v62 = vld [vmem:[%s10124_s0 + $0x280] sm:$0xff]  }
  0x16   :  { %5865 = vmatmul.mubr.msk.bf16.gmra.mxu0 %vm709_vm0, %v6066_v11  ;;  %5965 = vmatmul.mubr.msk.bf16.gmra.mxu1 %vm709_vm0, %v6068_v12  ;;  %v6118_v63 = vld [vmem:[%s10124_s0 + $0xf8] sm:$0xff]   ;;  %v6120_v0 = vld [vmem:[%s10124_s0 + $0x288] sm:$0xff]   ;;  %v6121_v1 = vld [vmem:[%s10124_s0 + $0x100] sm:$0xff]  }
  0x17   :  { %5868 = vmatprep.mubr.msk.bf16.mxu0 %vm709_vm0, %v6069_v13  ;;  %5968 = vmatprep.mubr.msk.bf16.mxu1 %vm709_vm0, %v6071_v14  ;;  %v6123_v2 = vld [vmem:[%s10124_s0 + $0x290] sm:$0xff]   ;;  %v6122_v3 = vld [vmem:[%s10124_s0 + $0x108] sm:$0xff]   ;;  %v6124_v4 = vld [vmem:[%s10124_s0 + $0x298] sm:$0xff]  }
  0x18   :  { %v6125_v5 = vld [vmem:[%s10124_s0 + $0x110] sm:$0xff]   ;;  %v6126_v6 = vld [vmem:[%s10124_s0 + $0x118] sm:$0xff]   ;;  %v6127_v7 = vld [vmem:[%s10124_s0 + $0x2a0] sm:$0xff]  }
  0x19   :  { %v6128_v8 = vld [vmem:[%s10124_s0 + $0x2a8] sm:$0xff]   ;;  %v6129_v9 = vld [vmem:[%s10124_s0 + $0x120] sm:$0xff]   ;;  %v6131_v11 = vld [vmem:[%s10124_s0 + $0x2b0] sm:$0xff]  }
  0x1a   :  { %v6130_v10 = vld [vmem:[%s10124_s0 + $0x128] sm:$0xff]   ;;  %v6132_v12 = vld [vmem:[%s10124_s0 + $0x2b8] sm:$0xff]   ;;  %v6133_v13 = vld [vmem:[%s10124_s0 + $0x130] sm:$0xff]  }
  0x1b   :  { %v6134_v14 = vld [vmem:[%s10124_s0 + $0x138] sm:$0xff]  }
  0x1e   :  { %5869 = vmatmul.mubr.msk.bf16.gmra.mxu0 %vm709_vm0, %v6070_v15  ;;  %5969 = vmatmul.mubr.msk.bf16.gmra.mxu1 %vm709_vm0, %v6072_v16  ;;  %v6135_v15 = vld [vmem:[%s10124_s0 + $0x2c0] sm:$0xff]   ;;  %v6136_v16 = vld [vmem:[%s10124_s0 + $0x2c8] sm:$0xff]  }
  0x1f   :  { %5872 = vmatprep.mubr.msk.bf16.mxu0 %vm709_vm0, %v6073_v17  ;;  %5972 = vmatprep.mubr.msk.bf16.mxu1 %vm709_vm0, %v6075_v18  ;;  %v6137_v17 = vld [vmem:[%s10124_s0 + $0x140] sm:$0xff]   ;;  %v6138_v18 = vld [vmem:[%s10124_s0 + $0x148] sm:$0xff]  }
  0x26   :  { %5873 = vmatmul.mubr.msk.bf16.gmra.mxu0 %vm709_vm0, %v6074_v19  ;;  %5973 = vmatmul.mubr.msk.bf16.gmra.mxu1 %vm709_vm0, %v6076_v20  ;;  %v6139_v19 = vld [vmem:[%s10124_s0 + $0x2d0] sm:$0xff]   ;;  %v6140_v20 = vld [vmem:[%s10124_s0 + $0x2d8] sm:$0xff]  }
  0x27   :  { %5876 = vmatprep.mubr.msk.bf16.mxu0 %vm709_vm0, %v6077_v21  ;;  %5976 = vmatprep.mubr.msk.bf16.mxu1 %vm709_vm0, %v6079_v22 }
  0x2e   :  { %5877 = vmatmul.mubr.msk.bf16.gmra.mxu0 %vm709_vm0, %v6078_v23  ;;  %5977 = vmatmul.mubr.msk.bf16.gmra.mxu1 %vm709_vm0, %v6080_v24 }
  0x2f   :  { %5880 = vmatprep.mubr.msk.bf16.mxu0 %vm709_vm0, %v6081_v25  ;;  %5980 = vmatprep.mubr.msk.bf16.mxu1 %vm709_vm0, %v6083_v26 }
  0x36   :  { %5881 = vmatmul.mubr.msk.bf16.gmra.mxu0 %vm709_vm0, %v6082_v27  ;;  %5981 = vmatmul.mubr.msk.bf16.gmra.mxu1 %vm709_vm0, %v6084_v28  ;;  %v6141_v28 = vld [vmem:[%s10124_s0 + $0x150] sm:$0xff]  }
  0x37   :  { %5884 = vmatprep.mubr.msk.bf16.mxu0 %vm709_vm0, %v6085_v29  ;;  %5984 = vmatprep.mubr.msk.bf16.mxu1 %vm709_vm0, %v6087_v30  ;;  %v6142_v30 = vld [vmem:[%s10124_s0 + $0x158] sm:$0xff]  }
  0x3e   :  { %5885 = vmatmul.mubr.msk.bf16.gmra.mxu0 %vm709_vm0, %v6086_v31  ;;  %5985 = vmatmul.mubr.msk.bf16.gmra.mxu1 %vm709_vm0, %v6088_v32  ;;  %v6143_v32 = vld [vmem:[%s10124_s0 + $0x2e0] sm:$0xff]  }
  0x3f   :  { %5888 = vmatprep.mubr.msk.bf16.mxu0 %vm709_vm0, %v6089_v33  ;;  %5988 = vmatprep.mubr.msk.bf16.mxu1 %vm709_vm0, %v6091_v34 }
  0x46   :  { %5889 = vmatmul.mubr.msk.bf16.gmra.mxu0 %vm709_vm0, %v6090_v35  ;;  %5989 = vmatmul.mubr.msk.bf16.gmra.mxu1 %vm709_vm0, %v6092_v36  ;;  %v6144_v35 = vld [vmem:[%s10124_s0 + $0x2e8] sm:$0xff]  }
  0x47   :  { %5892 = vmatprep.mubr.msk.bf16.mxu0 %vm709_vm0, %v6093_v37  ;;  %5992 = vmatprep.mubr.msk.bf16.mxu1 %vm709_vm0, %v6095_v38 }
  0x4e   :  { %5893 = vmatmul.mubr.msk.bf16.gmra.mxu0 %vm709_vm0, %v6094_v39  ;;  %5993 = vmatmul.mubr.msk.bf16.gmra.mxu1 %vm709_vm0, %v6096_v40  ;;  %v6145_v40 = vld [vmem:[%s10124_s0 + $0x160] sm:$0xff]  }
  0x4f   :  { %5896 = vmatprep.mubr.msk.bf16.mxu0 %vm709_vm0, %v6097_v41  ;;  %5996 = vmatprep.mubr.msk.bf16.mxu1 %vm709_vm0, %v6099_v42  ;;  %v6146_v42 = vld [vmem:[%s10124_s0 + $0x168] sm:$0xff]  }
  0x56   :  { %5897 = vmatmul.mubr.msk.bf16.gmra.mxu0 %vm709_vm0, %v6098_v43  ;;  %5997 = vmatmul.mubr.msk.bf16.gmra.mxu1 %vm709_vm0, %v6100_v44  ;;  %v6147_v44 = vld [vmem:[%s10124_s0 + $0x2f0] sm:$0xff]  }
  0x57   :  { %5900 = vmatprep.mubr.msk.bf16.mxu0 %vm709_vm0, %v6101_v45  ;;  %6000 = vmatprep.mubr.msk.bf16.mxu1 %vm709_vm0, %v6103_v46 }
  0x5e   :  { %5901 = vmatmul.mubr.msk.bf16.gmra.mxu0 %vm709_vm0, %v6102_v47  ;;  %6001 = vmatmul.mubr.msk.bf16.gmra.mxu1 %vm709_vm0, %v6104_v48  ;;  %v6148_v47 = vld [vmem:[%s10124_s0 + $0x2f8] sm:$0xff]  }
  0x5f   :  { %5904 = vmatprep.mubr.msk.bf16.mxu0 %vm709_vm0, %v6105_v49  ;;  %6004 = vmatprep.mubr.msk.bf16.mxu1 %vm709_vm0, %v6107_v50 }
  0x66   :  { %5905 = vmatmul.mubr.msk.bf16.gmra.mxu0 %vm709_vm0, %v6106_v51  ;;  %6005 = vmatmul.mubr.msk.bf16.gmra.mxu1 %vm709_vm0, %v6108_v52  ;;  %v6149_v52 = vld [vmem:[%s10124_s0 + $0x170] sm:$0xff]  }
  0x67   :  { %5908 = vmatprep.mubr.msk.bf16.mxu0 %vm709_vm0, %v6109_v53  ;;  %6008 = vmatprep.mubr.msk.bf16.mxu1 %vm709_vm0, %v6111_v54  ;;  %v6150_v54 = vld [vmem:[%s10124_s0 + $0x178] sm:$0xff]  }
  0x6e   :  { %5909 = vmatmul.mubr.msk.bf16.gmra.mxu0 %vm709_vm0, %v6110_v55  ;;  %6009 = vmatmul.mubr.msk.bf16.gmra.mxu1 %vm709_vm0, %v6112_v56  ;;  %v6151_v56 = vld [vmem:[%s10124_s0 + $0x300] sm:$0xff]  }
  0x6f   :  { %5912 = vmatprep.mubr.msk.bf16.mxu0 %vm709_vm0, %v6113_v57  ;;  %6012 = vmatprep.mubr.msk.bf16.mxu1 %vm709_vm0, %v6115_v58 }
  0x76   :  { %5913 = vmatmul.mubr.msk.bf16.gmra.mxu0 %vm709_vm0, %v6114_v59  ;;  %6013 = vmatmul.mubr.msk.bf16.gmra.mxu1 %vm709_vm0, %v6116_v60  ;;  %v6152_v59 = vld [vmem:[%s10124_s0 + $0x308] sm:$0xff]  }
  0x77   :  { %5916 = vmatprep.mubr.msk.bf16.mxu0 %vm709_vm0, %v6117_v61  ;;  %6016 = vmatprep.mubr.msk.bf16.mxu1 %vm709_vm0, %v6119_v62 }
  0x7e   :  { %5917 = vmatmul.mubr.msk.bf16.gmra.mxu0 %vm709_vm0, %v6118_v63  ;;  %6017 = vmatmul.mubr.msk.bf16.gmra.mxu1 %vm709_vm0, %v6120_v0 }
  0x7f   :  { %5920 = vmatprep.mubr.msk.bf16.mxu0 %vm709_vm0, %v6121_v1  ;;  %6020 = vmatprep.mubr.msk.bf16.mxu1 %vm709_vm0, %v6123_v2  ;;  %v6153_v2 = vld [vmem:[%s10124_s0 + $0x180] sm:$0xff]  }
  0x86   :  { %5921 = vmatmul.mubr.msk.bf16.gmra.mxu0 %vm709_vm0, %v6122_v3  ;;  %6021 = vmatmul.mubr.msk.bf16.gmra.mxu1 %vm709_vm0, %v6124_v4 }
  0x87   :  { %5924 = vmatprep.mubr.msk.bf16.mxu0 %vm709_vm0, %v6125_v5  ;;  %6024 = vmatprep.mubr.msk.bf16.mxu1 %vm709_vm0, %v6127_v7  ;;  %v6154_v5 = vld [vmem:[%s10124_s0 + $0x188] sm:$0xff]   ;;  %s6159_s0 = smov 64  }
  0x8e   :  { %5925 = vmatmul.mubr.msk.bf16.gmra.mxu0 %vm709_vm0, %v6126_v6  ;;  %6025 = vmatmul.mubr.msk.bf16.gmra.mxu1 %vm709_vm0, %v6128_v8 }
  0x8f   :  { %5928 = vmatprep.mubr.msk.bf16.mxu0 %vm709_vm0, %v6129_v9  ;;  %6028 = vmatprep.mubr.msk.bf16.mxu1 %vm709_vm0, %v6131_v11 }
  0x96   :  { %5929 = vmatmul.mubr.msk.bf16.gmra.mxu0 %vm709_vm0, %v6130_v10  ;;  %6029 = vmatmul.mubr.msk.bf16.gmra.mxu1 %vm709_vm0, %v6132_v12 }
  0x97   :  { %5932 = vmatprep.mubr.msk.bf16.mxu0 %vm709_vm0, %v6133_v13  ;;  %6032 = vmatprep.mubr.msk.bf16.mxu1 %vm709_vm0, %v6135_v15 }
  0x9e   :  { %5933 = vmatmul.mubr.msk.bf16.gmra.mxu0 %vm709_vm0, %v6134_v14  ;;  %6033 = vmatmul.mubr.msk.bf16.gmra.mxu1 %vm709_vm0, %v6136_v16 }
  0x9f   :  { %5936 = vmatprep.mubr.msk.bf16.mxu0 %vm709_vm0, %v6137_v17  ;;  %6036 = vmatprep.mubr.msk.bf16.mxu1 %vm709_vm0, %v6139_v19 }
  0xa6   :  { %5937 = vmatmul.mubr.msk.bf16.gmra.mxu0 %vm709_vm0, %v6138_v18  ;;  %6037 = vmatmul.mubr.msk.bf16.gmra.mxu1 %vm709_vm0, %v6140_v20 }
  0xa7   :  { %5940 = vmatprep.mubr.msk.bf16.mxu0 %vm709_vm0, %v6141_v28  ;;  %6040 = vmatprep.mubr.msk.bf16.mxu1 %vm709_vm0, %v6143_v32 }
  0xae   :  { %5941 = vmatmul.mubr.msk.bf16.gmra.mxu0 %vm709_vm0, %v6142_v30  ;;  %6041 = vmatmul.mubr.msk.bf16.gmra.mxu1 %vm709_vm0, %v6144_v35 }
  0xaf   :  { %5944 = vmatprep.mubr.msk.bf16.mxu0 %vm709_vm0, %v6145_v40  ;;  %6044 = vmatprep.mubr.msk.bf16.mxu1 %vm709_vm0, %v6147_v44 }
  0xb6   :  { %5945 = vmatmul.mubr.msk.bf16.gmra.mxu0 %vm709_vm0, %v6146_v42  ;;  %6045 = vmatmul.mubr.msk.bf16.gmra.mxu1 %vm709_vm0, %v6148_v47 }
  0xb7   :  { %5948 = vmatprep.mubr.msk.bf16.mxu0 %vm709_vm0, %v6149_v52  ;;  %6048 = vmatprep.mubr.msk.bf16.mxu1 %vm709_vm0, %v6151_v56 }
  0xbe   :  { %5949 = vmatmul.mubr.msk.bf16.gmra.mxu0 %vm709_vm0, %v6150_v54  ;;  %6049 = vmatmul.mubr.msk.bf16.gmra.mxu1 %vm709_vm0, %v6152_v59 }
  0xbf   :  { %5952 = vmatprep.mubr.msk.bf16.mxu0 %vm709_vm0, %v6153_v2 }
  0xc6   :  { %v6519_v21 = vpop.f32.mrf.mxu0  ;;  %v6521_v22 = vpop.f32.mrf.mxu1  ;;  %5953 = vmatmul.mubr.msk.bf16.gmra.mxu0 %vm709_vm0, %v6154_v5 }
  0xc7   :  { %10353 = vst [vmem:[#allocation2_spill] sm:$0xff] %v6521_v22  ;;  %2221 = vrot.lane.b32.xlu0 %v6521_v22, %s6158_s14  ;;  %2021 = vrot.lane.b32.xlu1 %v6519_v21, %s6158_s14 }
  0xc8   :  { %v6527_v23 = vpop.f32.mrf.mxu0  ;;  %v6529_v24 = vpop.f32.mrf.mxu1 }
  0xc9   :  { %10354 = vst [vmem:[#allocation3_spill] sm:$0xff] %v6529_v24 }
  0xca   :  { %v6531_v25 = vpop.f32.mrf.mxu0  ;;  %v6537_v26 = vpop.f32.mrf.mxu1 }
  0xcb   :  { %2017 = vrot.lane.b32.xlu0 %v6527_v23, %s6158_s14  ;;  %2023 = vrot.lane.b32.xlu1 %v6531_v25, %s6158_s14  ;;  %10355 = vst [vmem:[#allocation4_spill] sm:$0xff] %v6537_v26 }
  0xcc   :  { %v6539_v27 = vpop.f32.mrf.mxu0  ;;  %v6553_v31 = vpop.f32.mrf.mxu1 }
  0xcd   :  { %10356 = vst [vmem:[#allocation5_spill] sm:$0xff] %v6553_v31 }
  0xce   :  { %v6544_v29 = vpop.f32.mrf.mxu0  ;;  %v6562_v34 = vpop.f32.mrf.mxu1 }
  0xcf   :  { %2217 = vrot.lane.b32.xlu0 %v6529_v24, %s6158_s14  ;;  %2223 = vrot.lane.b32.xlu1 %v6537_v26, %s6158_s14  ;;  %10357 = vst [vmem:[#allocation6_spill] sm:$0xff] %v6562_v34 }
  0xd0   :  { %v6560_v33 = vpop.f32.mrf.mxu0  ;;  %v6575_v37 = vpop.f32.mrf.mxu1 }
  0xd1   :  { %10358 = vst [vmem:[#allocation7_spill] sm:$0xff] %v6575_v37 }
  0xd2   :  { %v6573_v36 = vpop.f32.mrf.mxu0  ;;  %v6581_v38 = vpop.f32.mrf.mxu1 }
  0xd3   :  { %2219 = vrot.lane.b32.xlu1 %v6553_v31, %s6158_s14  ;;  %2019 = vrot.lane.b32.xlu0 %v6539_v27, %s6158_s14  ;;  %10359 = vst [vmem:[#allocation8_spill] sm:$0xff] %v6581_v38 }
  0xd4   :  { %v6587_v39 = vpop.f32.mrf.mxu0  ;;  %v6601_v43 = vpop.f32.mrf.mxu1 }
  0xd5   :  { %10360 = vst [vmem:[#allocation9_spill] sm:$0xff] %v6601_v43 }
  0xd6   :  { %v6592_v41 = vpop.f32.mrf.mxu0  ;;  %v6610_v46 = vpop.f32.mrf.mxu1 }
  0xd7   :  { %2029 = vrot.lane.b32.xlu0 %v6544_v29, %s6158_s14  ;;  %2031 = vrot.lane.b32.xlu1 %v6573_v36, %s6158_s14  ;;  %10361 = vst [vmem:[#allocation10_spill] sm:$0xff] %v6610_v46 }
  0xd8   :  { %v6608_v45 = vpop.f32.mrf.mxu0  ;;  %v6623_v49 = vpop.f32.mrf.mxu1 }
  0xd9   :  { %10362 = vst [vmem:[#allocation11_spill] sm:$0xff] %v6623_v49 }
  0xda   :  { %v6621_v48 = vpop.f32.mrf.mxu0  ;;  %v6629_v50 = vpop.f32.mrf.mxu1 }
  0xdb   :  { %2229 = vrot.lane.b32.xlu0 %v6562_v34, %s6158_s14  ;;  %2231 = vrot.lane.b32.xlu1 %v6581_v38, %s6158_s14  ;;  %10363 = vst [vmem:[#allocation12_spill] sm:$0xff] %v6629_v50 }
  0xdc   :  { %v6635_v51 = vpop.f32.mrf.mxu0  ;;  %v6649_v55 = vpop.f32.mrf.mxu1 }
  0xdd   :  { %10364 = vst [vmem:[#allocation13_spill] sm:$0xff] %v6649_v55 }
  0xde   :  { %v6640_v53 = vpop.f32.mrf.mxu0  ;;  %v6658_v58 = vpop.f32.mrf.mxu1 }
  0xdf   :  { %2025 = vrot.lane.b32.xlu0 %v6560_v33, %s6158_s14  ;;  %2027 = vrot.lane.b32.xlu1 %v6587_v39, %s6158_s14  ;;  %10365 = vst [vmem:[#allocation14_spill] sm:$0xff] %v6658_v58 }
  0xe0   :  { %v6656_v57 = vpop.f32.mrf.mxu0  ;;  %v6671_v61 = vpop.f32.mrf.mxu1 }
  0xe1   :  { %10366 = vst [vmem:[#allocation15_spill] sm:$0xff] %v6671_v61 }
  0xe2   :  { %v6669_v60 = vpop.f32.mrf.mxu0  ;;  %v6677_v62 = vpop.f32.mrf.mxu1 }
  0xe3   :  { %2225 = vrot.lane.b32.xlu0 %v6575_v37, %s6158_s14  ;;  %2227 = vrot.lane.b32.xlu1 %v6601_v43, %s6158_s14  ;;  %10367 = vst [vmem:[#allocation16_spill] sm:$0xff] %v6677_v62 }
  0xe4   :  { %v6683_v63 = vpop.f32.mrf.mxu0  ;;  %v6691_v1 = vpop.f32.mrf.mxu1 }
  0xe5   :  { %10368 = vst [vmem:[#allocation17_spill] sm:$0xff] %v6691_v1 }
  0xe6   :  { %v6685_v0 = vpop.f32.mrf.mxu0  ;;  %v6698_v4 = vpop.f32.mrf.mxu1 }
  0xe7   :  { %2037 = vrot.lane.b32.xlu0 %v6592_v41, %s6158_s14  ;;  %2039 = vrot.lane.b32.xlu1 %v6621_v48, %s6158_s14  ;;  %10369 = vst [vmem:[#allocation18_spill] sm:$0xff] %v6698_v4 }
  0xe8   :  { %v6696_v3 = vpop.f32.mrf.mxu0  ;;  %v6711_v7 = vpop.f32.mrf.mxu1 }
  0xe9   :  { %10370 = vst [vmem:[#allocation19_spill] sm:$0xff] %v6711_v7 }
  0xea   :  { %v6709_v6 = vpop.f32.mrf.mxu0  ;;  %v6717_v8 = vpop.f32.mrf.mxu1 }
  0xeb   :  { %2237 = vrot.lane.b32.xlu0 %v6610_v46, %s6158_s14  ;;  %2239 = vrot.lane.b32.xlu1 %v6629_v50, %s6158_s14  ;;  %10371 = vst [vmem:[#allocation20_spill] sm:$0xff] %v6717_v8 }
  0xec   :  { %v6723_v9 = vpop.f32.mrf.mxu0  ;;  %v6731_v11 = vpop.f32.mrf.mxu1 }
  0xed   :  { %10372 = vst [vmem:[#allocation21_spill] sm:$0xff] %v6731_v11 }
  0xee   :  { %v6725_v10 = vpop.f32.mrf.mxu0  ;;  %v6735_v13 = vpop.f32.mrf.mxu1 }
  0xef   :  { %2033 = vrot.lane.b32.xlu0 %v6608_v45, %s6158_s14  ;;  %2035 = vrot.lane.b32.xlu1 %v6635_v51, %s6158_s14  ;;  %10373 = vst [vmem:[#allocation22_spill] sm:$0xff] %v6735_v13 }
  0xf0   :  { %v6733_v12 = vpop.f32.mrf.mxu0  ;;  %v6743_v15 = vpop.f32.mrf.mxu1 }
  0xf1   :  { %10374 = vst [vmem:[#allocation23_spill] sm:$0xff] %v6743_v15 }
  0xf2   :  { %v6741_v14 = vpop.f32.mrf.mxu0  ;;  %v6749_v16 = vpop.f32.mrf.mxu1 }
  0xf3   :  { %2233 = vrot.lane.b32.xlu0 %v6623_v49, %s6158_s14  ;;  %2235 = vrot.lane.b32.xlu1 %v6649_v55, %s6158_s14  ;;  %10375 = vst [vmem:[#allocation24_spill] sm:$0xff] %v6749_v16 }
  0xf4   :  { %v6755_v17 = vpop.f32.mrf.mxu0  ;;  %v6763_v19 = vpop.f32.mrf.mxu1 }
  0xf5   :  { %10377 = vst [vmem:[#allocation26_spill] sm:$0xff] %v6763_v19 }
  0xf6   :  { %v6757_v18 = vpop.f32.mrf.mxu0  ;;  %v6767_v28 = vpop.f32.mrf.mxu1 }
  0xf7   :  { %2045 = vrot.lane.b32.xlu0 %v6640_v53, %s6158_s14  ;;  %2047 = vrot.lane.b32.xlu1 %v6669_v60, %s6158_s14  ;;  %10376 = vst [vmem:[#allocation25_spill] sm:$0xff] %v6757_v18  ;;  %10378 = vst [vmem:[#allocation27_spill] sm:$0xff] %v6767_v28 }
  0xf8   :  { %v6765_v20 = vpop.f32.mrf.mxu0  ;;  %v6775_v32 = vpop.f32.mrf.mxu1 }
  0xf9   :  { %10380 = vst [vmem:[#allocation29_spill] sm:$0xff] %v6775_v32 }
  0xfa   :  { %v6773_v30 = vpop.f32.mrf.mxu0  ;;  %v6781_v35 = vpop.f32.mrf.mxu1 }
  0xfb   :  { %2245 = vrot.lane.b32.xlu0 %v6658_v58, %s6158_s14  ;;  %2247 = vrot.lane.b32.xlu1 %v6677_v62, %s6158_s14  ;;  %10379 = vst [vmem:[#allocation28_spill] sm:$0xff] %v6773_v30  ;;  %10381 = vst [vmem:[#allocation30_spill] sm:$0xff] %v6781_v35 }
  0xfc   :  { %v6787_v40 = vpop.f32.mrf.mxu0  ;;  %v6795_v44 = vpop.f32.mrf.mxu1 }
  0xfd   :  { %10382 = vst [vmem:[#allocation31_spill] sm:$0xff] %v6787_v40  ;;  %10384 = vst [vmem:[#allocation33_spill] sm:$0xff] %v6795_v44 }
  0xfe   :  { %v6789_v42 = vpop.f32.mrf.mxu0  ;;  %v6799_v52 = vpop.f32.mrf.mxu1 }
  0xff   :  { %2041 = vrot.lane.b32.xlu0 %v6656_v57, %s6158_s14  ;;  %2043 = vrot.lane.b32.xlu1 %v6683_v63, %s6158_s14  ;;  %10383 = vst [vmem:[#allocation32_spill] sm:$0xff] %v6789_v42  ;;  %10386 = vst [vmem:[#allocation35_spill] sm:$0xff] %v6799_v52 }
 0x100   :  { %v6797_v47 = vpop.f32.mrf.mxu0  ;;  %v6807_v56 = vpop.f32.mrf.mxu1 }
 0x101   :  { %10385 = vst [vmem:[#allocation34_spill] sm:$0xff] %v6797_v47  ;;  %10388 = vst [vmem:[#allocation37_spill] sm:$0xff] %v6807_v56 }
 0x102   :  { %v6805_v54 = vpop.f32.mrf.mxu0  ;;  %v6817_v5 = vpop.f32.mrf.mxu1 }
 0x103   :  { %2241 = vrot.lane.b32.xlu0 %v6671_v61, %s6158_s14  ;;  %2243 = vrot.lane.b32.xlu1 %v6691_v1, %s6158_s14  ;;  %10387 = vst [vmem:[#allocation36_spill] sm:$0xff] %v6805_v54  ;;  %10390 = vst [vmem:[#allocation39_spill] sm:$0xff] %v6817_v5 }
 0x107   :  { %2053 = vrot.lane.b32.xlu0 %v6685_v0, %s6158_s14  ;;  %2055 = vrot.lane.b32.xlu1 %v6709_v6, %s6158_s14 }
 0x10b   :  { %2253 = vrot.lane.b32.xlu0 %v6698_v4, %s6158_s14  ;;  %2255 = vrot.lane.b32.xlu1 %v6717_v8, %s6158_s14 }
 0x10f   :  { %2049 = vrot.lane.b32.xlu0 %v6696_v3, %s6158_s14  ;;  %2051 = vrot.lane.b32.xlu1 %v6723_v9, %s6158_s14 }
 0x113   :  { %2249 = vrot.lane.b32.xlu0 %v6711_v7, %s6158_s14  ;;  %2251 = vrot.lane.b32.xlu1 %v6731_v11, %s6158_s14 }
 0x117   :  { %2061 = vrot.lane.b32.xlu0 %v6725_v10, %s6158_s14  ;;  %2063 = vrot.lane.b32.xlu1 %v6741_v14, %s6158_s14 }
 0x11b   :  { %2261 = vrot.lane.b32.xlu0 %v6735_v13, %s6158_s14  ;;  %2263 = vrot.lane.b32.xlu1 %v6749_v16, %s6158_s14  ;;  %v6835_v16 = vpop.f32.mrf.mxu1 }
 0x11c   :  { %10393 = vst [vmem:[#allocation42_spill] sm:$0xff] %v6835_v16 }
 0x11f   :  { %2057 = vrot.lane.b32.xlu0 %v6733_v12, %s6158_s14  ;;  %2059 = vrot.lane.b32.xlu1 %v6755_v17, %s6158_s14 }
 0x123   :  { %2257 = vrot.lane.b32.xlu0 %v6743_v15, %s6158_s14  ;;  %2259 = vrot.lane.b32.xlu1 %v6763_v19, %s6158_s14  ;;  %v6843_v19 = vpop.f32.mrf.mxu1 }
 0x124   :  { %10397 = vst [vmem:[#allocation46_spill] sm:$0xff] %v6843_v19 }
 0x125   :  { %v6855_v11 = vpop.f32.mrf.mxu1 }
 0x126   :  { %10400 = vst [vmem:[#allocation49_spill] sm:$0xff] %v6855_v11 }
 0x127   :  { %2069 = vrot.lane.b32.xlu0 %v6757_v18, %s6158_s14  ;;  %2071 = vrot.lane.b32.xlu1 %v6773_v30, %s6158_s14  ;;  %v6865_v62 = vpop.f32.mrf.mxu1 }
 0x128   :  { %10401 = vst [vmem:[#allocation50_spill] sm:$0xff] %v6865_v62 }
 0x129   :  { %v6883_v50 = vpop.f32.mrf.mxu1 }
 0x12a   :  { %10406 = vst [vmem:[#allocation55_spill] sm:$0xff] %v6883_v50 }
 0x12b   :  { %2269 = vrot.lane.b32.xlu0 %v6767_v28, %s6158_s14  ;;  %2271 = vrot.lane.b32.xlu1 %v6781_v35, %s6158_s14  ;;  %v6823_v35 = vpop.f32.mrf.mxu0  ;;  %v6891_v55 = vpop.f32.mrf.mxu1 }
 0x12c   :  { %10391 = vst [vmem:[#allocation40_spill] sm:$0xff] %v6823_v35  ;;  %10408 = vst [vmem:[#allocation57_spill] sm:$0xff] %v6891_v55 }
 0x12d   :  { %v6903_v34 = vpop.f32.mrf.mxu1 }
 0x12e   :  { %10412 = vst [vmem:[#allocation61_spill] sm:$0xff] %v6903_v34 }
 0x12f   :  { %2065 = vrot.lane.b32.xlu0 %v6765_v20, %s6158_s14  ;;  %2067 = vrot.lane.b32.xlu1 %v6787_v40, %s6158_s14  ;;  %v6913_v43 = vpop.f32.mrf.mxu1 }
 0x130   :  { %10413 = vst [vmem:[#allocation62_spill] sm:$0xff] %v6913_v43 }
 0x131   :  { %v6931_v26 = vpop.f32.mrf.mxu1 }
 0x132   :  { %10418 = vst [vmem:[#allocation67_spill] sm:$0xff] %v6931_v26 }
 0x133   :  { %2265 = vrot.lane.b32.xlu0 %v6775_v32, %s6158_s14  ;;  %2267 = vrot.lane.b32.xlu1 %v6795_v44, %s6158_s14  ;;  %v6829_v32 = vpop.f32.mrf.mxu0  ;;  %v6939_v22 = vpop.f32.mrf.mxu1 }
 0x134   :  { %10392 = vst [vmem:[#allocation41_spill] sm:$0xff] %v6829_v32  ;;  %10420 = vst [vmem:[#allocation69_spill] sm:$0xff] %v6939_v22 }
 0x135   :  { %v6951_v31 = vpop.f32.mrf.mxu1 }
 0x136   :  { %10424 = vst [vmem:[#allocation73_spill] sm:$0xff] %v6951_v31 }
 0x137   :  { %2077 = vrot.lane.b32.xlu0 %v6789_v42, %s6158_s14  ;;  %2079 = vrot.lane.b32.xlu1 %v6805_v54, %s6158_s14  ;;  %v6961_v24 = vpop.f32.mrf.mxu1 }
 0x138   :  { %10425 = vst [vmem:[#allocation74_spill] sm:$0xff] %v6961_v24 }
 0x139   :  { %v6813_v59 = vpop.permute.xlu0 %2221  ;;  %v6815_v2 = vpop.permute.xlu1 %2021 }
 0x13a   :  { %10389 = vst [vmem:[#allocation38_spill] sm:$0xff] %v6813_v59 }
 0x13b   :  { %2277 = vrot.lane.b32.xlu0 %v6799_v52, %s6158_s14  ;;  %2279 = vrot.lane.b32.xlu1 %v6817_v5, %s6158_s14  ;;  %v6841_v5 = vpop.f32.mrf.mxu0 }
 0x13c   :  { %10396 = vst [vmem:[#allocation45_spill] sm:$0xff] %v6841_v5 }
 0x13d   :  { %v6825_v28 = vpop.permute.xlu0 %2017  ;;  %v6827_v44 = vpop.permute.xlu1 %2023 }
 0x13e   :  { %v6853_v4 = vpop.f32.mrf.mxu0 }
 0x13f   :  { %2073 = vrot.lane.b32.xlu0 %v6797_v47, %s6158_s14  ;;  %2075 = vrot.lane.b32.xlu1 %v6823_v35, %s6158_s14  ;;  %10399 = vst [vmem:[#allocation48_spill] sm:$0xff] %v6853_v4 }
 0x141   :  { %v6837_v52 = vpop.permute.xlu0 %2217  ;;  %v6839_v13 = vpop.permute.xlu1 %2223 }
 0x142   :  { %10394 = vst [vmem:[#allocation43_spill] sm:$0xff] %v6837_v52  ;;  %10395 = vst [vmem:[#allocation44_spill] sm:$0xff] %v6839_v13 }
 0x143   :  { %2273 = vrot.lane.b32.xlu0 %v6807_v56, %s6158_s14  ;;  %2275 = vrot.lane.b32.xlu1 %v6835_v16, %s6158_s14  ;;  %v6871_v16 = vpop.f32.mrf.mxu0 }
 0x144   :  { %10402 = vst [vmem:[#allocation51_spill] sm:$0xff] %v6871_v16 }
 0x145   :  { %v6849_v15 = vpop.permute.xlu1 %2219  ;;  %v6851_v8 = vpop.permute.xlu0 %2019 }
 0x146   :  { %10398 = vst [vmem:[#allocation47_spill] sm:$0xff] %v6849_v15  ;;  %v6877_v61 = vpop.f32.mrf.mxu0 }
 0x147   :  { %2085 = vrot.lane.b32.xlu0 %v6829_v32, %s6158_s14  ;;  %2087 = vrot.lane.b32.xlu1 %v6853_v4, %s6158_s14  ;;  %10405 = vst [vmem:[#allocation54_spill] sm:$0xff] %v6877_v61 }
 0x149   :  { %v6861_v7 = vpop.permute.xlu0 %2029  ;;  %v6863_v56 = vpop.permute.xlu1 %2031 }
 0x14b   :  { %2285 = vrot.lane.b32.xlu0 %v6843_v19, %s6158_s14  ;;  %2287 = vrot.lane.b32.xlu1 %v6865_v62, %s6158_s14  ;;  %v6889_v62 = vpop.f32.mrf.mxu0 }
 0x14c   :  { %10407 = vst [vmem:[#allocation56_spill] sm:$0xff] %v6889_v62 }
 0x14d   :  { %v6873_v58 = vpop.permute.xlu0 %2229  ;;  %v6875_v1 = vpop.permute.xlu1 %2231 }
 0x14e   :  { %10403 = vst [vmem:[#allocation52_spill] sm:$0xff] %v6873_v58  ;;  %10404 = vst [vmem:[#allocation53_spill] sm:$0xff] %v6875_v1  ;;  %v6901_v1 = vpop.f32.mrf.mxu0 }
 0x14f   :  { %2081 = vrot.lane.b32.xlu0 %v6841_v5, %s6158_s14  ;;  %2083 = vrot.lane.b32.xlu1 %v6871_v16, %s6158_s14  ;;  %10411 = vst [vmem:[#allocation60_spill] sm:$0xff] %v6901_v1 }
 0x151   :  { %v6885_v19 = vpop.permute.xlu0 %2025  ;;  %v6887_v46 = vpop.permute.xlu1 %2027 }
 0x153   :  { %2281 = vrot.lane.b32.xlu0 %v6855_v11, %s6158_s14  ;;  %2283 = vrot.lane.b32.xlu1 %v6883_v50, %s6158_s14  ;;  %v6919_v50 = vpop.f32.mrf.mxu0 }
 0x154   :  { %10414 = vst [vmem:[#allocation63_spill] sm:$0xff] %v6919_v50 }
 0x155   :  { %v6897_v49 = vpop.permute.xlu0 %2225  ;;  %v6899_v38 = vpop.permute.xlu1 %2227 }
 0x156   :  { %10409 = vst [vmem:[#allocation58_spill] sm:$0xff] %v6897_v49  ;;  %10410 = vst [vmem:[#allocation59_spill] sm:$0xff] %v6899_v38  ;;  %v6925_v49 = vpop.f32.mrf.mxu0 }
 0x157   :  { %2093 = vrot.lane.b32.xlu0 %v6877_v61, %s6158_s14  ;;  %2095 = vrot.lane.b32.xlu1 %v6901_v1, %s6158_s14  ;;  %10417 = vst [vmem:[#allocation66_spill] sm:$0xff] %v6925_v49 }
 0x159   :  { %v6909_v58 = vpop.permute.xlu0 %2037  ;;  %v6911_v11 = vpop.permute.xlu1 %2039 }
 0x15b   :  { %2293 = vrot.lane.b32.xlu0 %v6891_v55, %s6158_s14  ;;  %2295 = vrot.lane.b32.xlu1 %v6913_v43, %s6158_s14  ;;  %v6937_v43 = vpop.f32.mrf.mxu0 }
 0x15c   :  { %10419 = vst [vmem:[#allocation68_spill] sm:$0xff] %v6937_v43 }
 0x15d   :  { %v6921_v38 = vpop.permute.xlu0 %2237  ;;  %v6923_v37 = vpop.permute.xlu1 %2239 }
 0x15e   :  { %10415 = vst [vmem:[#allocation64_spill] sm:$0xff] %v6921_v38  ;;  %10416 = vst [vmem:[#allocation65_spill] sm:$0xff] %v6923_v37  ;;  %v6949_v59 = vpop.f32.mrf.mxu0 }
 0x15f   :  { %2089 = vrot.lane.b32.xlu0 %v6889_v62, %s6158_s14  ;;  %2091 = vrot.lane.b32.xlu1 %v6919_v50, %s6158_s14  ;;  %10423 = vst [vmem:[#allocation72_spill] sm:$0xff] %v6949_v59 }
 0x161   :  { %v6933_v55 = vpop.permute.xlu0 %2033  ;;  %v6935_v13 = vpop.permute.xlu1 %2035 }
 0x163   :  { %2289 = vrot.lane.b32.xlu0 %v6903_v34, %s6158_s14  ;;  %2291 = vrot.lane.b32.xlu1 %v6931_v26, %s6158_s14  ;;  %v6967_v26 = vpop.f32.mrf.mxu0 }
 0x164   :  { %10426 = vst [vmem:[#allocation75_spill] sm:$0xff] %v6967_v26 }
 0x165   :  { %v6945_v37 = vpop.permute.xlu0 %2233  ;;  %v6947_v38 = vpop.permute.xlu1 %2235 }
 0x166   :  { %10421 = vst [vmem:[#allocation70_spill] sm:$0xff] %v6945_v37  ;;  %10422 = vst [vmem:[#allocation71_spill] sm:$0xff] %v6947_v38  ;;  %v6973_v52 = vpop.f32.mrf.mxu0 }
 0x167   :  { %2101 = vrot.lane.b32.xlu0 %v6925_v49, %s6158_s14  ;;  %2103 = vrot.lane.b32.xlu1 %v6949_v59, %s6158_s14  ;;  %10429 = vst [vmem:[#allocation78_spill] sm:$0xff] %v6973_v52  ;;  %v6979_v59 = vpop.f32.mrf.mxu1 }
 0x168   :  { %10430 = vst [vmem:[#allocation79_spill] sm:$0xff] %v6979_v59 }
 0x169   :  { %v6957_v15 = vpop.permute.xlu0 %2045  ;;  %v6959_v34 = vpop.permute.xlu1 %2047 }
 0x16a   :  { %v6987_v1 = vpop.f32.mrf.mxu1 }
 0x16b   :  { %2301 = vrot.lane.b32.xlu0 %v6939_v22, %s6158_s14  ;;  %2303 = vrot.lane.b32.xlu1 %v6961_v24, %s6158_s14  ;;  %v6985_v24 = vpop.f32.mrf.mxu0  ;;  %10432 = vst [vmem:[#allocation81_spill] sm:$0xff] %v6987_v1 }
 0x16c   :  { %10431 = vst [vmem:[#allocation80_spill] sm:$0xff] %v6985_v24 }
 0x16d   :  { %v6969_v38 = vpop.permute.xlu0 %2245  ;;  %v6971_v37 = vpop.permute.xlu1 %2247 }
 0x16e   :  { %10427 = vst [vmem:[#allocation76_spill] sm:$0xff] %v6969_v38  ;;  %10428 = vst [vmem:[#allocation77_spill] sm:$0xff] %v6971_v37 }
 0x16f   :  { %2097 = vrot.lane.b32.xlu0 %v6937_v43, %s6158_s14  ;;  %2099 = vrot.lane.b32.xlu1 %v6967_v26, %s6158_s14  ;;  %v6997_v26 = vpop.f32.mrf.mxu0  ;;  %v6999_v43 = vpop.f32.mrf.mxu1 }
 0x170   :  { %10435 = vst [vmem:[#allocation84_spill] sm:$0xff] %v6997_v26  ;;  %10436 = vst [vmem:[#allocation85_spill] sm:$0xff] %v6999_v43 }
 0x171   :  { %v6981_v22 = vpop.permute.xlu0 %2041  ;;  %v6983_v49 = vpop.permute.xlu1 %2043 }
 0x172   :  { %v7009_v50 = vpop.f32.mrf.mxu1 }
 0x173   :  { %2297 = vrot.lane.b32.xlu0 %v6951_v31, %s6158_s14  ;;  %2299 = vrot.lane.b32.xlu1 %v6979_v59, %s6158_s14  ;;  %10437 = vst [vmem:[#allocation86_spill] sm:$0xff] %v7009_v50  ;;  %v7015_v59 = vpop.f32.mrf.mxu0 }
 0x174   :  { %10438 = vst [vmem:[#allocation87_spill] sm:$0xff] %v7015_v59 }
 0x175   :  { %v6993_v37 = vpop.permute.xlu0 %2241  ;;  %v6995_v38 = vpop.permute.xlu1 %2243 }
 0x176   :  { %10433 = vst [vmem:[#allocation82_spill] sm:$0xff] %v6993_v37  ;;  %10434 = vst [vmem:[#allocation83_spill] sm:$0xff] %v6995_v38 }
 0x177   :  { %2109 = vrot.lane.b32.xlu0 %v6973_v52, %s6158_s14  ;;  %2111 = vrot.lane.b32.xlu1 %v6997_v26, %s6158_s14  ;;  %v7021_v52 = vpop.f32.mrf.mxu0  ;;  %v7027_v26 = vpop.f32.mrf.mxu1 }
 0x178   :  { %10441 = vst [vmem:[#allocation90_spill] sm:$0xff] %v7021_v52  ;;  %10442 = vst [vmem:[#allocation91_spill] sm:$0xff] %v7027_v26 }
 0x179   :  { %v7005_v61 = vpop.permute.xlu0 %2053  ;;  %v7007_v31 = vpop.permute.xlu1 %2055 }
 0x17a   :  { %v7035_v4 = vpop.f32.mrf.mxu1 }
 0x17b   :  { %2309 = vrot.lane.b32.xlu0 %v6987_v1, %s6158_s14  ;;  %2311 = vrot.lane.b32.xlu1 %v7009_v50, %s6158_s14  ;;  %v7033_v50 = vpop.f32.mrf.mxu0  ;;  %10444 = vst [vmem:[#allocation93_spill] sm:$0xff] %v7035_v4 }
 0x17c   :  { %10443 = vst [vmem:[#allocation92_spill] sm:$0xff] %v7033_v50 }
 0x17d   :  { %v7017_v38 = vpop.permute.xlu0 %2253  ;;  %v7019_v37 = vpop.permute.xlu1 %2255 }
 0x17e   :  { %10439 = vst [vmem:[#allocation88_spill] sm:$0xff] %v7017_v38  ;;  %10440 = vst [vmem:[#allocation89_spill] sm:$0xff] %v7019_v37 }
 0x17f   :  { %2105 = vrot.lane.b32.xlu0 %v6985_v24, %s6158_s14  ;;  %2107 = vrot.lane.b32.xlu1 %v7015_v59, %s6158_s14  ;;  %v7045_v59 = vpop.f32.mrf.mxu0  ;;  %v7047_v24 = vpop.f32.mrf.mxu1 }
 0x180   :  { %10447 = vst [vmem:[#allocation96_spill] sm:$0xff] %v7045_v59  ;;  %10448 = vst [vmem:[#allocation97_spill] sm:$0xff] %v7047_v24 }
 0x181   :  { %v7029_v1 = vpop.permute.xlu0 %2049  ;;  %v7031_v62 = vpop.permute.xlu1 %2051 }
 0x182   :  { %v7057_v16 = vpop.f32.mrf.mxu1 }
 0x183   :  { %2305 = vrot.lane.b32.xlu0 %v6999_v43, %s6158_s14  ;;  %2307 = vrot.lane.b32.xlu1 %v7027_v26, %s6158_s14  ;;  %10449 = vst [vmem:[#allocation98_spill] sm:$0xff] %v7057_v16  ;;  %v7063_v26 = vpop.f32.mrf.mxu0 }
 0x184   :  { %10450 = vst [vmem:[#allocation99_spill] sm:$0xff] %v7063_v26 }
 0x185   :  { %v7041_v37 = vpop.permute.xlu0 %2249  ;;  %v7043_v38 = vpop.permute.xlu1 %2251 }
 0x186   :  { %10445 = vst [vmem:[#allocation94_spill] sm:$0xff] %v7041_v37  ;;  %10446 = vst [vmem:[#allocation95_spill] sm:$0xff] %v7043_v38 }
 0x187   :  { %2117 = vrot.lane.b32.xlu0 %v7021_v52, %s6158_s14  ;;  %2119 = vrot.lane.b32.xlu1 %v7045_v59, %s6158_s14  ;;  %v7069_v52 = vpop.f32.mrf.mxu0  ;;  %v7075_v59 = vpop.f32.mrf.mxu1 }
 0x188   :  { %10453 = vst [vmem:[#allocation102_spill] sm:$0xff] %v7069_v52  ;;  %10454 = vst [vmem:[#allocation103_spill] sm:$0xff] %v7075_v59 }
 0x189   :  { %v7053_v32 = vpop.permute.xlu0 %2061  ;;  %v7055_v43 = vpop.permute.xlu1 %2063 }
 0x18a   :  { %v7083_v54 = vpop.f32.mrf.mxu1 }
 0x18b   :  { %2317 = vrot.lane.b32.xlu0 %v7035_v4, %s6158_s14  ;;  %2319 = vrot.lane.b32.xlu1 %v7057_v16, %s6158_s14  ;;  %v7081_v16 = vpop.f32.mrf.mxu0  ;;  %10456 = vst [vmem:[#allocation105_spill] sm:$0xff] %v7083_v54 }
 0x18c   :  { %10455 = vst [vmem:[#allocation104_spill] sm:$0xff] %v7081_v16 }
 0x18d   :  { %v7065_v38 = vpop.permute.xlu0 %2261  ;;  %v7067_v37 = vpop.permute.xlu1 %2263 }
 0x18e   :  { %10451 = vst [vmem:[#allocation100_spill] sm:$0xff] %v7065_v38  ;;  %10452 = vst [vmem:[#allocation101_spill] sm:$0xff] %v7067_v37 }
 0x18f   :  { %2113 = vrot.lane.b32.xlu0 %v7033_v50, %s6158_s14  ;;  %2115 = vrot.lane.b32.xlu1 %v7063_v26, %s6158_s14  ;;  %v7093_v26 = vpop.f32.mrf.mxu0  ;;  %v7095_v50 = vpop.f32.mrf.mxu1 }
 0x190   :  { %10459 = vst [vmem:[#allocation108_spill] sm:$0xff] %v7093_v26  ;;  %10460 = vst [vmem:[#allocation109_spill] sm:$0xff] %v7095_v50 }
 0x191   :  { %v7077_v4 = vpop.permute.xlu0 %2057  ;;  %v7079_v5 = vpop.permute.xlu1 %2059 }
 0x192   :  { %v7105_v35 = vpop.f32.mrf.mxu1 }
 0x193   :  { %2313 = vrot.lane.b32.xlu0 %v7047_v24, %s6158_s14  ;;  %2315 = vrot.lane.b32.xlu1 %v7075_v59, %s6158_s14  ;;  %10463 = vst [vmem:[#allocation112_spill] sm:$0xff] %v7105_v35  ;;  %v7111_v59 = vpop.f32.mrf.mxu0 }
 0x194   :  { %10464 = vst [vmem:[#allocation113_spill] sm:$0xff] %v7111_v59 }
 0x195   :  { %v7089_v37 = vpop.permute.xlu0 %2257  ;;  %v7091_v38 = vpop.permute.xlu1 %2259 }
 0x196   :  { %10457 = vst [vmem:[#allocation106_spill] sm:$0xff] %v7089_v37  ;;  %10458 = vst [vmem:[#allocation107_spill] sm:$0xff] %v7091_v38 }
 0x197   :  { %2125 = vrot.lane.b32.xlu0 %v7069_v52, %s6158_s14  ;;  %2127 = vrot.lane.b32.xlu1 %v7093_v26, %s6158_s14  ;;  %v7117_v52 = vpop.f32.mrf.mxu0  ;;  %v7123_v26 = vpop.f32.mrf.mxu1 }
 0x198   :  { %10467 = vst [vmem:[#allocation116_spill] sm:$0xff] %v7117_v52  ;;  %10468 = vst [vmem:[#allocation117_spill] sm:$0xff] %v7123_v26 }
 0x199   :  { %v7101_v42 = vpop.permute.xlu0 %2069  ;;  %v7103_v24 = vpop.permute.xlu1 %2071 }
 0x19a   :  { %10461 = vst [vmem:[#allocation110_spill] sm:$0xff] %v7101_v42  ;;  %10462 = vst [vmem:[#allocation111_spill] sm:$0xff] %v7103_v24  ;;  %v7131_v30 = vpop.f32.mrf.mxu1 }
 0x19b   :  { %2325 = vrot.lane.b32.xlu0 %v7083_v54, %s6158_s14  ;;  %2327 = vrot.lane.b32.xlu1 %v7105_v35, %s6158_s14  ;;  %v7129_v35 = vpop.f32.mrf.mxu0  ;;  %10471 = vst [vmem:[#allocation120_spill] sm:$0xff] %v7131_v30 }
 0x19c   :  { %10470 = vst [vmem:[#allocation119_spill] sm:$0xff] %v7129_v35 }
 0x19d   :  { %v7113_v38 = vpop.permute.xlu0 %2269  ;;  %v7115_v37 = vpop.permute.xlu1 %2271 }
 0x19e   :  { %10465 = vst [vmem:[#allocation114_spill] sm:$0xff] %v7113_v38  ;;  %10466 = vst [vmem:[#allocation115_spill] sm:$0xff] %v7115_v37 }
 0x19f   :  { %2121 = vrot.lane.b32.xlu0 %v7081_v16, %s6158_s14  ;;  %2123 = vrot.lane.b32.xlu1 %v7111_v59, %s6158_s14  ;;  %v7141_v59 = vpop.f32.mrf.mxu0  ;;  %v7143_v16 = vpop.f32.mrf.mxu1 }
 0x1a0   :  { %10474 = vst [vmem:[#allocation123_spill] sm:$0xff] %v7141_v59  ;;  %10475 = vst [vmem:[#allocation124_spill] sm:$0xff] %v7143_v16 }
 0x1a1   :  { %v7125_v54 = vpop.permute.xlu0 %2065  ;;  %v7127_v47 = vpop.permute.xlu1 %2067 }
 0x1a2   :  { %10469 = vst [vmem:[#allocation118_spill] sm:$0xff] %v7127_v47  ;;  %v7153_v18 = vpop.f32.mrf.mxu1 }
 0x1a3   :  { %2321 = vrot.lane.b32.xlu0 %v7095_v50, %s6158_s14  ;;  %2323 = vrot.lane.b32.xlu1 %v7123_v26, %s6158_s14  ;;  %10478 = vst [vmem:[#allocation127_spill] sm:$0xff] %v7153_v18 }
 0x1a5   :  { %v7137_v37 = vpop.permute.xlu0 %2265  ;;  %v7139_v38 = vpop.permute.xlu1 %2267 }
 0x1a6   :  { %10472 = vst [vmem:[#allocation121_spill] sm:$0xff] %v7137_v37  ;;  %10473 = vst [vmem:[#allocation122_spill] sm:$0xff] %v7139_v38  ;;  %v7163_v37 = vpop.f32.mrf.mxu0 }
 0x1a7   :  { %2133 = vrot.lane.b32.xlu0 %v7117_v52, %s6158_s14  ;;  %2135 = vrot.lane.b32.xlu1 %v7141_v59, %s6158_s14  ;;  %10481 = vst [vmem:[#allocation130_spill] sm:$0xff] %v7163_v37 }
 0x1a9   :  { %v7149_v24 = vpop.permute.xlu0 %2077  ;;  %v7151_v50 = vpop.permute.xlu1 %2079 }
 0x1aa   :  { %10476 = vst [vmem:[#allocation125_spill] sm:$0xff] %v7149_v24  ;;  %10477 = vst [vmem:[#allocation126_spill] sm:$0xff] %v7151_v50  ;;  %v7175_v50 = vpop.f32.mrf.mxu0 }
 0x1ab   :  { %2333 = vrot.lane.b32.xlu0 %v7131_v30, %s6158_s14  ;;  %2335 = vrot.lane.b32.xlu1 %v7153_v18, %s6158_s14  ;;  %v7173_v30 = vpop.f32.mrf.mxu1  ;;  %10485 = vst [vmem:[#allocation134_spill] sm:$0xff] %v7175_v50  ;;  %v7183_v18 = vmax.f32 %v6527_v23, %v6825_v28 }
 0x1ac   :  { %10484 = vst [vmem:[#allocation133_spill] sm:$0xff] %v7173_v30 }
 0x1ad   :  { %v7159_v26 = vpop.permute.xlu0 %2277  ;;  %v7161_v38 = vpop.permute.xlu1 %2279 }
 0x1ae   :  { %10479 = vst [vmem:[#allocation128_spill] sm:$0xff] %v7159_v26  ;;  %10480 = vst [vmem:[#allocation129_spill] sm:$0xff] %v7161_v38  ;;  %v7187_v38 = vmax.f32 %v6539_v27, %v6851_v8  ;;  %v7195_v24 = vpop.f32.mrf.mxu1 }
 0x1af   :  { %2129 = vrot.lane.b32.xlu0 %v7129_v35, %s6158_s14  ;;  %2131 = vrot.lane.b32.xlu1 %v7163_v37, %s6158_s14  ;;  %v7193_v35 = vpop.f32.mrf.mxu0  ;;  %10489 = vst [vmem:[#allocation138_spill] sm:$0xff] %v7195_v24 }
 0x1b0   :  { %10488 = vst [vmem:[#allocation137_spill] sm:$0xff] %v7193_v35  ;;  %v7207_v8 = vpop.f32.mrf.mxu1 }
 0x1b1   :  { %v7169_v59 = vpop.permute.xlu0 %2073  ;;  %v7171_v52 = vpop.permute.xlu1 %2075  ;;  %10493 = vst [vmem:[#allocation142_spill] sm:$0xff] %v7207_v8 }
 0x1b2   :  { %10482 = vst [vmem:[#allocation131_spill] sm:$0xff] %v7169_v59  ;;  %10483 = vst [vmem:[#allocation132_spill] sm:$0xff] %v7171_v52  ;;  %v7205_v27 = vpop.f32.mrf.mxu0 }
 0x1b3   :  { %2329 = vrot.lane.b32.xlu0 %v7143_v16, %s6158_s14  ;;  %2331 = vrot.lane.b32.xlu1 %v7173_v30, %s6158_s14  ;;  %10492 = vst [vmem:[#allocation141_spill] sm:$0xff] %v7205_v27 }
 0x1b5   :  { %v7189_v26 = vpop.permute.xlu0 %2273  ;;  %v7191_v37 = vpop.permute.xlu1 %2275 }
 0x1b6   :  { %10486 = vst [vmem:[#allocation135_spill] sm:$0xff] %v7189_v26  ;;  %10487 = vst [vmem:[#allocation136_spill] sm:$0xff] %v7191_v37  ;;  %v7217_v37 = vpop.f32.mrf.mxu1  ;;  %v7223_v26 = vpop.f32.mrf.mxu0 }
 0x1b7   :  { %2997 = vrot.lane.b32.xlu0 %v7183_v18, %s6159_s0  ;;  %2999 = vrot.lane.b32.xlu1 %v7187_v38, %s6159_s0  ;;  %10496 = vst [vmem:[#allocation145_spill] sm:$0xff] %v7217_v37  ;;  %10497 = vst [vmem:[#allocation146_spill] sm:$0xff] %v7223_v26 }
 0x1b9   :  { %v7201_v23 = vpop.permute.xlu0 %2085  ;;  %v7203_v28 = vpop.permute.xlu1 %2087 }
 0x1ba   :  { %10490 = vst [vmem:[#allocation139_spill] sm:$0xff] %v7201_v23  ;;  %10491 = vst [vmem:[#allocation140_spill] sm:$0xff] %v7203_v28  ;;  %v7229_v23 = vpop.f32.mrf.mxu0 }
 0x1bb   :  { %2141 = vrot.lane.b32.xlu0 %v7175_v50, %s6158_s14  ;;  %2143 = vrot.lane.b32.xlu1 %v7205_v27, %s6158_s14  ;;  %10500 = vst [vmem:[#allocation149_spill] sm:$0xff] %v7229_v23 }
 0x1bd   :  { %v7213_v30 = vpop.permute.xlu0 %2285  ;;  %v7215_v16 = vpop.permute.xlu1 %2287 }
 0x1be   :  { %10494 = vst [vmem:[#allocation143_spill] sm:$0xff] %v7213_v30  ;;  %10495 = vst [vmem:[#allocation144_spill] sm:$0xff] %v7215_v16  ;;  %v7235_v16 = vpop.f32.mrf.mxu1 }
 0x1bf   :  { %2341 = vrot.lane.b32.xlu0 %v7195_v24, %s6158_s14  ;;  %2343 = vrot.lane.b32.xlu1 %v7217_v37, %s6158_s14  ;;  %10501 = vst [vmem:[#allocation150_spill] sm:$0xff] %v7235_v16  ;;  %v7241_v37 = vpop.f32.mrf.mxu0 }
 0x1c0   :  { %10504 = vst [vmem:[#allocation153_spill] sm:$0xff] %v7241_v37  ;;  %v7243_v27 = vpop.f32.mrf.mxu1 }
 0x1c1   :  { %v7225_v28 = vpop.permute.xlu0 %2081  ;;  %v7227_v50 = vpop.permute.xlu1 %2083  ;;  %10505 = vst [vmem:[#allocation154_spill] sm:$0xff] %v7243_v27 }
 0x1c2   :  { %10498 = vst [vmem:[#allocation147_spill] sm:$0xff] %v7225_v28  ;;  %10499 = vst [vmem:[#allocation148_spill] sm:$0xff] %v7227_v50  ;;  %v7255_v28 = vpop.f32.mrf.mxu1 }
 0x1c3   :  { %2137 = vrot.lane.b32.xlu0 %v7193_v35, %s6158_s14  ;;  %2139 = vrot.lane.b32.xlu1 %v7223_v26, %s6158_s14  ;;  %v7253_v26 = vpop.f32.mrf.mxu0  ;;  %10509 = vst [vmem:[#allocation158_spill] sm:$0xff] %v7255_v28 }
 0x1c4   :  { %10508 = vst [vmem:[#allocation157_spill] sm:$0xff] %v7253_v26 }
 0x1c5   :  { %v7237_v24 = vpop.permute.xlu0 %2281  ;;  %v7239_v30 = vpop.permute.xlu1 %2283 }
 0x1c6   :  { %10502 = vst [vmem:[#allocation151_spill] sm:$0xff] %v7237_v24  ;;  %10503 = vst [vmem:[#allocation152_spill] sm:$0xff] %v7239_v30  ;;  %v7265_v24 = vpop.f32.mrf.mxu1 }
 0x1c7   :  { %2337 = vrot.lane.b32.xlu0 %v7207_v8, %s6158_s14  ;;  %2339 = vrot.lane.b32.xlu1 %v7235_v16, %s6158_s14  ;;  %10512 = vst [vmem:[#allocation161_spill] sm:$0xff] %v7265_v24  ;;  %v7271_v16 = vpop.f32.mrf.mxu0 }
 0x1c8   :  { %10513 = vst [vmem:[#allocation162_spill] sm:$0xff] %v7271_v16 }
 0x1c9   :  { %v7249_v35 = vpop.permute.xlu0 %2093  ;;  %v7251_v50 = vpop.permute.xlu1 %2095 }
 0x1ca   :  { %10506 = vst [vmem:[#allocation155_spill] sm:$0xff] %v7249_v35  ;;  %10507 = vst [vmem:[#allocation156_spill] sm:$0xff] %v7251_v50  ;;  %v7277_v35 = vpop.f32.mrf.mxu0 }
 0x1cb   :  { %2149 = vrot.lane.b32.xlu0 %v7229_v23, %s6158_s14  ;;  %2151 = vrot.lane.b32.xlu1 %v7253_v26, %s6158_s14  ;;  %10516 = vst [vmem:[#allocation165_spill] sm:$0xff] %v7277_v35 }
 0x1cd   :  { %v7261_v30 = vpop.permute.xlu0 %2293  ;;  %v7263_v8 = vpop.permute.xlu1 %2295 }
 0x1ce   :  { %10510 = vst [vmem:[#allocation159_spill] sm:$0xff] %v7261_v30  ;;  %10511 = vst [vmem:[#allocation160_spill] sm:$0xff] %v7263_v8  ;;  %v7283_v8 = vpop.f32.mrf.mxu1 }
 0x1cf   :  { %2349 = vrot.lane.b32.xlu0 %v7243_v27, %s6158_s14  ;;  %2351 = vrot.lane.b32.xlu1 %v7265_v24, %s6158_s14  ;;  %10517 = vst [vmem:[#allocation166_spill] sm:$0xff] %v7283_v8  ;;  %v7289_v24 = vpop.f32.mrf.mxu0 }
 0x1d0   :  { %10520 = vst [vmem:[#allocation169_spill] sm:$0xff] %v7289_v24  ;;  %v7291_v26 = vpop.f32.mrf.mxu1 }
 0x1d1   :  { %v7273_v50 = vpop.permute.xlu0 %2089  ;;  %v7275_v23 = vpop.permute.xlu1 %2091  ;;  %10521 = vst [vmem:[#allocation170_spill] sm:$0xff] %v7291_v26 }
 0x1d2   :  { %10514 = vst [vmem:[#allocation163_spill] sm:$0xff] %v7273_v50  ;;  %10515 = vst [vmem:[#allocation164_spill] sm:$0xff] %v7275_v23  ;;  %v7303_v50 = vpop.f32.mrf.mxu1 }
 0x1d3   :  { %2145 = vrot.lane.b32.xlu0 %v7241_v37, %s6158_s14  ;;  %2147 = vrot.lane.b32.xlu1 %v7271_v16, %s6158_s14  ;;  %v7301_v16 = vpop.f32.mrf.mxu0  ;;  %10525 = vst [vmem:[#allocation174_spill] sm:$0xff] %v7303_v50 }
 0x1d4   :  { %10524 = vst [vmem:[#allocation173_spill] sm:$0xff] %v7301_v16 }
 0x1d5   :  { %v7285_v27 = vpop.permute.xlu0 %2289  ;;  %v7287_v30 = vpop.permute.xlu1 %2291 }
 0x1d6   :  { %10518 = vst [vmem:[#allocation167_spill] sm:$0xff] %v7285_v27  ;;  %10519 = vst [vmem:[#allocation168_spill] sm:$0xff] %v7287_v30  ;;  %v7313_v27 = vpop.f32.mrf.mxu1 }
 0x1d7   :  { %2345 = vrot.lane.b32.xlu0 %v7255_v28, %s6158_s14  ;;  %2347 = vrot.lane.b32.xlu1 %v7283_v8, %s6158_s14  ;;  %10528 = vst [vmem:[#allocation177_spill] sm:$0xff] %v7313_v27  ;;  %v7319_v8 = vpop.f32.mrf.mxu0 }
 0x1d8   :  { %10529 = vst [vmem:[#allocation178_spill] sm:$0xff] %v7319_v8 }
 0x1d9   :  { %v7297_v37 = vpop.permute.xlu0 %2101  ;;  %v7299_v23 = vpop.permute.xlu1 %2103 }
 0x1da   :  { %10522 = vst [vmem:[#allocation171_spill] sm:$0xff] %v7297_v37  ;;  %10523 = vst [vmem:[#allocation172_spill] sm:$0xff] %v7299_v23  ;;  %v7325_v37 = vpop.f32.mrf.mxu0 }
 0x1db   :  { %2157 = vrot.lane.b32.xlu0 %v7277_v35, %s6158_s14  ;;  %2159 = vrot.lane.b32.xlu1 %v7301_v16, %s6158_s14  ;;  %10532 = vst [vmem:[#allocation181_spill] sm:$0xff] %v7325_v37 }
 0x1dd   :  { %v7309_v30 = vpop.permute.xlu0 %2301  ;;  %v7311_v28 = vpop.permute.xlu1 %2303 }
 0x1de   :  { %10526 = vst [vmem:[#allocation175_spill] sm:$0xff] %v7309_v30  ;;  %10527 = vst [vmem:[#allocation176_spill] sm:$0xff] %v7311_v28  ;;  %v7331_v28 = vpop.f32.mrf.mxu1 }
 0x1df   :  { %2357 = vrot.lane.b32.xlu0 %v7291_v26, %s6158_s14  ;;  %2359 = vrot.lane.b32.xlu1 %v7313_v27, %s6158_s14  ;;  %10533 = vst [vmem:[#allocation182_spill] sm:$0xff] %v7331_v28  ;;  %v7337_v27 = vpop.f32.mrf.mxu0 }
 0x1e0   :  { %10536 = vst [vmem:[#allocation185_spill] sm:$0xff] %v7337_v27  ;;  %v7339_v16 = vpop.f32.mrf.mxu1 }
 0x1e1   :  { %v7321_v23 = vpop.permute.xlu0 %2097  ;;  %v7323_v35 = vpop.permute.xlu1 %2099  ;;  %10537 = vst [vmem:[#allocation186_spill] sm:$0xff] %v7339_v16 }
 0x1e2   :  { %10530 = vst [vmem:[#allocation179_spill] sm:$0xff] %v7321_v23  ;;  %10531 = vst [vmem:[#allocation180_spill] sm:$0xff] %v7323_v35  ;;  %v7351_v23 = vpop.f32.mrf.mxu1 }
 0x1e3   :  { %2153 = vrot.lane.b32.xlu0 %v7289_v24, %s6158_s14  ;;  %2155 = vrot.lane.b32.xlu1 %v7319_v8, %s6158_s14  ;;  %v7349_v8 = vpop.f32.mrf.mxu0  ;;  %10541 = vst [vmem:[#allocation190_spill] sm:$0xff] %v7351_v23 }
 0x1e4   :  { %10540 = vst [vmem:[#allocation189_spill] sm:$0xff] %v7349_v8 }
 0x1e5   :  { %v7333_v26 = vpop.permute.xlu0 %2297  ;;  %v7335_v30 = vpop.permute.xlu1 %2299 }
 0x1e6   :  { %10534 = vst [vmem:[#allocation183_spill] sm:$0xff] %v7333_v26  ;;  %10535 = vst [vmem:[#allocation184_spill] sm:$0xff] %v7335_v30  ;;  %v7361_v26 = vpop.f32.mrf.mxu1 }
 0x1e7   :  { %2353 = vrot.lane.b32.xlu0 %v7303_v50, %s6158_s14  ;;  %2355 = vrot.lane.b32.xlu1 %v7331_v28, %s6158_s14  ;;  %10544 = vst [vmem:[#allocation193_spill] sm:$0xff] %v7361_v26  ;;  %v7367_v28 = vpop.f32.mrf.mxu0 }
 0x1e8   :  { %10545 = vst [vmem:[#allocation194_spill] sm:$0xff] %v7367_v28 }
 0x1e9   :  { %v7345_v24 = vpop.permute.xlu0 %2109  ;;  %v7347_v35 = vpop.permute.xlu1 %2111 }
 0x1ea   :  { %10538 = vst [vmem:[#allocation187_spill] sm:$0xff] %v7345_v24  ;;  %10539 = vst [vmem:[#allocation188_spill] sm:$0xff] %v7347_v35  ;;  %v7373_v24 = vpop.f32.mrf.mxu0 }
 0x1eb   :  { %2165 = vrot.lane.b32.xlu0 %v7325_v37, %s6158_s14  ;;  %2167 = vrot.lane.b32.xlu1 %v7349_v8, %s6158_s14  ;;  %10548 = vst [vmem:[#allocation197_spill] sm:$0xff] %v7373_v24 }
 0x1ed   :  { %v7357_v30 = vpop.permute.xlu0 %2309  ;;  %v7359_v50 = vpop.permute.xlu1 %2311 }
 0x1ee   :  { %10542 = vst [vmem:[#allocation191_spill] sm:$0xff] %v7357_v30  ;;  %10543 = vst [vmem:[#allocation192_spill] sm:$0xff] %v7359_v50  ;;  %v7379_v50 = vpop.f32.mrf.mxu1 }
 0x1ef   :  { %2365 = vrot.lane.b32.xlu0 %v7339_v16, %s6158_s14  ;;  %2367 = vrot.lane.b32.xlu1 %v7361_v26, %s6158_s14  ;;  %10549 = vst [vmem:[#allocation198_spill] sm:$0xff] %v7379_v50  ;;  %v7385_v26 = vpop.f32.mrf.mxu0 }
 0x1f0   :  { %10552 = vst [vmem:[#allocation201_spill] sm:$0xff] %v7385_v26  ;;  %v7387_v8 = vpop.f32.mrf.mxu1 }
 0x1f1   :  { %v7369_v35 = vpop.permute.xlu0 %2105  ;;  %v7371_v37 = vpop.permute.xlu1 %2107  ;;  %10553 = vst [vmem:[#allocation202_spill] sm:$0xff] %v7387_v8 }
 0x1f2   :  { %10546 = vst [vmem:[#allocation195_spill] sm:$0xff] %v7369_v35  ;;  %10547 = vst [vmem:[#allocation196_spill] sm:$0xff] %v7371_v37  ;;  %v7399_v35 = vpop.f32.mrf.mxu1 }
 0x1f3   :  { %2161 = vrot.lane.b32.xlu0 %v7337_v27, %s6158_s14  ;;  %2163 = vrot.lane.b32.xlu1 %v7367_v28, %s6158_s14  ;;  %v7397_v28 = vpop.f32.mrf.mxu0  ;;  %10557 = vst [vmem:[#allocation206_spill] sm:$0xff] %v7399_v35 }
 0x1f4   :  { %10556 = vst [vmem:[#allocation205_spill] sm:$0xff] %v7397_v28 }
 0x1f5   :  { %v7381_v16 = vpop.permute.xlu0 %2305  ;;  %v7383_v30 = vpop.permute.xlu1 %2307 }
 0x1f6   :  { %10550 = vst [vmem:[#allocation199_spill] sm:$0xff] %v7381_v16  ;;  %10551 = vst [vmem:[#allocation200_spill] sm:$0xff] %v7383_v30  ;;  %v7409_v16 = vpop.f32.mrf.mxu1 }
 0x1f7   :  { %2361 = vrot.lane.b32.xlu0 %v7351_v23, %s6158_s14  ;;  %2363 = vrot.lane.b32.xlu1 %v7379_v50, %s6158_s14  ;;  %10560 = vst [vmem:[#allocation209_spill] sm:$0xff] %v7409_v16  ;;  %v7415_v50 = vpop.f32.mrf.mxu0 }
 0x1f8   :  { %10561 = vst [vmem:[#allocation210_spill] sm:$0xff] %v7415_v50 }
 0x1f9   :  { %v7393_v27 = vpop.permute.xlu0 %2117  ;;  %v7395_v37 = vpop.permute.xlu1 %2119 }
 0x1fa   :  { %10554 = vst [vmem:[#allocation203_spill] sm:$0xff] %v7393_v27  ;;  %10555 = vst [vmem:[#allocation204_spill] sm:$0xff] %v7395_v37  ;;  %v7421_v27 = vpop.f32.mrf.mxu0 }
 0x1fb   :  { %2173 = vrot.lane.b32.xlu0 %v7373_v24, %s6158_s14  ;;  %2175 = vrot.lane.b32.xlu1 %v7397_v28, %s6158_s14  ;;  %10564 = vst [vmem:[#allocation213_spill] sm:$0xff] %v7421_v27 }
 0x1fd   :  { %v7405_v30 = vpop.permute.xlu0 %2317  ;;  %v7407_v23 = vpop.permute.xlu1 %2319 }
 0x1fe   :  { %10558 = vst [vmem:[#allocation207_spill] sm:$0xff] %v7405_v30  ;;  %10559 = vst [vmem:[#allocation208_spill] sm:$0xff] %v7407_v23  ;;  %v7427_v23 = vpop.f32.mrf.mxu1 }
 0x1ff   :  { %2373 = vrot.lane.b32.xlu0 %v7387_v8, %s6158_s14  ;;  %2375 = vrot.lane.b32.xlu1 %v7409_v16, %s6158_s14  ;;  %10565 = vst [vmem:[#allocation214_spill] sm:$0xff] %v7427_v23  ;;  %v7433_v16 = vpop.f32.mrf.mxu0 }
 0x200   :  { %10568 = vst [vmem:[#allocation217_spill] sm:$0xff] %v7433_v16  ;;  %v7435_v28 = vpop.f32.mrf.mxu1 }
 0x201   :  { %v7417_v37 = vpop.permute.xlu0 %2113  ;;  %v7419_v24 = vpop.permute.xlu1 %2115  ;;  %10569 = vst [vmem:[#allocation218_spill] sm:$0xff] %v7435_v28 }
 0x202   :  { %10562 = vst [vmem:[#allocation211_spill] sm:$0xff] %v7417_v37  ;;  %10563 = vst [vmem:[#allocation212_spill] sm:$0xff] %v7419_v24  ;;  %v7447_v37 = vpop.f32.mrf.mxu1 }
 0x203   :  { %2169 = vrot.lane.b32.xlu0 %v7385_v26, %s6158_s14  ;;  %2171 = vrot.lane.b32.xlu1 %v7415_v50, %s6158_s14  ;;  %v7445_v50 = vpop.f32.mrf.mxu0  ;;  %10573 = vst [vmem:[#allocation222_spill] sm:$0xff] %v7447_v37 }
 0x204   :  { %10572 = vst [vmem:[#allocation221_spill] sm:$0xff] %v7445_v50 }
 0x205   :  { %v7429_v8 = vpop.permute.xlu0 %2313  ;;  %v7431_v30 = vpop.permute.xlu1 %2315 }
 0x206   :  { %10566 = vst [vmem:[#allocation215_spill] sm:$0xff] %v7429_v8  ;;  %10567 = vst [vmem:[#allocation216_spill] sm:$0xff] %v7431_v30  ;;  %v7457_v8 = vpop.f32.mrf.mxu1 }
 0x207   :  { %2369 = vrot.lane.b32.xlu0 %v7399_v35, %s6158_s14  ;;  %2371 = vrot.lane.b32.xlu1 %v7427_v23, %s6158_s14  ;;  %10576 = vst [vmem:[#allocation225_spill] sm:$0xff] %v7457_v8  ;;  %v7463_v23 = vpop.f32.mrf.mxu0 }
 0x208   :  { %10577 = vst [vmem:[#allocation226_spill] sm:$0xff] %v7463_v23 }
 0x209   :  { %v7441_v26 = vpop.permute.xlu0 %2125  ;;  %v7443_v24 = vpop.permute.xlu1 %2127 }
 0x20a   :  { %10570 = vst [vmem:[#allocation219_spill] sm:$0xff] %v7441_v26  ;;  %10571 = vst [vmem:[#allocation220_spill] sm:$0xff] %v7443_v24  ;;  %v7469_v26 = vpop.f32.mrf.mxu0 }
 0x20b   :  { %2181 = vrot.lane.b32.xlu0 %v7421_v27, %s6158_s14  ;;  %2183 = vrot.lane.b32.xlu1 %v7445_v50, %s6158_s14  ;;  %10580 = vst [vmem:[#allocation229_spill] sm:$0xff] %v7469_v26 }
 0x20d   :  { %v7453_v30 = vpop.permute.xlu0 %2325  ;;  %v7455_v35 = vpop.permute.xlu1 %2327 }
 0x20e   :  { %10574 = vst [vmem:[#allocation223_spill] sm:$0xff] %v7453_v30  ;;  %10575 = vst [vmem:[#allocation224_spill] sm:$0xff] %v7455_v35  ;;  %v7475_v35 = vpop.f32.mrf.mxu1 }
 0x20f   :  { %2381 = vrot.lane.b32.xlu0 %v7435_v28, %s6158_s14  ;;  %2383 = vrot.lane.b32.xlu1 %v7457_v8, %s6158_s14  ;;  %10581 = vst [vmem:[#allocation230_spill] sm:$0xff] %v7475_v35  ;;  %v7481_v8 = vpop.f32.mrf.mxu0 }
 0x210   :  { %10584 = vst [vmem:[#allocation233_spill] sm:$0xff] %v7481_v8  ;;  %v7483_v50 = vpop.f32.mrf.mxu1 }
 0x211   :  { %v7465_v24 = vpop.permute.xlu0 %2121  ;;  %v7467_v27 = vpop.permute.xlu1 %2123  ;;  %10585 = vst [vmem:[#allocation234_spill] sm:$0xff] %v7483_v50 }
 0x212   :  { %10578 = vst [vmem:[#allocation227_spill] sm:$0xff] %v7465_v24  ;;  %10579 = vst [vmem:[#allocation228_spill] sm:$0xff] %v7467_v27  ;;  %v7495_v24 = vpop.f32.mrf.mxu1 }
 0x213   :  { %2177 = vrot.lane.b32.xlu0 %v7433_v16, %s6158_s14  ;;  %2179 = vrot.lane.b32.xlu1 %v7463_v23, %s6158_s14  ;;  %v7493_v23 = vpop.f32.mrf.mxu0  ;;  %10589 = vst [vmem:[#allocation238_spill] sm:$0xff] %v7495_v24 }
 0x214   :  { %10588 = vst [vmem:[#allocation237_spill] sm:$0xff] %v7493_v23 }
 0x215   :  { %v7477_v28 = vpop.permute.xlu0 %2321  ;;  %v7479_v30 = vpop.permute.xlu1 %2323 }
 0x216   :  { %10582 = vst [vmem:[#allocation231_spill] sm:$0xff] %v7477_v28  ;;  %10583 = vst [vmem:[#allocation232_spill] sm:$0xff] %v7479_v30  ;;  %v7505_v28 = vpop.f32.mrf.mxu1 }
 0x217   :  { %2377 = vrot.lane.b32.xlu0 %v7447_v37, %s6158_s14  ;;  %2379 = vrot.lane.b32.xlu1 %v7475_v35, %s6158_s14  ;;  %10592 = vst [vmem:[#allocation241_spill] sm:$0xff] %v7505_v28  ;;  %v7511_v35 = vpop.f32.mrf.mxu0 }
 0x218   :  { %10593 = vst [vmem:[#allocation242_spill] sm:$0xff] %v7511_v35 }
 0x219   :  { %v7489_v16 = vpop.permute.xlu0 %2133  ;;  %v7491_v27 = vpop.permute.xlu1 %2135 }
 0x21a   :  { %10586 = vst [vmem:[#allocation235_spill] sm:$0xff] %v7489_v16  ;;  %10587 = vst [vmem:[#allocation236_spill] sm:$0xff] %v7491_v27  ;;  %v7517_v16 = vpop.f32.mrf.mxu0 }
 0x21b   :  { %2189 = vrot.lane.b32.xlu0 %v7469_v26, %s6158_s14  ;;  %2191 = vrot.lane.b32.xlu1 %v7493_v23, %s6158_s14  ;;  %10596 = vst [vmem:[#allocation245_spill] sm:$0xff] %v7517_v16 }
 0x21d   :  { %v7501_v30 = vpop.permute.xlu0 %2333  ;;  %v7503_v37 = vpop.permute.xlu1 %2335 }
 0x21e   :  { %10590 = vst [vmem:[#allocation239_spill] sm:$0xff] %v7501_v30  ;;  %10591 = vst [vmem:[#allocation240_spill] sm:$0xff] %v7503_v37  ;;  %v7523_v37 = vpop.f32.mrf.mxu1 }
 0x21f   :  { %2389 = vrot.lane.b32.xlu0 %v7483_v50, %s6158_s14  ;;  %2391 = vrot.lane.b32.xlu1 %v7505_v28, %s6158_s14  ;;  %10597 = vst [vmem:[#allocation246_spill] sm:$0xff] %v7523_v37  ;;  %v7529_v28 = vpop.f32.mrf.mxu0 }
 0x220   :  { %10600 = vst [vmem:[#allocation249_spill] sm:$0xff] %v7529_v28  ;;  %v7531_v23 = vpop.f32.mrf.mxu1 }
 0x221   :  { %v7513_v27 = vpop.permute.xlu0 %2129  ;;  %v7515_v26 = vpop.permute.xlu1 %2131  ;;  %10601 = vst [vmem:[#allocation250_spill] sm:$0xff] %v7531_v23 }
 0x222   :  { %10594 = vst [vmem:[#allocation243_spill] sm:$0xff] %v7513_v27  ;;  %10595 = vst [vmem:[#allocation244_spill] sm:$0xff] %v7515_v26 }
 0x223   :  { %2185 = vrot.lane.b32.xlu0 %v7481_v8, %s6158_s14  ;;  %2187 = vrot.lane.b32.xlu1 %v7511_v35, %s6158_s14  ;;  %v7540_v35 = vld [vmem:[%s10125_s2] ss:$0 sm:$0xff] }
 0x225   :  { %v7525_v50 = vpop.permute.xlu0 %2329  ;;  %v7527_v30 = vpop.permute.xlu1 %2331 }
 0x226   :  { %10598 = vst [vmem:[#allocation247_spill] sm:$0xff] %v7525_v50  ;;  %10599 = vst [vmem:[#allocation248_spill] sm:$0xff] %v7527_v30  ;;  %v7542_v50 = vpop.f32.mrf.mxu0  ;;  %v7544_v30 = vpop.f32.mrf.mxu1 }
 0x227   :  { %2385 = vrot.lane.b32.xlu0 %v7495_v24, %s6158_s14  ;;  %2387 = vrot.lane.b32.xlu1 %v7523_v37, %s6158_s14  ;;  %10602 = vst [vmem:[#allocation251_spill] sm:$0xff] %v7542_v50  ;;  %10603 = vst [vmem:[#allocation252_spill] sm:$0xff] %v7544_v30 }
 0x228   :  { %v7558_v40 = vpop.f32.mrf.mxu1 }
 0x229   :  { %v2998_v8 = vpop.permute.xlu0 %2997  ;;  %v3000_v26 = vpop.permute.xlu1 %2999  ;;  %10604 = vst [vmem:[#allocation253_spill] sm:$0xff] %v7558_v40 }
 0x22a   :  { %v3585_v27 = vmax.f32 %v7183_v18, %v2998_v8  ;;  %v3586_v52 = vmax.f32 %v7187_v38, %v3000_v26  ;;  %v7564_v26 = vpop.f32.mrf.mxu0 }
 0x22b   :  { %2197 = vrot.lane.b32.xlu0 %v7517_v16, %s6158_s14  ;;  %2199 = vrot.lane.b32.xlu1 %v7542_v50, %s6158_s14  ;;  %10605 = vst [vmem:[#allocation254_spill] sm:$0xff] %v7564_v26 }
 0x22c   :  { %v3788_v37 = vadd.f32 %v7540_v35, %v3585_v27  ;;  %v3789_v24 = vadd.f32 %v7540_v35, %v3586_v52 }
 0x22d   :  { %v7554_v59 = vpop.permute.xlu0 %2141  ;;  %v7556_v42 = vpop.permute.xlu1 %2143 }
 0x22e   :  { %v3984_v47 = vmax.f32 %v3788_v37, 0.0  ;;  %v3985_v18 = vmax.f32 %v3789_v24, 0.0  ;;  %v7578_v24 = vpop.f32.mrf.mxu0  ;;  %v7584_v37 = vpop.f32.mrf.mxu1 }
 0x22f   :  { %2397 = vrot.lane.b32.xlu0 %v7531_v23, %s6158_s14  ;;  %2399 = vrot.lane.b32.xlu1 %v7558_v40, %s6158_s14  ;;  %10608 = vst [vmem:[#allocation257_spill] sm:$0xff] %v7578_v24  ;;  %10609 = vst [vmem:[#allocation258_spill] sm:$0xff] %v7584_v37 }
 0x230   :  { %v5559_v38 = vpack.c.bf16 %v3984_v47, %v3984_v47  ;;  %v5560_v27 = vpack.c.bf16 %v3985_v18, %v3985_v18  ;;  %v7592_v40 = vpop.f32.mrf.mxu1 }
 0x231   :  { %v7566_v52 = vpop.permute.xlu0 %2341  ;;  %v7568_v8 = vpop.permute.xlu1 %2343  ;;  %10611 = vst [vmem:[#allocation260_spill] sm:$0xff] %v7592_v40 }
 0x232   :  { %10606 = vst [vmem:[#allocation255_spill] sm:$0xff] %v7566_v52  ;;  %10607 = vst [vmem:[#allocation256_spill] sm:$0xff] %v7568_v8  ;;  %v7604_v52 = vpop.f32.mrf.mxu1 }
 0x233   :  { %4965 = vst.msk [vmem:[%s10126_s3] sm:$0xf] %vm4964_vm1, %v5559_v38  ;;  %4966 = vst.msk [vmem:[%s10126_s3 + $0x4] sm:$0xf] %vm4964_vm1, %v5560_v27  ;;  %2193 = vrot.lane.b32.xlu0 %v7529_v28, %s6158_s14  ;;  %2195 = vrot.lane.b32.xlu1 %v7564_v26, %s6158_s14  ;;  %v7590_v38 = vpop.f32.mrf.mxu0 }
 0x234   :  { %10610 = vst [vmem:[#allocation259_spill] sm:$0xff] %v7590_v38  ;;  %10615 = vst [vmem:[#allocation264_spill] sm:$0xff] %v7604_v52  ;;  %v7614_v16 = vpop.f32.mrf.mxu1 }
 0x235   :  { %v7586_v47 = vpop.permute.xlu0 %2137  ;;  %v7588_v18 = vpop.permute.xlu1 %2139  ;;  %10616 = vst [vmem:[#allocation265_spill] sm:$0xff] %v7614_v16 }
 0x236   :  { %v7602_v8 = vpop.f32.mrf.mxu0 }
 0x237   :  { %2393 = vrot.lane.b32.xlu0 %v7544_v30, %s6158_s14  ;;  %2395 = vrot.lane.b32.xlu1 %v7584_v37, %s6158_s14  ;;  %10614 = vst [vmem:[#allocation263_spill] sm:$0xff] %v7602_v8 }
 0x239   :  { %v7598_v27 = vpop.permute.xlu0 %2337  ;;  %v7600_v23 = vpop.permute.xlu1 %2339 }
 0x23a   :  { %10612 = vst [vmem:[#allocation261_spill] sm:$0xff] %v7598_v27  ;;  %10613 = vst [vmem:[#allocation262_spill] sm:$0xff] %v7600_v23  ;;  %v7624_v27 = vpop.f32.mrf.mxu0 }
 0x23b   :  { %2205 = vrot.lane.b32.xlu0 %v7578_v24, %s6158_s14  ;;  %2207 = vrot.lane.b32.xlu1 %v7602_v8, %s6158_s14  ;;  %10619 = vst [vmem:[#allocation268_spill] sm:$0xff] %v7624_v27 }
 0x23c   :  { %v7636_v26 = vpop.f32.mrf.mxu0 }
 0x23d   :  { %v7610_v50 = vpop.permute.xlu0 %2149  ;;  %v7612_v30 = vpop.permute.xlu1 %2151  ;;  %10621 = vst [vmem:[#allocation270_spill] sm:$0xff] %v7636_v26 }
 0x23f   :  { %2405 = vrot.lane.b32.xlu0 %v7592_v40, %s6158_s14  ;;  %2407 = vrot.lane.b32.xlu1 %v7614_v16, %s6158_s14  ;;  %v7634_v40 = vpop.f32.mrf.mxu1  ;;  %v7644_v16 = vmax.f32 %v6531_v25, %v6827_v44  ;;  %v7668_v25 = vmax.f32 %v6519_v21, %v6815_v2  ;;  %v7686_v21 = vmax.f32 %v6587_v39, %v6887_v46 }
 0x240   :  { %10620 = vst [vmem:[#allocation269_spill] sm:$0xff] %v7634_v40 }
 0x241   :  { %v7620_v37 = vpop.permute.xlu0 %2349  ;;  %v7622_v23 = vpop.permute.xlu1 %2351 }
 0x242   :  { %10617 = vst [vmem:[#allocation266_spill] sm:$0xff] %v7620_v37  ;;  %10618 = vst [vmem:[#allocation267_spill] sm:$0xff] %v7622_v23 }
 0x243   :  { %2201 = vrot.lane.b32.xlu0 %v7590_v38, %s6158_s14  ;;  %2203 = vrot.lane.b32.xlu1 %v7624_v27, %s6158_s14  ;;  %v7650_v27 = vpop.f32.mrf.mxu0 }
 0x244   :  { %10624 = vst [vmem:[#allocation273_spill] sm:$0xff] %v7650_v27 }
 0x245   :  { %v7630_v8 = vpop.permute.xlu0 %2145  ;;  %v7632_v24 = vpop.permute.xlu1 %2147 }
 0x247   :  { %2401 = vrot.lane.b32.xlu0 %v7604_v52, %s6158_s14  ;;  %2403 = vrot.lane.b32.xlu1 %v7634_v40, %s6158_s14  ;;  %v7660_v40 = vpop.f32.mrf.mxu0 }
 0x248   :  { %10625 = vst [vmem:[#allocation274_spill] sm:$0xff] %v7660_v40 }
 0x249   :  { %v7646_v23 = vpop.permute.xlu0 %2345  ;;  %v7648_v37 = vpop.permute.xlu1 %2347 }
 0x24a   :  { %10622 = vst [vmem:[#allocation271_spill] sm:$0xff] %v7646_v23  ;;  %10623 = vst [vmem:[#allocation272_spill] sm:$0xff] %v7648_v37  ;;  %v7674_v23 = vpop.f32.mrf.mxu0 }
 0x24b   :  { %3003 = vrot.lane.b32.xlu1 %v7644_v16, %s6159_s0  ;;  %2213 = vrot.lane.b32.xlu0 %v7636_v26, %s6158_s14  ;;  %10628 = vst [vmem:[#allocation277_spill] sm:$0xff] %v7674_v23  ;;  %v7682_v26 = vmax.f32 %v6560_v33, %v6885_v19  ;;  %v7702_v33 = vmax.f32 %v6573_v36, %v6863_v56 }
 0x24c   :  { %v7714_v19 = vmax.f32 %v6608_v45, %v6933_v55  ;;  %v7730_v56 = vmax.f32 %v6592_v41, %v6909_v58  ;;  %v7734_v45 = vmax.f32 %v6621_v48, %v6911_v11  ;;  %v7750_v41 = vmax.f32 %v6683_v63, %v6983_v49 }
 0x24d   :  { %v7656_v52 = vpop.permute.xlu0 %2157  ;;  %v7658_v38 = vpop.permute.xlu1 %2159  ;;  %v7762_v11 = vmax.f32 %v6640_v53, %v6957_v15  ;;  %v7778_v63 = vmax.f32 %v6696_v3, %v7029_v1  ;;  %v7782_v53 = vmax.f32 %v6723_v9, %v7031_v62  ;;  %v7794_v15 = vmax.f32 %v6685_v0, %v7005_v61 }
 0x24e   :  { %v7798_v1 = vmax.f32 %v6709_v6, %v7007_v31  ;;  %v7810_v9 = vmax.f32 %v6733_v12, %v7077_v4  ;;  %v7814_v61 = vmax.f32 %v6755_v17, %v7079_v5  ;;  %v7826_v6 = vmax.f32 %v6725_v10, %v7053_v32  ;;  %v10639_v10 = vld [vmem:[#allocation118_spill] sm:$0xff]  ;;  %v10640_v32 = vld [vmem:[#allocation31_spill] sm:$0xff] }
 0x24f   :  { %2209 = vrot.lane.b32.xlu0 %v7650_v27, %s6158_s14  ;;  %2215 = vrot.lane.b32.xlu1 %v7660_v40, %s6158_s14  ;;  %v7830_v4 = vmax.f32 %v6741_v14, %v7055_v43  ;;  %v7842_v5 = vmax.f32 %v6765_v20, %v7125_v54  ;;  %v10644_v20 = vld [vmem:[#allocation111_spill] sm:$0xff]  ;;  %v10645_v54 = vld [vmem:[#allocation28_spill] sm:$0xff]  ;;  %v10664_v27 = vld [vmem:[#allocation45_spill] sm:$0xff] }
 0x251   :  { %v7670_v44 = vpop.permute.xlu0 %2357  ;;  %v7672_v37 = vpop.permute.xlu1 %2359 }
 0x252   :  { %10626 = vst [vmem:[#allocation275_spill] sm:$0xff] %v7670_v44  ;;  %10627 = vst [vmem:[#allocation276_spill] sm:$0xff] %v7672_v37  ;;  %v7698_v37 = vmax.f32 %v6544_v29, %v6861_v7  ;;  %v7718_v29 = vmax.f32 %v6635_v51, %v6935_v13  ;;  %v7746_v13 = vmax.f32 %v6656_v57, %v6981_v22 }
 0x253   :  { %3001 = vrot.lane.b32.xlu0 %v7668_v25, %s6159_s0  ;;  %2211 = vrot.lane.b32.xlu1 %v7674_v23, %s6158_s14  ;;  %v7766_v22 = vmax.f32 %v6669_v60, %v6959_v34  ;;  %v10663_v23 = vld [vmem:[#allocation147_spill] sm:$0xff] }
 0x254   :  { %v7906_v28 = vmax.f32 %v10664_v27, %v10663_v23  ;;  %v10674_v23 = vld [vmem:[#allocation140_spill] sm:$0xff] }
 0x255   :  { %v7688_v2 = vpop.permute.xlu0 %2153  ;;  %v7690_v44 = vpop.permute.xlu1 %2155  ;;  %v10675_v27 = vld [vmem:[#allocation48_spill] sm:$0xff] }
 0x257   :  { %3005 = vrot.lane.b32.xlu0 %v7682_v26, %s6159_s0  ;;  %3007 = vrot.lane.b32.xlu1 %v7686_v21, %s6159_s0 }
 0x259   :  { %v7704_v39 = vpop.permute.xlu0 %2353  ;;  %v7706_v46 = vpop.permute.xlu1 %2355 }
 0x25a   :  { %10629 = vst [vmem:[#allocation278_spill] sm:$0xff] %v7704_v39  ;;  %10630 = vst [vmem:[#allocation279_spill] sm:$0xff] %v7706_v46 }
 0x25b   :  { %3009 = vrot.lane.b32.xlu0 %v7698_v37, %s6159_s0  ;;  %3011 = vrot.lane.b32.xlu1 %v7702_v33, %s6159_s0 }
 0x25d   :  { %v7720_v36 = vpop.permute.xlu0 %2165  ;;  %v7722_v7 = vpop.permute.xlu1 %2167 }
 0x25f   :  { %3013 = vrot.lane.b32.xlu0 %v7714_v19, %s6159_s0  ;;  %3015 = vrot.lane.b32.xlu1 %v7718_v29, %s6159_s0 }
 0x261   :  { %v7736_v51 = vpop.permute.xlu0 %2365  ;;  %v7738_v55 = vpop.permute.xlu1 %2367 }
 0x262   :  { %10631 = vst [vmem:[#allocation280_spill] sm:$0xff] %v7736_v51  ;;  %10632 = vst [vmem:[#allocation281_spill] sm:$0xff] %v7738_v55  ;;  %v7862_v55 = vmax.f32 %v10645_v54, %v10644_v20  ;;  %v10649_v51 = vld [vmem:[#allocation131_spill] sm:$0xff] }
 0x263   :  { %3017 = vrot.lane.b32.xlu0 %v7730_v56, %s6159_s0  ;;  %3019 = vrot.lane.b32.xlu1 %v7734_v45, %s6159_s0 }
 0x264   :  { %10646 = vst [vmem:[#allocation31_spill] sm:$0xff] %v7862_v55 }
 0x265   :  { %v7752_v48 = vpop.permute.xlu0 %2161  ;;  %v7754_v58 = vpop.permute.xlu1 %2163 }
 0x267   :  { %3021 = vrot.lane.b32.xlu0 %v7746_v13, %s6159_s0  ;;  %3023 = vrot.lane.b32.xlu1 %v7750_v41, %s6159_s0 }
 0x269   :  { %v7768_v49 = vpop.permute.xlu0 %2361  ;;  %v7770_v57 = vpop.permute.xlu1 %2363 }
 0x26a   :  { %10633 = vst [vmem:[#allocation282_spill] sm:$0xff] %v7768_v49  ;;  %10634 = vst [vmem:[#allocation283_spill] sm:$0xff] %v7770_v57  ;;  %v10650_v57 = vld [vmem:[#allocation34_spill] sm:$0xff] }
 0x26b   :  { %3025 = vrot.lane.b32.xlu0 %v7762_v11, %s6159_s0  ;;  %3027 = vrot.lane.b32.xlu1 %v7766_v22, %s6159_s0  ;;  %v7874_v49 = vmax.f32 %v10650_v57, %v10649_v51  ;;  %v10658_v51 = vld [vmem:[#allocation126_spill] sm:$0xff]  ;;  %v10659_v57 = vld [vmem:[#allocation36_spill] sm:$0xff] }
 0x26c   :  { %v7894_v40 = vmax.f32 %v10659_v57, %v10658_v51 }
 0x26d   :  { %v7784_v34 = vpop.permute.xlu0 %2173  ;;  %v7786_v60 = vpop.permute.xlu1 %2175  ;;  %10651 = vst [vmem:[#allocation111_spill] sm:$0xff] %v7874_v49 }
 0x26e   :  { %10660 = vst [vmem:[#allocation34_spill] sm:$0xff] %v7894_v40 }
 0x26f   :  { %3029 = vrot.lane.b32.xlu0 %v7778_v63, %s6159_s0  ;;  %3031 = vrot.lane.b32.xlu1 %v7782_v53, %s6159_s0 }
 0x271   :  { %v7800_v62 = vpop.permute.xlu0 %2373  ;;  %v7802_v3 = vpop.permute.xlu1 %2375 }
 0x272   :  { %10635 = vst [vmem:[#allocation284_spill] sm:$0xff] %v7800_v62  ;;  %10636 = vst [vmem:[#allocation285_spill] sm:$0xff] %v7802_v3  ;;  %v7846_v3 = vmax.f32 %v10640_v32, %v10639_v10  ;;  %v10641_v62 = vld [vmem:[#allocation110_spill] sm:$0xff] }
 0x273   :  { %3033 = vrot.lane.b32.xlu0 %v7794_v15, %s6159_s0  ;;  %3035 = vrot.lane.b32.xlu1 %v7798_v1, %s6159_s0 }
 0x275   :  { %v7816_v31 = vpop.permute.xlu0 %2169  ;;  %v7818_v0 = vpop.permute.xlu1 %2171 }
 0x277   :  { %3037 = vrot.lane.b32.xlu0 %v7810_v9, %s6159_s0  ;;  %3039 = vrot.lane.b32.xlu1 %v7814_v61, %s6159_s0 }
 0x279   :  { %v7832_v12 = vpop.permute.xlu0 %2369  ;;  %v7834_v17 = vpop.permute.xlu1 %2371 }
 0x27a   :  { %10637 = vst [vmem:[#allocation286_spill] sm:$0xff] %v7832_v12  ;;  %10638 = vst [vmem:[#allocation287_spill] sm:$0xff] %v7834_v17  ;;  %v10642_v17 = vld [vmem:[#allocation25_spill] sm:$0xff] }
 0x27b   :  { %3041 = vrot.lane.b32.xlu0 %v7826_v6, %s6159_s0  ;;  %3043 = vrot.lane.b32.xlu1 %v7830_v4, %s6159_s0  ;;  %v7858_v12 = vmax.f32 %v10642_v17, %v10641_v62  ;;  %v10652_v62 = vld [vmem:[#allocation132_spill] sm:$0xff] }
 0x27c   :  { %v10653_v17 = vld [vmem:[#allocation40_spill] sm:$0xff] }
 0x27d   :  { %v7848_v43 = vpop.permute.xlu0 %2181  ;;  %v7850_v14 = vpop.permute.xlu1 %2183  ;;  %10643 = vst [vmem:[#allocation118_spill] sm:$0xff] %v7858_v12  ;;  %v7878_v46 = vmax.f32 %v10653_v17, %v10652_v62 }
 0x27f   :  { %3045 = vrot.lane.b32.xlu0 %v7842_v5, %s6159_s0  ;;  %3047 = vrot.lane.b32.xlu1 %v7846_v3, %s6159_s0  ;;  %10654 = vst [vmem:[#allocation28_spill] sm:$0xff] %v7878_v46 }
 0x281   :  { %v7864_v10 = vpop.permute.xlu0 %2381  ;;  %v7866_v32 = vpop.permute.xlu1 %2383 }
 0x282   :  { %10647 = vst [vmem:[#allocation110_spill] sm:$0xff] %v7864_v10  ;;  %10648 = vst [vmem:[#allocation25_spill] sm:$0xff] %v7866_v32  ;;  %v10655_v32 = vld [vmem:[#allocation125_spill] sm:$0xff]  ;;  %v10656_v10 = vld [vmem:[#allocation32_spill] sm:$0xff] }
 0x283   :  { %3049 = vrot.lane.b32.xlu0 %v7858_v12, %s6159_s0  ;;  %3051 = vrot.lane.b32.xlu1 %v7862_v55, %s6159_s0  ;;  %v7890_v39 = vmax.f32 %v10656_v10, %v10655_v32  ;;  %10665 = vst [vmem:[#allocation125_spill] sm:$0xff] %v7906_v28  ;;  %v10666_v10 = vld [vmem:[#allocation148_spill] sm:$0xff]  ;;  %v10667_v32 = vld [vmem:[#allocation51_spill] sm:$0xff] }
 0x285   :  { %v7880_v20 = vpop.permute.xlu0 %2177  ;;  %v7882_v54 = vpop.permute.xlu1 %2179  ;;  %10657 = vst [vmem:[#allocation131_spill] sm:$0xff] %v7890_v39 }
 0x287   :  { %3053 = vrot.lane.b32.xlu0 %v7874_v49, %s6159_s0  ;;  %3055 = vrot.lane.b32.xlu1 %v7878_v46, %s6159_s0  ;;  %v7910_v46 = vmax.f32 %v10667_v32, %v10666_v10 }
 0x289   :  { %v7896_v62 = vpop.permute.xlu0 %2377  ;;  %v7898_v17 = vpop.permute.xlu1 %2379  ;;  %10668 = vst [vmem:[#allocation32_spill] sm:$0xff] %v7910_v46 }
 0x28a   :  { %10661 = vst [vmem:[#allocation132_spill] sm:$0xff] %v7896_v62  ;;  %10662 = vst [vmem:[#allocation40_spill] sm:$0xff] %v7898_v17  ;;  %v10671_v17 = vld [vmem:[#allocation139_spill] sm:$0xff]  ;;  %v10672_v62 = vld [vmem:[#allocation41_spill] sm:$0xff] }
 0x28b   :  { %3057 = vrot.lane.b32.xlu0 %v7890_v39, %s6159_s0  ;;  %3059 = vrot.lane.b32.xlu1 %v7894_v40, %s6159_s0  ;;  %v7922_v40 = vmax.f32 %v10672_v62, %v10671_v17  ;;  %v7926_v39 = vmax.f32 %v10675_v27, %v10674_v23  ;;  %v10682_v62 = vld [vmem:[#allocation164_spill] sm:$0xff]  ;;  %v10683_v17 = vld [vmem:[#allocation63_spill] sm:$0xff] }
 0x28d   :  { %v7912_v51 = vpop.permute.xlu0 %2189  ;;  %v7914_v57 = vpop.permute.xlu1 %2191  ;;  %10673 = vst [vmem:[#allocation147_spill] sm:$0xff] %v7922_v40  ;;  %10676 = vst [vmem:[#allocation45_spill] sm:$0xff] %v7926_v39 }
 0x28e   :  { %10669 = vst [vmem:[#allocation126_spill] sm:$0xff] %v7912_v51  ;;  %10670 = vst [vmem:[#allocation36_spill] sm:$0xff] %v7914_v57  ;;  %v7942_v57 = vmax.f32 %v10683_v17, %v10682_v62 }
 0x28f   :  { %3061 = vrot.lane.b32.xlu0 %v7906_v28, %s6159_s0  ;;  %3063 = vrot.lane.b32.xlu1 %v7910_v46, %s6159_s0  ;;  %v10679_v28 = vld [vmem:[#allocation163_spill] sm:$0xff]  ;;  %v10680_v46 = vld [vmem:[#allocation56_spill] sm:$0xff] }
 0x290   :  { %v7938_v49 = vmax.f32 %v10680_v46, %v10679_v28  ;;  %10684 = vst [vmem:[#allocation41_spill] sm:$0xff] %v7942_v57  ;;  %v10688_v28 = vld [vmem:[#allocation156_spill] sm:$0xff] }
 0x291   :  { %v7928_v10 = vpop.permute.xlu0 %2389  ;;  %v7930_v32 = vpop.permute.xlu1 %2391  ;;  %v10689_v46 = vld [vmem:[#allocation60_spill] sm:$0xff] }
 0x292   :  { %10677 = vst [vmem:[#allocation148_spill] sm:$0xff] %v7928_v10  ;;  %10678 = vst [vmem:[#allocation51_spill] sm:$0xff] %v7930_v32  ;;  %v10685_v32 = vld [vmem:[#allocation155_spill] sm:$0xff]  ;;  %v10686_v10 = vld [vmem:[#allocation54_spill] sm:$0xff] }
 0x293   :  { %3065 = vrot.lane.b32.xlu0 %v7922_v40, %s6159_s0  ;;  %3067 = vrot.lane.b32.xlu1 %v7926_v39, %s6159_s0  ;;  %10681 = vst [vmem:[#allocation139_spill] sm:$0xff] %v7938_v49  ;;  %v7954_v39 = vmax.f32 %v10686_v10, %v10685_v32  ;;  %v7958_v40 = vmax.f32 %v10689_v46, %v10688_v28  ;;  %v10696_v10 = vld [vmem:[#allocation180_spill] sm:$0xff]  ;;  %v10697_v32 = vld [vmem:[#allocation75_spill] sm:$0xff] }
 0x294   :  { %v7974_v55 = vmax.f32 %v10697_v32, %v10696_v10 }
 0x295   :  { %v7944_v23 = vpop.permute.xlu0 %2185  ;;  %v7946_v27 = vpop.permute.xlu1 %2187  ;;  %10687 = vst [vmem:[#allocation140_spill] sm:$0xff] %v7954_v39  ;;  %10690 = vst [vmem:[#allocation48_spill] sm:$0xff] %v7958_v40 }
 0x296   :  { %10698 = vst [vmem:[#allocation63_spill] sm:$0xff] %v7974_v55 }
 0x297   :  { %3069 = vrot.lane.b32.xlu0 %v7938_v49, %s6159_s0  ;;  %3071 = vrot.lane.b32.xlu1 %v7942_v57, %s6159_s0  ;;  %v10693_v49 = vld [vmem:[#allocation179_spill] sm:$0xff]  ;;  %v10694_v57 = vld [vmem:[#allocation68_spill] sm:$0xff] }
 0x298   :  { %v7970_v51 = vmax.f32 %v10694_v57, %v10693_v49  ;;  %v10704_v49 = vld [vmem:[#allocation172_spill] sm:$0xff] }
 0x299   :  { %v7960_v62 = vpop.permute.xlu0 %2385  ;;  %v7962_v17 = vpop.permute.xlu1 %2387  ;;  %v10705_v57 = vld [vmem:[#allocation72_spill] sm:$0xff] }
 0x29a   :  { %10691 = vst [vmem:[#allocation163_spill] sm:$0xff] %v7960_v62  ;;  %10692 = vst [vmem:[#allocation56_spill] sm:$0xff] %v7962_v17  ;;  %v10701_v17 = vld [vmem:[#allocation171_spill] sm:$0xff]  ;;  %v10702_v62 = vld [vmem:[#allocation66_spill] sm:$0xff] }
 0x29b   :  { %3073 = vrot.lane.b32.xlu0 %v7954_v39, %s6159_s0  ;;  %3075 = vrot.lane.b32.xlu1 %v7958_v40, %s6159_s0  ;;  %10695 = vst [vmem:[#allocation164_spill] sm:$0xff] %v7970_v51  ;;  %v7986_v40 = vmax.f32 %v10702_v62, %v10701_v17  ;;  %v7990_v39 = vmax.f32 %v10705_v57, %v10704_v49  ;;  %v10712_v62 = vld [vmem:[#allocation196_spill] sm:$0xff]  ;;  %v10713_v17 = vld [vmem:[#allocation87_spill] sm:$0xff] }
 0x29d   :  { %v7976_v28 = vpop.permute.xlu0 %2197  ;;  %v7978_v46 = vpop.permute.xlu1 %2199  ;;  %10703 = vst [vmem:[#allocation156_spill] sm:$0xff] %v7986_v40  ;;  %10706 = vst [vmem:[#allocation60_spill] sm:$0xff] %v7990_v39 }
 0x29e   :  { %10699 = vst [vmem:[#allocation155_spill] sm:$0xff] %v7976_v28  ;;  %10700 = vst [vmem:[#allocation54_spill] sm:$0xff] %v7978_v46  ;;  %v8006_v28 = vmax.f32 %v10713_v17, %v10712_v62 }
 0x29f   :  { %3077 = vrot.lane.b32.xlu0 %v7970_v51, %s6159_s0  ;;  %3079 = vrot.lane.b32.xlu1 %v7974_v55, %s6159_s0  ;;  %v10709_v51 = vld [vmem:[#allocation195_spill] sm:$0xff]  ;;  %v10710_v55 = vld [vmem:[#allocation80_spill] sm:$0xff] }
 0x2a0   :  { %v8002_v46 = vmax.f32 %v10710_v55, %v10709_v51  ;;  %10714 = vst [vmem:[#allocation75_spill] sm:$0xff] %v8006_v28  ;;  %v10720_v55 = vld [vmem:[#allocation188_spill] sm:$0xff] }
 0x2a1   :  { %v7992_v10 = vpop.permute.xlu0 %2397  ;;  %v7994_v32 = vpop.permute.xlu1 %2399  ;;  %v10721_v51 = vld [vmem:[#allocation84_spill] sm:$0xff] }
 0x2a2   :  { %10707 = vst [vmem:[#allocation179_spill] sm:$0xff] %v7992_v10  ;;  %10708 = vst [vmem:[#allocation68_spill] sm:$0xff] %v7994_v32  ;;  %v10717_v32 = vld [vmem:[#allocation187_spill] sm:$0xff]  ;;  %v10718_v10 = vld [vmem:[#allocation78_spill] sm:$0xff] }
 0x2a3   :  { %3081 = vrot.lane.b32.xlu0 %v7986_v40, %s6159_s0  ;;  %3083 = vrot.lane.b32.xlu1 %v7990_v39, %s6159_s0  ;;  %10711 = vst [vmem:[#allocation180_spill] sm:$0xff] %v8002_v46  ;;  %v8018_v39 = vmax.f32 %v10718_v10, %v10717_v32  ;;  %v8022_v40 = vmax.f32 %v10721_v51, %v10720_v55  ;;  %v10728_v10 = vld [vmem:[#allocation212_spill] sm:$0xff]  ;;  %v10729_v32 = vld [vmem:[#allocation99_spill] sm:$0xff] }
 0x2a5   :  { %v8008_v49 = vpop.permute.xlu0 %2193  ;;  %v8010_v57 = vpop.permute.xlu1 %2195  ;;  %10719 = vst [vmem:[#allocation172_spill] sm:$0xff] %v8018_v39  ;;  %10722 = vst [vmem:[#allocation72_spill] sm:$0xff] %v8022_v40 }
 0x2a6   :  { %10715 = vst [vmem:[#allocation171_spill] sm:$0xff] %v8008_v49  ;;  %10716 = vst [vmem:[#allocation66_spill] sm:$0xff] %v8010_v57  ;;  %v8038_v49 = vmax.f32 %v10729_v32, %v10728_v10 }
 0x2a7   :  { %3085 = vrot.lane.b32.xlu0 %v8002_v46, %s6159_s0  ;;  %3087 = vrot.lane.b32.xlu1 %v8006_v28, %s6159_s0  ;;  %v10725_v46 = vld [vmem:[#allocation211_spill] sm:$0xff]  ;;  %v10726_v28 = vld [vmem:[#allocation92_spill] sm:$0xff] }
 0x2a8   :  { %v8034_v57 = vmax.f32 %v10726_v28, %v10725_v46  ;;  %10730 = vst [vmem:[#allocation87_spill] sm:$0xff] %v8038_v49  ;;  %v10736_v28 = vld [vmem:[#allocation204_spill] sm:$0xff] }
 0x2a9   :  { %v8024_v62 = vpop.permute.xlu0 %2393  ;;  %v8026_v17 = vpop.permute.xlu1 %2395  ;;  %v10737_v46 = vld [vmem:[#allocation96_spill] sm:$0xff] }
 0x2aa   :  { %10723 = vst [vmem:[#allocation195_spill] sm:$0xff] %v8024_v62  ;;  %10724 = vst [vmem:[#allocation80_spill] sm:$0xff] %v8026_v17  ;;  %v10733_v17 = vld [vmem:[#allocation203_spill] sm:$0xff]  ;;  %v10734_v62 = vld [vmem:[#allocation90_spill] sm:$0xff] }
 0x2ab   :  { %3089 = vrot.lane.b32.xlu0 %v8018_v39, %s6159_s0  ;;  %3091 = vrot.lane.b32.xlu1 %v8022_v40, %s6159_s0  ;;  %10727 = vst [vmem:[#allocation196_spill] sm:$0xff] %v8034_v57  ;;  %v8050_v40 = vmax.f32 %v10734_v62, %v10733_v17  ;;  %v8054_v39 = vmax.f32 %v10737_v46, %v10736_v28  ;;  %v10744_v62 = vld [vmem:[#allocation228_spill] sm:$0xff]  ;;  %v10745_v17 = vld [vmem:[#allocation113_spill] sm:$0xff] }
 0x2ad   :  { %v8040_v55 = vpop.permute.xlu0 %2205  ;;  %v8042_v51 = vpop.permute.xlu1 %2207  ;;  %10735 = vst [vmem:[#allocation188_spill] sm:$0xff] %v8050_v40  ;;  %10738 = vst [vmem:[#allocation84_spill] sm:$0xff] %v8054_v39 }
 0x2ae   :  { %10731 = vst [vmem:[#allocation187_spill] sm:$0xff] %v8040_v55  ;;  %10732 = vst [vmem:[#allocation78_spill] sm:$0xff] %v8042_v51  ;;  %v8070_v55 = vmax.f32 %v10745_v17, %v10744_v62 }
 0x2af   :  { %3093 = vrot.lane.b32.xlu0 %v8034_v57, %s6159_s0  ;;  %3095 = vrot.lane.b32.xlu1 %v8038_v49, %s6159_s0  ;;  %v10741_v57 = vld [vmem:[#allocation227_spill] sm:$0xff]  ;;  %v10742_v49 = vld [vmem:[#allocation104_spill] sm:$0xff] }
 0x2b0   :  { %v8066_v51 = vmax.f32 %v10742_v49, %v10741_v57  ;;  %10746 = vst [vmem:[#allocation99_spill] sm:$0xff] %v8070_v55  ;;  %v10752_v49 = vld [vmem:[#allocation220_spill] sm:$0xff] }
 0x2b1   :  { %v8056_v10 = vpop.permute.xlu0 %2405  ;;  %v8058_v32 = vpop.permute.xlu1 %2407  ;;  %v10753_v57 = vld [vmem:[#allocation108_spill] sm:$0xff] }
 0x2b2   :  { %10739 = vst [vmem:[#allocation211_spill] sm:$0xff] %v8056_v10  ;;  %10740 = vst [vmem:[#allocation92_spill] sm:$0xff] %v8058_v32  ;;  %v10749_v32 = vld [vmem:[#allocation219_spill] sm:$0xff]  ;;  %v10750_v10 = vld [vmem:[#allocation102_spill] sm:$0xff] }
 0x2b3   :  { %3097 = vrot.lane.b32.xlu0 %v8050_v40, %s6159_s0  ;;  %3099 = vrot.lane.b32.xlu1 %v8054_v39, %s6159_s0  ;;  %10743 = vst [vmem:[#allocation212_spill] sm:$0xff] %v8066_v51  ;;  %v8082_v39 = vmax.f32 %v10750_v10, %v10749_v32  ;;  %v8086_v40 = vmax.f32 %v10753_v57, %v10752_v49  ;;  %v10759_v10 = vld [vmem:[#allocation244_spill] sm:$0xff]  ;;  %v10760_v32 = vld [vmem:[#allocation130_spill] sm:$0xff] }
 0x2b5   :  { %v8072_v28 = vpop.permute.xlu0 %2201  ;;  %v8074_v46 = vpop.permute.xlu1 %2203  ;;  %10751 = vst [vmem:[#allocation204_spill] sm:$0xff] %v8082_v39  ;;  %10754 = vst [vmem:[#allocation96_spill] sm:$0xff] %v8086_v40 }
 0x2b6   :  { %10747 = vst [vmem:[#allocation203_spill] sm:$0xff] %v8072_v28  ;;  %10748 = vst [vmem:[#allocation90_spill] sm:$0xff] %v8074_v46  ;;  %v8102_v28 = vmax.f32 %v10760_v32, %v10759_v10  ;;  %v10767_v10 = vld [vmem:[#allocation123_spill] sm:$0xff] }
 0x2b7   :  { %3101 = vrot.lane.b32.xlu0 %v8066_v51, %s6159_s0  ;;  %3103 = vrot.lane.b32.xlu1 %v8070_v55, %s6159_s0  ;;  %v10757_v51 = vld [vmem:[#allocation243_spill] sm:$0xff] }
 0x2b8   :  { %v10758_v55 = vld [vmem:[#allocation119_spill] sm:$0xff]  ;;  %10761 = vst [vmem:[#allocation228_spill] sm:$0xff] %v8102_v28 }
 0x2b9   :  { %v8088_v62 = vpop.permute.xlu0 %2401  ;;  %v8090_v17 = vpop.permute.xlu1 %2403  ;;  %v8098_v46 = vmax.f32 %v10758_v55, %v10757_v51  ;;  %v10764_v55 = vld [vmem:[#allocation116_spill] sm:$0xff] }
 0x2ba   :  { %10755 = vst [vmem:[#allocation227_spill] sm:$0xff] %v8088_v62  ;;  %10756 = vst [vmem:[#allocation104_spill] sm:$0xff] %v8090_v17 }
 0x2bb   :  { %3105 = vrot.lane.b32.xlu0 %v8082_v39, %s6159_s0  ;;  %3107 = vrot.lane.b32.xlu1 %v8086_v40, %s6159_s0  ;;  %v10763_v40 = vld [vmem:[#allocation235_spill] sm:$0xff]  ;;  %v10766_v39 = vld [vmem:[#allocation236_spill] sm:$0xff] }
 0x2bc   :  { %v8114_v51 = vmax.f32 %v10764_v55, %v10763_v40  ;;  %v8118_v32 = vmax.f32 %v10767_v10, %v10766_v39  ;;  %v10770_v55 = vld [vmem:[#allocation146_spill] sm:$0xff] }
 0x2bd   :  { %v3004_v49 = vpop.permute.xlu1 %3003  ;;  %v8104_v57 = vpop.permute.xlu0 %2213  ;;  %v8134_v39 = vmax.f32 %v10770_v55, %v7588_v18  ;;  %v10771_v18 = vld [vmem:[#allocation134_spill] sm:$0xff] }
 0x2be   :  { %10762 = vst [vmem:[#allocation113_spill] sm:$0xff] %v8104_v57  ;;  %v3588_v62 = vmax.f32 %v7644_v16, %v3004_v49  ;;  %10765 = vst [vmem:[#allocation219_spill] sm:$0xff] %v8114_v51  ;;  %v10769_v49 = vld [vmem:[#allocation137_spill] sm:$0xff] }
 0x2bf   :  { %3109 = vrot.lane.b32.xlu0 %v8098_v46, %s6159_s0  ;;  %3111 = vrot.lane.b32.xlu1 %v8102_v28, %s6159_s0  ;;  %10768 = vst [vmem:[#allocation102_spill] sm:$0xff] %v8118_v32  ;;  %v8130_v40 = vmax.f32 %v10769_v49, %v7586_v47  ;;  %v10772_v49 = vld [vmem:[#allocation141_spill] sm:$0xff] }
 0x2c0   :  { %v3791_v17 = vadd.f32 %v7540_v35, %v3588_v62  ;;  %v8154_v55 = vmax.f32 %v10772_v49, %v7556_v42  ;;  %v10773_v42 = vld [vmem:[#allocation153_spill] sm:$0xff] }
 0x2c1   :  { %v8120_v12 = vpop.permute.xlu0 %2209  ;;  %v8122_v57 = vpop.permute.xlu1 %2215  ;;  %v8166_v49 = vmax.f32 %v10773_v42, %v7630_v8 }
 0x2c2   :  { %v3987_v16 = vmax.f32 %v3791_v17, 0.0 }
 0x2c3   :  { %3113 = vrot.lane.b32.xlu0 %v8114_v51, %s6159_s0  ;;  %3115 = vrot.lane.b32.xlu1 %v8118_v32, %s6159_s0 }
 0x2c4   :  { %v5562_v62 = vpack.c.bf16 %v3987_v16, %v3987_v16  ;;  %v8150_v16 = vmax.f32 %v10771_v18, %v7554_v59 }
 0x2c5   :  { %v3002_v10 = vpop.permute.xlu0 %3001  ;;  %v8136_v28 = vpop.permute.xlu1 %2211 }
 0x2c6   :  { %4968 = vst.msk [vmem:[%s10126_s3 + $0xc] sm:$0xf] %vm4964_vm1, %v5562_v62  ;;  %v3587_v17 = vmax.f32 %v7668_v25, %v3002_v10 }
 0x2c7   :  { %3117 = vrot.lane.b32.xlu0 %v8130_v40, %s6159_s0  ;;  %3119 = vrot.lane.b32.xlu1 %v8134_v39, %s6159_s0 }
 0x2c8   :  { %v3790_v47 = vadd.f32 %v7540_v35, %v3587_v17 }
 0x2c9   :  { %v3006_v32 = vpop.permute.xlu0 %3005  ;;  %v3008_v62 = vpop.permute.xlu1 %3007 }
 0x2ca   :  { %v3986_v51 = vmax.f32 %v3790_v47, 0.0  ;;  %v3589_v25 = vmax.f32 %v7682_v26, %v3006_v32  ;;  %v3590_v10 = vmax.f32 %v7686_v21, %v3008_v62  ;;  %v10774_v47 = vld [vmem:[#allocation162_spill] sm:$0xff] }
 0x2cb   :  { %3121 = vrot.lane.b32.xlu0 %v8150_v16, %s6159_s0  ;;  %3123 = vrot.lane.b32.xlu1 %v8154_v55, %s6159_s0  ;;  %v8170_v26 = vmax.f32 %v10774_v47, %v7632_v24 }
 0x2cc   :  { %v5561_v17 = vpack.c.bf16 %v3986_v51, %v3986_v51  ;;  %v3792_v59 = vadd.f32 %v7540_v35, %v3589_v25  ;;  %v3793_v18 = vadd.f32 %v7540_v35, %v3590_v10 }
 0x2cd   :  { %v3010_v21 = vpop.permute.xlu0 %3009  ;;  %v3012_v32 = vpop.permute.xlu1 %3011 }
 0x2ce   :  { %4967 = vst.msk [vmem:[%s10126_s3 + $0x8] sm:$0xf] %vm4964_vm1, %v5561_v17  ;;  %v3988_v51 = vmax.f32 %v3792_v59, 0.0  ;;  %v3989_v62 = vmax.f32 %v3793_v18, 0.0  ;;  %v3591_v25 = vmax.f32 %v7698_v37, %v3010_v21  ;;  %v3592_v10 = vmax.f32 %v7702_v33, %v3012_v32  ;;  %v10775_v17 = vld [vmem:[#allocation149_spill] sm:$0xff] }
 0x2cf   :  { %3125 = vrot.lane.b32.xlu0 %v8166_v49, %s6159_s0  ;;  %3127 = vrot.lane.b32.xlu1 %v8170_v26, %s6159_s0  ;;  %v8186_v59 = vmax.f32 %v10775_v17, %v7610_v50  ;;  %v10776_v37 = vld [vmem:[#allocation157_spill] sm:$0xff] }
 0x2d0   :  { %v5563_v8 = vpack.c.bf16 %v3988_v51, %v3988_v51  ;;  %v5564_v24 = vpack.c.bf16 %v3989_v62, %v3989_v62  ;;  %v3794_v42 = vadd.f32 %v7540_v35, %v3591_v25  ;;  %v3795_v47 = vadd.f32 %v7540_v35, %v3592_v10 }
 0x2d1   :  { %v8190_v18 = vmax.f32 %v10776_v37, %v7612_v30  ;;  %v3014_v33 = vpop.permute.xlu0 %3013  ;;  %v3016_v21 = vpop.permute.xlu1 %3015 }
 0x2d2   :  { %4969 = vst.msk [vmem:[%s10126_s3 + $0x10] sm:$0xf] %vm4964_vm1, %v5563_v8  ;;  %4970 = vst.msk [vmem:[%s10126_s3 + $0x14] sm:$0xf] %vm4964_vm1, %v5564_v24  ;;  %v3990_v32 = vmax.f32 %v3794_v42, 0.0  ;;  %v3991_v51 = vmax.f32 %v3795_v47, 0.0  ;;  %v3593_v50 = vmax.f32 %v7714_v19, %v3014_v33  ;;  %v3594_v62 = vmax.f32 %v7718_v29, %v3016_v21 }
 0x2d3   :  { %3129 = vrot.lane.b32.xlu0 %v8186_v59, %s6159_s0  ;;  %3131 = vrot.lane.b32.xlu1 %v8190_v18, %s6159_s0  ;;  %v10777_v24 = vld [vmem:[#allocation169_spill] sm:$0xff]  ;;  %v10778_v19 = vld [vmem:[#allocation178_spill] sm:$0xff] }
 0x2d4   :  { %v5565_v30 = vpack.c.bf16 %v3990_v32, %v3990_v32  ;;  %v5566_v25 = vpack.c.bf16 %v3991_v51, %v3991_v51  ;;  %v3796_v10 = vadd.f32 %v7540_v35, %v3593_v50  ;;  %v3797_v8 = vadd.f32 %v7540_v35, %v3594_v62  ;;  %v10779_v62 = vld [vmem:[#allocation165_spill] sm:$0xff] }
 0x2d5   :  { %v8210_v42 = vmax.f32 %v10777_v24, %v7688_v2  ;;  %v8214_v47 = vmax.f32 %v10778_v19, %v7690_v44  ;;  %v3018_v29 = vpop.permute.xlu0 %3017  ;;  %v3020_v17 = vpop.permute.xlu1 %3019 }
 0x2d6   :  { %4971 = vst.msk [vmem:[%s10126_s3 + $0x18] sm:$0xf] %vm4964_vm1, %v5565_v30  ;;  %4972 = vst.msk [vmem:[%s10126_s3 + $0x1c] sm:$0xf] %vm4964_vm1, %v5566_v25  ;;  %v3992_v37 = vmax.f32 %v3796_v10, 0.0  ;;  %v3993_v33 = vmax.f32 %v3797_v8, 0.0  ;;  %v3595_v2 = vmax.f32 %v7730_v56, %v3018_v29  ;;  %v3596_v21 = vmax.f32 %v7734_v45, %v3020_v17 }
 0x2d7   :  { %3133 = vrot.lane.b32.xlu0 %v8210_v42, %s6159_s0  ;;  %3135 = vrot.lane.b32.xlu1 %v8214_v47, %s6159_s0  ;;  %v8234_v30 = vmax.f32 %v10779_v62, %v7656_v52  ;;  %v10780_v56 = vld [vmem:[#allocation173_spill] sm:$0xff] }
 0x2d8   :  { %v5567_v44 = vpack.c.bf16 %v3992_v37, %v3992_v37  ;;  %v5568_v32 = vpack.c.bf16 %v3993_v33, %v3993_v33  ;;  %v3798_v51 = vadd.f32 %v7540_v35, %v3595_v2  ;;  %v3799_v50 = vadd.f32 %v7540_v35, %v3596_v21  ;;  %v10781_v33 = vld [vmem:[#allocation185_spill] sm:$0xff] }
 0x2d9   :  { %v8238_v25 = vmax.f32 %v10780_v56, %v7658_v38  ;;  %v3022_v45 = vpop.permute.xlu0 %3021  ;;  %v3024_v10 = vpop.permute.xlu1 %3023  ;;  %v8258_v2 = vmax.f32 %v10781_v33, %v7752_v48 }
 0x2da   :  { %4973 = vst.msk [vmem:[%s10126_s3 + $0x20] sm:$0xf] %vm4964_vm1, %v5567_v44  ;;  %4974 = vst.msk [vmem:[%s10126_s3 + $0x24] sm:$0xf] %vm4964_vm1, %v5568_v32  ;;  %v3994_v8 = vmax.f32 %v3798_v51, 0.0  ;;  %v3995_v24 = vmax.f32 %v3799_v50, 0.0  ;;  %v3597_v52 = vmax.f32 %v7746_v13, %v3022_v45  ;;  %v3598_v19 = vmax.f32 %v7750_v41, %v3024_v10 }
 0x2db   :  { %3137 = vrot.lane.b32.xlu0 %v8234_v30, %s6159_s0  ;;  %3139 = vrot.lane.b32.xlu1 %v8238_v25, %s6159_s0  ;;  %v10782_v13 = vld [vmem:[#allocation194_spill] sm:$0xff]  ;;  %v10783_v10 = vld [vmem:[#allocation181_spill] sm:$0xff] }
 0x2dc   :  { %v5569_v38 = vpack.c.bf16 %v3994_v8, %v3994_v8  ;;  %v5570_v29 = vpack.c.bf16 %v3995_v24, %v3995_v24  ;;  %v3800_v17 = vadd.f32 %v7540_v35, %v3597_v52  ;;  %v3801_v37 = vadd.f32 %v7540_v35, %v3598_v19 }
 0x2dd   :  { %v8262_v21 = vmax.f32 %v10782_v13, %v7754_v58  ;;  %v3026_v41 = vpop.permute.xlu0 %3025  ;;  %v3028_v44 = vpop.permute.xlu1 %3027  ;;  %v8282_v8 = vmax.f32 %v10783_v10, %v7720_v36  ;;  %v10785_v13 = vld [vmem:[#allocation201_spill] sm:$0xff] }
 0x2de   :  { %4975 = vst.msk [vmem:[%s10126_s3 + $0x28] sm:$0xf] %vm4964_vm1, %v5569_v38  ;;  %4976 = vst.msk [vmem:[%s10126_s3 + $0x2c] sm:$0xf] %vm4964_vm1, %v5570_v29  ;;  %v3996_v32 = vmax.f32 %v3800_v17, 0.0  ;;  %v3997_v51 = vmax.f32 %v3801_v37, 0.0  ;;  %v3599_v48 = vmax.f32 %v7762_v11, %v3026_v41  ;;  %v3600_v50 = vmax.f32 %v7766_v22, %v3028_v44 }
 0x2df   :  { %3141 = vrot.lane.b32.xlu0 %v8258_v2, %s6159_s0  ;;  %3143 = vrot.lane.b32.xlu1 %v8262_v21, %s6159_s0  ;;  %v10784_v11 = vld [vmem:[#allocation189_spill] sm:$0xff]  ;;  %v8306_v41 = vmax.f32 %v10785_v13, %v7816_v31 }
 0x2e0   :  { %v5571_v58 = vpack.c.bf16 %v3996_v32, %v3996_v32  ;;  %v5572_v62 = vpack.c.bf16 %v3997_v51, %v3997_v51  ;;  %v3802_v56 = vadd.f32 %v7540_v35, %v3599_v48  ;;  %v3803_v45 = vadd.f32 %v7540_v35, %v3600_v50 }
 0x2e1   :  { %v8286_v24 = vmax.f32 %v10784_v11, %v7722_v7  ;;  %v3030_v22 = vpop.permute.xlu0 %3029  ;;  %v3032_v52 = vpop.permute.xlu1 %3031 }
 0x2e2   :  { %4977 = vst.msk [vmem:[%s10126_s3 + $0x30] sm:$0xf] %vm4964_vm1, %v5571_v58  ;;  %4978 = vst.msk [vmem:[%s10126_s3 + $0x34] sm:$0xf] %vm4964_vm1, %v5572_v62  ;;  %v3998_v19 = vmax.f32 %v3802_v56, 0.0  ;;  %v3999_v38 = vmax.f32 %v3803_v45, 0.0  ;;  %v3601_v36 = vmax.f32 %v7778_v63, %v3030_v22  ;;  %v3602_v29 = vmax.f32 %v7782_v53, %v3032_v52 }
 0x2e3   :  { %3145 = vrot.lane.b32.xlu0 %v8282_v8, %s6159_s0  ;;  %3147 = vrot.lane.b32.xlu1 %v8286_v24, %s6159_s0  ;;  %v10786_v63 = vld [vmem:[#allocation210_spill] sm:$0xff]  ;;  %v10787_v45 = vld [vmem:[#allocation197_spill] sm:$0xff] }
 0x2e4   :  { %v5573_v7 = vpack.c.bf16 %v3998_v19, %v3998_v19  ;;  %v5574_v17 = vpack.c.bf16 %v3999_v38, %v3999_v38  ;;  %v3804_v37 = vadd.f32 %v7540_v35, %v3601_v36  ;;  %v3805_v33 = vadd.f32 %v7540_v35, %v3602_v29 }
 0x2e5   :  { %v8310_v44 = vmax.f32 %v10786_v63, %v7818_v0  ;;  %v3034_v53 = vpop.permute.xlu0 %3033  ;;  %v3036_v32 = vpop.permute.xlu1 %3035  ;;  %v8330_v10 = vmax.f32 %v10787_v45, %v7784_v34 }
 0x2e6   :  { %4979 = vst.msk [vmem:[%s10126_s3 + $0x38] sm:$0xf] %vm4964_vm1, %v5573_v7  ;;  %4980 = vst.msk [vmem:[%s10126_s3 + $0x3c] sm:$0xf] %vm4964_vm1, %v5574_v17  ;;  %v4000_v51 = vmax.f32 %v3804_v37, 0.0  ;;  %v4001_v48 = vmax.f32 %v3805_v33, 0.0  ;;  %v3603_v31 = vmax.f32 %v7794_v15, %v3034_v53  ;;  %v3604_v50 = vmax.f32 %v7798_v1, %v3036_v32 }
 0x2e7   :  { %3149 = vrot.lane.b32.xlu0 %v8306_v41, %s6159_s0  ;;  %3151 = vrot.lane.b32.xlu1 %v8310_v44, %s6159_s0  ;;  %v10788_v15 = vld [vmem:[#allocation205_spill] sm:$0xff] }
 0x2e8   :  { %v5575_v0 = vpack.c.bf16 %v4000_v51, %v4000_v51  ;;  %v5576_v58 = vpack.c.bf16 %v4001_v48, %v4001_v48  ;;  %v3806_v62 = vadd.f32 %v7540_v35, %v3603_v31  ;;  %v3807_v56 = vadd.f32 %v7540_v35, %v3604_v50  ;;  %v10789_v17 = vld [vmem:[#allocation217_spill] sm:$0xff] }
 0x2e9   :  { %v8334_v11 = vmax.f32 %v10788_v15, %v7786_v60  ;;  %v3038_v1 = vpop.permute.xlu0 %3037  ;;  %v3040_v22 = vpop.permute.xlu1 %3039  ;;  %v8354_v37 = vmax.f32 %v10789_v17, %v7880_v20  ;;  %v10791_v50 = vld [vmem:[#allocation213_spill] sm:$0xff]  ;;  %v10796_v17 = vld [vmem:[#allocation31_spill] sm:$0xff] }
 0x2ea   :  { %4981 = vst.msk [vmem:[%s10126_s3 + $0x40] sm:$0xf] %vm4964_vm1, %v5575_v0  ;;  %4982 = vst.msk [vmem:[%s10126_s3 + $0x44] sm:$0xf] %vm4964_vm1, %v5576_v58  ;;  %v4002_v52 = vmax.f32 %v3806_v62, 0.0  ;;  %v4003_v19 = vmax.f32 %v3807_v56, 0.0  ;;  %v3605_v34 = vmax.f32 %v7810_v9, %v3038_v1  ;;  %v3606_v38 = vmax.f32 %v7814_v61, %v3040_v22 }
 0x2eb   :  { %3153 = vrot.lane.b32.xlu0 %v8330_v10, %s6159_s0  ;;  %3155 = vrot.lane.b32.xlu1 %v8334_v11, %s6159_s0  ;;  %v10790_v9 = vld [vmem:[#allocation226_spill] sm:$0xff]  ;;  %v8378_v0 = vmax.f32 %v10791_v50, %v7848_v43 }
 0x2ec   :  { %v5577_v60 = vpack.c.bf16 %v4002_v52, %v4002_v52  ;;  %v5578_v36 = vpack.c.bf16 %v4003_v19, %v4003_v19  ;;  %v3808_v29 = vadd.f32 %v7540_v35, %v3605_v34  ;;  %v3809_v7 = vadd.f32 %v7540_v35, %v3606_v38  ;;  %v10793_v19 = vld [vmem:[#allocation233_spill] sm:$0xff] }
 0x2ed   :  { %v8358_v33 = vmax.f32 %v10790_v9, %v7882_v54  ;;  %v3042_v61 = vpop.permute.xlu0 %3041  ;;  %v3044_v13 = vpop.permute.xlu1 %3043  ;;  %v8402_v34 = vmax.f32 %v10793_v19, %v7944_v23  ;;  %v10795_v23 = vld [vmem:[#allocation118_spill] sm:$0xff]  ;;  %v10804_v19 = vld [vmem:[#allocation249_spill] sm:$0xff] }
 0x2ee   :  { %4983 = vst.msk [vmem:[%s10126_s3 + $0x48] sm:$0xf] %vm4964_vm1, %v5577_v60  ;;  %4984 = vst.msk [vmem:[%s10126_s3 + $0x4c] sm:$0xf] %vm4964_vm1, %v5578_v36  ;;  %v4004_v63 = vmax.f32 %v3808_v29, 0.0  ;;  %v4005_v53 = vmax.f32 %v3809_v7, 0.0  ;;  %v3607_v20 = vmax.f32 %v7826_v6, %v3042_v61  ;;  %v3608_v32 = vmax.f32 %v7830_v4, %v3044_v13 }
 0x2ef   :  { %3157 = vrot.lane.b32.xlu0 %v8354_v37, %s6159_s0  ;;  %3159 = vrot.lane.b32.xlu1 %v8358_v33, %s6159_s0  ;;  %v10792_v6 = vld [vmem:[#allocation221_spill] sm:$0xff] }
 0x2f0   :  { %v5579_v54 = vpack.c.bf16 %v4004_v63, %v4004_v63  ;;  %v5580_v51 = vpack.c.bf16 %v4005_v53, %v4005_v53  ;;  %v3810_v48 = vadd.f32 %v7540_v35, %v3607_v20  ;;  %v3811_v31 = vadd.f32 %v7540_v35, %v3608_v32  ;;  %v10797_v53 = vld [vmem:[#allocation126_spill] sm:$0xff]  ;;  %v10798_v20 = vld [vmem:[#allocation229_spill] sm:$0xff] }
 0x2f1   :  { %v8382_v58 = vmax.f32 %v10792_v6, %v7850_v14  ;;  %v3046_v4 = vpop.permute.xlu0 %3045  ;;  %v3048_v62 = vpop.permute.xlu1 %3047  ;;  %v8426_v32 = vmax.f32 %v10798_v20, %v10797_v53 }
 0x2f2   :  { %4985 = vst.msk [vmem:[%s10126_s3 + $0x50] sm:$0xf] %vm4964_vm1, %v5579_v54  ;;  %4986 = vst.msk [vmem:[%s10126_s3 + $0x54] sm:$0xf] %vm4964_vm1, %v5580_v51  ;;  %v4006_v56 = vmax.f32 %v3810_v48, 0.0  ;;  %v4007_v45 = vmax.f32 %v3811_v31, 0.0  ;;  %v3609_v43 = vmax.f32 %v7842_v5, %v3046_v4  ;;  %v3610_v15 = vmax.f32 %v7846_v3, %v3048_v62 }
 0x2f3   :  { %3161 = vrot.lane.b32.xlu0 %v8378_v0, %s6159_s0  ;;  %3163 = vrot.lane.b32.xlu1 %v8382_v58, %s6159_s0  ;;  %v10794_v5 = vld [vmem:[#allocation242_spill] sm:$0xff]  ;;  %v10799_v54 = vld [vmem:[#allocation36_spill] sm:$0xff]  ;;  %v10800_v51 = vld [vmem:[#allocation237_spill] sm:$0xff] }
 0x2f4   :  { %v5581_v14 = vpack.c.bf16 %v4006_v56, %v4006_v56  ;;  %v5582_v1 = vpack.c.bf16 %v4007_v45, %v4007_v45  ;;  %v3812_v22 = vadd.f32 %v7540_v35, %v3609_v43  ;;  %v3813_v52 = vadd.f32 %v7540_v35, %v3610_v15  ;;  %v10801_v62 = vld [vmem:[#allocation111_spill] sm:$0xff]  ;;  %v10802_v45 = vld [vmem:[#allocation28_spill] sm:$0xff] }
 0x2f5   :  { %v8406_v38 = vmax.f32 %v10794_v5, %v7946_v27  ;;  %v3050_v3 = vpop.permute.xlu0 %3049  ;;  %v3052_v60 = vpop.permute.xlu1 %3051  ;;  %v8430_v48 = vmax.f32 %v10800_v51, %v10799_v54  ;;  %v10809_v51 = vld [vmem:[#allocation155_spill] sm:$0xff] }
 0x2f6   :  { %4987 = vst.msk [vmem:[%s10126_s3 + $0x58] sm:$0xf] %vm4964_vm1, %v5581_v14  ;;  %4988 = vst.msk [vmem:[%s10126_s3 + $0x5c] sm:$0xf] %vm4964_vm1, %v5582_v1  ;;  %v4008_v36 = vmax.f32 %v3812_v22, 0.0  ;;  %v4009_v29 = vmax.f32 %v3813_v52, 0.0  ;;  %v3611_v7 = vmax.f32 %v10795_v23, %v3050_v3  ;;  %v3612_v9 = vmax.f32 %v10796_v17, %v3052_v60 }
 0x2f7   :  { %3165 = vrot.lane.b32.xlu0 %v8402_v34, %s6159_s0  ;;  %3167 = vrot.lane.b32.xlu1 %v8406_v38, %s6159_s0  ;;  %v10803_v52 = vld [vmem:[#allocation171_spill] sm:$0xff]  ;;  %v10805_v3 = vld [vmem:[#allocation66_spill] sm:$0xff] }
 0x2f8   :  { %v5583_v27 = vpack.c.bf16 %v4008_v36, %v4008_v36  ;;  %v5584_v61 = vpack.c.bf16 %v4009_v29, %v4009_v29  ;;  %v3814_v13 = vadd.f32 %v7540_v35, %v3611_v7  ;;  %v3815_v63 = vadd.f32 %v7540_v35, %v3612_v9  ;;  %v10806_v60 = vld [vmem:[#allocation254_spill] sm:$0xff]  ;;  %v10807_v9 = vld [vmem:[#allocation131_spill] sm:$0xff] }
 0x2f9   :  { %v3054_v31 = vpop.permute.xlu0 %3053  ;;  %v3056_v50 = vpop.permute.xlu1 %3055  ;;  %v8450_v5 = vmax.f32 %v10804_v19, %v10803_v52  ;;  %v8454_v36 = vmax.f32 %v10806_v60, %v10805_v3 }
 0x2fa   :  { %4989 = vst.msk [vmem:[%s10126_s3 + $0x60] sm:$0xf] %vm4964_vm1, %v5583_v27  ;;  %4990 = vst.msk [vmem:[%s10126_s3 + $0x64] sm:$0xf] %vm4964_vm1, %v5584_v61  ;;  %v4010_v6 = vmax.f32 %v3814_v13, 0.0  ;;  %v4011_v4 = vmax.f32 %v3815_v63, 0.0  ;;  %v3613_v56 = vmax.f32 %v10801_v62, %v3054_v31  ;;  %v3614_v43 = vmax.f32 %v10802_v45, %v3056_v50 }
 0x2fb   :  { %3169 = vrot.lane.b32.xlu0 %v8426_v32, %s6159_s0  ;;  %3171 = vrot.lane.b32.xlu1 %v8430_v48, %s6159_s0  ;;  %v10808_v61 = vld [vmem:[#allocation34_spill] sm:$0xff]  ;;  %v10810_v31 = vld [vmem:[#allocation245_spill] sm:$0xff] }
 0x2fc   :  { %v5585_v15 = vpack.c.bf16 %v4010_v6, %v4010_v6  ;;  %v5586_v14 = vpack.c.bf16 %v4011_v4, %v4011_v4  ;;  %v3816_v1 = vadd.f32 %v7540_v35, %v3613_v56  ;;  %v3817_v22 = vadd.f32 %v7540_v35, %v3614_v43  ;;  %v10811_v6 = vld [vmem:[#allocation54_spill] sm:$0xff]  ;;  %v10812_v4 = vld [vmem:[#allocation251_spill] sm:$0xff] }
 0x2fd   :  { %v3058_v29 = vpop.permute.xlu0 %3057  ;;  %v3060_v23 = vpop.permute.xlu1 %3059  ;;  %v8474_v50 = vmax.f32 %v10810_v31, %v10809_v51  ;;  %v8478_v62 = vmax.f32 %v10812_v4, %v10811_v6  ;;  %v10820_v31 = vld [vmem:[#allocation45_spill] sm:$0xff] }
 0x2fe   :  { %4991 = vst.msk [vmem:[%s10126_s3 + $0x68] sm:$0xf] %vm4964_vm1, %v5585_v15  ;;  %4992 = vst.msk [vmem:[%s10126_s3 + $0x6c] sm:$0xf] %vm4964_vm1, %v5586_v14  ;;  %v4012_v7 = vmax.f32 %v3816_v1, 0.0  ;;  %v4013_v17 = vmax.f32 %v3817_v22, 0.0  ;;  %v3615_v27 = vmax.f32 %v10807_v9, %v3058_v29  ;;  %v3616_v13 = vmax.f32 %v10808_v61, %v3060_v23 }
 0x2ff   :  { %3173 = vrot.lane.b32.xlu0 %v8450_v5, %s6159_s0  ;;  %3175 = vrot.lane.b32.xlu1 %v8454_v36, %s6159_s0  ;;  %v10813_v14 = vld [vmem:[#allocation125_spill] sm:$0xff]  ;;  %v10814_v22 = vld [vmem:[#allocation32_spill] sm:$0xff]  ;;  %v10815_v23 = vld [vmem:[#allocation203_spill] sm:$0xff] }
 0x300   :  { %v5587_v63 = vpack.c.bf16 %v4012_v7, %v4012_v7  ;;  %v5588_v53 = vpack.c.bf16 %v4013_v17, %v4013_v17  ;;  %v3818_v20 = vadd.f32 %v7540_v35, %v3615_v27  ;;  %v3819_v54 = vadd.f32 %v7540_v35, %v3616_v13  ;;  %v10816_v7 = vld [vmem:[#allocation259_spill] sm:$0xff]  ;;  %v10817_v9 = vld [vmem:[#allocation90_spill] sm:$0xff]  ;;  %v10818_v27 = vld [vmem:[#allocation268_spill] sm:$0xff] }
 0x301   :  { %v3062_v56 = vpop.permute.xlu0 %3061  ;;  %v3064_v45 = vpop.permute.xlu1 %3063  ;;  %v8498_v17 = vmax.f32 %v10816_v7, %v10815_v23  ;;  %v8502_v61 = vmax.f32 %v10818_v27, %v10817_v9  ;;  %v10825_v23 = vld [vmem:[#allocation139_spill] sm:$0xff]  ;;  %v10826_v9 = vld [vmem:[#allocation41_spill] sm:$0xff] }
 0x302   :  { %4993 = vst.msk [vmem:[%s10126_s3 + $0x70] sm:$0xf] %vm4964_vm1, %v5587_v63  ;;  %4994 = vst.msk [vmem:[%s10126_s3 + $0x74] sm:$0xf] %vm4964_vm1, %v5588_v53  ;;  %v4014_v43 = vmax.f32 %v3818_v20, 0.0  ;;  %v4015_v15 = vmax.f32 %v3819_v54, 0.0  ;;  %v3617_v1 = vmax.f32 %v10813_v14, %v3062_v56  ;;  %v3618_v52 = vmax.f32 %v10814_v22, %v3064_v45 }
 0x303   :  { %3177 = vrot.lane.b32.xlu0 %v8474_v50, %s6159_s0  ;;  %3179 = vrot.lane.b32.xlu1 %v8478_v62, %s6159_s0  ;;  %v10819_v54 = vld [vmem:[#allocation147_spill] sm:$0xff]  ;;  %v10822_v14 = vld [vmem:[#allocation257_spill] sm:$0xff]  ;;  %v10823_v22 = vld [vmem:[#allocation78_spill] sm:$0xff] }
 0x304   :  { %v5589_v19 = vpack.c.bf16 %v4014_v43, %v4014_v43  ;;  %v5590_v3 = vpack.c.bf16 %v4015_v15, %v4015_v15  ;;  %v3820_v60 = vadd.f32 %v7540_v35, %v3617_v1  ;;  %v3821_v29 = vadd.f32 %v7540_v35, %v3618_v52  ;;  %v10821_v15 = vld [vmem:[#allocation187_spill] sm:$0xff] }
 0x305   :  { %v3066_v13 = vpop.permute.xlu0 %3065  ;;  %v3068_v63 = vpop.permute.xlu1 %3067  ;;  %v8522_v1 = vmax.f32 %v10822_v14, %v10821_v15  ;;  %v10824_v52 = vld [vmem:[#allocation263_spill] sm:$0xff] }
 0x306   :  { %4995 = vst.msk [vmem:[%s10126_s3 + $0x78] sm:$0xf] %vm4964_vm1, %v5589_v19  ;;  %4996 = vst.msk [vmem:[%s10126_s3 + $0x7c] sm:$0xf] %vm4964_vm1, %v5590_v3  ;;  %v4016_v53 = vmax.f32 %v3820_v60, 0.0  ;;  %v4017_v20 = vmax.f32 %v3821_v29, 0.0  ;;  %v3619_v51 = vmax.f32 %v10819_v54, %v3066_v13  ;;  %v3620_v6 = vmax.f32 %v10820_v31, %v3068_v63 }
 0x307   :  { %3181 = vrot.lane.b32.xlu0 %v8498_v17, %s6159_s0  ;;  %3183 = vrot.lane.b32.xlu1 %v8502_v61, %s6159_s0  ;;  %v8526_v19 = vmax.f32 %v10824_v52, %v10823_v22  ;;  %v10830_v22 = vld [vmem:[#allocation48_spill] sm:$0xff] }
 0x308   :  { %v5591_v4 = vpack.c.bf16 %v4016_v53, %v4016_v53  ;;  %v5592_v56 = vpack.c.bf16 %v4017_v20, %v4017_v20  ;;  %v3822_v45 = vadd.f32 %v7540_v35, %v3619_v51  ;;  %v3823_v43 = vadd.f32 %v7540_v35, %v3620_v6  ;;  %v8545_v53 = vld [vmem:[%s10125_s2] ss:$0 sm:$0xff]  ;;  %v10827_v51 = vld [vmem:[#allocation273_spill] sm:$0xff] }
 0x309   :  { %v3070_v3 = vpop.permute.xlu0 %3069  ;;  %v3072_v60 = vpop.permute.xlu1 %3071  ;;  %v8551_v31 = vmax.f32 %v10827_v51, %v8120_v12  ;;  %v10828_v6 = vld [vmem:[#allocation277_spill] sm:$0xff]  ;;  %v10829_v12 = vld [vmem:[#allocation140_spill] sm:$0xff] }
 0x30a   :  { %4997 = vst.msk [vmem:[%s10126_s3 + $0x80] sm:$0xf] %vm4964_vm1, %v5591_v4  ;;  %4998 = vst.msk [vmem:[%s10126_s3 + $0x84] sm:$0xf] %vm4964_vm1, %v5592_v56  ;;  %v4018_v35 = vmax.f32 %v3822_v45, 0.0  ;;  %v4019_v29 = vmax.f32 %v3823_v43, 0.0  ;;  %v3621_v7 = vmax.f32 %v10825_v23, %v3070_v3  ;;  %v3622_v27 = vmax.f32 %v10826_v9, %v3072_v60 }
 0x30b   :  { %3185 = vrot.lane.b32.xlu0 %v8522_v1, %s6159_s0  ;;  %3187 = vrot.lane.b32.xlu1 %v8526_v19, %s6159_s0  ;;  %v8555_v4 = vmax.f32 %v10828_v6, %v8136_v28  ;;  %v10832_v23 = vld [vmem:[#allocation270_spill] sm:$0xff]  ;;  %v10834_v51 = vld [vmem:[#allocation164_spill] sm:$0xff] }
 0x30c   :  { %v5593_v13 = vpack.c.bf16 %v4018_v35, %v4018_v35  ;;  %v5594_v63 = vpack.c.bf16 %v4019_v29, %v4019_v29  ;;  %v3824_v20 = vadd.f32 %v8545_v53, %v3621_v7  ;;  %v3825_v54 = vadd.f32 %v8545_v53, %v3622_v27  ;;  %v10831_v29 = vld [vmem:[#allocation113_spill] sm:$0xff]  ;;  %v10833_v9 = vld [vmem:[#allocation274_spill] sm:$0xff] }
 0x30d   :  { %v3074_v56 = vpop.permute.xlu0 %3073  ;;  %v3076_v45 = vpop.permute.xlu1 %3075  ;;  %v8575_v7 = vmax.f32 %v10832_v23, %v10831_v29  ;;  %v8579_v27 = vmax.f32 %v10833_v9, %v8122_v57 }
 0x30e   :  { %4999 = vst.msk [vmem:[%s10126_s3 + $0x88] sm:$0xf] %vm4964_vm1, %v5593_v13  ;;  %5000 = vst.msk [vmem:[%s10126_s3 + $0x8c] sm:$0xf] %vm4964_vm1, %v5594_v63  ;;  %v4020_v43 = vmax.f32 %v3824_v20, 0.0  ;;  %v4021_v15 = vmax.f32 %v3825_v54, 0.0  ;;  %v3623_v14 = vmax.f32 %v10829_v12, %v3074_v56  ;;  %v3624_v52 = vmax.f32 %v10830_v22, %v3076_v45 }
 0x30f   :  { %3189 = vrot.lane.b32.xlu0 %v8551_v31, %s6159_s0  ;;  %3191 = vrot.lane.b32.xlu1 %v8555_v4, %s6159_s0  ;;  %v10835_v56 = vld [vmem:[#allocation63_spill] sm:$0xff] }
 0x310   :  { %v5595_v28 = vpack.c.bf16 %v4020_v43, %v4020_v43  ;;  %v5596_v3 = vpack.c.bf16 %v4021_v15, %v4021_v15  ;;  %v3826_v60 = vadd.f32 %v8545_v53, %v3623_v14  ;;  %v3827_v35 = vadd.f32 %v8545_v53, %v3624_v52  ;;  %v10836_v14 = vld [vmem:[#allocation43_spill] sm:$0xff] }
 0x311   :  { %v3078_v13 = vpop.permute.xlu0 %3077  ;;  %v3080_v63 = vpop.permute.xlu1 %3079  ;;  %v10837_v22 = vld [vmem:[#allocation3_spill] sm:$0xff] }
 0x312   :  { %5001 = vst.msk [vmem:[%s10126_s3 + $0x90] sm:$0xf] %vm4964_vm1, %v5595_v28  ;;  %5002 = vst.msk [vmem:[%s10126_s3 + $0x94] sm:$0xf] %vm4964_vm1, %v5596_v3  ;;  %v4022_v20 = vmax.f32 %v3826_v60, 0.0  ;;  %v4023_v54 = vmax.f32 %v3827_v35, 0.0  ;;  %v3625_v6 = vmax.f32 %v10834_v51, %v3078_v13  ;;  %v3626_v45 = vmax.f32 %v10835_v56, %v3080_v63 }
 0x313   :  { %3193 = vrot.lane.b32.xlu0 %v8575_v7, %s6159_s0  ;;  %3195 = vrot.lane.b32.xlu1 %v8579_v27, %s6159_s0  ;;  %v8599_v52 = vmax.f32 %v10837_v22, %v10836_v14  ;;  %v10838_v28 = vld [vmem:[#allocation47_spill] sm:$0xff]  ;;  %v10839_v3 = vld [vmem:[#allocation5_spill] sm:$0xff]  ;;  %v10840_v13 = vld [vmem:[#allocation156_spill] sm:$0xff] }
 0x314   :  { %v5597_v57 = vpack.c.bf16 %v4022_v20, %v4022_v20  ;;  %v5598_v43 = vpack.c.bf16 %v4023_v54, %v4023_v54  ;;  %v3828_v15 = vadd.f32 %v8545_v53, %v3625_v6  ;;  %v3829_v12 = vadd.f32 %v8545_v53, %v3626_v45  ;;  %v10841_v20 = vld [vmem:[#allocation60_spill] sm:$0xff] }
 0x315   :  { %v8603_v60 = vmax.f32 %v10839_v3, %v10838_v28  ;;  %v3082_v35 = vpop.permute.xlu0 %3081  ;;  %v3084_v29 = vpop.permute.xlu1 %3083  ;;  %v10845_v14 = vld [vmem:[#allocation4_spill] sm:$0xff] }
 0x316   :  { %5003 = vst.msk [vmem:[%s10126_s3 + $0x98] sm:$0xf] %vm4964_vm1, %v5597_v57  ;;  %5004 = vst.msk [vmem:[%s10126_s3 + $0x9c] sm:$0xf] %vm4964_vm1, %v5598_v43  ;;  %v4024_v23 = vmax.f32 %v3828_v15, 0.0  ;;  %v4025_v9 = vmax.f32 %v3829_v12, 0.0  ;;  %v3627_v63 = vmax.f32 %v10840_v13, %v3082_v35  ;;  %v3628_v54 = vmax.f32 %v10841_v20, %v3084_v29 }
 0x317   :  { %3197 = vrot.lane.b32.xlu0 %v8599_v52, %s6159_s0  ;;  %3199 = vrot.lane.b32.xlu1 %v8603_v60, %s6159_s0  ;;  %v10842_v57 = vld [vmem:[#allocation38_spill] sm:$0xff]  ;;  %v10844_v12 = vld [vmem:[#allocation44_spill] sm:$0xff]  ;;  %v10847_v13 = vld [vmem:[#allocation75_spill] sm:$0xff] }
 0x318   :  { %v5599_v51 = vpack.c.bf16 %v4024_v23, %v4024_v23  ;;  %v5600_v6 = vpack.c.bf16 %v4025_v9, %v4025_v9  ;;  %v3830_v56 = vadd.f32 %v8545_v53, %v3627_v63  ;;  %v3831_v45 = vadd.f32 %v8545_v53, %v3628_v54  ;;  %v10843_v43 = vld [vmem:[#allocation2_spill] sm:$0xff]  ;;  %v10846_v23 = vld [vmem:[#allocation180_spill] sm:$0xff] }
 0x319   :  { %v8623_v15 = vmax.f32 %v10843_v43, %v10842_v57  ;;  %v8627_v22 = vmax.f32 %v10845_v14, %v10844_v12  ;;  %v3086_v28 = vpop.permute.xlu0 %3085  ;;  %v3088_v3 = vpop.permute.xlu1 %3087  ;;  %v10848_v43 = vld [vmem:[#allocation58_spill] sm:$0xff]  ;;  %v10852_v12 = vld [vmem:[#allocation9_spill] sm:$0xff] }
 0x31a   :  { %5005 = vst.msk [vmem:[%s10126_s3 + $0xa0] sm:$0xf] %vm4964_vm1, %v5599_v51  ;;  %5006 = vst.msk [vmem:[%s10126_s3 + $0xa4] sm:$0xf] %vm4964_vm1, %v5600_v6  ;;  %v4026_v35 = vmax.f32 %v3830_v56, 0.0  ;;  %v4027_v29 = vmax.f32 %v3831_v45, 0.0  ;;  %v3629_v9 = vmax.f32 %v10846_v23, %v3086_v28  ;;  %v3630_v63 = vmax.f32 %v10847_v13, %v3088_v3 }
 0x31b   :  { %3201 = vrot.lane.b32.xlu0 %v8623_v15, %s6159_s0  ;;  %3203 = vrot.lane.b32.xlu1 %v8627_v22, %s6159_s0  ;;  %v10849_v6 = vld [vmem:[#allocation7_spill] sm:$0xff]  ;;  %v10854_v23 = vld [vmem:[#allocation172_spill] sm:$0xff] }
 0x31c   :  { %v5601_v20 = vpack.c.bf16 %v4026_v35, %v4026_v35  ;;  %v5602_v54 = vpack.c.bf16 %v4027_v29, %v4027_v29  ;;  %v3832_v51 = vadd.f32 %v8545_v53, %v3629_v9  ;;  %v3833_v57 = vadd.f32 %v8545_v53, %v3630_v63  ;;  %v10851_v45 = vld [vmem:[#allocation59_spill] sm:$0xff]  ;;  %v10855_v13 = vld [vmem:[#allocation72_spill] sm:$0xff] }
 0x31d   :  { %v8647_v56 = vmax.f32 %v10849_v6, %v10848_v43  ;;  %v8651_v14 = vmax.f32 %v10852_v12, %v10851_v45  ;;  %v3090_v28 = vpop.permute.xlu0 %3089  ;;  %v3092_v3 = vpop.permute.xlu1 %3091  ;;  %v10856_v12 = vld [vmem:[#allocation52_spill] sm:$0xff] }
 0x31e   :  { %5007 = vst.msk [vmem:[%s10126_s3 + $0xa8] sm:$0xf] %vm4964_vm1, %v5601_v20  ;;  %5008 = vst.msk [vmem:[%s10126_s3 + $0xac] sm:$0xf] %vm4964_vm1, %v5602_v54  ;;  %v4028_v35 = vmax.f32 %v3832_v51, 0.0  ;;  %v4029_v29 = vmax.f32 %v3833_v57, 0.0  ;;  %v3631_v9 = vmax.f32 %v10854_v23, %v3090_v28  ;;  %v3632_v63 = vmax.f32 %v10855_v13, %v3092_v3 }
 0x31f   :  { %10850 = vst [vmem:[#allocation220_spill] sm:$0xff] %v8647_v56  ;;  %10853 = vst [vmem:[#allocation108_spill] sm:$0xff] %v8651_v14  ;;  %3205 = vrot.lane.b32.xlu0 %v8647_v56, %s6159_s0  ;;  %3207 = vrot.lane.b32.xlu1 %v8651_v14, %s6159_s0  ;;  %v10857_v54 = vld [vmem:[#allocation6_spill] sm:$0xff]  ;;  %v10859_v57 = vld [vmem:[#allocation53_spill] sm:$0xff] }
 0x320   :  { %v5603_v43 = vpack.c.bf16 %v4028_v35, %v4028_v35  ;;  %v5604_v6 = vpack.c.bf16 %v4029_v29, %v4029_v29  ;;  %v3834_v20 = vadd.f32 %v8545_v53, %v3631_v9  ;;  %v3835_v45 = vadd.f32 %v8545_v53, %v3632_v63  ;;  %v10860_v28 = vld [vmem:[#allocation8_spill] sm:$0xff]  ;;  %v10864_v56 = vld [vmem:[#allocation70_spill] sm:$0xff] }
 0x321   :  { %v8671_v51 = vmax.f32 %v10857_v54, %v10856_v12  ;;  %v8675_v23 = vmax.f32 %v10860_v28, %v10859_v57  ;;  %v3094_v3 = vpop.permute.xlu0 %3093  ;;  %v3096_v13 = vpop.permute.xlu1 %3095  ;;  %v10862_v9 = vld [vmem:[#allocation196_spill] sm:$0xff]  ;;  %v10863_v12 = vld [vmem:[#allocation87_spill] sm:$0xff] }
 0x322   :  { %5009 = vst.msk [vmem:[%s10126_s3 + $0xb0] sm:$0xf] %vm4964_vm1, %v5603_v43  ;;  %5010 = vst.msk [vmem:[%s10126_s3 + $0xb4] sm:$0xf] %vm4964_vm1, %v5604_v6  ;;  %v4030_v35 = vmax.f32 %v3834_v20, 0.0  ;;  %v4031_v29 = vmax.f32 %v3835_v45, 0.0  ;;  %v3633_v63 = vmax.f32 %v10862_v9, %v3094_v3  ;;  %v3634_v54 = vmax.f32 %v10863_v12, %v3096_v13 }
 0x323   :  { %10858 = vst [vmem:[#allocation243_spill] sm:$0xff] %v8671_v51  ;;  %10861 = vst [vmem:[#allocation119_spill] sm:$0xff] %v8675_v23  ;;  %3209 = vrot.lane.b32.xlu0 %v8671_v51, %s6159_s0  ;;  %3211 = vrot.lane.b32.xlu1 %v8675_v23, %s6159_s0  ;;  %v10865_v6 = vld [vmem:[#allocation11_spill] sm:$0xff]  ;;  %v10868_v3 = vld [vmem:[#allocation13_spill] sm:$0xff] }
 0x324   :  { %v5605_v57 = vpack.c.bf16 %v4030_v35, %v4030_v35  ;;  %v5606_v28 = vpack.c.bf16 %v4031_v29, %v4031_v29  ;;  %v3836_v43 = vadd.f32 %v8545_v53, %v3633_v63  ;;  %v3837_v14 = vadd.f32 %v8545_v53, %v3634_v54  ;;  %v10867_v45 = vld [vmem:[#allocation71_spill] sm:$0xff]  ;;  %v10871_v54 = vld [vmem:[#allocation84_spill] sm:$0xff] }
 0x325   :  { %v8695_v20 = vmax.f32 %v10865_v6, %v10864_v56  ;;  %v8699_v9 = vmax.f32 %v10868_v3, %v10867_v45  ;;  %v3098_v13 = vpop.permute.xlu0 %3097  ;;  %v3100_v12 = vpop.permute.xlu1 %3099  ;;  %v10870_v56 = vld [vmem:[#allocation188_spill] sm:$0xff] }
 0x326   :  { %5011 = vst.msk [vmem:[%s10126_s3 + $0xb8] sm:$0xf] %vm4964_vm1, %v5605_v57  ;;  %5012 = vst.msk [vmem:[%s10126_s3 + $0xbc] sm:$0xf] %vm4964_vm1, %v5606_v28  ;;  %v4032_v35 = vmax.f32 %v3836_v43, 0.0  ;;  %v4033_v29 = vmax.f32 %v3837_v14, 0.0  ;;  %v3635_v63 = vmax.f32 %v10870_v56, %v3098_v13  ;;  %v3636_v6 = vmax.f32 %v10871_v54, %v3100_v12 }
 0x327   :  { %10866 = vst [vmem:[#allocation244_spill] sm:$0xff] %v8695_v20  ;;  %10869 = vst [vmem:[#allocation130_spill] sm:$0xff] %v8699_v9  ;;  %3213 = vrot.lane.b32.xlu0 %v8695_v20, %s6159_s0  ;;  %3215 = vrot.lane.b32.xlu1 %v8699_v9, %s6159_s0  ;;  %v10872_v51 = vld [vmem:[#allocation64_spill] sm:$0xff]  ;;  %v10873_v28 = vld [vmem:[#allocation10_spill] sm:$0xff] }
 0x328   :  { %v5607_v45 = vpack.c.bf16 %v4032_v35, %v4032_v35  ;;  %v5608_v3 = vpack.c.bf16 %v4033_v29, %v4033_v29  ;;  %v3838_v57 = vadd.f32 %v8545_v53, %v3635_v63  ;;  %v3839_v23 = vadd.f32 %v8545_v53, %v3636_v6  ;;  %v10875_v14 = vld [vmem:[#allocation65_spill] sm:$0xff]  ;;  %v10876_v13 = vld [vmem:[#allocation12_spill] sm:$0xff]  ;;  %v10879_v6 = vld [vmem:[#allocation99_spill] sm:$0xff] }
 0x329   :  { %v8719_v43 = vmax.f32 %v10873_v28, %v10872_v51  ;;  %v8723_v56 = vmax.f32 %v10876_v13, %v10875_v14  ;;  %v3102_v12 = vpop.permute.xlu0 %3101  ;;  %v3104_v54 = vpop.permute.xlu1 %3103  ;;  %v10878_v51 = vld [vmem:[#allocation212_spill] sm:$0xff]  ;;  %v10880_v20 = vld [vmem:[#allocation82_spill] sm:$0xff] }
 0x32a   :  { %5013 = vst.msk [vmem:[%s10126_s3 + $0xc0] sm:$0xf] %vm4964_vm1, %v5607_v45  ;;  %5014 = vst.msk [vmem:[%s10126_s3 + $0xc4] sm:$0xf] %vm4964_vm1, %v5608_v3  ;;  %v4034_v35 = vmax.f32 %v3838_v57, 0.0  ;;  %v4035_v29 = vmax.f32 %v3839_v23, 0.0  ;;  %v3637_v63 = vmax.f32 %v10878_v51, %v3102_v12  ;;  %v3638_v28 = vmax.f32 %v10879_v6, %v3104_v54 }
 0x32b   :  { %10874 = vst [vmem:[#allocation235_spill] sm:$0xff] %v8719_v43  ;;  %10877 = vst [vmem:[#allocation116_spill] sm:$0xff] %v8723_v56  ;;  %3217 = vrot.lane.b32.xlu0 %v8719_v43, %s6159_s0  ;;  %3219 = vrot.lane.b32.xlu1 %v8723_v56, %s6159_s0  ;;  %v10881_v3 = vld [vmem:[#allocation15_spill] sm:$0xff]  ;;  %v10883_v12 = vld [vmem:[#allocation17_spill] sm:$0xff] }
 0x32c   :  { %v5609_v14 = vpack.c.bf16 %v4034_v35, %v4034_v35  ;;  %v5610_v13 = vpack.c.bf16 %v4035_v29, %v4035_v29  ;;  %v3840_v45 = vadd.f32 %v8545_v53, %v3637_v63  ;;  %v3841_v9 = vadd.f32 %v8545_v53, %v3638_v28  ;;  %v10882_v23 = vld [vmem:[#allocation83_spill] sm:$0xff]  ;;  %v10886_v28 = vld [vmem:[#allocation96_spill] sm:$0xff] }
 0x32d   :  { %v8743_v57 = vmax.f32 %v10881_v3, %v10880_v20  ;;  %v8747_v51 = vmax.f32 %v10883_v12, %v10882_v23  ;;  %v3106_v54 = vpop.permute.xlu0 %3105  ;;  %v3108_v6 = vpop.permute.xlu1 %3107  ;;  %v10885_v20 = vld [vmem:[#allocation204_spill] sm:$0xff] }
 0x32e   :  { %5015 = vst.msk [vmem:[%s10126_s3 + $0xc8] sm:$0xf] %vm4964_vm1, %v5609_v14  ;;  %5016 = vst.msk [vmem:[%s10126_s3 + $0xcc] sm:$0xf] %vm4964_vm1, %v5610_v13  ;;  %v4036_v35 = vmax.f32 %v3840_v45, 0.0  ;;  %v4037_v29 = vmax.f32 %v3841_v9, 0.0  ;;  %v3639_v63 = vmax.f32 %v10885_v20, %v3106_v54  ;;  %v3640_v3 = vmax.f32 %v10886_v28, %v3108_v6 }
 0x32f   :  { %10884 = vst [vmem:[#allocation236_spill] sm:$0xff] %v8747_v51  ;;  %3221 = vrot.lane.b32.xlu0 %v8743_v57, %s6159_s0  ;;  %3223 = vrot.lane.b32.xlu1 %v8747_v51, %s6159_s0  ;;  %v10887_v43 = vld [vmem:[#allocation76_spill] sm:$0xff]  ;;  %v10888_v13 = vld [vmem:[#allocation14_spill] sm:$0xff]  ;;  %v10890_v9 = vld [vmem:[#allocation77_spill] sm:$0xff] }
 0x330   :  { %v5611_v23 = vpack.c.bf16 %v4036_v35, %v4036_v35  ;;  %v5612_v12 = vpack.c.bf16 %v4037_v29, %v4037_v29  ;;  %v3842_v14 = vadd.f32 %v8545_v53, %v3639_v63  ;;  %v3843_v56 = vadd.f32 %v8545_v53, %v3640_v3  ;;  %v10891_v54 = vld [vmem:[#allocation16_spill] sm:$0xff]  ;;  %v10894_v51 = vld [vmem:[#allocation94_spill] sm:$0xff] }
 0x331   :  { %v8767_v45 = vmax.f32 %v10888_v13, %v10887_v43  ;;  %v8771_v20 = vmax.f32 %v10891_v54, %v10890_v9  ;;  %v3110_v6 = vpop.permute.xlu0 %3109  ;;  %v3112_v28 = vpop.permute.xlu1 %3111  ;;  %v10893_v63 = vld [vmem:[#allocation228_spill] sm:$0xff] }
 0x332   :  { %5017 = vst.msk [vmem:[%s10126_s3 + $0xd0] sm:$0xf] %vm4964_vm1, %v5611_v23  ;;  %5018 = vst.msk [vmem:[%s10126_s3 + $0xd4] sm:$0xf] %vm4964_vm1, %v5612_v12  ;;  %v4038_v35 = vmax.f32 %v3842_v14, 0.0  ;;  %v4039_v29 = vmax.f32 %v3843_v56, 0.0  ;;  %v3641_v43 = vmax.f32 %v8098_v46, %v3110_v6  ;;  %v3642_v3 = vmax.f32 %v10893_v63, %v3112_v28 }
 0x333   :  { %10889 = vst [vmem:[#allocation123_spill] sm:$0xff] %v8767_v45  ;;  %10892 = vst [vmem:[#allocation137_spill] sm:$0xff] %v8771_v20  ;;  %3225 = vrot.lane.b32.xlu0 %v8767_v45, %s6159_s0  ;;  %3227 = vrot.lane.b32.xlu1 %v8771_v20, %s6159_s0  ;;  %v10895_v12 = vld [vmem:[#allocation19_spill] sm:$0xff]  ;;  %v10897_v46 = vld [vmem:[#allocation21_spill] sm:$0xff] }
 0x334   :  { %v5613_v13 = vpack.c.bf16 %v4038_v35, %v4038_v35  ;;  %v5614_v9 = vpack.c.bf16 %v4039_v29, %v4039_v29  ;;  %v3844_v23 = vadd.f32 %v8545_v53, %v3641_v43  ;;  %v3845_v54 = vadd.f32 %v8545_v53, %v3642_v3  ;;  %v10896_v56 = vld [vmem:[#allocation95_spill] sm:$0xff]  ;;  %v10899_v3 = vld [vmem:[#allocation102_spill] sm:$0xff]  ;;  %v10900_v45 = vld [vmem:[#allocation88_spill] sm:$0xff] }
 0x335   :  { %v8791_v14 = vmax.f32 %v10895_v12, %v10894_v51  ;;  %v8795_v6 = vmax.f32 %v10897_v46, %v10896_v56  ;;  %v3114_v28 = vpop.permute.xlu0 %3113  ;;  %v3116_v63 = vpop.permute.xlu1 %3115  ;;  %v10898_v51 = vld [vmem:[#allocation219_spill] sm:$0xff] }
 0x336   :  { %5019 = vst.msk [vmem:[%s10126_s3 + $0xd8] sm:$0xf] %vm4964_vm1, %v5613_v13  ;;  %5020 = vst.msk [vmem:[%s10126_s3 + $0xdc] sm:$0xf] %vm4964_vm1, %v5614_v9  ;;  %v4040_v35 = vmax.f32 %v3844_v23, 0.0  ;;  %v4041_v29 = vmax.f32 %v3845_v54, 0.0  ;;  %v3643_v43 = vmax.f32 %v10898_v51, %v3114_v28  ;;  %v3644_v12 = vmax.f32 %v10899_v3, %v3116_v63 }
 0x337   :  { %3229 = vrot.lane.b32.xlu0 %v8791_v14, %s6159_s0  ;;  %3231 = vrot.lane.b32.xlu1 %v8795_v6, %s6159_s0  ;;  %v10901_v9 = vld [vmem:[#allocation18_spill] sm:$0xff]  ;;  %v10902_v54 = vld [vmem:[#allocation89_spill] sm:$0xff]  ;;  %v10903_v28 = vld [vmem:[#allocation20_spill] sm:$0xff] }
 0x338   :  { %v5615_v56 = vpack.c.bf16 %v4040_v35, %v4040_v35  ;;  %v5616_v46 = vpack.c.bf16 %v4041_v29, %v4041_v29  ;;  %v3846_v13 = vadd.f32 %v8545_v53, %v3643_v43  ;;  %v3847_v20 = vadd.f32 %v8545_v53, %v3644_v12 }
 0x339   :  { %v8815_v23 = vmax.f32 %v10901_v9, %v10900_v45  ;;  %v8819_v51 = vmax.f32 %v10903_v28, %v10902_v54  ;;  %v3118_v63 = vpop.permute.xlu0 %3117  ;;  %v3120_v3 = vpop.permute.xlu1 %3119  ;;  %v10904_v28 = vld [vmem:[#allocation106_spill] sm:$0xff] }
 0x33a   :  { %5021 = vst.msk [vmem:[%s10126_s3 + $0xe0] sm:$0xf] %vm4964_vm1, %v5615_v56  ;;  %5022 = vst.msk [vmem:[%s10126_s3 + $0xe4] sm:$0xf] %vm4964_vm1, %v5616_v46  ;;  %v4042_v35 = vmax.f32 %v3846_v13, 0.0  ;;  %v4043_v29 = vmax.f32 %v3847_v20, 0.0  ;;  %v3645_v45 = vmax.f32 %v8130_v40, %v3118_v63  ;;  %v3646_v43 = vmax.f32 %v8134_v39, %v3120_v3 }
 0x33b   :  { %3233 = vrot.lane.b32.xlu0 %v8815_v23, %s6159_s0  ;;  %3235 = vrot.lane.b32.xlu1 %v8819_v51, %s6159_s0  ;;  %v10905_v46 = vld [vmem:[#allocation23_spill] sm:$0xff]  ;;  %v10907_v40 = vld [vmem:[#allocation26_spill] sm:$0xff] }
 0x33c   :  { %v5617_v12 = vpack.c.bf16 %v4042_v35, %v4042_v35  ;;  %v5618_v9 = vpack.c.bf16 %v4043_v29, %v4043_v29  ;;  %v3848_v56 = vadd.f32 %v8545_v53, %v3645_v45  ;;  %v3849_v54 = vadd.f32 %v8545_v53, %v3646_v43  ;;  %v10906_v20 = vld [vmem:[#allocation107_spill] sm:$0xff] }
 0x33d   :  { %v8839_v13 = vmax.f32 %v10905_v46, %v10904_v28  ;;  %v8843_v63 = vmax.f32 %v10907_v40, %v10906_v20  ;;  %v3122_v39 = vpop.permute.xlu0 %3121  ;;  %v3124_v3 = vpop.permute.xlu1 %3123  ;;  %v10908_v40 = vld [vmem:[#allocation100_spill] sm:$0xff] }
 0x33e   :  { %5023 = vst.msk [vmem:[%s10126_s3 + $0xe8] sm:$0xf] %vm4964_vm1, %v5617_v12  ;;  %5024 = vst.msk [vmem:[%s10126_s3 + $0xec] sm:$0xf] %vm4964_vm1, %v5618_v9  ;;  %v4044_v35 = vmax.f32 %v3848_v56, 0.0  ;;  %v4045_v29 = vmax.f32 %v3849_v54, 0.0  ;;  %v3647_v45 = vmax.f32 %v8150_v16, %v3122_v39  ;;  %v3648_v43 = vmax.f32 %v8154_v55, %v3124_v3 }
 0x33f   :  { %3237 = vrot.lane.b32.xlu0 %v8839_v13, %s6159_s0  ;;  %3239 = vrot.lane.b32.xlu1 %v8843_v63, %s6159_s0  ;;  %v10909_v9 = vld [vmem:[#allocation22_spill] sm:$0xff]  ;;  %v10910_v54 = vld [vmem:[#allocation101_spill] sm:$0xff]  ;;  %v10911_v16 = vld [vmem:[#allocation24_spill] sm:$0xff] }
 0x340   :  { %v5619_v28 = vpack.c.bf16 %v4044_v35, %v4044_v35  ;;  %v5620_v46 = vpack.c.bf16 %v4045_v29, %v4045_v29  ;;  %v3850_v12 = vadd.f32 %v8545_v53, %v3647_v45  ;;  %v3851_v20 = vadd.f32 %v8545_v53, %v3648_v43 }
 0x341   :  { %v8863_v56 = vmax.f32 %v10909_v9, %v10908_v40  ;;  %v8867_v39 = vmax.f32 %v10911_v16, %v10910_v54  ;;  %v3126_v55 = vpop.permute.xlu0 %3125  ;;  %v3128_v3 = vpop.permute.xlu1 %3127  ;;  %v10912_v16 = vld [vmem:[#allocation121_spill] sm:$0xff] }
 0x342   :  { %5025 = vst.msk [vmem:[%s10126_s3 + $0xf0] sm:$0xf] %vm4964_vm1, %v5619_v28  ;;  %5026 = vst.msk [vmem:[%s10126_s3 + $0xf4] sm:$0xf] %vm4964_vm1, %v5620_v46  ;;  %v4046_v35 = vmax.f32 %v3850_v12, 0.0  ;;  %v4047_v29 = vmax.f32 %v3851_v20, 0.0  ;;  %v3649_v45 = vmax.f32 %v8166_v49, %v3126_v55  ;;  %v3650_v43 = vmax.f32 %v8170_v26, %v3128_v3 }
 0x343   :  { %3241 = vrot.lane.b32.xlu0 %v8863_v56, %s6159_s0  ;;  %3243 = vrot.lane.b32.xlu1 %v8867_v39, %s6159_s0  ;;  %v10913_v46 = vld [vmem:[#allocation29_spill] sm:$0xff]  ;;  %v10914_v20 = vld [vmem:[#allocation122_spill] sm:$0xff] }
 0x344   :  { %v5621_v40 = vpack.c.bf16 %v4046_v35, %v4046_v35  ;;  %v5622_v9 = vpack.c.bf16 %v4047_v29, %v4047_v29  ;;  %v3852_v28 = vadd.f32 %v8545_v53, %v3649_v45  ;;  %v3853_v54 = vadd.f32 %v8545_v53, %v3650_v43  ;;  %v10915_v49 = vld [vmem:[#allocation33_spill] sm:$0xff] }
 0x345   :  { %v8887_v12 = vmax.f32 %v10913_v46, %v10912_v16  ;;  %v8891_v55 = vmax.f32 %v10915_v49, %v10914_v20  ;;  %v3130_v26 = vpop.permute.xlu0 %3129  ;;  %v3132_v3 = vpop.permute.xlu1 %3131  ;;  %v10916_v49 = vld [vmem:[#allocation114_spill] sm:$0xff] }
 0x346   :  { %5027 = vst.msk [vmem:[%s10126_s3 + $0xf8] sm:$0xf] %vm4964_vm1, %v5621_v40  ;;  %5028 = vst.msk [vmem:[%s10126_s3 + $0xfc] sm:$0xf] %vm4964_vm1, %v5622_v9  ;;  %v4048_v35 = vmax.f32 %v3852_v28, 0.0  ;;  %v4049_v29 = vmax.f32 %v3853_v54, 0.0  ;;  %v3651_v45 = vmax.f32 %v8186_v59, %v3130_v26  ;;  %v3652_v43 = vmax.f32 %v8190_v18, %v3132_v3 }
 0x347   :  { %3245 = vrot.lane.b32.xlu0 %v8887_v12, %s6159_s0  ;;  %3247 = vrot.lane.b32.xlu1 %v8891_v55, %s6159_s0  ;;  %v10917_v9 = vld [vmem:[#allocation27_spill] sm:$0xff]  ;;  %v10919_v59 = vld [vmem:[#allocation30_spill] sm:$0xff] }
 0x348   :  { %v5623_v16 = vpack.c.bf16 %v4048_v35, %v4048_v35  ;;  %v5624_v46 = vpack.c.bf16 %v4049_v29, %v4049_v29  ;;  %v3854_v40 = vadd.f32 %v8545_v53, %v3651_v45  ;;  %v3855_v20 = vadd.f32 %v8545_v53, %v3652_v43  ;;  %v10918_v54 = vld [vmem:[#allocation115_spill] sm:$0xff] }
 0x349   :  { %v8911_v28 = vmax.f32 %v10917_v9, %v10916_v49  ;;  %v8915_v26 = vmax.f32 %v10919_v59, %v10918_v54  ;;  %v3134_v18 = vpop.permute.xlu0 %3133  ;;  %v3136_v3 = vpop.permute.xlu1 %3135  ;;  %v10920_v59 = vld [vmem:[#allocation135_spill] sm:$0xff] }
 0x34a   :  { %5029 = vst.msk [vmem:[%s10126_s3 + $0x100] sm:$0xf] %vm4964_vm1, %v5623_v16  ;;  %5030 = vst.msk [vmem:[%s10126_s3 + $0x104] sm:$0xf] %vm4964_vm1, %v5624_v46  ;;  %v4050_v35 = vmax.f32 %v3854_v40, 0.0  ;;  %v4051_v29 = vmax.f32 %v3855_v20, 0.0  ;;  %v3653_v45 = vmax.f32 %v8210_v42, %v3134_v18  ;;  %v3654_v43 = vmax.f32 %v8214_v47, %v3136_v3 }
 0x34b   :  { %3249 = vrot.lane.b32.xlu0 %v8911_v28, %s6159_s0  ;;  %3251 = vrot.lane.b32.xlu1 %v8915_v26, %s6159_s0  ;;  %v10921_v46 = vld [vmem:[#allocation37_spill] sm:$0xff]  ;;  %v10922_v20 = vld [vmem:[#allocation136_spill] sm:$0xff]  ;;  %v10923_v42 = vld [vmem:[#allocation42_spill] sm:$0xff] }
 0x34c   :  { %v5625_v49 = vpack.c.bf16 %v4050_v35, %v4050_v35  ;;  %v5626_v9 = vpack.c.bf16 %v4051_v29, %v4051_v29  ;;  %v3856_v16 = vadd.f32 %v8545_v53, %v3653_v45  ;;  %v3857_v54 = vadd.f32 %v8545_v53, %v3654_v43 }
 0x34d   :  { %v8935_v40 = vmax.f32 %v10921_v46, %v10920_v59  ;;  %v8939_v18 = vmax.f32 %v10923_v42, %v10922_v20  ;;  %v3138_v47 = vpop.permute.xlu0 %3137  ;;  %v3140_v3 = vpop.permute.xlu1 %3139  ;;  %v10924_v42 = vld [vmem:[#allocation128_spill] sm:$0xff] }
 0x34e   :  { %5031 = vst.msk [vmem:[%s10126_s3 + $0x108] sm:$0xf] %vm4964_vm1, %v5625_v49  ;;  %5032 = vst.msk [vmem:[%s10126_s3 + $0x10c] sm:$0xf] %vm4964_vm1, %v5626_v9  ;;  %v4052_v35 = vmax.f32 %v3856_v16, 0.0  ;;  %v4053_v29 = vmax.f32 %v3857_v54, 0.0  ;;  %v3655_v45 = vmax.f32 %v8234_v30, %v3138_v47  ;;  %v3656_v43 = vmax.f32 %v8238_v25, %v3140_v3 }
 0x34f   :  { %3253 = vrot.lane.b32.xlu0 %v8935_v40, %s6159_s0  ;;  %3255 = vrot.lane.b32.xlu1 %v8939_v18, %s6159_s0  ;;  %v10925_v9 = vld [vmem:[#allocation35_spill] sm:$0xff]  ;;  %v10926_v54 = vld [vmem:[#allocation129_spill] sm:$0xff] }
 0x350   :  { %v5627_v59 = vpack.c.bf16 %v4052_v35, %v4052_v35  ;;  %v5628_v46 = vpack.c.bf16 %v4053_v29, %v4053_v29  ;;  %v3858_v49 = vadd.f32 %v8545_v53, %v3655_v45  ;;  %v3859_v20 = vadd.f32 %v8545_v53, %v3656_v43  ;;  %v10927_v30 = vld [vmem:[#allocation39_spill] sm:$0xff] }
 0x351   :  { %v8959_v16 = vmax.f32 %v10925_v9, %v10924_v42  ;;  %v8963_v47 = vmax.f32 %v10927_v30, %v10926_v54  ;;  %v3142_v25 = vpop.permute.xlu0 %3141  ;;  %v3144_v3 = vpop.permute.xlu1 %3143  ;;  %v10928_v30 = vld [vmem:[#allocation151_spill] sm:$0xff] }
 0x352   :  { %5033 = vst.msk [vmem:[%s10126_s3 + $0x110] sm:$0xf] %vm4964_vm1, %v5627_v59  ;;  %5034 = vst.msk [vmem:[%s10126_s3 + $0x114] sm:$0xf] %vm4964_vm1, %v5628_v46  ;;  %v4054_v35 = vmax.f32 %v3858_v49, 0.0  ;;  %v4055_v29 = vmax.f32 %v3859_v20, 0.0  ;;  %v3657_v45 = vmax.f32 %v8258_v2, %v3142_v25  ;;  %v3658_v43 = vmax.f32 %v8262_v21, %v3144_v3 }
 0x353   :  { %3257 = vrot.lane.b32.xlu0 %v8959_v16, %s6159_s0  ;;  %3259 = vrot.lane.b32.xlu1 %v8963_v47, %s6159_s0  ;;  %v10929_v46 = vld [vmem:[#allocation49_spill] sm:$0xff]  ;;  %v10930_v20 = vld [vmem:[#allocation152_spill] sm:$0xff]  ;;  %v10931_v2 = vld [vmem:[#allocation55_spill] sm:$0xff] }
 0x354   :  { %v5629_v42 = vpack.c.bf16 %v4054_v35, %v4054_v35  ;;  %v5630_v9 = vpack.c.bf16 %v4055_v29, %v4055_v29  ;;  %v3860_v59 = vadd.f32 %v8545_v53, %v3657_v45  ;;  %v3861_v54 = vadd.f32 %v8545_v53, %v3658_v43 }
 0x355   :  { %v8983_v49 = vmax.f32 %v10929_v46, %v10928_v30  ;;  %v8987_v25 = vmax.f32 %v10931_v2, %v10930_v20  ;;  %v3146_v21 = vpop.permute.xlu0 %3145  ;;  %v3148_v3 = vpop.permute.xlu1 %3147  ;;  %v10932_v2 = vld [vmem:[#allocation143_spill] sm:$0xff] }
 0x356   :  { %5035 = vst.msk [vmem:[%s10126_s3 + $0x118] sm:$0xf] %vm4964_vm1, %v5629_v42  ;;  %5036 = vst.msk [vmem:[%s10126_s3 + $0x11c] sm:$0xf] %vm4964_vm1, %v5630_v9  ;;  %v4056_v35 = vmax.f32 %v3860_v59, 0.0  ;;  %v4057_v29 = vmax.f32 %v3861_v54, 0.0  ;;  %v3659_v45 = vmax.f32 %v8282_v8, %v3146_v21  ;;  %v3660_v43 = vmax.f32 %v8286_v24, %v3148_v3 }
 0x357   :  { %3261 = vrot.lane.b32.xlu0 %v8983_v49, %s6159_s0  ;;  %3263 = vrot.lane.b32.xlu1 %v8987_v25, %s6159_s0  ;;  %v10933_v9 = vld [vmem:[#allocation46_spill] sm:$0xff]  ;;  %v10934_v54 = vld [vmem:[#allocation144_spill] sm:$0xff] }
 0x358   :  { %v5631_v30 = vpack.c.bf16 %v4056_v35, %v4056_v35  ;;  %v5632_v46 = vpack.c.bf16 %v4057_v29, %v4057_v29  ;;  %v3862_v42 = vadd.f32 %v8545_v53, %v3659_v45  ;;  %v3863_v20 = vadd.f32 %v8545_v53, %v3660_v43  ;;  %v10935_v8 = vld [vmem:[#allocation50_spill] sm:$0xff] }
 0x359   :  { %v9007_v59 = vmax.f32 %v10933_v9, %v10932_v2  ;;  %v9011_v21 = vmax.f32 %v10935_v8, %v10934_v54  ;;  %v3150_v24 = vpop.permute.xlu0 %3149  ;;  %v3152_v3 = vpop.permute.xlu1 %3151  ;;  %v10936_v8 = vld [vmem:[#allocation167_spill] sm:$0xff] }
 0x35a   :  { %5037 = vst.msk [vmem:[%s10126_s3 + $0x120] sm:$0xf] %vm4964_vm1, %v5631_v30  ;;  %5038 = vst.msk [vmem:[%s10126_s3 + $0x124] sm:$0xf] %vm4964_vm1, %v5632_v46  ;;  %v4058_v35 = vmax.f32 %v3862_v42, 0.0  ;;  %v4059_v29 = vmax.f32 %v3863_v20, 0.0  ;;  %v3661_v45 = vmax.f32 %v8306_v41, %v3150_v24  ;;  %v3662_v43 = vmax.f32 %v8310_v44, %v3152_v3 }
 0x35b   :  { %3265 = vrot.lane.b32.xlu0 %v9007_v59, %s6159_s0  ;;  %3267 = vrot.lane.b32.xlu1 %v9011_v21, %s6159_s0  ;;  %v10937_v46 = vld [vmem:[#allocation61_spill] sm:$0xff]  ;;  %v10938_v20 = vld [vmem:[#allocation168_spill] sm:$0xff]  ;;  %v10939_v41 = vld [vmem:[#allocation67_spill] sm:$0xff] }
 0x35c   :  { %v5633_v2 = vpack.c.bf16 %v4058_v35, %v4058_v35  ;;  %v5634_v9 = vpack.c.bf16 %v4059_v29, %v4059_v29  ;;  %v3864_v30 = vadd.f32 %v8545_v53, %v3661_v45  ;;  %v3865_v54 = vadd.f32 %v8545_v53, %v3662_v43 }
 0x35d   :  { %v9031_v42 = vmax.f32 %v10937_v46, %v10936_v8  ;;  %v9035_v24 = vmax.f32 %v10939_v41, %v10938_v20  ;;  %v3154_v44 = vpop.permute.xlu0 %3153  ;;  %v3156_v3 = vpop.permute.xlu1 %3155  ;;  %v10940_v41 = vld [vmem:[#allocation159_spill] sm:$0xff] }
 0x35e   :  { %5039 = vst.msk [vmem:[%s10126_s3 + $0x128] sm:$0xf] %vm4964_vm1, %v5633_v2  ;;  %5040 = vst.msk [vmem:[%s10126_s3 + $0x12c] sm:$0xf] %vm4964_vm1, %v5634_v9  ;;  %v4060_v35 = vmax.f32 %v3864_v30, 0.0  ;;  %v4061_v29 = vmax.f32 %v3865_v54, 0.0  ;;  %v3663_v45 = vmax.f32 %v8330_v10, %v3154_v44  ;;  %v3664_v43 = vmax.f32 %v8334_v11, %v3156_v3 }
 0x35f   :  { %3269 = vrot.lane.b32.xlu0 %v9031_v42, %s6159_s0  ;;  %3271 = vrot.lane.b32.xlu1 %v9035_v24, %s6159_s0  ;;  %v10941_v9 = vld [vmem:[#allocation57_spill] sm:$0xff]  ;;  %v10942_v54 = vld [vmem:[#allocation160_spill] sm:$0xff]  ;;  %v10943_v10 = vld [vmem:[#allocation62_spill] sm:$0xff] }
 0x360   :  { %v5635_v8 = vpack.c.bf16 %v4060_v35, %v4060_v35  ;;  %v5636_v46 = vpack.c.bf16 %v4061_v29, %v4061_v29  ;;  %v3866_v2 = vadd.f32 %v8545_v53, %v3663_v45  ;;  %v3867_v20 = vadd.f32 %v8545_v53, %v3664_v43 }
 0x361   :  { %v9055_v30 = vmax.f32 %v10941_v9, %v10940_v41  ;;  %v9059_v44 = vmax.f32 %v10943_v10, %v10942_v54  ;;  %v3158_v11 = vpop.permute.xlu0 %3157  ;;  %v3160_v3 = vpop.permute.xlu1 %3159  ;;  %v10944_v10 = vld [vmem:[#allocation183_spill] sm:$0xff] }
 0x362   :  { %5041 = vst.msk [vmem:[%s10126_s3 + $0x130] sm:$0xf] %vm4964_vm1, %v5635_v8  ;;  %5042 = vst.msk [vmem:[%s10126_s3 + $0x134] sm:$0xf] %vm4964_vm1, %v5636_v46  ;;  %v4062_v35 = vmax.f32 %v3866_v2, 0.0  ;;  %v4063_v29 = vmax.f32 %v3867_v20, 0.0  ;;  %v3665_v45 = vmax.f32 %v8354_v37, %v3158_v11  ;;  %v3666_v43 = vmax.f32 %v8358_v33, %v3160_v3 }
 0x363   :  { %3273 = vrot.lane.b32.xlu0 %v9055_v30, %s6159_s0  ;;  %3275 = vrot.lane.b32.xlu1 %v9059_v44, %s6159_s0  ;;  %v10945_v46 = vld [vmem:[#allocation73_spill] sm:$0xff]  ;;  %v10946_v20 = vld [vmem:[#allocation184_spill] sm:$0xff]  ;;  %v10947_v37 = vld [vmem:[#allocation79_spill] sm:$0xff] }
 0x364   :  { %v5637_v41 = vpack.c.bf16 %v4062_v35, %v4062_v35  ;;  %v5638_v9 = vpack.c.bf16 %v4063_v29, %v4063_v29  ;;  %v3868_v8 = vadd.f32 %v8545_v53, %v3665_v45  ;;  %v3869_v54 = vadd.f32 %v8545_v53, %v3666_v43 }
 0x365   :  { %v9079_v2 = vmax.f32 %v10945_v46, %v10944_v10  ;;  %v9083_v11 = vmax.f32 %v10947_v37, %v10946_v20  ;;  %v3162_v33 = vpop.permute.xlu0 %3161  ;;  %v3164_v3 = vpop.permute.xlu1 %3163  ;;  %v10948_v37 = vld [vmem:[#allocation175_spill] sm:$0xff] }
 0x366   :  { %5043 = vst.msk [vmem:[%s10126_s3 + $0x138] sm:$0xf] %vm4964_vm1, %v5637_v41  ;;  %5044 = vst.msk [vmem:[%s10126_s3 + $0x13c] sm:$0xf] %vm4964_vm1, %v5638_v9  ;;  %v4064_v35 = vmax.f32 %v3868_v8, 0.0  ;;  %v4065_v29 = vmax.f32 %v3869_v54, 0.0  ;;  %v3667_v45 = vmax.f32 %v8378_v0, %v3162_v33  ;;  %v3668_v43 = vmax.f32 %v8382_v58, %v3164_v3 }
 0x367   :  { %3277 = vrot.lane.b32.xlu0 %v9079_v2, %s6159_s0  ;;  %3279 = vrot.lane.b32.xlu1 %v9083_v11, %s6159_s0  ;;  %v10949_v9 = vld [vmem:[#allocation69_spill] sm:$0xff]  ;;  %v10950_v54 = vld [vmem:[#allocation176_spill] sm:$0xff]  ;;  %v10951_v0 = vld [vmem:[#allocation74_spill] sm:$0xff] }
 0x368   :  { %v5639_v10 = vpack.c.bf16 %v4064_v35, %v4064_v35  ;;  %v5640_v46 = vpack.c.bf16 %v4065_v29, %v4065_v29  ;;  %v3870_v41 = vadd.f32 %v8545_v53, %v3667_v45  ;;  %v3871_v20 = vadd.f32 %v8545_v53, %v3668_v43 }
 0x369   :  { %v9103_v8 = vmax.f32 %v10949_v9, %v10948_v37  ;;  %v9107_v33 = vmax.f32 %v10951_v0, %v10950_v54  ;;  %v3166_v58 = vpop.permute.xlu0 %3165  ;;  %v3168_v3 = vpop.permute.xlu1 %3167  ;;  %v10952_v0 = vld [vmem:[#allocation199_spill] sm:$0xff] }
 0x36a   :  { %5045 = vst.msk [vmem:[%s10126_s3 + $0x140] sm:$0xf] %vm4964_vm1, %v5639_v10  ;;  %5046 = vst.msk [vmem:[%s10126_s3 + $0x144] sm:$0xf] %vm4964_vm1, %v5640_v46  ;;  %v4066_v35 = vmax.f32 %v3870_v41, 0.0  ;;  %v4067_v29 = vmax.f32 %v3871_v20, 0.0  ;;  %v3669_v45 = vmax.f32 %v8402_v34, %v3166_v58  ;;  %v3670_v43 = vmax.f32 %v8406_v38, %v3168_v3 }
 0x36b   :  { %3281 = vrot.lane.b32.xlu0 %v9103_v8, %s6159_s0  ;;  %3283 = vrot.lane.b32.xlu1 %v9107_v33, %s6159_s0  ;;  %v10953_v46 = vld [vmem:[#allocation85_spill] sm:$0xff]  ;;  %v10954_v20 = vld [vmem:[#allocation200_spill] sm:$0xff]  ;;  %v10955_v34 = vld [vmem:[#allocation91_spill] sm:$0xff] }
 0x36c   :  { %v5641_v37 = vpack.c.bf16 %v4066_v35, %v4066_v35  ;;  %v5642_v9 = vpack.c.bf16 %v4067_v29, %v4067_v29  ;;  %v3872_v10 = vadd.f32 %v8545_v53, %v3669_v45  ;;  %v3873_v54 = vadd.f32 %v8545_v53, %v3670_v43 }
 0x36d   :  { %v9127_v41 = vmax.f32 %v10953_v46, %v10952_v0  ;;  %v9131_v58 = vmax.f32 %v10955_v34, %v10954_v20  ;;  %v3170_v38 = vpop.permute.xlu0 %3169  ;;  %v3172_v3 = vpop.permute.xlu1 %3171  ;;  %v10956_v34 = vld [vmem:[#allocation191_spill] sm:$0xff] }
 0x36e   :  { %5047 = vst.msk [vmem:[%s10126_s3 + $0x148] sm:$0xf] %vm4964_vm1, %v5641_v37  ;;  %5048 = vst.msk [vmem:[%s10126_s3 + $0x14c] sm:$0xf] %vm4964_vm1, %v5642_v9  ;;  %v4068_v35 = vmax.f32 %v3872_v10, 0.0  ;;  %v4069_v29 = vmax.f32 %v3873_v54, 0.0  ;;  %v3671_v45 = vmax.f32 %v8426_v32, %v3170_v38  ;;  %v3672_v43 = vmax.f32 %v8430_v48, %v3172_v3 }
 0x36f   :  { %3285 = vrot.lane.b32.xlu0 %v9127_v41, %s6159_s0  ;;  %3287 = vrot.lane.b32.xlu1 %v9131_v58, %s6159_s0  ;;  %v10957_v9 = vld [vmem:[#allocation81_spill] sm:$0xff]  ;;  %v10958_v54 = vld [vmem:[#allocation192_spill] sm:$0xff]  ;;  %v10959_v32 = vld [vmem:[#allocation86_spill] sm:$0xff] }
 0x370   :  { %v5643_v0 = vpack.c.bf16 %v4068_v35, %v4068_v35  ;;  %v5644_v46 = vpack.c.bf16 %v4069_v29, %v4069_v29  ;;  %v3874_v37 = vadd.f32 %v8545_v53, %v3671_v45  ;;  %v3875_v20 = vadd.f32 %v8545_v53, %v3672_v43 }
 0x371   :  { %v9151_v10 = vmax.f32 %v10957_v9, %v10956_v34  ;;  %v9155_v38 = vmax.f32 %v10959_v32, %v10958_v54  ;;  %v3174_v48 = vpop.permute.xlu0 %3173  ;;  %v3176_v3 = vpop.permute.xlu1 %3175  ;;  %v10960_v32 = vld [vmem:[#allocation215_spill] sm:$0xff] }
 0x372   :  { %5049 = vst.msk [vmem:[%s10126_s3 + $0x150] sm:$0xf] %vm4964_vm1, %v5643_v0  ;;  %5050 = vst.msk [vmem:[%s10126_s3 + $0x154] sm:$0xf] %vm4964_vm1, %v5644_v46  ;;  %v4070_v35 = vmax.f32 %v3874_v37, 0.0  ;;  %v4071_v29 = vmax.f32 %v3875_v20, 0.0  ;;  %v3673_v45 = vmax.f32 %v8450_v5, %v3174_v48  ;;  %v3674_v43 = vmax.f32 %v8454_v36, %v3176_v3 }
 0x373   :  { %3289 = vrot.lane.b32.xlu0 %v9151_v10, %s6159_s0  ;;  %3291 = vrot.lane.b32.xlu1 %v9155_v38, %s6159_s0  ;;  %v10961_v46 = vld [vmem:[#allocation97_spill] sm:$0xff]  ;;  %v10962_v20 = vld [vmem:[#allocation216_spill] sm:$0xff]  ;;  %v10963_v5 = vld [vmem:[#allocation103_spill] sm:$0xff] }
 0x374   :  { %v5645_v34 = vpack.c.bf16 %v4070_v35, %v4070_v35  ;;  %v5646_v9 = vpack.c.bf16 %v4071_v29, %v4071_v29  ;;  %v3876_v0 = vadd.f32 %v8545_v53, %v3673_v45  ;;  %v3877_v54 = vadd.f32 %v8545_v53, %v3674_v43 }
 0x375   :  { %v9175_v37 = vmax.f32 %v10961_v46, %v10960_v32  ;;  %v9179_v48 = vmax.f32 %v10963_v5, %v10962_v20  ;;  %v3178_v36 = vpop.permute.xlu0 %3177  ;;  %v3180_v3 = vpop.permute.xlu1 %3179  ;;  %v10964_v5 = vld [vmem:[#allocation207_spill] sm:$0xff] }
 0x376   :  { %5051 = vst.msk [vmem:[%s10126_s3 + $0x158] sm:$0xf] %vm4964_vm1, %v5645_v34  ;;  %5052 = vst.msk [vmem:[%s10126_s3 + $0x15c] sm:$0xf] %vm4964_vm1, %v5646_v9  ;;  %v4072_v35 = vmax.f32 %v3876_v0, 0.0  ;;  %v4073_v29 = vmax.f32 %v3877_v54, 0.0  ;;  %v3675_v45 = vmax.f32 %v8474_v50, %v3178_v36  ;;  %v3676_v43 = vmax.f32 %v8478_v62, %v3180_v3 }
 0x377   :  { %3293 = vrot.lane.b32.xlu0 %v9175_v37, %s6159_s0  ;;  %3295 = vrot.lane.b32.xlu1 %v9179_v48, %s6159_s0  ;;  %v10965_v9 = vld [vmem:[#allocation93_spill] sm:$0xff]  ;;  %v10966_v54 = vld [vmem:[#allocation208_spill] sm:$0xff]  ;;  %v10967_v50 = vld [vmem:[#allocation98_spill] sm:$0xff] }
 0x378   :  { %v5647_v32 = vpack.c.bf16 %v4072_v35, %v4072_v35  ;;  %v5648_v46 = vpack.c.bf16 %v4073_v29, %v4073_v29  ;;  %v3878_v34 = vadd.f32 %v8545_v53, %v3675_v45  ;;  %v3879_v20 = vadd.f32 %v8545_v53, %v3676_v43 }
 0x379   :  { %v9199_v0 = vmax.f32 %v10965_v9, %v10964_v5  ;;  %v9203_v36 = vmax.f32 %v10967_v50, %v10966_v54  ;;  %v3182_v62 = vpop.permute.xlu0 %3181  ;;  %v3184_v3 = vpop.permute.xlu1 %3183  ;;  %v10968_v50 = vld [vmem:[#allocation231_spill] sm:$0xff] }
 0x37a   :  { %5053 = vst.msk [vmem:[%s10126_s3 + $0x160] sm:$0xf] %vm4964_vm1, %v5647_v32  ;;  %5054 = vst.msk [vmem:[%s10126_s3 + $0x164] sm:$0xf] %vm4964_vm1, %v5648_v46  ;;  %v4074_v35 = vmax.f32 %v3878_v34, 0.0  ;;  %v4075_v29 = vmax.f32 %v3879_v20, 0.0  ;;  %v3677_v45 = vmax.f32 %v8498_v17, %v3182_v62  ;;  %v3678_v43 = vmax.f32 %v8502_v61, %v3184_v3 }
 0x37b   :  { %3297 = vrot.lane.b32.xlu0 %v9199_v0, %s6159_s0  ;;  %3299 = vrot.lane.b32.xlu1 %v9203_v36, %s6159_s0  ;;  %v10969_v46 = vld [vmem:[#allocation109_spill] sm:$0xff]  ;;  %v10970_v20 = vld [vmem:[#allocation232_spill] sm:$0xff] }
 0x37c   :  { %v5649_v5 = vpack.c.bf16 %v4074_v35, %v4074_v35  ;;  %v5650_v9 = vpack.c.bf16 %v4075_v29, %v4075_v29  ;;  %v3880_v32 = vadd.f32 %v8545_v53, %v3677_v45  ;;  %v3881_v54 = vadd.f32 %v8545_v53, %v3678_v43  ;;  %v10971_v17 = vld [vmem:[#allocation117_spill] sm:$0xff] }
 0x37d   :  { %v9223_v34 = vmax.f32 %v10969_v46, %v10968_v50  ;;  %v9227_v62 = vmax.f32 %v10971_v17, %v10970_v20  ;;  %v3186_v61 = vpop.permute.xlu0 %3185  ;;  %v3188_v3 = vpop.permute.xlu1 %3187  ;;  %v10972_v17 = vld [vmem:[#allocation223_spill] sm:$0xff] }
 0x37e   :  { %5055 = vst.msk [vmem:[%s10126_s3 + $0x168] sm:$0xf] %vm4964_vm1, %v5649_v5  ;;  %5056 = vst.msk [vmem:[%s10126_s3 + $0x16c] sm:$0xf] %vm4964_vm1, %v5650_v9  ;;  %v4076_v35 = vmax.f32 %v3880_v32, 0.0  ;;  %v4077_v29 = vmax.f32 %v3881_v54, 0.0  ;;  %v3679_v45 = vmax.f32 %v8522_v1, %v3186_v61  ;;  %v3680_v43 = vmax.f32 %v8526_v19, %v3188_v3 }
 0x37f   :  { %3301 = vrot.lane.b32.xlu0 %v9223_v34, %s6159_s0  ;;  %3303 = vrot.lane.b32.xlu1 %v9227_v62, %s6159_s0  ;;  %v10973_v9 = vld [vmem:[#allocation105_spill] sm:$0xff]  ;;  %v10974_v54 = vld [vmem:[#allocation224_spill] sm:$0xff] }
 0x380   :  { %v5651_v50 = vpack.c.bf16 %v4076_v35, %v4076_v35  ;;  %v5652_v46 = vpack.c.bf16 %v4077_v29, %v4077_v29  ;;  %v3882_v5 = vadd.f32 %v8545_v53, %v3679_v45  ;;  %v3883_v20 = vadd.f32 %v8545_v53, %v3680_v43  ;;  %v10975_v1 = vld [vmem:[#allocation112_spill] sm:$0xff] }
 0x381   :  { %v9247_v32 = vmax.f32 %v10973_v9, %v10972_v17  ;;  %v9251_v61 = vmax.f32 %v10975_v1, %v10974_v54  ;;  %v3190_v19 = vpop.permute.xlu0 %3189  ;;  %v3192_v3 = vpop.permute.xlu1 %3191  ;;  %v10976_v1 = vld [vmem:[#allocation247_spill] sm:$0xff] }
 0x382   :  { %5057 = vst.msk [vmem:[%s10126_s3 + $0x170] sm:$0xf] %vm4964_vm1, %v5651_v50  ;;  %5058 = vst.msk [vmem:[%s10126_s3 + $0x174] sm:$0xf] %vm4964_vm1, %v5652_v46  ;;  %v4078_v35 = vmax.f32 %v3882_v5, 0.0  ;;  %v4079_v29 = vmax.f32 %v3883_v20, 0.0  ;;  %v3681_v45 = vmax.f32 %v8551_v31, %v3190_v19  ;;  %v3682_v43 = vmax.f32 %v8555_v4, %v3192_v3 }
 0x383   :  { %3305 = vrot.lane.b32.xlu0 %v9247_v32, %s6159_s0  ;;  %3307 = vrot.lane.b32.xlu1 %v9251_v61, %s6159_s0  ;;  %v10977_v46 = vld [vmem:[#allocation124_spill] sm:$0xff]  ;;  %v10979_v31 = vld [vmem:[#allocation133_spill] sm:$0xff] }
 0x384   :  { %v5653_v17 = vpack.c.bf16 %v4078_v35, %v4078_v35  ;;  %v5654_v9 = vpack.c.bf16 %v4079_v29, %v4079_v29  ;;  %v3884_v50 = vadd.f32 %v8545_v53, %v3681_v45  ;;  %v3885_v54 = vadd.f32 %v8545_v53, %v3682_v43  ;;  %v10978_v20 = vld [vmem:[#allocation248_spill] sm:$0xff] }
 0x385   :  { %v9271_v5 = vmax.f32 %v10977_v46, %v10976_v1  ;;  %v9275_v19 = vmax.f32 %v10979_v31, %v10978_v20  ;;  %v3194_v4 = vpop.permute.xlu0 %3193  ;;  %v3196_v3 = vpop.permute.xlu1 %3195  ;;  %v10980_v31 = vld [vmem:[#allocation239_spill] sm:$0xff] }
 0x386   :  { %5059 = vst.msk [vmem:[%s10126_s3 + $0x178] sm:$0xf] %vm4964_vm1, %v5653_v17  ;;  %5060 = vst.msk [vmem:[%s10126_s3 + $0x17c] sm:$0xf] %vm4964_vm1, %v5654_v9  ;;  %v4080_v35 = vmax.f32 %v3884_v50, 0.0  ;;  %v4081_v29 = vmax.f32 %v3885_v54, 0.0  ;;  %v3683_v45 = vmax.f32 %v8575_v7, %v3194_v4  ;;  %v3684_v43 = vmax.f32 %v8579_v27, %v3196_v3 }
 0x387   :  { %3309 = vrot.lane.b32.xlu0 %v9271_v5, %s6159_s0  ;;  %3311 = vrot.lane.b32.xlu1 %v9275_v19, %s6159_s0  ;;  %v10981_v9 = vld [vmem:[#allocation120_spill] sm:$0xff]  ;;  %v10983_v7 = vld [vmem:[#allocation127_spill] sm:$0xff] }
 0x388   :  { %v5655_v1 = vpack.c.bf16 %v4080_v35, %v4080_v35  ;;  %v5656_v46 = vpack.c.bf16 %v4081_v29, %v4081_v29  ;;  %v3886_v17 = vadd.f32 %v8545_v53, %v3683_v45  ;;  %v3887_v20 = vadd.f32 %v8545_v53, %v3684_v43  ;;  %v10982_v54 = vld [vmem:[#allocation240_spill] sm:$0xff] }
 0x389   :  { %v9295_v50 = vmax.f32 %v10981_v9, %v10980_v31  ;;  %v9299_v4 = vmax.f32 %v10983_v7, %v10982_v54  ;;  %v3198_v27 = vpop.permute.xlu0 %3197  ;;  %v3200_v3 = vpop.permute.xlu1 %3199  ;;  %v10987_v9 = vld [vmem:[#allocation262_spill] sm:$0xff] }
 0x38a   :  { %5061 = vst.msk [vmem:[%s10126_s3 + $0x180] sm:$0xf] %vm4964_vm1, %v5655_v1  ;;  %5062 = vst.msk [vmem:[%s10126_s3 + $0x184] sm:$0xf] %vm4964_vm1, %v5656_v46  ;;  %v4082_v53 = vmax.f32 %v3886_v17, 0.0  ;;  %v4083_v35 = vmax.f32 %v3887_v20, 0.0  ;;  %v3685_v29 = vmax.f32 %v8599_v52, %v3198_v27  ;;  %v3686_v45 = vmax.f32 %v8603_v60, %v3200_v3 }
 0x38b   :  { %3313 = vrot.lane.b32.xlu0 %v9295_v50, %s6159_s0  ;;  %3315 = vrot.lane.b32.xlu1 %v9299_v4, %s6159_s0  ;;  %v9318_v1 = vld [vmem:[%s10125_s2] ss:$0 sm:$0xff]  ;;  %v10984_v52 = vld [vmem:[#allocation261_spill] sm:$0xff]  ;;  %v10985_v20 = vld [vmem:[#allocation142_spill] sm:$0xff] }
 0x38c   :  { %v5657_v43 = vpack.c.bf16 %v4082_v53, %v4082_v53  ;;  %v5658_v31 = vpack.c.bf16 %v4083_v35, %v4083_v35  ;;  %v3888_v46 = vadd.f32 %v9318_v1, %v3685_v29  ;;  %v3889_v17 = vadd.f32 %v9318_v1, %v3686_v45  ;;  %v10988_v54 = vld [vmem:[#allocation150_spill] sm:$0xff] }
 0x38d   :  { %v9324_v60 = vmax.f32 %v10985_v20, %v10984_v52  ;;  %v9328_v7 = vmax.f32 %v10988_v54, %v10987_v9  ;;  %v3202_v27 = vpop.permute.xlu0 %3201  ;;  %v3204_v3 = vpop.permute.xlu1 %3203  ;;  %v10990_v54 = vld [vmem:[#allocation255_spill] sm:$0xff] }
 0x38e   :  { %5063 = vst.msk [vmem:[%s10126_s3 + $0x188] sm:$0xf] %vm4964_vm1, %v5657_v43  ;;  %5064 = vst.msk [vmem:[%s10126_s3 + $0x18c] sm:$0xf] %vm4964_vm1, %v5658_v31  ;;  %v4084_v53 = vmax.f32 %v3888_v46, 0.0  ;;  %v4085_v35 = vmax.f32 %v3889_v17, 0.0  ;;  %v3687_v29 = vmax.f32 %v8623_v15, %v3202_v27  ;;  %v3688_v45 = vmax.f32 %v8627_v22, %v3204_v3 }
 0x38f   :  { %10986 = vst [vmem:[#allocation146_spill] sm:$0xff] %v9324_v60  ;;  %10989 = vst [vmem:[#allocation134_spill] sm:$0xff] %v9328_v7  ;;  %3317 = vrot.lane.b32.xlu0 %v9324_v60, %s6159_s0  ;;  %3319 = vrot.lane.b32.xlu1 %v9328_v7, %s6159_s0  ;;  %v10991_v31 = vld [vmem:[#allocation138_spill] sm:$0xff]  ;;  %v10993_v17 = vld [vmem:[#allocation256_spill] sm:$0xff] }
 0x390   :  { %v5659_v52 = vpack.c.bf16 %v4084_v53, %v4084_v53  ;;  %v5660_v20 = vpack.c.bf16 %v4085_v35, %v4085_v35  ;;  %v3890_v43 = vadd.f32 %v9318_v1, %v3687_v29  ;;  %v3891_v9 = vadd.f32 %v9318_v1, %v3688_v45  ;;  %v10994_v15 = vld [vmem:[#allocation145_spill] sm:$0xff]  ;;  %v10996_v29 = vld [vmem:[#allocation220_spill] sm:$0xff]  ;;  %v10998_v60 = vld [vmem:[#allocation271_spill] sm:$0xff] }
 0x391   :  { %v9348_v46 = vmax.f32 %v10991_v31, %v10990_v54  ;;  %v9352_v27 = vmax.f32 %v10994_v15, %v10993_v17  ;;  %v3206_v22 = vpop.permute.xlu0 %3205  ;;  %v3208_v3 = vpop.permute.xlu1 %3207  ;;  %v10997_v54 = vld [vmem:[#allocation108_spill] sm:$0xff] }
 0x392   :  { %5065 = vst.msk [vmem:[%s10126_s3 + $0x190] sm:$0xf] %vm4964_vm1, %v5659_v52  ;;  %5066 = vst.msk [vmem:[%s10126_s3 + $0x194] sm:$0xf] %vm4964_vm1, %v5660_v20  ;;  %v4086_v53 = vmax.f32 %v3890_v43, 0.0  ;;  %v4087_v35 = vmax.f32 %v3891_v9, 0.0  ;;  %v3689_v45 = vmax.f32 %v10996_v29, %v3206_v22  ;;  %v3690_v31 = vmax.f32 %v10997_v54, %v3208_v3 }
 0x393   :  { %10992 = vst [vmem:[#allocation141_spill] sm:$0xff] %v9348_v46  ;;  %10995 = vst [vmem:[#allocation153_spill] sm:$0xff] %v9352_v27  ;;  %3321 = vrot.lane.b32.xlu0 %v9348_v46, %s6159_s0  ;;  %3323 = vrot.lane.b32.xlu1 %v9352_v27, %s6159_s0  ;;  %v10999_v20 = vld [vmem:[#allocation158_spill] sm:$0xff]  ;;  %v11001_v9 = vld [vmem:[#allocation272_spill] sm:$0xff] }
 0x394   :  { %v5661_v17 = vpack.c.bf16 %v4086_v53, %v4086_v53  ;;  %v5662_v15 = vpack.c.bf16 %v4087_v35, %v4087_v35  ;;  %v3892_v52 = vadd.f32 %v9318_v1, %v3689_v45  ;;  %v3893_v7 = vadd.f32 %v9318_v1, %v3690_v31  ;;  %v11002_v22 = vld [vmem:[#allocation166_spill] sm:$0xff]  ;;  %v11005_v31 = vld [vmem:[#allocation119_spill] sm:$0xff] }
 0x395   :  { %v9372_v43 = vmax.f32 %v10999_v20, %v10998_v60  ;;  %v9376_v29 = vmax.f32 %v11002_v22, %v11001_v9  ;;  %v3210_v3 = vpop.permute.xlu0 %3209  ;;  %v3212_v54 = vpop.permute.xlu1 %3211  ;;  %v11004_v60 = vld [vmem:[#allocation243_spill] sm:$0xff]  ;;  %v11006_v46 = vld [vmem:[#allocation266_spill] sm:$0xff] }
 0x396   :  { %5067 = vst.msk [vmem:[%s10126_s3 + $0x198] sm:$0xf] %vm4964_vm1, %v5661_v17  ;;  %5068 = vst.msk [vmem:[%s10126_s3 + $0x19c] sm:$0xf] %vm4964_vm1, %v5662_v15  ;;  %v4088_v53 = vmax.f32 %v3892_v52, 0.0  ;;  %v4089_v35 = vmax.f32 %v3893_v7, 0.0  ;;  %v3691_v45 = vmax.f32 %v11004_v60, %v3210_v3  ;;  %v3692_v20 = vmax.f32 %v11005_v31, %v3212_v54 }
 0x397   :  { %11000 = vst [vmem:[#allocation162_spill] sm:$0xff] %v9372_v43  ;;  %11003 = vst [vmem:[#allocation149_spill] sm:$0xff] %v9376_v29  ;;  %3325 = vrot.lane.b32.xlu0 %v9372_v43, %s6159_s0  ;;  %3327 = vrot.lane.b32.xlu1 %v9376_v29, %s6159_s0  ;;  %v11007_v15 = vld [vmem:[#allocation154_spill] sm:$0xff]  ;;  %v11009_v7 = vld [vmem:[#allocation267_spill] sm:$0xff] }
 0x398   :  { %v5663_v9 = vpack.c.bf16 %v4088_v53, %v4088_v53  ;;  %v5664_v22 = vpack.c.bf16 %v4089_v35, %v4089_v35  ;;  %v3894_v17 = vadd.f32 %v9318_v1, %v3691_v45  ;;  %v3895_v27 = vadd.f32 %v9318_v1, %v3692_v20  ;;  %v11010_v3 = vld [vmem:[#allocation161_spill] sm:$0xff]  ;;  %v11013_v20 = vld [vmem:[#allocation130_spill] sm:$0xff] }
 0x399   :  { %v9396_v52 = vmax.f32 %v11007_v15, %v11006_v46  ;;  %v9400_v60 = vmax.f32 %v11010_v3, %v11009_v7  ;;  %v3214_v54 = vpop.permute.xlu0 %3213  ;;  %v3216_v31 = vpop.permute.xlu1 %3215  ;;  %v11012_v46 = vld [vmem:[#allocation244_spill] sm:$0xff]  ;;  %v11014_v43 = vld [vmem:[#allocation278_spill] sm:$0xff] }
 0x39a   :  { %5069 = vst.msk [vmem:[%s10126_s3 + $0x1a0] sm:$0xf] %vm4964_vm1, %v5663_v9  ;;  %5070 = vst.msk [vmem:[%s10126_s3 + $0x1a4] sm:$0xf] %vm4964_vm1, %v5664_v22  ;;  %v4090_v53 = vmax.f32 %v3894_v17, 0.0  ;;  %v4091_v35 = vmax.f32 %v3895_v27, 0.0  ;;  %v3693_v45 = vmax.f32 %v11012_v46, %v3214_v54  ;;  %v3694_v15 = vmax.f32 %v11013_v20, %v3216_v31 }
 0x39b   :  { %11008 = vst [vmem:[#allocation157_spill] sm:$0xff] %v9396_v52  ;;  %11011 = vst [vmem:[#allocation169_spill] sm:$0xff] %v9400_v60  ;;  %3329 = vrot.lane.b32.xlu0 %v9396_v52, %s6159_s0  ;;  %3331 = vrot.lane.b32.xlu1 %v9400_v60, %s6159_s0  ;;  %v11015_v22 = vld [vmem:[#allocation174_spill] sm:$0xff]  ;;  %v11016_v27 = vld [vmem:[#allocation279_spill] sm:$0xff] }
 0x39c   :  { %v5665_v7 = vpack.c.bf16 %v4090_v53, %v4090_v53  ;;  %v5666_v3 = vpack.c.bf16 %v4091_v35, %v4091_v35  ;;  %v3896_v9 = vadd.f32 %v9318_v1, %v3693_v45  ;;  %v3897_v29 = vadd.f32 %v9318_v1, %v3694_v15  ;;  %v11017_v54 = vld [vmem:[#allocation182_spill] sm:$0xff]  ;;  %v11020_v15 = vld [vmem:[#allocation116_spill] sm:$0xff]  ;;  %v11021_v52 = vld [vmem:[#allocation275_spill] sm:$0xff] }
 0x39d   :  { %v9420_v17 = vmax.f32 %v11015_v22, %v11014_v43  ;;  %v9424_v46 = vmax.f32 %v11017_v54, %v11016_v27  ;;  %v3218_v31 = vpop.permute.xlu0 %3217  ;;  %v3220_v20 = vpop.permute.xlu1 %3219  ;;  %v11019_v43 = vld [vmem:[#allocation235_spill] sm:$0xff] }
 0x39e   :  { %5071 = vst.msk [vmem:[%s10126_s3 + $0x1a8] sm:$0xf] %vm4964_vm1, %v5665_v7  ;;  %5072 = vst.msk [vmem:[%s10126_s3 + $0x1ac] sm:$0xf] %vm4964_vm1, %v5666_v3  ;;  %v4092_v53 = vmax.f32 %v3896_v9, 0.0  ;;  %v4093_v35 = vmax.f32 %v3897_v29, 0.0  ;;  %v3695_v45 = vmax.f32 %v11019_v43, %v3218_v31  ;;  %v3696_v22 = vmax.f32 %v11020_v15, %v3220_v20 }
 0x39f   :  { %11018 = vst [vmem:[#allocation178_spill] sm:$0xff] %v9424_v46  ;;  %3333 = vrot.lane.b32.xlu0 %v9420_v17, %s6159_s0  ;;  %3335 = vrot.lane.b32.xlu1 %v9424_v46, %s6159_s0  ;;  %v11022_v3 = vld [vmem:[#allocation170_spill] sm:$0xff]  ;;  %v11024_v29 = vld [vmem:[#allocation276_spill] sm:$0xff]  ;;  %v11025_v31 = vld [vmem:[#allocation177_spill] sm:$0xff] }
 0x3a0   :  { %v5667_v27 = vpack.c.bf16 %v4092_v53, %v4092_v53  ;;  %v5668_v54 = vpack.c.bf16 %v4093_v35, %v4093_v35  ;;  %v3898_v7 = vadd.f32 %v9318_v1, %v3695_v45  ;;  %v3899_v60 = vadd.f32 %v9318_v1, %v3696_v22  ;;  %v11027_v45 = vld [vmem:[#allocation236_spill] sm:$0xff]  ;;  %v11028_v46 = vld [vmem:[#allocation282_spill] sm:$0xff] }
 0x3a1   :  { %v9444_v9 = vmax.f32 %v11022_v3, %v11021_v52  ;;  %v9448_v43 = vmax.f32 %v11025_v31, %v11024_v29  ;;  %v3222_v20 = vpop.permute.xlu0 %3221  ;;  %v3224_v15 = vpop.permute.xlu1 %3223 }
 0x3a2   :  { %5073 = vst.msk [vmem:[%s10126_s3 + $0x1b0] sm:$0xf] %vm4964_vm1, %v5667_v27  ;;  %5074 = vst.msk [vmem:[%s10126_s3 + $0x1b4] sm:$0xf] %vm4964_vm1, %v5668_v54  ;;  %v4094_v53 = vmax.f32 %v3898_v7, 0.0  ;;  %v4095_v35 = vmax.f32 %v3899_v60, 0.0  ;;  %v3697_v52 = vmax.f32 %v8743_v57, %v3222_v20  ;;  %v3698_v22 = vmax.f32 %v11027_v45, %v3224_v15 }
 0x3a3   :  { %11023 = vst [vmem:[#allocation165_spill] sm:$0xff] %v9444_v9  ;;  %11026 = vst [vmem:[#allocation173_spill] sm:$0xff] %v9448_v43  ;;  %3337 = vrot.lane.b32.xlu0 %v9444_v9, %s6159_s0  ;;  %3339 = vrot.lane.b32.xlu1 %v9448_v43, %s6159_s0  ;;  %v11029_v54 = vld [vmem:[#allocation190_spill] sm:$0xff]  ;;  %v11030_v60 = vld [vmem:[#allocation283_spill] sm:$0xff] }
 0x3a4   :  { %v5669_v3 = vpack.c.bf16 %v4094_v53, %v4094_v53  ;;  %v5670_v29 = vpack.c.bf16 %v4095_v35, %v4095_v35  ;;  %v3900_v27 = vadd.f32 %v9318_v1, %v3697_v52  ;;  %v3901_v31 = vadd.f32 %v9318_v1, %v3698_v22  ;;  %v11031_v57 = vld [vmem:[#allocation198_spill] sm:$0xff]  ;;  %v11033_v22 = vld [vmem:[#allocation137_spill] sm:$0xff]  ;;  %v11034_v9 = vld [vmem:[#allocation280_spill] sm:$0xff] }
 0x3a5   :  { %v9468_v7 = vmax.f32 %v11029_v54, %v11028_v46  ;;  %v9472_v20 = vmax.f32 %v11031_v57, %v11030_v60  ;;  %v3226_v15 = vpop.permute.xlu0 %3225  ;;  %v3228_v45 = vpop.permute.xlu1 %3227  ;;  %v11032_v46 = vld [vmem:[#allocation123_spill] sm:$0xff] }
 0x3a6   :  { %5075 = vst.msk [vmem:[%s10126_s3 + $0x1b8] sm:$0xf] %vm4964_vm1, %v5669_v3  ;;  %5076 = vst.msk [vmem:[%s10126_s3 + $0x1bc] sm:$0xf] %vm4964_vm1, %v5670_v29  ;;  %v4096_v53 = vmax.f32 %v3900_v27, 0.0  ;;  %v4097_v35 = vmax.f32 %v3901_v31, 0.0  ;;  %v3699_v52 = vmax.f32 %v11032_v46, %v3226_v15  ;;  %v3700_v54 = vmax.f32 %v11033_v22, %v3228_v45 }
 0x3a7   :  { %3341 = vrot.lane.b32.xlu0 %v9468_v7, %s6159_s0  ;;  %3343 = vrot.lane.b32.xlu1 %v9472_v20, %s6159_s0  ;;  %v11035_v29 = vld [vmem:[#allocation186_spill] sm:$0xff]  ;;  %v11036_v31 = vld [vmem:[#allocation281_spill] sm:$0xff] }
 0x3a8   :  { %v5671_v60 = vpack.c.bf16 %v4096_v53, %v4096_v53  ;;  %v5672_v57 = vpack.c.bf16 %v4097_v35, %v4097_v35  ;;  %v3902_v3 = vadd.f32 %v9318_v1, %v3699_v52  ;;  %v3903_v43 = vadd.f32 %v9318_v1, %v3700_v54  ;;  %v11037_v15 = vld [vmem:[#allocation193_spill] sm:$0xff] }
 0x3a9   :  { %v9492_v27 = vmax.f32 %v11035_v29, %v11034_v9  ;;  %v9496_v46 = vmax.f32 %v11037_v15, %v11036_v31  ;;  %v3230_v45 = vpop.permute.xlu0 %3229  ;;  %v3232_v22 = vpop.permute.xlu1 %3231  ;;  %v11038_v15 = vld [vmem:[#allocation286_spill] sm:$0xff] }
 0x3aa   :  { %5077 = vst.msk [vmem:[%s10126_s3 + $0x1c0] sm:$0xf] %vm4964_vm1, %v5671_v60  ;;  %5078 = vst.msk [vmem:[%s10126_s3 + $0x1c4] sm:$0xf] %vm4964_vm1, %v5672_v57  ;;  %v4098_v53 = vmax.f32 %v3902_v3, 0.0  ;;  %v4099_v35 = vmax.f32 %v3903_v43, 0.0  ;;  %v3701_v9 = vmax.f32 %v8791_v14, %v3230_v45  ;;  %v3702_v52 = vmax.f32 %v8795_v6, %v3232_v22 }
 0x3ab   :  { %3345 = vrot.lane.b32.xlu0 %v9492_v27, %s6159_s0  ;;  %3347 = vrot.lane.b32.xlu1 %v9496_v46, %s6159_s0  ;;  %v11039_v57 = vld [vmem:[#allocation206_spill] sm:$0xff]  ;;  %v11040_v43 = vld [vmem:[#allocation287_spill] sm:$0xff] }
 0x3ac   :  { %v5673_v54 = vpack.c.bf16 %v4098_v53, %v4098_v53  ;;  %v5674_v29 = vpack.c.bf16 %v4099_v35, %v4099_v35  ;;  %v3904_v60 = vadd.f32 %v9318_v1, %v3701_v9  ;;  %v3905_v31 = vadd.f32 %v9318_v1, %v3702_v52  ;;  %v11041_v14 = vld [vmem:[#allocation214_spill] sm:$0xff] }
 0x3ad   :  { %v9516_v3 = vmax.f32 %v11039_v57, %v11038_v15  ;;  %v9520_v45 = vmax.f32 %v11041_v14, %v11040_v43  ;;  %v3234_v6 = vpop.permute.xlu0 %3233  ;;  %v3236_v22 = vpop.permute.xlu1 %3235  ;;  %v11042_v14 = vld [vmem:[#allocation284_spill] sm:$0xff] }
 0x3ae   :  { %5079 = vst.msk [vmem:[%s10126_s3 + $0x1c8] sm:$0xf] %vm4964_vm1, %v5673_v54  ;;  %5080 = vst.msk [vmem:[%s10126_s3 + $0x1cc] sm:$0xf] %vm4964_vm1, %v5674_v29  ;;  %v4100_v53 = vmax.f32 %v3904_v60, 0.0  ;;  %v4101_v35 = vmax.f32 %v3905_v31, 0.0  ;;  %v3703_v9 = vmax.f32 %v8815_v23, %v3234_v6  ;;  %v3704_v52 = vmax.f32 %v8819_v51, %v3236_v22 }
 0x3af   :  { %3349 = vrot.lane.b32.xlu0 %v9516_v3, %s6159_s0  ;;  %3351 = vrot.lane.b32.xlu1 %v9520_v45, %s6159_s0  ;;  %v11043_v29 = vld [vmem:[#allocation202_spill] sm:$0xff]  ;;  %v11044_v31 = vld [vmem:[#allocation285_spill] sm:$0xff] }
 0x3b0   :  { %v5675_v15 = vpack.c.bf16 %v4100_v53, %v4100_v53  ;;  %v5676_v57 = vpack.c.bf16 %v4101_v35, %v4101_v35  ;;  %v3906_v54 = vadd.f32 %v9318_v1, %v3703_v9  ;;  %v3907_v43 = vadd.f32 %v9318_v1, %v3704_v52  ;;  %v11045_v23 = vld [vmem:[#allocation209_spill] sm:$0xff] }
 0x3b1   :  { %v9540_v60 = vmax.f32 %v11043_v29, %v11042_v14  ;;  %v9544_v6 = vmax.f32 %v11045_v23, %v11044_v31  ;;  %v3238_v51 = vpop.permute.xlu0 %3237  ;;  %v3240_v22 = vpop.permute.xlu1 %3239  ;;  %v11046_v23 = vld [vmem:[#allocation132_spill] sm:$0xff] }
 0x3b2   :  { %5081 = vst.msk [vmem:[%s10126_s3 + $0x1d0] sm:$0xf] %vm4964_vm1, %v5675_v15  ;;  %5082 = vst.msk [vmem:[%s10126_s3 + $0x1d4] sm:$0xf] %vm4964_vm1, %v5676_v57  ;;  %v4102_v53 = vmax.f32 %v3906_v54, 0.0  ;;  %v4103_v35 = vmax.f32 %v3907_v43, 0.0  ;;  %v3705_v9 = vmax.f32 %v8839_v13, %v3238_v51  ;;  %v3706_v52 = vmax.f32 %v8843_v63, %v3240_v22 }
 0x3b3   :  { %3353 = vrot.lane.b32.xlu0 %v9540_v60, %s6159_s0  ;;  %3355 = vrot.lane.b32.xlu1 %v9544_v6, %s6159_s0  ;;  %v11047_v57 = vld [vmem:[#allocation222_spill] sm:$0xff]  ;;  %v11048_v43 = vld [vmem:[#allocation40_spill] sm:$0xff] }
 0x3b4   :  { %v5677_v14 = vpack.c.bf16 %v4102_v53, %v4102_v53  ;;  %v5678_v29 = vpack.c.bf16 %v4103_v35, %v4103_v35  ;;  %v3908_v15 = vadd.f32 %v9318_v1, %v3705_v9  ;;  %v3909_v31 = vadd.f32 %v9318_v1, %v3706_v52  ;;  %v11049_v13 = vld [vmem:[#allocation230_spill] sm:$0xff] }
 0x3b5   :  { %v9564_v54 = vmax.f32 %v11047_v57, %v11046_v23  ;;  %v9568_v51 = vmax.f32 %v11049_v13, %v11048_v43  ;;  %v3242_v63 = vpop.permute.xlu0 %3241  ;;  %v3244_v22 = vpop.permute.xlu1 %3243  ;;  %v11050_v13 = vld [vmem:[#allocation110_spill] sm:$0xff] }
 0x3b6   :  { %5083 = vst.msk [vmem:[%s10126_s3 + $0x1d8] sm:$0xf] %vm4964_vm1, %v5677_v14  ;;  %5084 = vst.msk [vmem:[%s10126_s3 + $0x1dc] sm:$0xf] %vm4964_vm1, %v5678_v29  ;;  %v4104_v53 = vmax.f32 %v3908_v15, 0.0  ;;  %v4105_v35 = vmax.f32 %v3909_v31, 0.0  ;;  %v3707_v9 = vmax.f32 %v8863_v56, %v3242_v63  ;;  %v3708_v52 = vmax.f32 %v8867_v39, %v3244_v22 }
 0x3b7   :  { %3357 = vrot.lane.b32.xlu0 %v9564_v54, %s6159_s0  ;;  %3359 = vrot.lane.b32.xlu1 %v9568_v51, %s6159_s0  ;;  %v11051_v29 = vld [vmem:[#allocation218_spill] sm:$0xff]  ;;  %v11052_v31 = vld [vmem:[#allocation25_spill] sm:$0xff] }
 0x3b8   :  { %v5679_v23 = vpack.c.bf16 %v4104_v53, %v4104_v53  ;;  %v5680_v57 = vpack.c.bf16 %v4105_v35, %v4105_v35  ;;  %v3910_v14 = vadd.f32 %v9318_v1, %v3707_v9  ;;  %v3911_v43 = vadd.f32 %v9318_v1, %v3708_v52  ;;  %v11053_v56 = vld [vmem:[#allocation225_spill] sm:$0xff] }
 0x3b9   :  { %v9588_v15 = vmax.f32 %v11051_v29, %v11050_v13  ;;  %v9592_v63 = vmax.f32 %v11053_v56, %v11052_v31  ;;  %v3246_v39 = vpop.permute.xlu0 %3245  ;;  %v3248_v22 = vpop.permute.xlu1 %3247  ;;  %v11054_v56 = vld [vmem:[#allocation163_spill] sm:$0xff] }
 0x3ba   :  { %5085 = vst.msk [vmem:[%s10126_s3 + $0x1e0] sm:$0xf] %vm4964_vm1, %v5679_v23  ;;  %5086 = vst.msk [vmem:[%s10126_s3 + $0x1e4] sm:$0xf] %vm4964_vm1, %v5680_v57  ;;  %v4106_v53 = vmax.f32 %v3910_v14, 0.0  ;;  %v4107_v35 = vmax.f32 %v3911_v43, 0.0  ;;  %v3709_v9 = vmax.f32 %v8887_v12, %v3246_v39  ;;  %v3710_v52 = vmax.f32 %v8891_v55, %v3248_v22 }
 0x3bb   :  { %3361 = vrot.lane.b32.xlu0 %v9588_v15, %s6159_s0  ;;  %3363 = vrot.lane.b32.xlu1 %v9592_v63, %s6159_s0  ;;  %v11055_v57 = vld [vmem:[#allocation238_spill] sm:$0xff]  ;;  %v11056_v43 = vld [vmem:[#allocation56_spill] sm:$0xff] }
 0x3bc   :  { %v5681_v13 = vpack.c.bf16 %v4106_v53, %v4106_v53  ;;  %v5682_v29 = vpack.c.bf16 %v4107_v35, %v4107_v35  ;;  %v3912_v23 = vadd.f32 %v9318_v1, %v3709_v9  ;;  %v3913_v31 = vadd.f32 %v9318_v1, %v3710_v52  ;;  %v11057_v12 = vld [vmem:[#allocation246_spill] sm:$0xff] }
 0x3bd   :  { %v9612_v14 = vmax.f32 %v11055_v57, %v11054_v56  ;;  %v9616_v39 = vmax.f32 %v11057_v12, %v11056_v43  ;;  %v3250_v55 = vpop.permute.xlu0 %3249  ;;  %v3252_v22 = vpop.permute.xlu1 %3251  ;;  %v11058_v12 = vld [vmem:[#allocation148_spill] sm:$0xff] }
 0x3be   :  { %5087 = vst.msk [vmem:[%s10126_s3 + $0x1e8] sm:$0xf] %vm4964_vm1, %v5681_v13  ;;  %5088 = vst.msk [vmem:[%s10126_s3 + $0x1ec] sm:$0xf] %vm4964_vm1, %v5682_v29  ;;  %v4108_v53 = vmax.f32 %v3912_v23, 0.0  ;;  %v4109_v35 = vmax.f32 %v3913_v31, 0.0  ;;  %v3711_v9 = vmax.f32 %v8911_v28, %v3250_v55  ;;  %v3712_v52 = vmax.f32 %v8915_v26, %v3252_v22 }
 0x3bf   :  { %3365 = vrot.lane.b32.xlu0 %v9612_v14, %s6159_s0  ;;  %3367 = vrot.lane.b32.xlu1 %v9616_v39, %s6159_s0  ;;  %v11059_v29 = vld [vmem:[#allocation234_spill] sm:$0xff]  ;;  %v11060_v31 = vld [vmem:[#allocation51_spill] sm:$0xff]  ;;  %v11061_v28 = vld [vmem:[#allocation241_spill] sm:$0xff] }
 0x3c0   :  { %v5683_v56 = vpack.c.bf16 %v4108_v53, %v4108_v53  ;;  %v5684_v57 = vpack.c.bf16 %v4109_v35, %v4109_v35  ;;  %v3914_v13 = vadd.f32 %v9318_v1, %v3711_v9  ;;  %v3915_v43 = vadd.f32 %v9318_v1, %v3712_v52 }
 0x3c1   :  { %v9636_v23 = vmax.f32 %v11059_v29, %v11058_v12  ;;  %v9640_v55 = vmax.f32 %v11061_v28, %v11060_v31  ;;  %v3254_v26 = vpop.permute.xlu0 %3253  ;;  %v3256_v22 = vpop.permute.xlu1 %3255  ;;  %v11062_v28 = vld [vmem:[#allocation195_spill] sm:$0xff] }
 0x3c2   :  { %5089 = vst.msk [vmem:[%s10126_s3 + $0x1f0] sm:$0xf] %vm4964_vm1, %v5683_v56  ;;  %5090 = vst.msk [vmem:[%s10126_s3 + $0x1f4] sm:$0xf] %vm4964_vm1, %v5684_v57  ;;  %v4110_v53 = vmax.f32 %v3914_v13, 0.0  ;;  %v4111_v35 = vmax.f32 %v3915_v43, 0.0  ;;  %v3713_v9 = vmax.f32 %v8935_v40, %v3254_v26  ;;  %v3714_v52 = vmax.f32 %v8939_v18, %v3256_v22 }
 0x3c3   :  { %3369 = vrot.lane.b32.xlu0 %v9636_v23, %s6159_s0  ;;  %3371 = vrot.lane.b32.xlu1 %v9640_v55, %s6159_s0  ;;  %v11063_v57 = vld [vmem:[#allocation252_spill] sm:$0xff]  ;;  %v11065_v40 = vld [vmem:[#allocation258_spill] sm:$0xff] }
 0x3c4   :  { %v5685_v12 = vpack.c.bf16 %v4110_v53, %v4110_v53  ;;  %v5686_v29 = vpack.c.bf16 %v4111_v35, %v4111_v35  ;;  %v3916_v56 = vadd.f32 %v9318_v1, %v3713_v9  ;;  %v3917_v31 = vadd.f32 %v9318_v1, %v3714_v52  ;;  %v11064_v43 = vld [vmem:[#allocation80_spill] sm:$0xff] }
 0x3c5   :  { %v9660_v13 = vmax.f32 %v11063_v57, %v11062_v28  ;;  %v9664_v26 = vmax.f32 %v11065_v40, %v11064_v43  ;;  %v3258_v18 = vpop.permute.xlu0 %3257  ;;  %v3260_v22 = vpop.permute.xlu1 %3259  ;;  %v11066_v40 = vld [vmem:[#allocation179_spill] sm:$0xff] }
 0x3c6   :  { %5091 = vst.msk [vmem:[%s10126_s3 + $0x1f8] sm:$0xf] %vm4964_vm1, %v5685_v12  ;;  %5092 = vst.msk [vmem:[%s10126_s3 + $0x1fc] sm:$0xf] %vm4964_vm1, %v5686_v29  ;;  %v4112_v53 = vmax.f32 %v3916_v56, 0.0  ;;  %v4113_v35 = vmax.f32 %v3917_v31, 0.0  ;;  %v3715_v9 = vmax.f32 %v8959_v16, %v3258_v18  ;;  %v3716_v52 = vmax.f32 %v8963_v47, %v3260_v22 }
 0x3c7   :  { %3373 = vrot.lane.b32.xlu0 %v9660_v13, %s6159_s0  ;;  %3375 = vrot.lane.b32.xlu1 %v9664_v26, %s6159_s0  ;;  %v11067_v29 = vld [vmem:[#allocation250_spill] sm:$0xff]  ;;  %v11068_v31 = vld [vmem:[#allocation68_spill] sm:$0xff]  ;;  %v11069_v16 = vld [vmem:[#allocation253_spill] sm:$0xff] }
 0x3c8   :  { %v5687_v28 = vpack.c.bf16 %v4112_v53, %v4112_v53  ;;  %v5688_v57 = vpack.c.bf16 %v4113_v35, %v4113_v35  ;;  %v3918_v12 = vadd.f32 %v9318_v1, %v3715_v9  ;;  %v3919_v43 = vadd.f32 %v9318_v1, %v3716_v52 }
 0x3c9   :  { %v9684_v56 = vmax.f32 %v11067_v29, %v11066_v40  ;;  %v9688_v18 = vmax.f32 %v11069_v16, %v11068_v31  ;;  %v3262_v47 = vpop.permute.xlu0 %3261  ;;  %v3264_v22 = vpop.permute.xlu1 %3263  ;;  %v11070_v16 = vld [vmem:[#allocation227_spill] sm:$0xff] }
 0x3ca   :  { %5093 = vst.msk [vmem:[%s10126_s3 + $0x200] sm:$0xf] %vm4964_vm1, %v5687_v28  ;;  %5094 = vst.msk [vmem:[%s10126_s3 + $0x204] sm:$0xf] %vm4964_vm1, %v5688_v57  ;;  %v4114_v53 = vmax.f32 %v3918_v12, 0.0  ;;  %v4115_v35 = vmax.f32 %v3919_v43, 0.0  ;;  %v3717_v9 = vmax.f32 %v8983_v49, %v3262_v47  ;;  %v3718_v52 = vmax.f32 %v8987_v25, %v3264_v22 }
 0x3cb   :  { %3377 = vrot.lane.b32.xlu0 %v9684_v56, %s6159_s0  ;;  %3379 = vrot.lane.b32.xlu1 %v9688_v18, %s6159_s0  ;;  %v11071_v57 = vld [vmem:[#allocation264_spill] sm:$0xff]  ;;  %v11073_v49 = vld [vmem:[#allocation269_spill] sm:$0xff] }
 0x3cc   :  { %v5689_v40 = vpack.c.bf16 %v4114_v53, %v4114_v53  ;;  %v5690_v29 = vpack.c.bf16 %v4115_v35, %v4115_v35  ;;  %v3920_v28 = vadd.f32 %v9318_v1, %v3717_v9  ;;  %v3921_v31 = vadd.f32 %v9318_v1, %v3718_v52  ;;  %v11072_v43 = vld [vmem:[#allocation104_spill] sm:$0xff] }
 0x3cd   :  { %v9708_v12 = vmax.f32 %v11071_v57, %v11070_v16  ;;  %v9712_v47 = vmax.f32 %v11073_v49, %v11072_v43  ;;  %v3266_v25 = vpop.permute.xlu0 %3265  ;;  %v3268_v22 = vpop.permute.xlu1 %3267  ;;  %v11074_v49 = vld [vmem:[#allocation211_spill] sm:$0xff] }
 0x3ce   :  { %5095 = vst.msk [vmem:[%s10126_s3 + $0x208] sm:$0xf] %vm4964_vm1, %v5689_v40  ;;  %5096 = vst.msk [vmem:[%s10126_s3 + $0x20c] sm:$0xf] %vm4964_vm1, %v5690_v29  ;;  %v4116_v53 = vmax.f32 %v3920_v28, 0.0  ;;  %v4117_v35 = vmax.f32 %v3921_v31, 0.0  ;;  %v3719_v9 = vmax.f32 %v9007_v59, %v3266_v25  ;;  %v3720_v52 = vmax.f32 %v9011_v21, %v3268_v22 }
 0x3cf   :  { %3381 = vrot.lane.b32.xlu0 %v9708_v12, %s6159_s0  ;;  %3383 = vrot.lane.b32.xlu1 %v9712_v47, %s6159_s0  ;;  %v11075_v29 = vld [vmem:[#allocation260_spill] sm:$0xff]  ;;  %v11077_v59 = vld [vmem:[#allocation265_spill] sm:$0xff] }
 0x3d0   :  { %v5691_v16 = vpack.c.bf16 %v4116_v53, %v4116_v53  ;;  %v5692_v57 = vpack.c.bf16 %v4117_v35, %v4117_v35  ;;  %v3922_v40 = vadd.f32 %v9318_v1, %v3719_v9  ;;  %v3923_v43 = vadd.f32 %v9318_v1, %v3720_v52  ;;  %v11076_v31 = vld [vmem:[#allocation92_spill] sm:$0xff] }
 0x3d1   :  { %v9732_v28 = vmax.f32 %v11075_v29, %v11074_v49  ;;  %v9736_v25 = vmax.f32 %v11077_v59, %v11076_v31  ;;  %v3270_v21 = vpop.permute.xlu0 %3269  ;;  %v3272_v22 = vpop.permute.xlu1 %3271 }
 0x3d2   :  { %5097 = vst.msk [vmem:[%s10126_s3 + $0x210] sm:$0xf] %vm4964_vm1, %v5691_v16  ;;  %5098 = vst.msk [vmem:[%s10126_s3 + $0x214] sm:$0xf] %vm4964_vm1, %v5692_v57  ;;  %v4118_v53 = vmax.f32 %v3922_v40, 0.0  ;;  %v4119_v35 = vmax.f32 %v3923_v43, 0.0  ;;  %v3721_v9 = vmax.f32 %v9031_v42, %v3270_v21  ;;  %v3722_v52 = vmax.f32 %v9035_v24, %v3272_v22 }
 0x3d3   :  { %3385 = vrot.lane.b32.xlu0 %v9732_v28, %s6159_s0  ;;  %3387 = vrot.lane.b32.xlu1 %v9736_v25, %s6159_s0 }
 0x3d4   :  { %v5693_v49 = vpack.c.bf16 %v4118_v53, %v4118_v53  ;;  %v5694_v29 = vpack.c.bf16 %v4119_v35, %v4119_v35  ;;  %v3924_v16 = vadd.f32 %v9318_v1, %v3721_v9  ;;  %v3925_v31 = vadd.f32 %v9318_v1, %v3722_v52 }
 0x3d5   :  { %v3274_v59 = vpop.permute.xlu0 %3273  ;;  %v3276_v57 = vpop.permute.xlu1 %3275 }
 0x3d6   :  { %5099 = vst.msk [vmem:[%s10126_s3 + $0x218] sm:$0xf] %vm4964_vm1, %v5693_v49  ;;  %5100 = vst.msk [vmem:[%s10126_s3 + $0x21c] sm:$0xf] %vm4964_vm1, %v5694_v29  ;;  %v4120_v42 = vmax.f32 %v3924_v16, 0.0  ;;  %v4121_v24 = vmax.f32 %v3925_v31, 0.0  ;;  %v3723_v40 = vmax.f32 %v9055_v30, %v3274_v59  ;;  %v3724_v43 = vmax.f32 %v9059_v44, %v3276_v57 }
 0x3d8   :  { %v5695_v21 = vpack.c.bf16 %v4120_v42, %v4120_v42  ;;  %v5696_v22 = vpack.c.bf16 %v4121_v24, %v4121_v24  ;;  %v3926_v53 = vadd.f32 %v9318_v1, %v3723_v40  ;;  %v3927_v35 = vadd.f32 %v9318_v1, %v3724_v43 }
 0x3d9   :  { %v3278_v9 = vpop.permute.xlu0 %3277  ;;  %v3280_v52 = vpop.permute.xlu1 %3279 }
 0x3da   :  { %5101 = vst.msk [vmem:[%s10126_s3 + $0x220] sm:$0xf] %vm4964_vm1, %v5695_v21  ;;  %5102 = vst.msk [vmem:[%s10126_s3 + $0x224] sm:$0xf] %vm4964_vm1, %v5696_v22  ;;  %v4122_v30 = vmax.f32 %v3926_v53, 0.0  ;;  %v4123_v44 = vmax.f32 %v3927_v35, 0.0  ;;  %v3725_v49 = vmax.f32 %v9079_v2, %v3278_v9  ;;  %v3726_v29 = vmax.f32 %v9083_v11, %v3280_v52 }
 0x3dc   :  { %v5697_v16 = vpack.c.bf16 %v4122_v30, %v4122_v30  ;;  %v5698_v31 = vpack.c.bf16 %v4123_v44, %v4123_v44  ;;  %v3928_v59 = vadd.f32 %v9318_v1, %v3725_v49  ;;  %v3929_v57 = vadd.f32 %v9318_v1, %v3726_v29 }
 0x3dd   :  { %v3282_v42 = vpop.permute.xlu0 %3281  ;;  %v3284_v24 = vpop.permute.xlu1 %3283 }
 0x3de   :  { %5103 = vst.msk [vmem:[%s10126_s3 + $0x228] sm:$0xf] %vm4964_vm1, %v5697_v16  ;;  %5104 = vst.msk [vmem:[%s10126_s3 + $0x22c] sm:$0xf] %vm4964_vm1, %v5698_v31  ;;  %v4124_v2 = vmax.f32 %v3928_v59, 0.0  ;;  %v4125_v11 = vmax.f32 %v3929_v57, 0.0  ;;  %v3727_v40 = vmax.f32 %v9103_v8, %v3282_v42  ;;  %v3728_v43 = vmax.f32 %v9107_v33, %v3284_v24 }
 0x3e0   :  { %v5699_v21 = vpack.c.bf16 %v4124_v2, %v4124_v2  ;;  %v5700_v22 = vpack.c.bf16 %v4125_v11, %v4125_v11  ;;  %v3930_v53 = vadd.f32 %v9318_v1, %v3727_v40  ;;  %v3931_v35 = vadd.f32 %v9318_v1, %v3728_v43 }
 0x3e1   :  { %v3286_v9 = vpop.permute.xlu0 %3285  ;;  %v3288_v52 = vpop.permute.xlu1 %3287 }
 0x3e2   :  { %5105 = vst.msk [vmem:[%s10126_s3 + $0x230] sm:$0xf] %vm4964_vm1, %v5699_v21  ;;  %5106 = vst.msk [vmem:[%s10126_s3 + $0x234] sm:$0xf] %vm4964_vm1, %v5700_v22  ;;  %v4126_v8 = vmax.f32 %v3930_v53, 0.0  ;;  %v4127_v33 = vmax.f32 %v3931_v35, 0.0  ;;  %v3729_v30 = vmax.f32 %v9127_v41, %v3286_v9  ;;  %v3730_v44 = vmax.f32 %v9131_v58, %v3288_v52 }
 0x3e4   :  { %v5701_v49 = vpack.c.bf16 %v4126_v8, %v4126_v8  ;;  %v5702_v29 = vpack.c.bf16 %v4127_v33, %v4127_v33  ;;  %v3932_v16 = vadd.f32 %v9318_v1, %v3729_v30  ;;  %v3933_v31 = vadd.f32 %v9318_v1, %v3730_v44 }
 0x3e5   :  { %v3290_v59 = vpop.permute.xlu0 %3289  ;;  %v3292_v57 = vpop.permute.xlu1 %3291 }
 0x3e6   :  { %5107 = vst.msk [vmem:[%s10126_s3 + $0x238] sm:$0xf] %vm4964_vm1, %v5701_v49  ;;  %5108 = vst.msk [vmem:[%s10126_s3 + $0x23c] sm:$0xf] %vm4964_vm1, %v5702_v29  ;;  %v4128_v41 = vmax.f32 %v3932_v16, 0.0  ;;  %v4129_v58 = vmax.f32 %v3933_v31, 0.0  ;;  %v3731_v42 = vmax.f32 %v9151_v10, %v3290_v59  ;;  %v3732_v24 = vmax.f32 %v9155_v38, %v3292_v57 }
 0x3e8   :  { %v5703_v2 = vpack.c.bf16 %v4128_v41, %v4128_v41  ;;  %v5704_v11 = vpack.c.bf16 %v4129_v58, %v4129_v58  ;;  %v3934_v40 = vadd.f32 %v9318_v1, %v3731_v42  ;;  %v3935_v43 = vadd.f32 %v9318_v1, %v3732_v24 }
 0x3e9   :  { %v3294_v21 = vpop.permute.xlu0 %3293  ;;  %v3296_v22 = vpop.permute.xlu1 %3295 }
 0x3ea   :  { %5109 = vst.msk [vmem:[%s10126_s3 + $0x240] sm:$0xf] %vm4964_vm1, %v5703_v2  ;;  %5110 = vst.msk [vmem:[%s10126_s3 + $0x244] sm:$0xf] %vm4964_vm1, %v5704_v11  ;;  %v4130_v10 = vmax.f32 %v3934_v40, 0.0  ;;  %v4131_v38 = vmax.f32 %v3935_v43, 0.0  ;;  %v3733_v53 = vmax.f32 %v9175_v37, %v3294_v21  ;;  %v3734_v35 = vmax.f32 %v9179_v48, %v3296_v22 }
 0x3ec   :  { %v5705_v9 = vpack.c.bf16 %v4130_v10, %v4130_v10  ;;  %v5706_v52 = vpack.c.bf16 %v4131_v38, %v4131_v38  ;;  %v3936_v8 = vadd.f32 %v9318_v1, %v3733_v53  ;;  %v3937_v33 = vadd.f32 %v9318_v1, %v3734_v35 }
 0x3ed   :  { %v3298_v30 = vpop.permute.xlu0 %3297  ;;  %v3300_v44 = vpop.permute.xlu1 %3299 }
 0x3ee   :  { %5111 = vst.msk [vmem:[%s10126_s3 + $0x248] sm:$0xf] %vm4964_vm1, %v5705_v9  ;;  %5112 = vst.msk [vmem:[%s10126_s3 + $0x24c] sm:$0xf] %vm4964_vm1, %v5706_v52  ;;  %v4132_v37 = vmax.f32 %v3936_v8, 0.0  ;;  %v4133_v48 = vmax.f32 %v3937_v33, 0.0  ;;  %v3735_v49 = vmax.f32 %v9199_v0, %v3298_v30  ;;  %v3736_v29 = vmax.f32 %v9203_v36, %v3300_v44 }
 0x3f0   :  { %v5707_v16 = vpack.c.bf16 %v4132_v37, %v4132_v37  ;;  %v5708_v31 = vpack.c.bf16 %v4133_v48, %v4133_v48  ;;  %v3938_v59 = vadd.f32 %v9318_v1, %v3735_v49  ;;  %v3939_v57 = vadd.f32 %v9318_v1, %v3736_v29 }
 0x3f1   :  { %v3302_v41 = vpop.permute.xlu0 %3301  ;;  %v3304_v58 = vpop.permute.xlu1 %3303 }
 0x3f2   :  { %5113 = vst.msk [vmem:[%s10126_s3 + $0x250] sm:$0xf] %vm4964_vm1, %v5707_v16  ;;  %5114 = vst.msk [vmem:[%s10126_s3 + $0x254] sm:$0xf] %vm4964_vm1, %v5708_v31  ;;  %v4134_v0 = vmax.f32 %v3938_v59, 0.0  ;;  %v4135_v36 = vmax.f32 %v3939_v57, 0.0  ;;  %v3737_v42 = vmax.f32 %v9223_v34, %v3302_v41  ;;  %v3738_v24 = vmax.f32 %v9227_v62, %v3304_v58 }
 0x3f4   :  { %v5709_v2 = vpack.c.bf16 %v4134_v0, %v4134_v0  ;;  %v5710_v11 = vpack.c.bf16 %v4135_v36, %v4135_v36  ;;  %v3940_v40 = vadd.f32 %v9318_v1, %v3737_v42  ;;  %v3941_v43 = vadd.f32 %v9318_v1, %v3738_v24 }
 0x3f5   :  { %v3306_v21 = vpop.permute.xlu0 %3305  ;;  %v3308_v22 = vpop.permute.xlu1 %3307 }
 0x3f6   :  { %5115 = vst.msk [vmem:[%s10126_s3 + $0x258] sm:$0xf] %vm4964_vm1, %v5709_v2  ;;  %5116 = vst.msk [vmem:[%s10126_s3 + $0x25c] sm:$0xf] %vm4964_vm1, %v5710_v11  ;;  %v4136_v34 = vmax.f32 %v3940_v40, 0.0  ;;  %v4137_v62 = vmax.f32 %v3941_v43, 0.0  ;;  %v3739_v10 = vmax.f32 %v9247_v32, %v3306_v21  ;;  %v3740_v38 = vmax.f32 %v9251_v61, %v3308_v22 }
 0x3f7   :  { %v11078_v2 = vld [vmem:[#allocation146_spill] sm:$0xff] }
 0x3f8   :  { %v5711_v53 = vpack.c.bf16 %v4136_v34, %v4136_v34  ;;  %v5712_v35 = vpack.c.bf16 %v4137_v62, %v4137_v62  ;;  %v3942_v9 = vadd.f32 %v9318_v1, %v3739_v10  ;;  %v3943_v52 = vadd.f32 %v9318_v1, %v3740_v38  ;;  %v11079_v40 = vld [vmem:[#allocation134_spill] sm:$0xff] }
 0x3f9   :  { %v3310_v8 = vpop.permute.xlu0 %3309  ;;  %v3312_v33 = vpop.permute.xlu1 %3311 }
 0x3fa   :  { %5117 = vst.msk [vmem:[%s10126_s3 + $0x260] sm:$0xf] %vm4964_vm1, %v5711_v53  ;;  %5118 = vst.msk [vmem:[%s10126_s3 + $0x264] sm:$0xf] %vm4964_vm1, %v5712_v35  ;;  %v4138_v32 = vmax.f32 %v3942_v9, 0.0  ;;  %v4139_v61 = vmax.f32 %v3943_v52, 0.0  ;;  %v3741_v30 = vmax.f32 %v9271_v5, %v3310_v8  ;;  %v3742_v44 = vmax.f32 %v9275_v19, %v3312_v33 }
 0x3fb   :  { %v11080_v9 = vld [vmem:[#allocation141_spill] sm:$0xff] }
 0x3fc   :  { %v5713_v37 = vpack.c.bf16 %v4138_v32, %v4138_v32  ;;  %v5714_v48 = vpack.c.bf16 %v4139_v61, %v4139_v61  ;;  %v3944_v49 = vadd.f32 %v9318_v1, %v3741_v30  ;;  %v3945_v29 = vadd.f32 %v9318_v1, %v3742_v44  ;;  %v11081_v8 = vld [vmem:[#allocation153_spill] sm:$0xff] }
 0x3fd   :  { %v3314_v16 = vpop.permute.xlu0 %3313  ;;  %v3316_v31 = vpop.permute.xlu1 %3315 }
 0x3fe   :  { %5119 = vst.msk [vmem:[%s10126_s3 + $0x268] sm:$0xf] %vm4964_vm1, %v5713_v37  ;;  %5120 = vst.msk [vmem:[%s10126_s3 + $0x26c] sm:$0xf] %vm4964_vm1, %v5714_v48  ;;  %v4140_v5 = vmax.f32 %v3944_v49, 0.0  ;;  %v4141_v19 = vmax.f32 %v3945_v29, 0.0  ;;  %v3743_v59 = vmax.f32 %v9295_v50, %v3314_v16  ;;  %v3744_v57 = vmax.f32 %v9299_v4, %v3316_v31 }
 0x3ff   :  { %v11082_v16 = vld [vmem:[#allocation162_spill] sm:$0xff] }
 0x400   :  { %v5715_v41 = vpack.c.bf16 %v4140_v5, %v4140_v5  ;;  %v5716_v58 = vpack.c.bf16 %v4141_v19, %v4141_v19  ;;  %v3946_v0 = vadd.f32 %v9318_v1, %v3743_v59  ;;  %v3947_v36 = vadd.f32 %v9318_v1, %v3744_v57  ;;  %v11083_v5 = vld [vmem:[#allocation149_spill] sm:$0xff] }
 0x401   :  { %v3318_v42 = vpop.permute.xlu0 %3317  ;;  %v3320_v24 = vpop.permute.xlu1 %3319 }
 0x402   :  { %5121 = vst.msk [vmem:[%s10126_s3 + $0x270] sm:$0xf] %vm4964_vm1, %v5715_v41  ;;  %5122 = vst.msk [vmem:[%s10126_s3 + $0x274] sm:$0xf] %vm4964_vm1, %v5716_v58  ;;  %v4142_v50 = vmax.f32 %v3946_v0, 0.0  ;;  %v4143_v4 = vmax.f32 %v3947_v36, 0.0  ;;  %v3745_v11 = vmax.f32 %v11078_v2, %v3318_v42  ;;  %v3746_v43 = vmax.f32 %v11079_v40, %v3320_v24 }
 0x403   :  { %v11085_v2 = vld [vmem:[#allocation169_spill] sm:$0xff] }
 0x404   :  { %v5717_v21 = vpack.c.bf16 %v4142_v50, %v4142_v50  ;;  %v5718_v22 = vpack.c.bf16 %v4143_v4, %v4143_v4  ;;  %v3948_v34 = vadd.f32 %v9318_v1, %v3745_v11  ;;  %v3949_v62 = vadd.f32 %v9318_v1, %v3746_v43  ;;  %v11084_v50 = vld [vmem:[#allocation157_spill] sm:$0xff] }
 0x405   :  { %v3322_v10 = vpop.permute.xlu0 %3321  ;;  %v3324_v38 = vpop.permute.xlu1 %3323 }
 0x406   :  { %5123 = vst.msk [vmem:[%s10126_s3 + $0x278] sm:$0xf] %vm4964_vm1, %v5717_v21  ;;  %5124 = vst.msk [vmem:[%s10126_s3 + $0x27c] sm:$0xf] %vm4964_vm1, %v5718_v22  ;;  %v4144_v53 = vmax.f32 %v3948_v34, 0.0  ;;  %v4145_v35 = vmax.f32 %v3949_v62, 0.0  ;;  %v3747_v52 = vmax.f32 %v11080_v9, %v3322_v10  ;;  %v3748_v33 = vmax.f32 %v11081_v8, %v3324_v38 }
 0x408   :  { %v5719_v32 = vpack.c.bf16 %v4144_v53, %v4144_v53  ;;  %v5720_v61 = vpack.c.bf16 %v4145_v35, %v4145_v35  ;;  %v3950_v30 = vadd.f32 %v9318_v1, %v3747_v52  ;;  %v3951_v44 = vadd.f32 %v9318_v1, %v3748_v33  ;;  %v11086_v35 = vld [vmem:[#allocation178_spill] sm:$0xff] }
 0x409   :  { %v3326_v37 = vpop.permute.xlu0 %3325  ;;  %v3328_v48 = vpop.permute.xlu1 %3327 }
 0x40a   :  { %5125 = vst.msk [vmem:[%s10126_s3 + $0x280] sm:$0xf] %vm4964_vm1, %v5719_v32  ;;  %5126 = vst.msk [vmem:[%s10126_s3 + $0x284] sm:$0xf] %vm4964_vm1, %v5720_v61  ;;  %v4146_v49 = vmax.f32 %v3950_v30, 0.0  ;;  %v4147_v29 = vmax.f32 %v3951_v44, 0.0  ;;  %v3749_v31 = vmax.f32 %v11082_v16, %v3326_v37  ;;  %v3750_v19 = vmax.f32 %v11083_v5, %v3328_v48 }
 0x40b   :  { %v11087_v37 = vld [vmem:[#allocation165_spill] sm:$0xff] }
 0x40c   :  { %v5721_v59 = vpack.c.bf16 %v4146_v49, %v4146_v49  ;;  %v5722_v57 = vpack.c.bf16 %v4147_v29, %v4147_v29  ;;  %v3952_v41 = vadd.f32 %v9318_v1, %v3749_v31  ;;  %v3953_v58 = vadd.f32 %v9318_v1, %v3750_v19  ;;  %v11088_v49 = vld [vmem:[#allocation173_spill] sm:$0xff] }
 0x40d   :  { %v3330_v0 = vpop.permute.xlu0 %3329  ;;  %v3332_v36 = vpop.permute.xlu1 %3331 }
 0x40e   :  { %5127 = vst.msk [vmem:[%s10126_s3 + $0x288] sm:$0xf] %vm4964_vm1, %v5721_v59  ;;  %5128 = vst.msk [vmem:[%s10126_s3 + $0x28c] sm:$0xf] %vm4964_vm1, %v5722_v57  ;;  %v4148_v42 = vmax.f32 %v3952_v41, 0.0  ;;  %v4149_v24 = vmax.f32 %v3953_v58, 0.0  ;;  %v3751_v4 = vmax.f32 %v11084_v50, %v3330_v0  ;;  %v3752_v11 = vmax.f32 %v11085_v2, %v3332_v36 }
 0x410   :  { %v5723_v40 = vpack.c.bf16 %v4148_v42, %v4148_v42  ;;  %v5724_v43 = vpack.c.bf16 %v4149_v24, %v4149_v24  ;;  %v3954_v21 = vadd.f32 %v9318_v1, %v3751_v4  ;;  %v3955_v22 = vadd.f32 %v9318_v1, %v3752_v11 }
 0x411   :  { %v3334_v34 = vpop.permute.xlu0 %3333  ;;  %v3336_v62 = vpop.permute.xlu1 %3335 }
 0x412   :  { %5129 = vst.msk [vmem:[%s10126_s3 + $0x290] sm:$0xf] %vm4964_vm1, %v5723_v40  ;;  %5130 = vst.msk [vmem:[%s10126_s3 + $0x294] sm:$0xf] %vm4964_vm1, %v5724_v43  ;;  %v4150_v10 = vmax.f32 %v3954_v21, 0.0  ;;  %v4151_v38 = vmax.f32 %v3955_v22, 0.0  ;;  %v3753_v53 = vmax.f32 %v9420_v17, %v3334_v34  ;;  %v3754_v9 = vmax.f32 %v11086_v35, %v3336_v62 }
 0x413   :  { %v9983_v22 = vld [vmem:[%s10125_s2] ss:$0 sm:$0xff] }
 0x414   :  { %v5725_v52 = vpack.c.bf16 %v4150_v10, %v4150_v10  ;;  %v5726_v8 = vpack.c.bf16 %v4151_v38, %v4151_v38  ;;  %v3956_v33 = vadd.f32 %v9318_v1, %v3753_v53  ;;  %v3957_v32 = vadd.f32 %v9318_v1, %v3754_v9 }
 0x415   :  { %v3338_v61 = vpop.permute.xlu0 %3337  ;;  %v3340_v30 = vpop.permute.xlu1 %3339 }
 0x416   :  { %5131 = vst.msk [vmem:[%s10126_s3 + $0x298] sm:$0xf] %vm4964_vm1, %v5725_v52  ;;  %5132 = vst.msk [vmem:[%s10126_s3 + $0x29c] sm:$0xf] %vm4964_vm1, %v5726_v8  ;;  %v4152_v17 = vmax.f32 %v3956_v33, 0.0  ;;  %v4153_v44 = vmax.f32 %v3957_v32, 0.0  ;;  %v3755_v48 = vmax.f32 %v11087_v37, %v3338_v61  ;;  %v3756_v29 = vmax.f32 %v11088_v49, %v3340_v30 }
 0x418   :  { %v5727_v16 = vpack.c.bf16 %v4152_v17, %v4152_v17  ;;  %v5728_v31 = vpack.c.bf16 %v4153_v44, %v4153_v44  ;;  %v3958_v5 = vadd.f32 %v9318_v1, %v3755_v48  ;;  %v3959_v19 = vadd.f32 %v9318_v1, %v3756_v29 }
 0x419   :  { %v3342_v59 = vpop.permute.xlu0 %3341  ;;  %v3344_v57 = vpop.permute.xlu1 %3343 }
 0x41a   :  { %5133 = vst.msk [vmem:[%s10126_s3 + $0x2a0] sm:$0xf] %vm4964_vm1, %v5727_v16  ;;  %5134 = vst.msk [vmem:[%s10126_s3 + $0x2a4] sm:$0xf] %vm4964_vm1, %v5728_v31  ;;  %v4154_v41 = vmax.f32 %v3958_v5, 0.0  ;;  %v4155_v58 = vmax.f32 %v3959_v19, 0.0  ;;  %v3757_v0 = vmax.f32 %v9468_v7, %v3342_v59  ;;  %v3758_v36 = vmax.f32 %v9472_v20, %v3344_v57 }
 0x41c   :  { %v5729_v42 = vpack.c.bf16 %v4154_v41, %v4154_v41  ;;  %v5730_v24 = vpack.c.bf16 %v4155_v58, %v4155_v58  ;;  %v3960_v50 = vadd.f32 %v9318_v1, %v3757_v0  ;;  %v3961_v4 = vadd.f32 %v9318_v1, %v3758_v36 }
 0x41d   :  { %v3346_v2 = vpop.permute.xlu0 %3345  ;;  %v3348_v11 = vpop.permute.xlu1 %3347 }
 0x41e   :  { %5135 = vst.msk [vmem:[%s10126_s3 + $0x2a8] sm:$0xf] %vm4964_vm1, %v5729_v42  ;;  %5136 = vst.msk [vmem:[%s10126_s3 + $0x2ac] sm:$0xf] %vm4964_vm1, %v5730_v24  ;;  %v4156_v7 = vmax.f32 %v3960_v50, 0.0  ;;  %v4157_v20 = vmax.f32 %v3961_v4, 0.0  ;;  %v3759_v40 = vmax.f32 %v9492_v27, %v3346_v2  ;;  %v3760_v43 = vmax.f32 %v9496_v46, %v3348_v11 }
 0x420   :  { %v5731_v21 = vpack.c.bf16 %v4156_v7, %v4156_v7  ;;  %v5732_v1 = vpack.c.bf16 %v4157_v20, %v4157_v20  ;;  %v3962_v34 = vadd.f32 %v9983_v22, %v3759_v40  ;;  %v3963_v62 = vadd.f32 %v9983_v22, %v3760_v43 }
 0x421   :  { %v3350_v10 = vpop.permute.xlu0 %3349  ;;  %v3352_v38 = vpop.permute.xlu1 %3351 }
 0x422   :  { %5137 = vst.msk [vmem:[%s10126_s3 + $0x2b0] sm:$0xf] %vm4964_vm1, %v5731_v21  ;;  %5138 = vst.msk [vmem:[%s10126_s3 + $0x2b4] sm:$0xf] %vm4964_vm1, %v5732_v1  ;;  %v4158_v27 = vmax.f32 %v3962_v34, 0.0  ;;  %v4159_v46 = vmax.f32 %v3963_v62, 0.0  ;;  %v3761_v53 = vmax.f32 %v9516_v3, %v3350_v10  ;;  %v3762_v35 = vmax.f32 %v9520_v45, %v3352_v38 }
 0x424   :  { %v5733_v9 = vpack.c.bf16 %v4158_v27, %v4158_v27  ;;  %v5734_v52 = vpack.c.bf16 %v4159_v46, %v4159_v46  ;;  %v3964_v8 = vadd.f32 %v9983_v22, %v3761_v53  ;;  %v3965_v33 = vadd.f32 %v9983_v22, %v3762_v35 }
 0x425   :  { %v3354_v32 = vpop.permute.xlu0 %3353  ;;  %v3356_v61 = vpop.permute.xlu1 %3355 }
 0x426   :  { %5139 = vst.msk [vmem:[%s10126_s3 + $0x2b8] sm:$0xf] %vm4964_vm1, %v5733_v9  ;;  %5140 = vst.msk [vmem:[%s10126_s3 + $0x2bc] sm:$0xf] %vm4964_vm1, %v5734_v52  ;;  %v4160_v3 = vmax.f32 %v3964_v8, 0.0  ;;  %v4161_v45 = vmax.f32 %v3965_v33, 0.0  ;;  %v3763_v30 = vmax.f32 %v9540_v60, %v3354_v32  ;;  %v3764_v17 = vmax.f32 %v9544_v6, %v3356_v61 }
 0x428   :  { %v5735_v44 = vpack.c.bf16 %v4160_v3, %v4160_v3  ;;  %v5736_v37 = vpack.c.bf16 %v4161_v45, %v4161_v45  ;;  %v3966_v48 = vadd.f32 %v9983_v22, %v3763_v30  ;;  %v3967_v49 = vadd.f32 %v9983_v22, %v3764_v17 }
 0x429   :  { %v3358_v29 = vpop.permute.xlu0 %3357  ;;  %v3360_v16 = vpop.permute.xlu1 %3359 }
 0x42a   :  { %5141 = vst.msk [vmem:[%s10126_s3 + $0x2c0] sm:$0xf] %vm4964_vm1, %v5735_v44  ;;  %5142 = vst.msk [vmem:[%s10126_s3 + $0x2c4] sm:$0xf] %vm4964_vm1, %v5736_v37  ;;  %v4162_v60 = vmax.f32 %v3966_v48, 0.0  ;;  %v4163_v6 = vmax.f32 %v3967_v49, 0.0  ;;  %v3765_v31 = vmax.f32 %v9564_v54, %v3358_v29  ;;  %v3766_v5 = vmax.f32 %v9568_v51, %v3360_v16 }
 0x42c   :  { %v5737_v19 = vpack.c.bf16 %v4162_v60, %v4162_v60  ;;  %v5738_v59 = vpack.c.bf16 %v4163_v6, %v4163_v6  ;;  %v3968_v57 = vadd.f32 %v9983_v22, %v3765_v31  ;;  %v3969_v41 = vadd.f32 %v9983_v22, %v3766_v5 }
 0x42d   :  { %v3362_v58 = vpop.permute.xlu0 %3361  ;;  %v3364_v0 = vpop.permute.xlu1 %3363 }
 0x42e   :  { %5143 = vst.msk [vmem:[%s10126_s3 + $0x2c8] sm:$0xf] %vm4964_vm1, %v5737_v19  ;;  %5144 = vst.msk [vmem:[%s10126_s3 + $0x2cc] sm:$0xf] %vm4964_vm1, %v5738_v59  ;;  %v4164_v54 = vmax.f32 %v3968_v57, 0.0  ;;  %v4165_v51 = vmax.f32 %v3969_v41, 0.0  ;;  %v3767_v36 = vmax.f32 %v9588_v15, %v3362_v58  ;;  %v3768_v42 = vmax.f32 %v9592_v63, %v3364_v0 }
 0x430   :  { %v5739_v24 = vpack.c.bf16 %v4164_v54, %v4164_v54  ;;  %v5740_v50 = vpack.c.bf16 %v4165_v51, %v4165_v51  ;;  %v3970_v4 = vadd.f32 %v9983_v22, %v3767_v36  ;;  %v3971_v2 = vadd.f32 %v9983_v22, %v3768_v42 }
 0x431   :  { %v3366_v11 = vpop.permute.xlu0 %3365  ;;  %v3368_v7 = vpop.permute.xlu1 %3367 }
 0x432   :  { %5145 = vst.msk [vmem:[%s10126_s3 + $0x2d0] sm:$0xf] %vm4964_vm1, %v5739_v24  ;;  %5146 = vst.msk [vmem:[%s10126_s3 + $0x2d4] sm:$0xf] %vm4964_vm1, %v5740_v50  ;;  %v4166_v15 = vmax.f32 %v3970_v4, 0.0  ;;  %v4167_v63 = vmax.f32 %v3971_v2, 0.0  ;;  %v3769_v20 = vmax.f32 %v9612_v14, %v3366_v11  ;;  %v3770_v40 = vmax.f32 %v9616_v39, %v3368_v7 }
 0x434   :  { %v5741_v43 = vpack.c.bf16 %v4166_v15, %v4166_v15  ;;  %v5742_v21 = vpack.c.bf16 %v4167_v63, %v4167_v63  ;;  %v3972_v1 = vadd.f32 %v9983_v22, %v3769_v20  ;;  %v3973_v34 = vadd.f32 %v9983_v22, %v3770_v40 }
 0x435   :  { %v3370_v62 = vpop.permute.xlu0 %3369  ;;  %v3372_v10 = vpop.permute.xlu1 %3371 }
 0x436   :  { %5147 = vst.msk [vmem:[%s10126_s3 + $0x2d8] sm:$0xf] %vm4964_vm1, %v5741_v43  ;;  %5148 = vst.msk [vmem:[%s10126_s3 + $0x2dc] sm:$0xf] %vm4964_vm1, %v5742_v21  ;;  %v4168_v14 = vmax.f32 %v3972_v1, 0.0  ;;  %v4169_v39 = vmax.f32 %v3973_v34, 0.0  ;;  %v3771_v38 = vmax.f32 %v9636_v23, %v3370_v62  ;;  %v3772_v27 = vmax.f32 %v9640_v55, %v3372_v10 }
 0x438   :  { %v5743_v46 = vpack.c.bf16 %v4168_v14, %v4168_v14  ;;  %v5744_v53 = vpack.c.bf16 %v4169_v39, %v4169_v39  ;;  %v3974_v35 = vadd.f32 %v9983_v22, %v3771_v38  ;;  %v3975_v9 = vadd.f32 %v9983_v22, %v3772_v27 }
 0x439   :  { %v3374_v52 = vpop.permute.xlu0 %3373  ;;  %v3376_v8 = vpop.permute.xlu1 %3375 }
 0x43a   :  { %5149 = vst.msk [vmem:[%s10126_s3 + $0x2e0] sm:$0xf] %vm4964_vm1, %v5743_v46  ;;  %5150 = vst.msk [vmem:[%s10126_s3 + $0x2e4] sm:$0xf] %vm4964_vm1, %v5744_v53  ;;  %v4170_v23 = vmax.f32 %v3974_v35, 0.0  ;;  %v4171_v55 = vmax.f32 %v3975_v9, 0.0  ;;  %v3773_v33 = vmax.f32 %v9660_v13, %v3374_v52  ;;  %v3774_v32 = vmax.f32 %v9664_v26, %v3376_v8 }
 0x43c   :  { %v5745_v61 = vpack.c.bf16 %v4170_v23, %v4170_v23  ;;  %v5746_v3 = vpack.c.bf16 %v4171_v55, %v4171_v55  ;;  %v3976_v45 = vadd.f32 %v9983_v22, %v3773_v33  ;;  %v3977_v30 = vadd.f32 %v9983_v22, %v3774_v32 }
 0x43d   :  { %v3378_v17 = vpop.permute.xlu0 %3377  ;;  %v3380_v44 = vpop.permute.xlu1 %3379 }
 0x43e   :  { %5151 = vst.msk [vmem:[%s10126_s3 + $0x2e8] sm:$0xf] %vm4964_vm1, %v5745_v61  ;;  %5152 = vst.msk [vmem:[%s10126_s3 + $0x2ec] sm:$0xf] %vm4964_vm1, %v5746_v3  ;;  %v4172_v13 = vmax.f32 %v3976_v45, 0.0  ;;  %v4173_v26 = vmax.f32 %v3977_v30, 0.0  ;;  %v3775_v37 = vmax.f32 %v9684_v56, %v3378_v17  ;;  %v3776_v48 = vmax.f32 %v9688_v18, %v3380_v44 }
 0x440   :  { %v5747_v49 = vpack.c.bf16 %v4172_v13, %v4172_v13  ;;  %v5748_v29 = vpack.c.bf16 %v4173_v26, %v4173_v26  ;;  %v3978_v16 = vadd.f32 %v9983_v22, %v3775_v37  ;;  %v3979_v60 = vadd.f32 %v9983_v22, %v3776_v48 }
 0x441   :  { %v3382_v6 = vpop.permute.xlu0 %3381  ;;  %v3384_v31 = vpop.permute.xlu1 %3383 }
 0x442   :  { %5153 = vst.msk [vmem:[%s10126_s3 + $0x2f0] sm:$0xf] %vm4964_vm1, %v5747_v49  ;;  %5154 = vst.msk [vmem:[%s10126_s3 + $0x2f4] sm:$0xf] %vm4964_vm1, %v5748_v29  ;;  %v4174_v56 = vmax.f32 %v3978_v16, 0.0  ;;  %v4175_v18 = vmax.f32 %v3979_v60, 0.0  ;;  %v3777_v5 = vmax.f32 %v9708_v12, %v3382_v6  ;;  %v3778_v19 = vmax.f32 %v9712_v47, %v3384_v31 }
 0x444   :  { %v5749_v59 = vpack.c.bf16 %v4174_v56, %v4174_v56  ;;  %v5750_v57 = vpack.c.bf16 %v4175_v18, %v4175_v18  ;;  %v3980_v41 = vadd.f32 %v9983_v22, %v3777_v5  ;;  %v3981_v58 = vadd.f32 %v9983_v22, %v3778_v19 }
 0x445   :  { %v3386_v0 = vpop.permute.xlu0 %3385  ;;  %v3388_v54 = vpop.permute.xlu1 %3387 }
 0x446   :  { %5155 = vst.msk [vmem:[%s10126_s3 + $0x2f8] sm:$0xf] %vm4964_vm1, %v5749_v59  ;;  %5156 = vst.msk [vmem:[%s10126_s3 + $0x2fc] sm:$0xf] %vm4964_vm1, %v5750_v57  ;;  %v4176_v12 = vmax.f32 %v3980_v41, 0.0  ;;  %v4177_v47 = vmax.f32 %v3981_v58, 0.0  ;;  %v3779_v51 = vmax.f32 %v9732_v28, %v3386_v0  ;;  %v3780_v36 = vmax.f32 %v9736_v25, %v3388_v54 }
 0x448   :  { %v5751_v42 = vpack.c.bf16 %v4176_v12, %v4176_v12  ;;  %v5752_v24 = vpack.c.bf16 %v4177_v47, %v4177_v47  ;;  %v3982_v50 = vadd.f32 %v9983_v22, %v3779_v51  ;;  %v3983_v4 = vadd.f32 %v9983_v22, %v3780_v36 }
 0x44a   :  { %5157 = vst.msk [vmem:[%s10126_s3 + $0x300] sm:$0xf] %vm4964_vm1, %v5751_v42  ;;  %5158 = vst.msk [vmem:[%s10126_s3 + $0x304] sm:$0xf] %vm4964_vm1, %v5752_v24  ;;  %v4178_v2 = vmax.f32 %v3982_v50, 0.0  ;;  %v4179_v28 = vmax.f32 %v3983_v4, 0.0 }
 0x44c   :  { %v5753_v11 = vpack.c.bf16 %v4178_v2, %v4178_v2  ;;  %v5754_v25 = vpack.c.bf16 %v4179_v28, %v4179_v28 }
 0x44e   :  { %5159 = vst.msk [vmem:[%s10126_s3 + $0x308] sm:$0xf] %vm4964_vm1, %v5753_v11  ;;  %5160 = vst.msk [vmem:[%s10126_s3 + $0x30c] sm:$0xf] %vm4964_vm1, %v5754_v25 }

// kernel: cnn_forward.3
= control target key start
LH: loop header
LB: loop body
LE: loop exit
PB: predicated region body
PF: predicated region fallthrough
CT: control target
= control target key end

     0   :  { %vm5930_vm0 = vmmov 0   ;;  %vm4377_vm1 = vcmask 523264   ;;  %vm4451_vm2 = vcmask 80896   ;;  %s7278_s1 = inlined_call_operand.vmem [shape: bf16[6272,64], index: 1, kind: input, shape index: {}]   ;;  %s7279_s0 = inlined_call_operand.vmem [shape: bf16[8,6272], index: 0, kind: input, shape index: {}]   ;;  %s7280_s2 = inlined_call_operand.vmem [shape: f32[1,64], index: 2, kind: input, shape index: {}]   ;;  %s7281_s3 = inlined_call_operand.vmem [shape: f32[64,10], index: 3, kind: input, shape index: {}]   ;;  %s7282_s4 = inlined_call_operand.vmem [shape: f32[1,10], index: 4, kind: input, shape index: {}]   ;;  %s7283_s5 = inlined_call_operand.vmem [shape: f32[8,10], index: 5, kind: output, shape index: {}]  }
   0x1   :  { %v5488_v0 = vld [vmem:[%s7278_s1 + $0x78] sm:$0xff]   ;;  %v5492_v4 = vld [vmem:[%s7278_s1 + $0x70] sm:$0xff]   ;;  %v5496_v8 = vld [vmem:[%s7278_s1 + $0x68] sm:$0xff]  }
   0x2   :  { %v5489_v1 = vld [vmem:[%s7278_s1 + $0x38] sm:$0xff]   ;;  %4901 = vmatprep.subr.bf16.mxu0 %v5488_v0  ;;  %v5493_v5 = vld [vmem:[%s7278_s1 + $0x30] sm:$0xff]   ;;  %v5497_v9 = vld [vmem:[%s7278_s1 + $0x28] sm:$0xff]  }
   0x3   :  { %v5490_v2 = vld [vmem:[%s7278_s1 + $0xf8] sm:$0xff]   ;;  %4902 = vmatpush3.bf16.msra.mxu0 %v5489_v1  ;;  %v5494_v6 = vld [vmem:[%s7278_s1 + $0xf0] sm:$0xff]   ;;  %v5498_v10 = vld [vmem:[%s7278_s1 + $0xe8] sm:$0xff]  }
   0x4   :  { %v5491_v3 = vld [vmem:[%s7278_s1 + $0xb8] sm:$0xff]   ;;  %4923 = vmatprep.subr.bf16.mxu1 %v5490_v2  ;;  %4903 = vmatprep.subr.bf16.mxu0 %v5492_v4  ;;  %v5495_v7 = vld [vmem:[%s7278_s1 + $0xb0] sm:$0xff]   ;;  %v5499_v11 = vld [vmem:[%s7278_s1 + $0xa8] sm:$0xff]  }
   0x5   :  { %4924 = vmatpush3.bf16.msra.mxu1 %v5491_v3  ;;  %v5500_v12 = vld [vmem:[%s7278_s1 + $0x60] sm:$0xff]   ;;  %v5504_v16 = vld [vmem:[%s7278_s1 + $0x58] sm:$0xff]   ;;  %v5508_v20 = vld [vmem:[%s7278_s1 + $0x50] sm:$0xff]  }
   0x6   :  { %4925 = vmatprep.subr.bf16.mxu1 %v5494_v6  ;;  %v5501_v13 = vld [vmem:[%s7278_s1 + $0x20] sm:$0xff]   ;;  %v5505_v17 = vld [vmem:[%s7278_s1 + $0x18] sm:$0xff]   ;;  %v5509_v21 = vld [vmem:[%s7278_s1 + $0x10] sm:$0xff]  }
   0x7   :  { %4904 = vmatpush3.bf16.msra.mxu0 %v5493_v5  ;;  %v5502_v14 = vld [vmem:[%s7278_s1 + $0xe0] sm:$0xff]   ;;  %v5506_v18 = vld [vmem:[%s7278_s1 + $0xd8] sm:$0xff]   ;;  %v5510_v22 = vld [vmem:[%s7278_s1 + $0xd0] sm:$0xff]  }
   0x8   :  { %4905 = vmatprep.subr.bf16.mxu0 %v5496_v8  ;;  %v5503_v15 = vld [vmem:[%s7278_s1 + $0xa0] sm:$0xff]   ;;  %v5507_v19 = vld [vmem:[%s7278_s1 + $0x98] sm:$0xff]   ;;  %v5511_v23 = vld [vmem:[%s7278_s1 + $0x90] sm:$0xff]  }
   0x9   :  { %4926 = vmatpush3.bf16.msra.mxu1 %v5495_v7  ;;  %v5512_v24 = vld [vmem:[%s7278_s1 + $0x48] sm:$0xff]   ;;  %v5516_v28 = vld [vmem:[%s7278_s1 + $0x40] sm:$0xff]   ;;  %v5522_v35 = vld [vmem:[%s7278_s1 + $0x178] sm:$0xff]  }
   0xa   :  { %4927 = vmatprep.subr.bf16.mxu1 %v5498_v10  ;;  %v5513_v25 = vld [vmem:[%s7278_s1 + $0x8] sm:$0xff]   ;;  %v5517_v29 = vld [vmem:[%s7278_s1] sm:$0xff]   ;;  %v5525_v39 = vld [vmem:[%s7278_s1 + $0x138] sm:$0xff]  }
   0xb   :  { %4906 = vmatpush3.bf16.msra.mxu0 %v5497_v9  ;;  %v5514_v26 = vld [vmem:[%s7278_s1 + $0xc8] sm:$0xff]   ;;  %v5518_v30 = vld [vmem:[%s7278_s1 + $0xc0] sm:$0xff]   ;;  %v5526_v40 = vld [vmem:[%s7278_s1 + $0x1f8] sm:$0xff]  }
   0xc   :  { %4907 = vmatprep.subr.bf16.mxu0 %v5500_v12  ;;  %v5515_v27 = vld [vmem:[%s7278_s1 + $0x88] sm:$0xff]   ;;  %v21_v31 = vld [vmem:[%s7279_s0] sm:$0xff]  ;;  %v5527_v41 = vld [vmem:[%s7278_s1 + $0x1b8] sm:$0xff]  }
   0xd   :  { %4928 = vmatpush3.bf16.msra.mxu1 %v5499_v11  ;;  %v4458_v32 = vcombine.low %v21_v31, %v21_v31  ;;  %v4459_v33 = vcombine.high %v21_v31, %v21_v31  ;;  %v5521_v34 = vld [vmem:[%s7278_s1 + $0x80] sm:$0xff]   ;;  %v22_v36 = vld [vmem:[%s7279_s0 + $0x8] sm:$0xff]  ;;  %v5528_v42 = vld [vmem:[%s7278_s1 + $0x170] sm:$0xff]  }
   0xe   :  { %4929 = vmatprep.subr.bf16.mxu1 %v5502_v14  ;;  %v4460_v37 = vcombine.low %v22_v36, %v22_v36  ;;  %v4461_v38 = vcombine.high %v22_v36, %v22_v36  ;;  %v5529_v43 = vld [vmem:[%s7278_s1 + $0x130] sm:$0xff]   ;;  %v5532_v46 = vld [vmem:[%s7278_s1 + $0x168] sm:$0xff]   ;;  %v5536_v50 = vld [vmem:[%s7278_s1 + $0x160] sm:$0xff]  }
   0xf   :  { %4908 = vmatpush3.bf16.msra.mxu0 %v5501_v13  ;;  %3393 = vmatprep.mubr.bf16.mxu0 %v4459_v33  ;;  %v5530_v44 = vld [vmem:[%s7278_s1 + $0x1f0] sm:$0xff]   ;;  %v5533_v47 = vld [vmem:[%s7278_s1 + $0x128] sm:$0xff]   ;;  %v5537_v51 = vld [vmem:[%s7278_s1 + $0x120] sm:$0xff]  }
  0x10   :  { %4909 = vmatprep.subr.bf16.mxu0 %v5504_v16  ;;  %3433 = vmatprep.mubr.bf16.mxu1 %v4461_v38  ;;  %v5531_v45 = vld [vmem:[%s7278_s1 + $0x1b0] sm:$0xff]   ;;  %v5534_v48 = vld [vmem:[%s7278_s1 + $0x1e8] sm:$0xff]   ;;  %v5538_v52 = vld [vmem:[%s7278_s1 + $0x1e0] sm:$0xff]  }
  0x11   :  { %4930 = vmatpush3.bf16.msra.mxu1 %v5503_v15  ;;  %v5535_v49 = vld [vmem:[%s7278_s1 + $0x1a8] sm:$0xff]   ;;  %v5539_v53 = vld [vmem:[%s7278_s1 + $0x1a0] sm:$0xff]   ;;  %v5540_v54 = vld [vmem:[%s7278_s1 + $0x158] sm:$0xff]  }
  0x12   :  { %4931 = vmatprep.subr.bf16.mxu1 %v5506_v18  ;;  %v5541_v55 = vld [vmem:[%s7278_s1 + $0x118] sm:$0xff]   ;;  %v5544_v58 = vld [vmem:[%s7278_s1 + $0x150] sm:$0xff]   ;;  %v5548_v62 = vld [vmem:[%s7278_s1 + $0x148] sm:$0xff]  }
  0x13   :  { %4910 = vmatpush3.bf16.msra.mxu0 %v5505_v17  ;;  %v5542_v56 = vld [vmem:[%s7278_s1 + $0x1d8] sm:$0xff]   ;;  %v5545_v59 = vld [vmem:[%s7278_s1 + $0x110] sm:$0xff]   ;;  %v5549_v63 = vld [vmem:[%s7278_s1 + $0x108] sm:$0xff]  }
  0x14   :  { %4911 = vmatprep.subr.bf16.mxu0 %v5508_v20  ;;  %v5543_v57 = vld [vmem:[%s7278_s1 + $0x198] sm:$0xff]   ;;  %v5546_v60 = vld [vmem:[%s7278_s1 + $0x1d0] sm:$0xff]   ;;  %v5550_v0 = vld [vmem:[%s7278_s1 + $0x1c8] sm:$0xff]  }
  0x15   :  { %4932 = vmatpush3.bf16.msra.mxu1 %v5507_v19  ;;  %v5547_v61 = vld [vmem:[%s7278_s1 + $0x190] sm:$0xff]   ;;  %v5551_v1 = vld [vmem:[%s7278_s1 + $0x188] sm:$0xff]   ;;  %v5552_v2 = vld [vmem:[%s7278_s1 + $0x140] sm:$0xff]  }
  0x16   :  { %4933 = vmatprep.subr.bf16.mxu1 %v5510_v22  ;;  %v5553_v3 = vld [vmem:[%s7278_s1 + $0x100] sm:$0xff]   ;;  %v23_v5 = vld [vmem:[%s7279_s0 + $0x10] sm:$0xff]  ;;  %v5558_v9 = vld [vmem:[%s7278_s1 + $0x278] sm:$0xff]  }
  0x17   :  { %4912 = vmatpush3.bf16.msra.mxu0 %v5509_v21  ;;  %v5554_v4 = vld [vmem:[%s7278_s1 + $0x1c0] sm:$0xff]   ;;  %v4462_v6 = vcombine.low %v23_v5, %v23_v5  ;;  %v4463_v7 = vcombine.high %v23_v5, %v23_v5  ;;  %v24_v10 = vld [vmem:[%s7279_s0 + $0x18] sm:$0xff]  ;;  %v5564_v16 = vld [vmem:[%s7278_s1 + $0x270] sm:$0xff]  }
  0x18   :  { %4913 = vmatprep.subr.bf16.mxu0 %v5512_v24  ;;  %v5557_v8 = vld [vmem:[%s7278_s1 + $0x180] sm:$0xff]   ;;  %v4464_v11 = vcombine.low %v24_v10, %v24_v10  ;;  %v4465_v12 = vcombine.high %v24_v10, %v24_v10  ;;  %v5561_v13 = vld [vmem:[%s7278_s1 + $0x238] sm:$0xff]   ;;  %v5565_v17 = vld [vmem:[%s7278_s1 + $0x230] sm:$0xff]  }
  0x19   :  { %4934 = vmatpush3.bf16.msra.mxu1 %v5511_v23  ;;  %v5562_v14 = vld [vmem:[%s7278_s1 + $0x2f8] sm:$0xff]   ;;  %v5566_v18 = vld [vmem:[%s7278_s1 + $0x2f0] sm:$0xff]   ;;  %v5568_v20 = vld [vmem:[%s7278_s1 + $0x268] sm:$0xff]  }
  0x1a   :  { %4935 = vmatprep.subr.bf16.mxu1 %v5514_v26  ;;  %v5563_v15 = vld [vmem:[%s7278_s1 + $0x2b8] sm:$0xff]   ;;  %v5567_v19 = vld [vmem:[%s7278_s1 + $0x2b0] sm:$0xff]   ;;  %v5569_v21 = vld [vmem:[%s7278_s1 + $0x228] sm:$0xff]  }
  0x1b   :  { %4914 = vmatpush3.bf16.msra.mxu0 %v5513_v25  ;;  %v5570_v22 = vld [vmem:[%s7278_s1 + $0x2e8] sm:$0xff]   ;;  %v5572_v24 = vld [vmem:[%s7278_s1 + $0x260] sm:$0xff]   ;;  %v5579_v31 = vld [vmem:[%s7278_s1 + $0x298] sm:$0xff]  }
  0x1c   :  { %4915 = vmatprep.subr.bf16.mxu0 %v5516_v28  ;;  %v5571_v23 = vld [vmem:[%s7278_s1 + $0x2a8] sm:$0xff]   ;;  %v5573_v25 = vld [vmem:[%s7278_s1 + $0x220] sm:$0xff]   ;;  %v5576_v28 = vld [vmem:[%s7278_s1 + $0x258] sm:$0xff]  }
  0x1d   :  { %4936 = vmatpush3.bf16.msra.mxu1 %v5515_v27  ;;  %v5574_v26 = vld [vmem:[%s7278_s1 + $0x2e0] sm:$0xff]   ;;  %v5581_v33 = vld [vmem:[%s7278_s1 + $0x210] sm:$0xff]   ;;  %v5584_v36 = vld [vmem:[%s7278_s1 + $0x248] sm:$0xff]  }
  0x1e   :  { %4937 = vmatprep.subr.bf16.mxu1 %v5518_v30  ;;  %v5575_v27 = vld [vmem:[%s7278_s1 + $0x2a0] sm:$0xff]   ;;  %v5578_v30 = vld [vmem:[%s7278_s1 + $0x2d8] sm:$0xff]   ;;  %v5586_v38 = vld [vmem:[%s7278_s1 + $0x2c8] sm:$0xff]  }
  0x1f   :  { %4916 = vmatpush3.bf16.msra.mxu0 %v5517_v29  ;;  %v5577_v29 = vld [vmem:[%s7278_s1 + $0x218] sm:$0xff]   ;;  %v5620_v10 = vld [vmem:[%s7278_s1 + $0x348] sm:$0xff]  }
  0x20   :  { %4945 = vmatprep.subr.bf16.mxu0 %v5522_v35  ;;  %v5583_v35 = vld [vmem:[%s7278_s1 + $0x290] sm:$0xff]   ;;  %v5615_v5 = vld [vmem:[%s7278_s1 + $0x398] sm:$0xff]  }
  0x21   :  { %4938 = vmatpush3.bf16.msra.mxu1 %v5521_v34  ;;  %v5582_v34 = vld [vmem:[%s7278_s1 + $0x2d0] sm:$0xff]  }
  0x22   :  { %3394 = vmatmul.mubr.bf16.vlgmr.msra.gmra.mxu0 %v4458_v32  ;;  %4967 = vmatprep.subr.bf16.mxu1 %v5526_v40  ;;  %v5580_v32 = vld [vmem:[%s7278_s1 + $0x250] sm:$0xff]   ;;  %v5588_v40 = vld [vmem:[%s7278_s1 + $0x240] sm:$0xff]  }
  0x23   :  { %4946 = vmatpush3.bf16.msra.mxu0 %v5525_v39  ;;  %3473 = vmatprep.mubr.bf16.mxu0 %v4463_v7  ;;  %v5587_v39 = vld [vmem:[%s7278_s1 + $0x288] sm:$0xff]   ;;  %v5617_v7 = vld [vmem:[%s7278_s1 + $0x310] sm:$0xff]  }
  0x24   :  { %3434 = vmatmul.mubr.bf16.vlgmr.msra.gmra.mxu1 %v4460_v37  ;;  %4947 = vmatprep.subr.bf16.mxu0 %v5528_v42  ;;  %v5585_v37 = vld [vmem:[%s7278_s1 + $0x208] sm:$0xff]   ;;  %v5590_v42 = vld [vmem:[%s7278_s1 + $0x2c0] sm:$0xff]  }
  0x25   :  { %4968 = vmatpush3.bf16.msra.mxu1 %v5527_v41  ;;  %3513 = vmatprep.mubr.bf16.mxu1 %v4465_v12  ;;  %v5589_v41 = vld [vmem:[%s7278_s1 + $0x200] sm:$0xff]   ;;  %v5622_v12 = vld [vmem:[%s7278_s1 + $0x3c8] sm:$0xff]  }
  0x26   :  { %4969 = vmatprep.subr.bf16.mxu1 %v5530_v44 }
  0x27   :  { %4948 = vmatpush3.bf16.msra.mxu0 %v5529_v43  ;;  %v25_v43 = vld [vmem:[%s7279_s0 + $0x20] sm:$0xff] }
  0x28   :  { %4949 = vmatprep.subr.bf16.mxu0 %v5532_v46  ;;  %v4466_v44 = vcombine.low %v25_v43, %v25_v43  ;;  %v5593_v46 = vld [vmem:[%s7278_s1 + $0x280] sm:$0xff]  }
  0x29   :  { %4970 = vmatpush3.bf16.msra.mxu1 %v5531_v45  ;;  %v4467_v45 = vcombine.high %v25_v43, %v25_v43  ;;  %v5651_v43 = vld [vmem:[%s7278_s1 + $0x498] sm:$0xff]  }
  0x2a   :  { %4971 = vmatprep.subr.bf16.mxu1 %v5534_v48  ;;  %v26_v48 = vld [vmem:[%s7279_s0 + $0x28] sm:$0xff] }
  0x2b   :  { %4950 = vmatpush3.bf16.msra.mxu0 %v5533_v47  ;;  %v5594_v47 = vld [vmem:[%s7278_s1 + $0x378] sm:$0xff]  }
  0x2c   :  { %4951 = vmatprep.subr.bf16.mxu0 %v5536_v50  ;;  %v4469_v50 = vcombine.high %v26_v48, %v26_v48 }
  0x2d   :  { %4972 = vmatpush3.bf16.msra.mxu1 %v5535_v49  ;;  %v4468_v49 = vcombine.low %v26_v48, %v26_v48  ;;  %v5656_v48 = vld [vmem:[%s7278_s1 + $0x448] sm:$0xff]  }
  0x2e   :  { %4973 = vmatprep.subr.bf16.mxu1 %v5538_v52  ;;  %v5598_v52 = vld [vmem:[%s7278_s1 + $0x3f8] sm:$0xff]  }
  0x2f   :  { %4952 = vmatpush3.bf16.msra.mxu0 %v5537_v51  ;;  %v5597_v51 = vld [vmem:[%s7278_s1 + $0x338] sm:$0xff]  }
  0x30   :  { %4953 = vmatprep.subr.bf16.mxu0 %v5540_v54  ;;  %v5600_v54 = vld [vmem:[%s7278_s1 + $0x370] sm:$0xff]  }
  0x31   :  { %4974 = vmatpush3.bf16.msra.mxu1 %v5539_v53  ;;  %v5599_v53 = vld [vmem:[%s7278_s1 + $0x3b8] sm:$0xff]  }
  0x32   :  { %4975 = vmatprep.subr.bf16.mxu1 %v5542_v56  ;;  %v5602_v56 = vld [vmem:[%s7278_s1 + $0x3f0] sm:$0xff]  }
  0x33   :  { %4954 = vmatpush3.bf16.msra.mxu0 %v5541_v55  ;;  %v5601_v55 = vld [vmem:[%s7278_s1 + $0x330] sm:$0xff]  }
  0x34   :  { %4955 = vmatprep.subr.bf16.mxu0 %v5544_v58  ;;  %v5604_v58 = vld [vmem:[%s7278_s1 + $0x368] sm:$0xff]  }
  0x35   :  { %4976 = vmatpush3.bf16.msra.mxu1 %v5543_v57  ;;  %v5603_v57 = vld [vmem:[%s7278_s1 + $0x3b0] sm:$0xff]  }
  0x36   :  { %4977 = vmatprep.subr.bf16.mxu1 %v5546_v60  ;;  %v5606_v60 = vld [vmem:[%s7278_s1 + $0x3e8] sm:$0xff]  }
  0x37   :  { %4956 = vmatpush3.bf16.msra.mxu0 %v5545_v59  ;;  %v5605_v59 = vld [vmem:[%s7278_s1 + $0x328] sm:$0xff]  }
  0x38   :  { %4957 = vmatprep.subr.bf16.mxu0 %v5548_v62  ;;  %v5608_v62 = vld [vmem:[%s7278_s1 + $0x360] sm:$0xff]  }
  0x39   :  { %4978 = vmatpush3.bf16.msra.mxu1 %v5547_v61  ;;  %v5607_v61 = vld [vmem:[%s7278_s1 + $0x3a8] sm:$0xff]  }
  0x3a   :  { %4979 = vmatprep.subr.bf16.mxu1 %v5550_v0  ;;  %v5610_v0 = vld [vmem:[%s7278_s1 + $0x3e0] sm:$0xff]  }
  0x3b   :  { %4958 = vmatpush3.bf16.msra.mxu0 %v5549_v63  ;;  %v5609_v63 = vld [vmem:[%s7278_s1 + $0x320] sm:$0xff]  }
  0x3c   :  { %4959 = vmatprep.subr.bf16.mxu0 %v5552_v2  ;;  %v5612_v2 = vld [vmem:[%s7278_s1 + $0x358] sm:$0xff]  }
  0x3d   :  { %4980 = vmatpush3.bf16.msra.mxu1 %v5551_v1  ;;  %v5611_v1 = vld [vmem:[%s7278_s1 + $0x3a0] sm:$0xff]  }
  0x3e   :  { %4981 = vmatprep.subr.bf16.mxu1 %v5554_v4  ;;  %v5614_v4 = vld [vmem:[%s7278_s1 + $0x3d8] sm:$0xff]  }
  0x3f   :  { %4960 = vmatpush3.bf16.msra.mxu0 %v5553_v3  ;;  %v5613_v3 = vld [vmem:[%s7278_s1 + $0x318] sm:$0xff]  }
  0x40   :  { %4989 = vmatprep.subr.bf16.mxu0 %v5558_v9  ;;  %v5619_v9 = vld [vmem:[%s7278_s1 + $0x390] sm:$0xff]  }
  0x41   :  { %4982 = vmatpush3.bf16.msra.mxu1 %v5557_v8  ;;  %v5618_v8 = vld [vmem:[%s7278_s1 + $0x3d0] sm:$0xff]  }
  0x42   :  { %3474 = vmatmul.mubr.bf16.vlgmr.msra.gmra.mxu0 %v4462_v6  ;;  %5011 = vmatprep.subr.bf16.mxu1 %v5562_v14  ;;  %v5616_v6 = vld [vmem:[%s7278_s1 + $0x350] sm:$0xff]   ;;  %v5624_v14 = vld [vmem:[%s7278_s1 + $0x340] sm:$0xff]  }
  0x43   :  { %4990 = vmatpush3.bf16.msra.mxu0 %v5561_v13  ;;  %3553 = vmatprep.mubr.bf16.mxu0 %v4467_v45  ;;  %v5623_v13 = vld [vmem:[%s7278_s1 + $0x388] sm:$0xff]   ;;  %v5653_v45 = vld [vmem:[%s7278_s1 + $0x410] sm:$0xff]  }
  0x44   :  { %3514 = vmatmul.mubr.bf16.vlgmr.msra.gmra.mxu1 %v4464_v11  ;;  %4991 = vmatprep.subr.bf16.mxu0 %v5564_v16  ;;  %v5621_v11 = vld [vmem:[%s7278_s1 + $0x308] sm:$0xff]   ;;  %v5626_v16 = vld [vmem:[%s7278_s1 + $0x3c0] sm:$0xff]  }
  0x45   :  { %5012 = vmatpush3.bf16.msra.mxu1 %v5563_v15  ;;  %3593 = vmatprep.mubr.bf16.mxu1 %v4469_v50  ;;  %v5625_v15 = vld [vmem:[%s7278_s1 + $0x300] sm:$0xff]   ;;  %v5658_v50 = vld [vmem:[%s7278_s1 + $0x4c8] sm:$0xff]  }
  0x46   :  { %5013 = vmatprep.subr.bf16.mxu1 %v5566_v18 }
  0x47   :  { %4992 = vmatpush3.bf16.msra.mxu0 %v5565_v17  ;;  %v27_v17 = vld [vmem:[%s7279_s0 + $0x30] sm:$0xff] }
  0x48   :  { %4993 = vmatprep.subr.bf16.mxu0 %v5568_v20  ;;  %v4470_v18 = vcombine.low %v27_v17, %v27_v17  ;;  %v5629_v20 = vld [vmem:[%s7278_s1 + $0x380] sm:$0xff]  }
  0x49   :  { %5014 = vmatpush3.bf16.msra.mxu1 %v5567_v19  ;;  %v4471_v19 = vcombine.high %v27_v17, %v27_v17  ;;  %v5687_v17 = vld [vmem:[%s7278_s1 + $0x598] sm:$0xff]  }
  0x4a   :  { %5015 = vmatprep.subr.bf16.mxu1 %v5570_v22  ;;  %v28_v22 = vld [vmem:[%s7279_s0 + $0x38] sm:$0xff] }
  0x4b   :  { %4994 = vmatpush3.bf16.msra.mxu0 %v5569_v21  ;;  %v5630_v21 = vld [vmem:[%s7278_s1 + $0x478] sm:$0xff]  }
  0x4c   :  { %4995 = vmatprep.subr.bf16.mxu0 %v5572_v24  ;;  %v4473_v24 = vcombine.high %v28_v22, %v28_v22 }
  0x4d   :  { %5016 = vmatpush3.bf16.msra.mxu1 %v5571_v23  ;;  %v4472_v23 = vcombine.low %v28_v22, %v28_v22  ;;  %v5692_v22 = vld [vmem:[%s7278_s1 + $0x548] sm:$0xff]  }
  0x4e   :  { %5017 = vmatprep.subr.bf16.mxu1 %v5574_v26  ;;  %v5634_v26 = vld [vmem:[%s7278_s1 + $0x4f8] sm:$0xff]  }
  0x4f   :  { %4996 = vmatpush3.bf16.msra.mxu0 %v5573_v25  ;;  %v5633_v25 = vld [vmem:[%s7278_s1 + $0x438] sm:$0xff]  }
  0x50   :  { %4997 = vmatprep.subr.bf16.mxu0 %v5576_v28  ;;  %v5636_v28 = vld [vmem:[%s7278_s1 + $0x470] sm:$0xff]  }
  0x51   :  { %5018 = vmatpush3.bf16.msra.mxu1 %v5575_v27  ;;  %v5635_v27 = vld [vmem:[%s7278_s1 + $0x4b8] sm:$0xff]  }
  0x52   :  { %5019 = vmatprep.subr.bf16.mxu1 %v5578_v30  ;;  %v5638_v30 = vld [vmem:[%s7278_s1 + $0x4f0] sm:$0xff]  }
  0x53   :  { %4998 = vmatpush3.bf16.msra.mxu0 %v5577_v29  ;;  %v5637_v29 = vld [vmem:[%s7278_s1 + $0x430] sm:$0xff]  }
  0x54   :  { %4999 = vmatprep.subr.bf16.mxu0 %v5580_v32  ;;  %v5640_v32 = vld [vmem:[%s7278_s1 + $0x468] sm:$0xff]  }
  0x55   :  { %5020 = vmatpush3.bf16.msra.mxu1 %v5579_v31  ;;  %v5639_v31 = vld [vmem:[%s7278_s1 + $0x4b0] sm:$0xff]  }
  0x56   :  { %5021 = vmatprep.subr.bf16.mxu1 %v5582_v34  ;;  %v5642_v34 = vld [vmem:[%s7278_s1 + $0x4e8] sm:$0xff]  }
  0x57   :  { %5000 = vmatpush3.bf16.msra.mxu0 %v5581_v33  ;;  %v5641_v33 = vld [vmem:[%s7278_s1 + $0x428] sm:$0xff]  }
  0x58   :  { %5001 = vmatprep.subr.bf16.mxu0 %v5584_v36  ;;  %v5644_v36 = vld [vmem:[%s7278_s1 + $0x460] sm:$0xff]  }
  0x59   :  { %5022 = vmatpush3.bf16.msra.mxu1 %v5583_v35  ;;  %v5643_v35 = vld [vmem:[%s7278_s1 + $0x4a8] sm:$0xff]  }
  0x5a   :  { %5023 = vmatprep.subr.bf16.mxu1 %v5586_v38  ;;  %v5646_v38 = vld [vmem:[%s7278_s1 + $0x4e0] sm:$0xff]  }
  0x5b   :  { %5002 = vmatpush3.bf16.msra.mxu0 %v5585_v37  ;;  %v5645_v37 = vld [vmem:[%s7278_s1 + $0x420] sm:$0xff]  }
  0x5c   :  { %5003 = vmatprep.subr.bf16.mxu0 %v5588_v40  ;;  %v5648_v40 = vld [vmem:[%s7278_s1 + $0x458] sm:$0xff]  }
  0x5d   :  { %5024 = vmatpush3.bf16.msra.mxu1 %v5587_v39  ;;  %v5647_v39 = vld [vmem:[%s7278_s1 + $0x4a0] sm:$0xff]  }
  0x5e   :  { %5025 = vmatprep.subr.bf16.mxu1 %v5590_v42  ;;  %v5650_v42 = vld [vmem:[%s7278_s1 + $0x4d8] sm:$0xff]  }
  0x5f   :  { %5004 = vmatpush3.bf16.msra.mxu0 %v5589_v41  ;;  %v5649_v41 = vld [vmem:[%s7278_s1 + $0x418] sm:$0xff]  }
  0x60   :  { %5033 = vmatprep.subr.bf16.mxu0 %v5594_v47  ;;  %v5655_v47 = vld [vmem:[%s7278_s1 + $0x490] sm:$0xff]  }
  0x61   :  { %5026 = vmatpush3.bf16.msra.mxu1 %v5593_v46  ;;  %v5654_v46 = vld [vmem:[%s7278_s1 + $0x4d0] sm:$0xff]  }
  0x62   :  { %3554 = vmatmul.mubr.bf16.vlgmr.msra.gmra.mxu0 %v4466_v44  ;;  %5055 = vmatprep.subr.bf16.mxu1 %v5598_v52  ;;  %v5652_v44 = vld [vmem:[%s7278_s1 + $0x450] sm:$0xff]   ;;  %v5660_v52 = vld [vmem:[%s7278_s1 + $0x440] sm:$0xff]  }
  0x63   :  { %5034 = vmatpush3.bf16.msra.mxu0 %v5597_v51  ;;  %3633 = vmatprep.mubr.bf16.mxu0 %v4471_v19  ;;  %v5659_v51 = vld [vmem:[%s7278_s1 + $0x488] sm:$0xff]   ;;  %v5689_v19 = vld [vmem:[%s7278_s1 + $0x510] sm:$0xff]  }
  0x64   :  { %3594 = vmatmul.mubr.bf16.vlgmr.msra.gmra.mxu1 %v4468_v49  ;;  %5035 = vmatprep.subr.bf16.mxu0 %v5600_v54  ;;  %v5657_v49 = vld [vmem:[%s7278_s1 + $0x408] sm:$0xff]   ;;  %v5662_v54 = vld [vmem:[%s7278_s1 + $0x4c0] sm:$0xff]  }
  0x65   :  { %5056 = vmatpush3.bf16.msra.mxu1 %v5599_v53  ;;  %3673 = vmatprep.mubr.bf16.mxu1 %v4473_v24  ;;  %v5661_v53 = vld [vmem:[%s7278_s1 + $0x400] sm:$0xff]   ;;  %v5694_v24 = vld [vmem:[%s7278_s1 + $0x5c8] sm:$0xff]  }
  0x66   :  { %5057 = vmatprep.subr.bf16.mxu1 %v5602_v56 }
  0x67   :  { %5036 = vmatpush3.bf16.msra.mxu0 %v5601_v55  ;;  %v29_v55 = vld [vmem:[%s7279_s0 + $0x40] sm:$0xff] }
  0x68   :  { %5037 = vmatprep.subr.bf16.mxu0 %v5604_v58  ;;  %v4474_v56 = vcombine.low %v29_v55, %v29_v55  ;;  %v5665_v58 = vld [vmem:[%s7278_s1 + $0x480] sm:$0xff]  }
  0x69   :  { %5058 = vmatpush3.bf16.msra.mxu1 %v5603_v57  ;;  %v4475_v57 = vcombine.high %v29_v55, %v29_v55  ;;  %v5723_v55 = vld [vmem:[%s7278_s1 + $0x698] sm:$0xff]  }
  0x6a   :  { %5059 = vmatprep.subr.bf16.mxu1 %v5606_v60  ;;  %v30_v60 = vld [vmem:[%s7279_s0 + $0x48] sm:$0xff] }
  0x6b   :  { %5038 = vmatpush3.bf16.msra.mxu0 %v5605_v59  ;;  %v5666_v59 = vld [vmem:[%s7278_s1 + $0x578] sm:$0xff]  }
  0x6c   :  { %5039 = vmatprep.subr.bf16.mxu0 %v5608_v62  ;;  %v4477_v62 = vcombine.high %v30_v60, %v30_v60 }
  0x6d   :  { %5060 = vmatpush3.bf16.msra.mxu1 %v5607_v61  ;;  %v4476_v61 = vcombine.low %v30_v60, %v30_v60  ;;  %v5728_v60 = vld [vmem:[%s7278_s1 + $0x648] sm:$0xff]  }
  0x6e   :  { %5061 = vmatprep.subr.bf16.mxu1 %v5610_v0  ;;  %v5670_v0 = vld [vmem:[%s7278_s1 + $0x5f8] sm:$0xff]  }
  0x6f   :  { %5040 = vmatpush3.bf16.msra.mxu0 %v5609_v63  ;;  %v5669_v63 = vld [vmem:[%s7278_s1 + $0x538] sm:$0xff]  }
  0x70   :  { %5041 = vmatprep.subr.bf16.mxu0 %v5612_v2  ;;  %v5672_v2 = vld [vmem:[%s7278_s1 + $0x570] sm:$0xff]  }
  0x71   :  { %5062 = vmatpush3.bf16.msra.mxu1 %v5611_v1  ;;  %v5671_v1 = vld [vmem:[%s7278_s1 + $0x5b8] sm:$0xff]  }
  0x72   :  { %5063 = vmatprep.subr.bf16.mxu1 %v5614_v4  ;;  %v5674_v4 = vld [vmem:[%s7278_s1 + $0x5f0] sm:$0xff]  }
  0x73   :  { %5042 = vmatpush3.bf16.msra.mxu0 %v5613_v3  ;;  %v5673_v3 = vld [vmem:[%s7278_s1 + $0x530] sm:$0xff]  }
  0x74   :  { %5043 = vmatprep.subr.bf16.mxu0 %v5616_v6  ;;  %v5676_v6 = vld [vmem:[%s7278_s1 + $0x568] sm:$0xff]  }
  0x75   :  { %5064 = vmatpush3.bf16.msra.mxu1 %v5615_v5  ;;  %v5675_v5 = vld [vmem:[%s7278_s1 + $0x5b0] sm:$0xff]  }
  0x76   :  { %5065 = vmatprep.subr.bf16.mxu1 %v5618_v8  ;;  %v5678_v8 = vld [vmem:[%s7278_s1 + $0x5e8] sm:$0xff]  }
  0x77   :  { %5044 = vmatpush3.bf16.msra.mxu0 %v5617_v7  ;;  %v5677_v7 = vld [vmem:[%s7278_s1 + $0x528] sm:$0xff]  }
  0x78   :  { %5045 = vmatprep.subr.bf16.mxu0 %v5620_v10  ;;  %v5680_v10 = vld [vmem:[%s7278_s1 + $0x560] sm:$0xff]  }
  0x79   :  { %5066 = vmatpush3.bf16.msra.mxu1 %v5619_v9  ;;  %v5679_v9 = vld [vmem:[%s7278_s1 + $0x5a8] sm:$0xff]  }
  0x7a   :  { %5067 = vmatprep.subr.bf16.mxu1 %v5622_v12  ;;  %v5682_v12 = vld [vmem:[%s7278_s1 + $0x5e0] sm:$0xff]  }
  0x7b   :  { %5046 = vmatpush3.bf16.msra.mxu0 %v5621_v11  ;;  %v5681_v11 = vld [vmem:[%s7278_s1 + $0x520] sm:$0xff]  }
  0x7c   :  { %5047 = vmatprep.subr.bf16.mxu0 %v5624_v14  ;;  %v5684_v14 = vld [vmem:[%s7278_s1 + $0x558] sm:$0xff]  }
  0x7d   :  { %5068 = vmatpush3.bf16.msra.mxu1 %v5623_v13  ;;  %v5683_v13 = vld [vmem:[%s7278_s1 + $0x5a0] sm:$0xff]  }
  0x7e   :  { %5069 = vmatprep.subr.bf16.mxu1 %v5626_v16  ;;  %v5686_v16 = vld [vmem:[%s7278_s1 + $0x5d8] sm:$0xff]  }
  0x7f   :  { %5048 = vmatpush3.bf16.msra.mxu0 %v5625_v15  ;;  %v5685_v15 = vld [vmem:[%s7278_s1 + $0x518] sm:$0xff]  }
  0x80   :  { %5077 = vmatprep.subr.bf16.mxu0 %v5630_v21  ;;  %v5691_v21 = vld [vmem:[%s7278_s1 + $0x590] sm:$0xff]  }
  0x81   :  { %5070 = vmatpush3.bf16.msra.mxu1 %v5629_v20  ;;  %v5690_v20 = vld [vmem:[%s7278_s1 + $0x5d0] sm:$0xff]  }
  0x82   :  { %3634 = vmatmul.mubr.bf16.vlgmr.msra.gmra.mxu0 %v4470_v18  ;;  %5099 = vmatprep.subr.bf16.mxu1 %v5634_v26  ;;  %v5688_v18 = vld [vmem:[%s7278_s1 + $0x550] sm:$0xff]   ;;  %v5696_v26 = vld [vmem:[%s7278_s1 + $0x540] sm:$0xff]  }
  0x83   :  { %5078 = vmatpush3.bf16.msra.mxu0 %v5633_v25  ;;  %3713 = vmatprep.mubr.bf16.mxu0 %v4475_v57  ;;  %v5695_v25 = vld [vmem:[%s7278_s1 + $0x588] sm:$0xff]   ;;  %v5725_v57 = vld [vmem:[%s7278_s1 + $0x610] sm:$0xff]  }
  0x84   :  { %3674 = vmatmul.mubr.bf16.vlgmr.msra.gmra.mxu1 %v4472_v23  ;;  %5079 = vmatprep.subr.bf16.mxu0 %v5636_v28  ;;  %v5693_v23 = vld [vmem:[%s7278_s1 + $0x508] sm:$0xff]   ;;  %v5698_v28 = vld [vmem:[%s7278_s1 + $0x5c0] sm:$0xff]  }
  0x85   :  { %5100 = vmatpush3.bf16.msra.mxu1 %v5635_v27  ;;  %3753 = vmatprep.mubr.bf16.mxu1 %v4477_v62  ;;  %v5697_v27 = vld [vmem:[%s7278_s1 + $0x500] sm:$0xff]   ;;  %v5730_v62 = vld [vmem:[%s7278_s1 + $0x6c8] sm:$0xff]  }
  0x86   :  { %5101 = vmatprep.subr.bf16.mxu1 %v5638_v30 }
  0x87   :  { %5080 = vmatpush3.bf16.msra.mxu0 %v5637_v29  ;;  %v31_v29 = vld [vmem:[%s7279_s0 + $0x50] sm:$0xff] }
  0x88   :  { %5081 = vmatprep.subr.bf16.mxu0 %v5640_v32  ;;  %v4478_v30 = vcombine.low %v31_v29, %v31_v29  ;;  %v5701_v32 = vld [vmem:[%s7278_s1 + $0x580] sm:$0xff]  }
  0x89   :  { %5102 = vmatpush3.bf16.msra.mxu1 %v5639_v31  ;;  %v4479_v31 = vcombine.high %v31_v29, %v31_v29 }
  0x8a   :  { %5103 = vmatprep.subr.bf16.mxu1 %v5642_v34  ;;  %v32_v34 = vld [vmem:[%s7279_s0 + $0x58] sm:$0xff] }
  0x8b   :  { %5082 = vmatpush3.bf16.msra.mxu0 %v5641_v33  ;;  %v5702_v33 = vld [vmem:[%s7278_s1 + $0x678] sm:$0xff]  }
  0x8c   :  { %5083 = vmatprep.subr.bf16.mxu0 %v5644_v36  ;;  %v4481_v36 = vcombine.high %v32_v34, %v32_v34 }
  0x8d   :  { %5104 = vmatpush3.bf16.msra.mxu1 %v5643_v35  ;;  %v4480_v35 = vcombine.low %v32_v34, %v32_v34  ;;  %v5751_v34 = vld [vmem:[%s7278_s1 + $0x7a8] sm:$0xff]  }
  0x8e   :  { %5105 = vmatprep.subr.bf16.mxu1 %v5646_v38  ;;  %v5706_v38 = vld [vmem:[%s7278_s1 + $0x6f8] sm:$0xff]  }
  0x8f   :  { %5084 = vmatpush3.bf16.msra.mxu0 %v5645_v37  ;;  %v5705_v37 = vld [vmem:[%s7278_s1 + $0x638] sm:$0xff]  }
  0x90   :  { %5085 = vmatprep.subr.bf16.mxu0 %v5648_v40  ;;  %v5708_v40 = vld [vmem:[%s7278_s1 + $0x670] sm:$0xff]  }
  0x91   :  { %5106 = vmatpush3.bf16.msra.mxu1 %v5647_v39  ;;  %v5707_v39 = vld [vmem:[%s7278_s1 + $0x6b8] sm:$0xff]  }
  0x92   :  { %5107 = vmatprep.subr.bf16.mxu1 %v5650_v42  ;;  %v5710_v42 = vld [vmem:[%s7278_s1 + $0x6f0] sm:$0xff]  }
  0x93   :  { %5086 = vmatpush3.bf16.msra.mxu0 %v5649_v41  ;;  %v5709_v41 = vld [vmem:[%s7278_s1 + $0x630] sm:$0xff]  }
  0x94   :  { %5087 = vmatprep.subr.bf16.mxu0 %v5652_v44  ;;  %v5712_v44 = vld [vmem:[%s7278_s1 + $0x668] sm:$0xff]  }
  0x95   :  { %5108 = vmatpush3.bf16.msra.mxu1 %v5651_v43  ;;  %v5711_v43 = vld [vmem:[%s7278_s1 + $0x6b0] sm:$0xff]  }
  0x96   :  { %5109 = vmatprep.subr.bf16.mxu1 %v5654_v46  ;;  %v5714_v46 = vld [vmem:[%s7278_s1 + $0x6e8] sm:$0xff]  }
  0x97   :  { %5088 = vmatpush3.bf16.msra.mxu0 %v5653_v45  ;;  %v5713_v45 = vld [vmem:[%s7278_s1 + $0x628] sm:$0xff]  }
  0x98   :  { %5089 = vmatprep.subr.bf16.mxu0 %v5656_v48  ;;  %v5716_v48 = vld [vmem:[%s7278_s1 + $0x660] sm:$0xff]  }
  0x99   :  { %5110 = vmatpush3.bf16.msra.mxu1 %v5655_v47  ;;  %v5715_v47 = vld [vmem:[%s7278_s1 + $0x6a8] sm:$0xff]  }
  0x9a   :  { %5111 = vmatprep.subr.bf16.mxu1 %v5658_v50  ;;  %v5718_v50 = vld [vmem:[%s7278_s1 + $0x6e0] sm:$0xff]  }
  0x9b   :  { %5090 = vmatpush3.bf16.msra.mxu0 %v5657_v49  ;;  %v5717_v49 = vld [vmem:[%s7278_s1 + $0x620] sm:$0xff]  }
  0x9c   :  { %5091 = vmatprep.subr.bf16.mxu0 %v5660_v52  ;;  %v5720_v52 = vld [vmem:[%s7278_s1 + $0x658] sm:$0xff]  }
  0x9d   :  { %5112 = vmatpush3.bf16.msra.mxu1 %v5659_v51  ;;  %v5719_v51 = vld [vmem:[%s7278_s1 + $0x6a0] sm:$0xff]  }
  0x9e   :  { %5113 = vmatprep.subr.bf16.mxu1 %v5662_v54  ;;  %v5722_v54 = vld [vmem:[%s7278_s1 + $0x6d8] sm:$0xff]  }
  0x9f   :  { %5092 = vmatpush3.bf16.msra.mxu0 %v5661_v53  ;;  %v5721_v53 = vld [vmem:[%s7278_s1 + $0x618] sm:$0xff]  }
  0xa0   :  { %5121 = vmatprep.subr.bf16.mxu0 %v5666_v59  ;;  %v5727_v59 = vld [vmem:[%s7278_s1 + $0x690] sm:$0xff]  }
  0xa1   :  { %5114 = vmatpush3.bf16.msra.mxu1 %v5665_v58  ;;  %v5726_v58 = vld [vmem:[%s7278_s1 + $0x6d0] sm:$0xff]  }
  0xa2   :  { %3714 = vmatmul.mubr.bf16.vlgmr.msra.gmra.mxu0 %v4474_v56  ;;  %5143 = vmatprep.subr.bf16.mxu1 %v5670_v0  ;;  %v5724_v56 = vld [vmem:[%s7278_s1 + $0x650] sm:$0xff]   ;;  %v5732_v0 = vld [vmem:[%s7278_s1 + $0x640] sm:$0xff]  }
  0xa3   :  { %5122 = vmatpush3.bf16.msra.mxu0 %v5669_v63  ;;  %3793 = vmatprep.mubr.bf16.mxu0 %v4479_v31  ;;  %v5731_v63 = vld [vmem:[%s7278_s1 + $0x688] sm:$0xff]  }
  0xa4   :  { %3754 = vmatmul.mubr.bf16.vlgmr.msra.gmra.mxu1 %v4476_v61  ;;  %5123 = vmatprep.subr.bf16.mxu0 %v5672_v2  ;;  %v5729_v61 = vld [vmem:[%s7278_s1 + $0x608] sm:$0xff]   ;;  %v5734_v2 = vld [vmem:[%s7278_s1 + $0x6c0] sm:$0xff]  }
  0xa5   :  { %5144 = vmatpush3.bf16.msra.mxu1 %v5671_v1  ;;  %3833 = vmatprep.mubr.bf16.mxu1 %v4481_v36  ;;  %v5733_v1 = vld [vmem:[%s7278_s1 + $0x600] sm:$0xff]   ;;  %v5748_v31 = vld [vmem:[%s7278_s1 + $0x768] sm:$0xff]  }
  0xa6   :  { %5145 = vmatprep.subr.bf16.mxu1 %v5674_v4  ;;  %v5753_v36 = vld [vmem:[%s7278_s1 + $0x720] sm:$0xff]  }
  0xa7   :  { %5124 = vmatpush3.bf16.msra.mxu0 %v5673_v3  ;;  %v33_v3 = vld [vmem:[%s7279_s0 + $0x60] sm:$0xff] }
  0xa8   :  { %5125 = vmatprep.subr.bf16.mxu0 %v5676_v6  ;;  %v4483_v6 = vcombine.high %v33_v3, %v33_v3 }
  0xa9   :  { %5146 = vmatpush3.bf16.msra.mxu1 %v5675_v5  ;;  %v4482_v5 = vcombine.low %v33_v3, %v33_v3 }
  0xaa   :  { %5147 = vmatprep.subr.bf16.mxu1 %v5678_v8  ;;  %v5738_v8 = vld [vmem:[%s7278_s1 + $0x778] sm:$0xff]  }
  0xab   :  { %5126 = vmatpush3.bf16.msra.mxu0 %v5677_v7  ;;  %v5737_v7 = vld [vmem:[%s7278_s1 + $0x680] sm:$0xff]  }
  0xac   :  { %5127 = vmatprep.subr.bf16.mxu0 %v5680_v10 }
  0xad   :  { %5148 = vmatpush3.bf16.msra.mxu1 %v5679_v9  ;;  %v34_v9 = vld [vmem:[%s7279_s0 + $0x68] sm:$0xff] }
  0xae   :  { %5149 = vmatprep.subr.bf16.mxu1 %v5682_v12  ;;  %v4484_v12 = vcombine.low %v34_v9, %v34_v9 }
  0xaf   :  { %5128 = vmatpush3.bf16.msra.mxu0 %v5681_v11 }
  0xb0   :  { %5129 = vmatprep.subr.bf16.mxu0 %v5684_v14  ;;  %v5741_v14 = vld [vmem:[%s7278_s1 + $0x738] sm:$0xff]  }
  0xb1   :  { %5150 = vmatpush3.bf16.msra.mxu1 %v5683_v13  ;;  %v4485_v13 = vcombine.high %v34_v9, %v34_v9 }
  0xb2   :  { %5151 = vmatprep.subr.bf16.mxu1 %v5686_v16 }
  0xb3   :  { %5130 = vmatpush3.bf16.msra.mxu0 %v5685_v15  ;;  %v4457_v15 = vld [vmem:[%s7280_s2] ss:$0 sm:$0xff] }
  0xb4   :  { %5131 = vmatprep.subr.bf16.mxu0 %v5688_v18 }
  0xb5   :  { %5152 = vmatpush3.bf16.msra.mxu1 %v5687_v17  ;;  %v5742_v17 = vld [vmem:[%s7278_s1 + $0x7f8] sm:$0xff]  }
  0xb6   :  { %5153 = vmatprep.subr.bf16.mxu1 %v5690_v20 }
  0xb7   :  { %5132 = vmatpush3.bf16.msra.mxu0 %v5689_v19 }
  0xb8   :  { %5133 = vmatprep.subr.bf16.mxu0 %v5692_v22 }
  0xb9   :  { %5154 = vmatpush3.bf16.msra.mxu1 %v5691_v21  ;;  %v5743_v21 = vld [vmem:[%s7278_s1 + $0x7b8] sm:$0xff]  }
  0xba   :  { %5155 = vmatprep.subr.bf16.mxu1 %v5694_v24 }
  0xbb   :  { %5134 = vmatpush3.bf16.msra.mxu0 %v5693_v23  ;;  %v5744_v23 = vld [vmem:[%s7278_s1 + $0x770] sm:$0xff]  }
  0xbc   :  { %5135 = vmatprep.subr.bf16.mxu0 %v5696_v26 }
  0xbd   :  { %5156 = vmatpush3.bf16.msra.mxu1 %v5695_v25 }
  0xbe   :  { %5157 = vmatprep.subr.bf16.mxu1 %v5698_v28  ;;  %v5746_v28 = vld [vmem:[%s7278_s1 + $0x7f0] sm:$0xff]  }
  0xbf   :  { %5136 = vmatpush3.bf16.msra.mxu0 %v5697_v27  ;;  %v5745_v27 = vld [vmem:[%s7278_s1 + $0x730] sm:$0xff]  }
  0xc0   :  { %5165 = vmatprep.subr.bf16.mxu0 %v5702_v33  ;;  %v5750_v33 = vld [vmem:[%s7278_s1 + $0x7e8] sm:$0xff]  }
  0xc1   :  { %5158 = vmatpush3.bf16.msra.mxu1 %v5701_v32  ;;  %v5749_v32 = vld [vmem:[%s7278_s1 + $0x728] sm:$0xff]  }
  0xc2   :  { %3794 = vmatmul.mubr.bf16.vlgmr.msra.gmra.mxu0 %v4478_v30  ;;  %5187 = vmatprep.subr.bf16.mxu1 %v5706_v38  ;;  %v5747_v30 = vld [vmem:[%s7278_s1 + $0x7b0] sm:$0xff]   ;;  %v5755_v38 = vld [vmem:[%s7278_s1 + $0x7a0] sm:$0xff]  }
  0xc3   :  { %5166 = vmatpush3.bf16.msra.mxu0 %v5705_v37  ;;  %3873 = vmatprep.mubr.bf16.mxu0 %v4483_v6  ;;  %v5754_v37 = vld [vmem:[%s7278_s1 + $0x7e0] sm:$0xff]  }
  0xc4   :  { %3834 = vmatmul.mubr.bf16.vlgmr.msra.gmra.mxu1 %v4480_v35  ;;  %5167 = vmatprep.subr.bf16.mxu0 %v5708_v40  ;;  %v5752_v35 = vld [vmem:[%s7278_s1 + $0x760] sm:$0xff]   ;;  %v5757_v40 = vld [vmem:[%s7278_s1 + $0x718] sm:$0xff]  }
  0xc5   :  { %5188 = vmatpush3.bf16.msra.mxu1 %v5707_v39  ;;  %3913 = vmatprep.mubr.bf16.mxu1 %v4485_v13  ;;  %v5756_v39 = vld [vmem:[%s7278_s1 + $0x758] sm:$0xff]   ;;  %v5781_v13 = vld [vmem:[%s7278_s1 + $0x830] sm:$0xff]  }
  0xc6   :  { %5189 = vmatprep.subr.bf16.mxu1 %v5710_v42  ;;  %v5759_v42 = vld [vmem:[%s7278_s1 + $0x798] sm:$0xff]  }
  0xc7   :  { %5168 = vmatpush3.bf16.msra.mxu0 %v5709_v41  ;;  %v5758_v41 = vld [vmem:[%s7278_s1 + $0x7d8] sm:$0xff]  }
  0xc8   :  { %5169 = vmatprep.subr.bf16.mxu0 %v5712_v44  ;;  %v5761_v44 = vld [vmem:[%s7278_s1 + $0x710] sm:$0xff]  }
  0xc9   :  { %5190 = vmatpush3.bf16.msra.mxu1 %v5711_v43  ;;  %v5760_v43 = vld [vmem:[%s7278_s1 + $0x750] sm:$0xff]  }
  0xca   :  { %5191 = vmatprep.subr.bf16.mxu1 %v5714_v46  ;;  %v5763_v46 = vld [vmem:[%s7278_s1 + $0x790] sm:$0xff]  }
  0xcb   :  { %5170 = vmatpush3.bf16.msra.mxu0 %v5713_v45  ;;  %v5762_v45 = vld [vmem:[%s7278_s1 + $0x7d0] sm:$0xff]  }
  0xcc   :  { %5171 = vmatprep.subr.bf16.mxu0 %v5716_v48  ;;  %v5765_v48 = vld [vmem:[%s7278_s1 + $0x708] sm:$0xff]  }
  0xcd   :  { %5192 = vmatpush3.bf16.msra.mxu1 %v5715_v47  ;;  %v5764_v47 = vld [vmem:[%s7278_s1 + $0x748] sm:$0xff]  }
  0xce   :  { %5193 = vmatprep.subr.bf16.mxu1 %v5718_v50  ;;  %v5767_v50 = vld [vmem:[%s7278_s1 + $0x788] sm:$0xff]  }
  0xcf   :  { %5172 = vmatpush3.bf16.msra.mxu0 %v5717_v49  ;;  %v5766_v49 = vld [vmem:[%s7278_s1 + $0x7c8] sm:$0xff]  }
  0xd0   :  { %5173 = vmatprep.subr.bf16.mxu0 %v5720_v52  ;;  %v5769_v52 = vld [vmem:[%s7278_s1 + $0x700] sm:$0xff]  }
  0xd1   :  { %5194 = vmatpush3.bf16.msra.mxu1 %v5719_v51  ;;  %v5768_v51 = vld [vmem:[%s7278_s1 + $0x740] sm:$0xff]  }
  0xd2   :  { %5195 = vmatprep.subr.bf16.mxu1 %v5722_v54 }
  0xd3   :  { %5174 = vmatpush3.bf16.msra.mxu0 %v5721_v53  ;;  %v5770_v53 = vld [vmem:[%s7278_s1 + $0x7c0] sm:$0xff]  }
  0xd4   :  { %5175 = vmatprep.subr.bf16.mxu0 %v5724_v56 }
  0xd5   :  { %5196 = vmatpush3.bf16.msra.mxu1 %v5723_v55  ;;  %v35_v55 = vld [vmem:[%s7279_s0 + $0x70] sm:$0xff] }
  0xd6   :  { %5197 = vmatprep.subr.bf16.mxu1 %v5726_v58  ;;  %v4486_v56 = vcombine.low %v35_v55, %v35_v55  ;;  %v5773_v58 = vld [vmem:[%s7278_s1 + $0x780] sm:$0xff]  }
  0xd7   :  { %5176 = vmatpush3.bf16.msra.mxu0 %v5725_v57  ;;  %v4487_v57 = vcombine.high %v35_v55, %v35_v55 }
  0xd8   :  { %5177 = vmatprep.subr.bf16.mxu0 %v5728_v60  ;;  %v5774_v60 = vld [vmem:[%s7278_s1 + $0x878] sm:$0xff]  }
  0xd9   :  { %5198 = vmatpush3.bf16.msra.mxu1 %v5727_v59 }
  0xda   :  { %5199 = vmatprep.subr.bf16.mxu1 %v5730_v62 }
  0xdb   :  { %5178 = vmatpush3.bf16.msra.mxu0 %v5729_v61  ;;  %v36_v61 = vld [vmem:[%s7279_s0 + $0x78] sm:$0xff] }
  0xdc   :  { %5179 = vmatprep.subr.bf16.mxu0 %v5732_v0  ;;  %v4488_v0 = vcombine.low %v36_v61, %v36_v61 }
  0xdd   :  { %5200 = vmatpush3.bf16.msra.mxu1 %v5731_v63 }
  0xde   :  { %5201 = vmatprep.subr.bf16.mxu1 %v5734_v2  ;;  %v5777_v2 = vld [vmem:[%s7278_s1 + $0x838] sm:$0xff]  }
  0xdf   :  { %5180 = vmatpush3.bf16.msra.mxu0 %v5733_v1  ;;  %v4489_v1 = vcombine.high %v36_v61, %v36_v61 }
  0xe0   :  { %5209 = vmatprep.subr.bf16.mxu0 %v5738_v8 }
  0xe1   :  { %5202 = vmatpush3.bf16.msra.mxu1 %v5737_v7  ;;  %v5779_v7 = vld [vmem:[%s7278_s1 + $0x8b8] sm:$0xff]  }
  0xe2   :  { %v4917_v4 = vpop.f32.mrf.mxu0  ;;  %3874 = vmatmul.mubr.bf16.vlgmr.msra.gmra.mxu0 %v4482_v5  ;;  %5231 = vmatprep.subr.bf16.mxu1 %v5742_v17  ;;  %v5778_v5 = vld [vmem:[%s7278_s1 + $0x8f8] sm:$0xff]   ;;  %v5784_v17 = vld [vmem:[%s7278_s1 + $0x868] sm:$0xff]  }
  0xe3   :  { %5210 = vmatpush3.bf16.msra.mxu0 %v5741_v14  ;;  %3953 = vmatprep.mubr.bf16.mxu0 %v4487_v57  ;;  %v5782_v14 = vld [vmem:[%s7278_s1 + $0x8f0] sm:$0xff]  }
  0xe4   :  { %v4918_v10 = vpop.f32.mrf.mxu0  ;;  %v4939_v11 = vpop.f32.mrf.mxu1  ;;  %3914 = vmatmul.mubr.bf16.vlgmr.msra.gmra.mxu1 %v4484_v12  ;;  %5211 = vmatprep.subr.bf16.mxu0 %v5744_v23  ;;  %v5790_v23 = vld [vmem:[%s7278_s1 + $0x8e0] sm:$0xff]  }
  0xe5   :  { %v4919_v16 = vadd.f32 %v4918_v10, %v4917_v4  ;;  %5232 = vmatpush3.bf16.msra.mxu1 %v5743_v21  ;;  %3993 = vmatprep.mubr.bf16.mxu1 %v4489_v1  ;;  %v5780_v10 = vld [vmem:[%s7278_s1 + $0x870] sm:$0xff]   ;;  %v5788_v21 = vld [vmem:[%s7278_s1 + $0x860] sm:$0xff]  }
  0xe6   :  { %v4920_v18 = vpop.f32.mrf.mxu0  ;;  %v4940_v19 = vpop.f32.mrf.mxu1  ;;  %5233 = vmatprep.subr.bf16.mxu1 %v5746_v28  ;;  %v5795_v28 = vld [vmem:[%s7278_s1 + $0x898] sm:$0xff]   ;;  %v5818_v1 = vld [vmem:[%s7278_s1 + $0x9f0] sm:$0xff]  }
  0xe7   :  { %v3396_v20 = vadd.f32 %v4919_v16, %v4457_v15  ;;  %v4941_v22 = vadd.f32 %v4940_v19, %v4939_v11  ;;  %5212 = vmatpush3.bf16.msra.mxu0 %v5745_v27  ;;  %v5783_v16 = vld [vmem:[%s7278_s1 + $0x8b0] sm:$0xff]   ;;  %v5785_v18 = vld [vmem:[%s7278_s1 + $0x828] sm:$0xff]   ;;  %v5794_v27 = vld [vmem:[%s7278_s1 + $0x8d8] sm:$0xff]  }
  0xe8   :  { %v4921_v24 = vpop.f32.mrf.mxu0  ;;  %v4942_v25 = vpop.f32.mrf.mxu1  ;;  %5213 = vmatprep.subr.bf16.mxu0 %v5748_v31  ;;  %v5786_v19 = vld [vmem:[%s7278_s1 + $0x8e8] sm:$0xff]   ;;  %v5798_v31 = vld [vmem:[%s7278_s1 + $0x8d0] sm:$0xff]  }
  0xe9   :  { %v6693_v26 = vadd.f32 %v4941_v22, %v3396_v20  ;;  %5234 = vmatpush3.bf16.msra.mxu1 %v5747_v30  ;;  %v5787_v20 = vld [vmem:[%s7278_s1 + $0x8a8] sm:$0xff]   ;;  %v5789_v22 = vld [vmem:[%s7278_s1 + $0x820] sm:$0xff]   ;;  %v5792_v25 = vld [vmem:[%s7278_s1 + $0x858] sm:$0xff]  }
  0xea   :  { %v4943_v29 = vpop.f32.mrf.mxu1  ;;  %5235 = vmatprep.subr.bf16.mxu1 %v5750_v33  ;;  %v5791_v24 = vld [vmem:[%s7278_s1 + $0x8a0] sm:$0xff]   ;;  %v5797_v30 = vld [vmem:[%s7278_s1 + $0x810] sm:$0xff]   ;;  %v5800_v33 = vld [vmem:[%s7278_s1 + $0x848] sm:$0xff]  }
  0xeb   :  { %5214 = vmatpush3.bf16.msra.mxu0 %v5749_v32  ;;  %v5796_v29 = vld [vmem:[%s7278_s1 + $0x850] sm:$0xff]  }
  0xec   :  { %5215 = vmatprep.subr.bf16.mxu0 %v5752_v35  ;;  %v5799_v32 = vld [vmem:[%s7278_s1 + $0x890] sm:$0xff]   ;;  %v5802_v35 = vld [vmem:[%s7278_s1 + $0x8c8] sm:$0xff]  }
  0xed   :  { %5236 = vmatpush3.bf16.msra.mxu1 %v5751_v34  ;;  %v5801_v34 = vld [vmem:[%s7278_s1 + $0x808] sm:$0xff]  }
  0xee   :  { %5237 = vmatprep.subr.bf16.mxu1 %v5754_v37  ;;  %v5804_v37 = vld [vmem:[%s7278_s1 + $0x840] sm:$0xff]  }
  0xef   :  { %5216 = vmatpush3.bf16.msra.mxu0 %v5753_v36  ;;  %v5803_v36 = vld [vmem:[%s7278_s1 + $0x888] sm:$0xff]  }
  0xf0   :  { %5217 = vmatprep.subr.bf16.mxu0 %v5756_v39  ;;  %v5806_v39 = vld [vmem:[%s7278_s1 + $0x8c0] sm:$0xff]  }
  0xf1   :  { %5238 = vmatpush3.bf16.msra.mxu1 %v5755_v38  ;;  %v5805_v38 = vld [vmem:[%s7278_s1 + $0x800] sm:$0xff]  }
  0xf2   :  { %5239 = vmatprep.subr.bf16.mxu1 %v5758_v41 }
  0xf3   :  { %5218 = vmatpush3.bf16.msra.mxu0 %v5757_v40  ;;  %v37_v40 = vld [vmem:[%s7279_s0 + $0x80] sm:$0xff] }
  0xf4   :  { %5219 = vmatprep.subr.bf16.mxu0 %v5760_v43  ;;  %v4491_v43 = vcombine.high %v37_v40, %v37_v40 }
  0xf5   :  { %5240 = vmatpush3.bf16.msra.mxu1 %v5759_v42  ;;  %v4490_v42 = vcombine.low %v37_v40, %v37_v40 }
  0xf6   :  { %5241 = vmatprep.subr.bf16.mxu1 %v5762_v45  ;;  %v5810_v45 = vld [vmem:[%s7278_s1 + $0x978] sm:$0xff]  }
  0xf7   :  { %5220 = vmatpush3.bf16.msra.mxu0 %v5761_v44  ;;  %v5809_v44 = vld [vmem:[%s7278_s1 + $0x880] sm:$0xff]  }
  0xf8   :  { %5221 = vmatprep.subr.bf16.mxu0 %v5764_v47 }
  0xf9   :  { %5242 = vmatpush3.bf16.msra.mxu1 %v5763_v46 }
  0xfa   :  { %5243 = vmatprep.subr.bf16.mxu1 %v5766_v49 }
  0xfb   :  { %5222 = vmatpush3.bf16.msra.mxu0 %v5765_v48  ;;  %v38_v48 = vld [vmem:[%s7279_s0 + $0x88] sm:$0xff] }
  0xfc   :  { %5223 = vmatprep.subr.bf16.mxu0 %v5768_v51  ;;  %v4493_v51 = vcombine.high %v38_v48, %v38_v48 }
  0xfd   :  { %5244 = vmatpush3.bf16.msra.mxu1 %v5767_v50  ;;  %v4492_v50 = vcombine.low %v38_v48, %v38_v48 }
  0xfe   :  { %5245 = vmatprep.subr.bf16.mxu1 %v5770_v53 }
  0xff   :  { %5224 = vmatpush3.bf16.msra.mxu0 %v5769_v52  ;;  %v5813_v52 = vld [vmem:[%s7278_s1 + $0x938] sm:$0xff]  }
 0x100   :  { %5253 = vmatprep.subr.bf16.mxu0 %v5774_v60 }
 0x101   :  { %5246 = vmatpush3.bf16.msra.mxu1 %v5773_v58  ;;  %v5815_v58 = vld [vmem:[%s7278_s1 + $0x9b8] sm:$0xff]  }
 0x102   :  { %v4961_v54 = vpop.f32.mrf.mxu0  ;;  %3954 = vmatmul.mubr.bf16.vlgmr.msra.gmra.mxu0 %v4486_v56  ;;  %5275 = vmatprep.subr.bf16.mxu1 %v5778_v5  ;;  %v5814_v56 = vld [vmem:[%s7278_s1 + $0x9f8] sm:$0xff]   ;;  %v5822_v5 = vld [vmem:[%s7278_s1 + $0x9e8] sm:$0xff]  }
 0x103   :  { %5254 = vmatpush3.bf16.msra.mxu0 %v5777_v2  ;;  %4033 = vmatprep.mubr.bf16.mxu0 %v4491_v43  ;;  %v5819_v2 = vld [vmem:[%s7278_s1 + $0x9b0] sm:$0xff]   ;;  %v5851_v43 = vld [vmem:[%s7278_s1 + $0xab8] sm:$0xff]  }
 0x104   :  { %v4962_v59 = vpop.f32.mrf.mxu0  ;;  %v4983_v63 = vpop.f32.mrf.mxu1  ;;  %3994 = vmatmul.mubr.bf16.vlgmr.msra.gmra.mxu1 %v4488_v0  ;;  %5255 = vmatprep.subr.bf16.mxu0 %v5780_v10  ;;  %v5827_v10 = vld [vmem:[%s7278_s1 + $0x9a0] sm:$0xff]  }
 0x105   :  { %v4963_v62 = vadd.f32 %v4962_v59, %v4961_v54  ;;  %5276 = vmatpush3.bf16.msra.mxu1 %v5779_v7  ;;  %4073 = vmatprep.mubr.bf16.mxu1 %v4493_v51  ;;  %v5824_v7 = vld [vmem:[%s7278_s1 + $0x960] sm:$0xff]  }
 0x106   :  { %v4964_v3 = vpop.f32.mrf.mxu0  ;;  %v4984_v6 = vpop.f32.mrf.mxu1  ;;  %5277 = vmatprep.subr.bf16.mxu1 %v5782_v14  ;;  %v5831_v14 = vld [vmem:[%s7278_s1 + $0x998] sm:$0xff]  }
 0x107   :  { %v3476_v4 = vadd.f32 %v4963_v62, %v6693_v26  ;;  %v4985_v8 = vadd.f32 %v4984_v6, %v4983_v63  ;;  %5256 = vmatpush3.bf16.msra.mxu0 %v5781_v13  ;;  %v5793_v26 = vld [vmem:[%s7278_s1 + $0x818] sm:$0xff]   ;;  %v5816_v62 = vld [vmem:[%s7278_s1 + $0x970] sm:$0xff]   ;;  %v5820_v3 = vld [vmem:[%s7278_s1 + $0x968] sm:$0xff]  }
 0x108   :  { %v4965_v9 = vpop.f32.mrf.mxu0  ;;  %v4986_v11 = vpop.f32.mrf.mxu1  ;;  %5257 = vmatprep.subr.bf16.mxu0 %v5784_v17  ;;  %v5817_v63 = vld [vmem:[%s7278_s1 + $0x930] sm:$0xff]   ;;  %v5823_v6 = vld [vmem:[%s7278_s1 + $0x9a8] sm:$0xff]   ;;  %v5830_v13 = vld [vmem:[%s7278_s1 + $0x9d8] sm:$0xff]  }
 0x109   :  { %v6798_v12 = vadd.f32 %v4985_v8, %v3476_v4  ;;  %5278 = vmatpush3.bf16.msra.mxu1 %v5783_v16  ;;  %v5821_v4 = vld [vmem:[%s7278_s1 + $0x928] sm:$0xff]   ;;  %v5825_v8 = vld [vmem:[%s7278_s1 + $0x920] sm:$0xff]   ;;  %v5828_v11 = vld [vmem:[%s7278_s1 + $0x958] sm:$0xff]  }
 0x10a   :  { %v4987_v15 = vpop.f32.mrf.mxu1  ;;  %5279 = vmatprep.subr.bf16.mxu1 %v5786_v19  ;;  %v5826_v9 = vld [vmem:[%s7278_s1 + $0x9e0] sm:$0xff]   ;;  %v5833_v16 = vld [vmem:[%s7278_s1 + $0x910] sm:$0xff]   ;;  %v5836_v19 = vld [vmem:[%s7278_s1 + $0x948] sm:$0xff]  }
 0x10b   :  { %5258 = vmatpush3.bf16.msra.mxu0 %v5785_v18  ;;  %v5832_v15 = vld [vmem:[%s7278_s1 + $0x950] sm:$0xff]  }
 0x10c   :  { %5259 = vmatprep.subr.bf16.mxu0 %v5788_v21  ;;  %v5834_v17 = vld [vmem:[%s7278_s1 + $0x9d0] sm:$0xff]   ;;  %v5838_v21 = vld [vmem:[%s7278_s1 + $0x9c8] sm:$0xff]  }
 0x10d   :  { %5280 = vmatpush3.bf16.msra.mxu1 %v5787_v20  ;;  %v5835_v18 = vld [vmem:[%s7278_s1 + $0x990] sm:$0xff]   ;;  %v5837_v20 = vld [vmem:[%s7278_s1 + $0x908] sm:$0xff]  }
 0x10e   :  { %5281 = vmatprep.subr.bf16.mxu1 %v5790_v23  ;;  %v5840_v23 = vld [vmem:[%s7278_s1 + $0x940] sm:$0xff]  }
 0x10f   :  { %5260 = vmatpush3.bf16.msra.mxu0 %v5789_v22  ;;  %v5839_v22 = vld [vmem:[%s7278_s1 + $0x988] sm:$0xff]  }
 0x110   :  { %5261 = vmatprep.subr.bf16.mxu0 %v5792_v25  ;;  %v5842_v25 = vld [vmem:[%s7278_s1 + $0x9c0] sm:$0xff]  }
 0x111   :  { %5282 = vmatpush3.bf16.msra.mxu1 %v5791_v24  ;;  %v5841_v24 = vld [vmem:[%s7278_s1 + $0x900] sm:$0xff]  }
 0x112   :  { %5283 = vmatprep.subr.bf16.mxu1 %v5794_v27 }
 0x113   :  { %5262 = vmatpush3.bf16.msra.mxu0 %v5793_v26  ;;  %v39_v26 = vld [vmem:[%s7279_s0 + $0x90] sm:$0xff] }
 0x114   :  { %5263 = vmatprep.subr.bf16.mxu0 %v5796_v29  ;;  %v4495_v29 = vcombine.high %v39_v26, %v39_v26 }
 0x115   :  { %5284 = vmatpush3.bf16.msra.mxu1 %v5795_v28  ;;  %v4494_v28 = vcombine.low %v39_v26, %v39_v26 }
 0x116   :  { %5285 = vmatprep.subr.bf16.mxu1 %v5798_v31  ;;  %v5846_v31 = vld [vmem:[%s7278_s1 + $0xa78] sm:$0xff]  }
 0x117   :  { %5264 = vmatpush3.bf16.msra.mxu0 %v5797_v30  ;;  %v5845_v30 = vld [vmem:[%s7278_s1 + $0x980] sm:$0xff]  }
 0x118   :  { %5265 = vmatprep.subr.bf16.mxu0 %v5800_v33 }
 0x119   :  { %5286 = vmatpush3.bf16.msra.mxu1 %v5799_v32  ;;  %v40_v32 = vld [vmem:[%s7279_s0 + $0x98] sm:$0xff] }
 0x11a   :  { %5287 = vmatprep.subr.bf16.mxu1 %v5802_v35  ;;  %v4496_v35 = vcombine.low %v40_v32, %v40_v32 }
 0x11b   :  { %5266 = vmatpush3.bf16.msra.mxu0 %v5801_v34 }
 0x11c   :  { %5267 = vmatprep.subr.bf16.mxu0 %v5804_v37  ;;  %v5849_v37 = vld [vmem:[%s7278_s1 + $0xa38] sm:$0xff]  }
 0x11d   :  { %5288 = vmatpush3.bf16.msra.mxu1 %v5803_v36  ;;  %v4497_v36 = vcombine.high %v40_v32, %v40_v32  ;;  %v5888_v32 = vld [vmem:[%s7278_s1 + $0xb70] sm:$0xff]  }
 0x11e   :  { %5289 = vmatprep.subr.bf16.mxu1 %v5806_v39  ;;  %v5850_v39 = vld [vmem:[%s7278_s1 + $0xaf8] sm:$0xff]  }
 0x11f   :  { %5268 = vmatpush3.bf16.msra.mxu0 %v5805_v38 }
 0x120   :  { %5297 = vmatprep.subr.bf16.mxu0 %v5810_v45  ;;  %v5852_v45 = vld [vmem:[%s7278_s1 + $0xa70] sm:$0xff]  }
 0x121   :  { %5290 = vmatpush3.bf16.msra.mxu1 %v5809_v44 }
 0x122   :  { %v5005_v41 = vpop.f32.mrf.mxu0  ;;  %4034 = vmatmul.mubr.bf16.vlgmr.msra.gmra.mxu0 %v4490_v42  ;;  %5319 = vmatprep.subr.bf16.mxu1 %v5814_v56  ;;  %v5859_v56 = vld [vmem:[%s7278_s1 + $0xaa8] sm:$0xff]  }
 0x123   :  { %5298 = vmatpush3.bf16.msra.mxu0 %v5813_v52  ;;  %4113 = vmatprep.mubr.bf16.mxu0 %v4495_v29  ;;  %v5855_v52 = vld [vmem:[%s7278_s1 + $0xab0] sm:$0xff]   ;;  %v5887_v29 = vld [vmem:[%s7278_s1 + $0xbb8] sm:$0xff]  }
 0x124   :  { %v5006_v46 = vpop.f32.mrf.mxu0  ;;  %v5027_v47 = vpop.f32.mrf.mxu1  ;;  %4074 = vmatmul.mubr.bf16.vlgmr.msra.gmra.mxu1 %v4492_v50  ;;  %5299 = vmatprep.subr.bf16.mxu0 %v5816_v62  ;;  %v5854_v50 = vld [vmem:[%s7278_s1 + $0xaf0] sm:$0xff]   ;;  %v5865_v62 = vld [vmem:[%s7278_s1 + $0xa18] sm:$0xff]  }
 0x125   :  { %v5007_v49 = vadd.f32 %v5006_v46, %v5005_v41  ;;  %5320 = vmatpush3.bf16.msra.mxu1 %v5815_v58  ;;  %4153 = vmatprep.mubr.bf16.mxu1 %v4497_v36  ;;  %v5861_v58 = vld [vmem:[%s7278_s1 + $0xa20] sm:$0xff]   ;;  %v5890_v36 = vld [vmem:[%s7278_s1 + $0xbf0] sm:$0xff]  }
 0x126   :  { %v5008_v53 = vpop.f32.mrf.mxu0  ;;  %v5028_v54 = vpop.f32.mrf.mxu1  ;;  %5321 = vmatprep.subr.bf16.mxu1 %v5818_v1  ;;  %v5868_v1 = vld [vmem:[%s7278_s1 + $0xa50] sm:$0xff]  }
 0x127   :  { %v3556_v55 = vadd.f32 %v5007_v49, %v6798_v12  ;;  %v5029_v57 = vadd.f32 %v5028_v54, %v5027_v47  ;;  %5300 = vmatpush3.bf16.msra.mxu0 %v5817_v63  ;;  %v5829_v12 = vld [vmem:[%s7278_s1 + $0x918] sm:$0xff]   ;;  %v5853_v49 = vld [vmem:[%s7278_s1 + $0xa30] sm:$0xff]   ;;  %v5856_v53 = vld [vmem:[%s7278_s1 + $0xa68] sm:$0xff]  }
 0x128   :  { %v5009_v59 = vpop.f32.mrf.mxu0  ;;  %v5030_v60 = vpop.f32.mrf.mxu1  ;;  %5301 = vmatprep.subr.bf16.mxu0 %v5820_v3  ;;  %v5857_v54 = vld [vmem:[%s7278_s1 + $0xa28] sm:$0xff]   ;;  %v5866_v63 = vld [vmem:[%s7278_s1 + $0xad8] sm:$0xff]   ;;  %v5870_v3 = vld [vmem:[%s7278_s1 + $0xad0] sm:$0xff]  }
 0x129   :  { %v6900_v61 = vadd.f32 %v5029_v57, %v3556_v55  ;;  %5322 = vmatpush3.bf16.msra.mxu1 %v5819_v2  ;;  %v5858_v55 = vld [vmem:[%s7278_s1 + $0xae8] sm:$0xff]   ;;  %v5860_v57 = vld [vmem:[%s7278_s1 + $0xa60] sm:$0xff]   ;;  %v5869_v2 = vld [vmem:[%s7278_s1 + $0xa10] sm:$0xff]  }
 0x12a   :  { %v5031_v0 = vpop.f32.mrf.mxu1  ;;  %5323 = vmatprep.subr.bf16.mxu1 %v5822_v5  ;;  %v5862_v59 = vld [vmem:[%s7278_s1 + $0xae0] sm:$0xff]   ;;  %v5872_v5 = vld [vmem:[%s7278_s1 + $0xa48] sm:$0xff]  }
 0x12b   :  { %5302 = vmatpush3.bf16.msra.mxu0 %v5821_v4  ;;  %v5863_v60 = vld [vmem:[%s7278_s1 + $0xaa0] sm:$0xff]   ;;  %v5867_v0 = vld [vmem:[%s7278_s1 + $0xa98] sm:$0xff]   ;;  %v5871_v4 = vld [vmem:[%s7278_s1 + $0xa90] sm:$0xff]  }
 0x12c   :  { %5303 = vmatprep.subr.bf16.mxu0 %v5824_v7  ;;  %v5874_v7 = vld [vmem:[%s7278_s1 + $0xac8] sm:$0xff]  }
 0x12d   :  { %5324 = vmatpush3.bf16.msra.mxu1 %v5823_v6  ;;  %v5873_v6 = vld [vmem:[%s7278_s1 + $0xa08] sm:$0xff]  }
 0x12e   :  { %5325 = vmatprep.subr.bf16.mxu1 %v5826_v9  ;;  %v5876_v9 = vld [vmem:[%s7278_s1 + $0xa40] sm:$0xff]  }
 0x12f   :  { %5304 = vmatpush3.bf16.msra.mxu0 %v5825_v8  ;;  %v5875_v8 = vld [vmem:[%s7278_s1 + $0xa88] sm:$0xff]  }
 0x130   :  { %5305 = vmatprep.subr.bf16.mxu0 %v5828_v11  ;;  %v5878_v11 = vld [vmem:[%s7278_s1 + $0xac0] sm:$0xff]  }
 0x131   :  { %5326 = vmatpush3.bf16.msra.mxu1 %v5827_v10  ;;  %v5877_v10 = vld [vmem:[%s7278_s1 + $0xa00] sm:$0xff]  }
 0x132   :  { %5327 = vmatprep.subr.bf16.mxu1 %v5830_v13  ;;  %v41_v13 = vld [vmem:[%s7279_s0 + $0xa0] sm:$0xff] }
 0x133   :  { %5306 = vmatpush3.bf16.msra.mxu0 %v5829_v12 }
 0x134   :  { %5307 = vmatprep.subr.bf16.mxu0 %v5832_v15  ;;  %v4499_v15 = vcombine.high %v41_v13, %v41_v13 }
 0x135   :  { %5328 = vmatpush3.bf16.msra.mxu1 %v5831_v14  ;;  %v4498_v14 = vcombine.low %v41_v13, %v41_v13 }
 0x136   :  { %5329 = vmatprep.subr.bf16.mxu1 %v5834_v17 }
 0x137   :  { %5308 = vmatpush3.bf16.msra.mxu0 %v5833_v16  ;;  %v5881_v16 = vld [vmem:[%s7278_s1 + $0xa80] sm:$0xff]  }
 0x138   :  { %5309 = vmatprep.subr.bf16.mxu0 %v5836_v19  ;;  %v42_v19 = vld [vmem:[%s7279_s0 + $0xa8] sm:$0xff] }
 0x139   :  { %5330 = vmatpush3.bf16.msra.mxu1 %v5835_v18  ;;  %v5882_v18 = vld [vmem:[%s7278_s1 + $0xb78] sm:$0xff]  }
 0x13a   :  { %5331 = vmatprep.subr.bf16.mxu1 %v5838_v21 }
 0x13b   :  { %5310 = vmatpush3.bf16.msra.mxu0 %v5837_v20 }
 0x13c   :  { %5311 = vmatprep.subr.bf16.mxu0 %v5840_v23  ;;  %v4501_v23 = vcombine.high %v42_v19, %v42_v19 }
 0x13d   :  { %5332 = vmatpush3.bf16.msra.mxu1 %v5839_v22  ;;  %v4500_v22 = vcombine.low %v42_v19, %v42_v19 }
 0x13e   :  { %5333 = vmatprep.subr.bf16.mxu1 %v5842_v25 }
 0x13f   :  { %5312 = vmatpush3.bf16.msra.mxu0 %v5841_v24  ;;  %v5885_v24 = vld [vmem:[%s7278_s1 + $0xb38] sm:$0xff]  }
 0x140   :  { %5341 = vmatprep.subr.bf16.mxu0 %v5846_v31 }
 0x141   :  { %5334 = vmatpush3.bf16.msra.mxu1 %v5845_v30 }
 0x142   :  { %v5049_v27 = vpop.f32.mrf.mxu0  ;;  %4114 = vmatmul.mubr.bf16.vlgmr.msra.gmra.mxu0 %v4494_v28  ;;  %5363 = vmatprep.subr.bf16.mxu1 %v5850_v39  ;;  %v5892_v39 = vld [vmem:[%s7278_s1 + $0xb68] sm:$0xff]  }
 0x143   :  { %5342 = vmatpush3.bf16.msra.mxu0 %v5849_v37  ;;  %4193 = vmatprep.mubr.bf16.mxu0 %v4499_v15  ;;  %v5921_v15 = vld [vmem:[%s7278_s1 + $0xc30] sm:$0xff]  }
 0x144   :  { %v5050_v33 = vpop.f32.mrf.mxu0  ;;  %v5071_v34 = vpop.f32.mrf.mxu1  ;;  %4154 = vmatmul.mubr.bf16.vlgmr.msra.gmra.mxu1 %v4496_v35  ;;  %5343 = vmatprep.subr.bf16.mxu0 %v5852_v45  ;;  %v5889_v35 = vld [vmem:[%s7278_s1 + $0xb30] sm:$0xff]   ;;  %v5898_v45 = vld [vmem:[%s7278_s1 + $0xbe0] sm:$0xff]  }
 0x145   :  { %v5051_v38 = vadd.f32 %v5050_v33, %v5049_v27  ;;  %5364 = vmatpush3.bf16.msra.mxu1 %v5851_v43  ;;  %v5886_v27 = vld [vmem:[%s7278_s1 + $0xbf8] sm:$0xff]   ;;  %4233 = vmatprep.mubr.bf16.mxu1 %v4501_v23  ;;  %v5896_v43 = vld [vmem:[%s7278_s1 + $0xb60] sm:$0xff]   ;;  %v5925_v23 = vld [vmem:[%s7278_s1 + $0xc10] sm:$0xff]  }
 0x146   :  { %v5052_v40 = vpop.f32.mrf.mxu0  ;;  %v5072_v41 = vpop.f32.mrf.mxu1  ;;  %5365 = vmatprep.subr.bf16.mxu1 %v5854_v50  ;;  %v5903_v50 = vld [vmem:[%s7278_s1 + $0xb98] sm:$0xff]  }
 0x147   :  { %v3636_v42 = vadd.f32 %v5051_v38, %v6900_v61  ;;  %v5073_v44 = vadd.f32 %v5072_v41, %v5071_v34  ;;  %5344 = vmatpush3.bf16.msra.mxu0 %v5853_v49  ;;  %v5864_v61 = vld [vmem:[%s7278_s1 + $0xa58] sm:$0xff]   ;;  %v5891_v38 = vld [vmem:[%s7278_s1 + $0xbb0] sm:$0xff]   ;;  %v5893_v40 = vld [vmem:[%s7278_s1 + $0xb28] sm:$0xff]  }
 0x148   :  { %v5053_v46 = vpop.f32.mrf.mxu0  ;;  %v5074_v47 = vpop.f32.mrf.mxu1  ;;  %5345 = vmatprep.subr.bf16.mxu0 %v5856_v53  ;;  %v5894_v41 = vld [vmem:[%s7278_s1 + $0xbe8] sm:$0xff]   ;;  %v5902_v49 = vld [vmem:[%s7278_s1 + $0xbd8] sm:$0xff]   ;;  %v5906_v53 = vld [vmem:[%s7278_s1 + $0xbd0] sm:$0xff]  }
 0x149   :  { %v7008_v48 = vadd.f32 %v5073_v44, %v3636_v42  ;;  %5366 = vmatpush3.bf16.msra.mxu1 %v5855_v52  ;;  %v5895_v42 = vld [vmem:[%s7278_s1 + $0xba8] sm:$0xff]   ;;  %v5897_v44 = vld [vmem:[%s7278_s1 + $0xb20] sm:$0xff]   ;;  %v5900_v47 = vld [vmem:[%s7278_s1 + $0xb58] sm:$0xff]  }
 0x14a   :  { %v5075_v51 = vpop.f32.mrf.mxu1  ;;  %5367 = vmatprep.subr.bf16.mxu1 %v5858_v55  ;;  %v5899_v46 = vld [vmem:[%s7278_s1 + $0xba0] sm:$0xff]   ;;  %v5905_v52 = vld [vmem:[%s7278_s1 + $0xb10] sm:$0xff]   ;;  %v5908_v55 = vld [vmem:[%s7278_s1 + $0xb48] sm:$0xff]  }
 0x14b   :  { %5346 = vmatpush3.bf16.msra.mxu0 %v5857_v54  ;;  %v5904_v51 = vld [vmem:[%s7278_s1 + $0xb50] sm:$0xff]  }
 0x14c   :  { %5347 = vmatprep.subr.bf16.mxu0 %v5860_v57  ;;  %v5907_v54 = vld [vmem:[%s7278_s1 + $0xb90] sm:$0xff]   ;;  %v5910_v57 = vld [vmem:[%s7278_s1 + $0xbc8] sm:$0xff]  }
 0x14d   :  { %5368 = vmatpush3.bf16.msra.mxu1 %v5859_v56  ;;  %v5909_v56 = vld [vmem:[%s7278_s1 + $0xb08] sm:$0xff]  }
 0x14e   :  { %5369 = vmatprep.subr.bf16.mxu1 %v5862_v59  ;;  %v5912_v59 = vld [vmem:[%s7278_s1 + $0xb40] sm:$0xff]  }
 0x14f   :  { %5348 = vmatpush3.bf16.msra.mxu0 %v5861_v58  ;;  %v5911_v58 = vld [vmem:[%s7278_s1 + $0xb88] sm:$0xff]  }
 0x150   :  { %5349 = vmatprep.subr.bf16.mxu0 %v5864_v61  ;;  %v5914_v61 = vld [vmem:[%s7278_s1 + $0xbc0] sm:$0xff]  }
 0x151   :  { %5370 = vmatpush3.bf16.msra.mxu1 %v5863_v60  ;;  %v5913_v60 = vld [vmem:[%s7278_s1 + $0xb00] sm:$0xff]  }
 0x152   :  { %5371 = vmatprep.subr.bf16.mxu1 %v5866_v63 }
 0x153   :  { %5350 = vmatpush3.bf16.msra.mxu0 %v5865_v62  ;;  %v43_v62 = vld [vmem:[%s7279_s0 + $0xb0] sm:$0xff] }
 0x154   :  { %5351 = vmatprep.subr.bf16.mxu0 %v5868_v1  ;;  %v4503_v1 = vcombine.high %v43_v62, %v43_v62 }
 0x155   :  { %5372 = vmatpush3.bf16.msra.mxu1 %v5867_v0  ;;  %v4502_v0 = vcombine.low %v43_v62, %v43_v62 }
 0x156   :  { %5373 = vmatprep.subr.bf16.mxu1 %v5870_v3  ;;  %v5929_v3 = vmov 0.0  }
 0x157   :  { %5352 = vmatpush3.bf16.msra.mxu0 %v5869_v2  ;;  %v5917_v2 = vld [vmem:[%s7278_s1 + $0xb80] sm:$0xff]  }
 0x158   :  { %5353 = vmatprep.subr.bf16.mxu0 %v5872_v5 }
 0x159   :  { %5374 = vmatpush3.bf16.msra.mxu1 %v5871_v4  ;;  %v44_v4 = vld [vmem:[%s7279_s0 + $0xb8] sm:$0xff] }
 0x15a   :  { %5375 = vmatprep.subr.bf16.mxu1 %v5874_v7  ;;  %v4504_v7 = vcombine.low %v44_v4, %v44_v4 }
 0x15b   :  { %5354 = vmatpush3.bf16.msra.mxu0 %v5873_v6 }
 0x15c   :  { %5355 = vmatprep.subr.bf16.mxu0 %v5876_v9  ;;  %v5920_v9 = vld [vmem:[%s7278_s1 + $0xc38] sm:$0xff]  }
 0x15d   :  { %5376 = vmatpush3.bf16.msra.mxu1 %v5875_v8  ;;  %v4505_v8 = vcombine.high %v44_v4, %v44_v4 }
 0x15e   :  { %5377 = vmatprep.subr.bf16.mxu1 %v5878_v11 }
 0x15f   :  { %5356 = vmatpush3.bf16.msra.mxu0 %v5877_v10 }
 0x160   :  { %5385 = vmatprep.subr.bf16.mxu0 %v5882_v18 }
 0x161   :  { %5378 = vmatpush3.bf16.msra.mxu1 %v5881_v16 }
 0x162   :  { %v5093_v12 = vpop.f32.mrf.mxu0  ;;  %4194 = vmatmul.mubr.bf16.vlgmr.msra.gmra.mxu0 %v4498_v14  ;;  %5407 = vmatprep.subr.bf16.mxu1 %v5886_v27 }
 0x163   :  { %5386 = vmatpush3.bf16.msra.mxu0 %v5885_v24  ;;  %4273 = vmatprep.mubr.bf16.mxu0 %v4503_v1  ;;  %v5926_v24 = vld [vmem:[%s7278_s1 + $0xc08] sm:$0xff]   ;;  %v4362_v1 = vld [vmem:[%s7281_s3] sm:$0xff] }
 0x164   :  { %v5094_v17 = vpop.f32.mrf.mxu0  ;;  %v5115_v21 = vpop.f32.mrf.mxu1  ;;  %4234 = vmatmul.mubr.bf16.vlgmr.msra.gmra.mxu1 %v4500_v22  ;;  %5387 = vmatprep.subr.bf16.mxu0 %v5888_v32  ;;  %v5924_v22 = vld [vmem:[%s7278_s1 + $0xc18] sm:$0xff]  }
 0x165   :  { %v5095_v20 = vadd.f32 %v5094_v17, %v5093_v12  ;;  %5408 = vmatpush3.bf16.msra.mxu1 %v5887_v29  ;;  %4313 = vmatprep.mubr.bf16.mxu1 %v4505_v8 }
 0x166   :  { %v5096_v25 = vpop.f32.mrf.mxu0  ;;  %v5116_v28 = vpop.f32.mrf.mxu1  ;;  %5409 = vmatprep.subr.bf16.mxu1 %v5890_v36 }
 0x167   :  { %v3716_v26 = vadd.f32 %v5095_v20, %v7008_v48  ;;  %v5117_v30 = vadd.f32 %v5116_v28, %v5115_v21  ;;  %5388 = vmatpush3.bf16.msra.mxu0 %v5889_v35  ;;  %v5901_v48 = vld [vmem:[%s7278_s1 + $0xb18] sm:$0xff]   ;;  %v5922_v20 = vld [vmem:[%s7278_s1 + $0xc28] sm:$0xff]   ;;  %v5923_v21 = vld [vmem:[%s7278_s1 + $0xc20] sm:$0xff]  }
 0x168   :  { %v5097_v31 = vpop.f32.mrf.mxu0  ;;  %v5118_v33 = vpop.f32.mrf.mxu1  ;;  %5389 = vmatprep.subr.bf16.mxu0 %v5892_v39  ;;  %v5927_v25 = vld [vmem:[%s7278_s1 + $0xc00] sm:$0xff]  }
 0x169   :  { %v7113_v34 = vadd.f32 %v5117_v30, %v3716_v26  ;;  %5410 = vmatpush3.bf16.msra.mxu1 %v5891_v38  ;;  %v5928_v26 = vld [vmem:[%s7279_s0 + $0xc0] ss:$0 sps:$4 sm:$0xff]  }
 0x16a   :  { %v5119_v37 = vpop.f32.mrf.mxu1  ;;  %5411 = vmatprep.subr.bf16.mxu1 %v5894_v41 }
 0x16b   :  { %5390 = vmatpush3.bf16.msra.mxu0 %v5893_v40 }
 0x16c   :  { %5391 = vmatprep.subr.bf16.mxu0 %v5896_v43 }
 0x16d   :  { %5412 = vmatpush3.bf16.msra.mxu1 %v5895_v42 }
 0x16e   :  { %5413 = vmatprep.subr.bf16.mxu1 %v5898_v45 }
 0x16f   :  { %5392 = vmatpush3.bf16.msra.mxu0 %v5897_v44 }
 0x170   :  { %5393 = vmatprep.subr.bf16.mxu0 %v5900_v47 }
 0x171   :  { %5414 = vmatpush3.bf16.msra.mxu1 %v5899_v46 }
 0x172   :  { %5415 = vmatprep.subr.bf16.mxu1 %v5902_v49 }
 0x173   :  { %5394 = vmatpush3.bf16.msra.mxu0 %v5901_v48 }
 0x174   :  { %5395 = vmatprep.subr.bf16.mxu0 %v5904_v51  ;;  %v4369_v51 = vld [vmem:[%s7281_s3 + $0x38] sm:$0xff] }
 0x175   :  { %5416 = vmatpush3.bf16.msra.mxu1 %v5903_v50 }
 0x176   :  { %5417 = vmatprep.subr.bf16.mxu1 %v5906_v53  ;;  %v4367_v53 = vld [vmem:[%s7281_s3 + $0x28] sm:$0xff] }
 0x177   :  { %5396 = vmatpush3.bf16.msra.mxu0 %v5905_v52  ;;  %v4368_v52 = vld [vmem:[%s7281_s3 + $0x30] sm:$0xff] }
 0x178   :  { %5397 = vmatprep.subr.bf16.mxu0 %v5908_v55  ;;  %v4365_v55 = vld [vmem:[%s7281_s3 + $0x18] sm:$0xff] }
 0x179   :  { %5418 = vmatpush3.bf16.msra.mxu1 %v5907_v54  ;;  %v4366_v54 = vld [vmem:[%s7281_s3 + $0x20] sm:$0xff] }
 0x17a   :  { %5419 = vmatprep.subr.bf16.mxu1 %v5910_v57  ;;  %v4364_v57 = vld [vmem:[%s7281_s3 + $0x10] sm:$0xff] }
 0x17b   :  { %5398 = vmatpush3.bf16.msra.mxu0 %v5909_v56 }
 0x17c   :  { %5399 = vmatprep.subr.bf16.mxu0 %v5912_v59 }
 0x17d   :  { %5420 = vmatpush3.bf16.msra.mxu1 %v5911_v58 }
 0x17e   :  { %5421 = vmatprep.subr.bf16.mxu1 %v5914_v61  ;;  %v4363_v61 = vld [vmem:[%s7281_s3 + $0x8] sm:$0xff] }
 0x17f   :  { %5400 = vmatpush3.bf16.msra.mxu0 %v5913_v60 }
 0x180   :  { %5447 = vmatprep.subr.bf16.mxu0 %v5929_v3 }
 0x181   :  { %5422 = vmatpush3.bf16.msra.mxu1 %v5917_v2 }
 0x182   :  { %v5137_v63 = vpop.f32.mrf.mxu0  ;;  %4274 = vmatmul.mubr.bf16.vlgmr.msra.gmra.mxu0 %v4502_v0  ;;  %5467 = vmatprep.subr.mxu1 %v5929_v3 }
 0x183   :  { %5448 = vmatpush3.bf16.msra.mxu0 %v5920_v9  ;;  %5463 = vmatprep.mubr.msk.bf16.mxu0 %vm5930_vm0, %v5929_v3 }
 0x184   :  { %v5138_v5 = vpop.f32.mrf.mxu0  ;;  %v5159_v6 = vpop.f32.mrf.mxu1  ;;  %4314 = vmatmul.mubr.bf16.vlgmr.msra.gmra.mxu1 %v4504_v7  ;;  %5449 = vmatprep.subr.bf16.mxu0 %v5929_v3 }
 0x185   :  { %v5139_v10 = vadd.f32 %v5138_v5, %v5137_v63  ;;  %5483 = vmatprep.mubr.msk.f32.mxu1 %vm5930_vm0, %v5929_v3  ;;  %5468 = vmatpush3.msra.mxu1 %v4369_v51 }
 0x186   :  { %v5140_v11 = vpop.f32.mrf.mxu0  ;;  %v5160_v12 = vpop.f32.mrf.mxu1  ;;  %5469 = vmatprep.subr.mxu1 %v5929_v3 }
 0x187   :  { %v3796_v13 = vadd.f32 %v5139_v10, %v7113_v34  ;;  %v5161_v14 = vadd.f32 %v5160_v12, %v5159_v6  ;;  %5450 = vmatpush3.bf16.msra.mxu0 %v5921_v15  ;;  %5470 = vmatpush3.msra.mxu1 %v4368_v52 }
 0x188   :  { %v5141_v16 = vpop.f32.mrf.mxu0  ;;  %v5162_v17 = vpop.f32.mrf.mxu1  ;;  %5451 = vmatprep.subr.bf16.mxu0 %v5929_v3  ;;  %5471 = vmatprep.subr.mxu1 %v5929_v3 }
 0x189   :  { %v3836_v18 = vadd.f32 %v5161_v14, %v3796_v13  ;;  %5472 = vmatpush3.msra.mxu1 %v4367_v53 }
 0x18a   :  { %v5163_v19 = vpop.f32.mrf.mxu1  ;;  %5473 = vmatprep.subr.mxu1 %v5929_v3 }
 0x18b   :  { %5452 = vmatpush3.bf16.msra.mxu0 %v5922_v20  ;;  %5474 = vmatpush3.msra.mxu1 %v4366_v54 }
 0x18c   :  { %5453 = vmatprep.subr.bf16.mxu0 %v5929_v3  ;;  %5475 = vmatprep.subr.mxu1 %v5929_v3 }
 0x18d   :  { %5476 = vmatpush3.msra.mxu1 %v4365_v55 }
 0x18e   :  { %5477 = vmatprep.subr.mxu1 %v5929_v3 }
 0x18f   :  { %5454 = vmatpush3.bf16.msra.mxu0 %v5923_v21  ;;  %5478 = vmatpush3.msra.mxu1 %v4364_v57 }
 0x190   :  { %5455 = vmatprep.subr.bf16.mxu0 %v5929_v3  ;;  %5479 = vmatprep.subr.mxu1 %v5929_v3 }
 0x191   :  { %5480 = vmatpush3.msra.mxu1 %v4363_v61 }
 0x192   :  { %5481 = vmatprep.subr.mxu1 %v5929_v3 }
 0x193   :  { %5456 = vmatpush3.bf16.msra.mxu0 %v5924_v22  ;;  %5482 = vmatpush3.msra.mxu1 %v4362_v1 }
 0x194   :  { %5457 = vmatprep.subr.bf16.mxu0 %v5929_v3 }
 0x197   :  { %5458 = vmatpush3.bf16.msra.mxu0 %v5925_v23 }
 0x198   :  { %5459 = vmatprep.subr.bf16.mxu0 %v5929_v3 }
 0x19b   :  { %5460 = vmatpush3.bf16.msra.mxu0 %v5926_v24 }
 0x19c   :  { %5461 = vmatprep.subr.bf16.mxu0 %v5929_v3 }
 0x19f   :  { %5462 = vmatpush3.bf16.msra.mxu0 %v5927_v25 }
 0x1a2   :  { %v5181_v27 = vpop.f32.mrf.mxu0  ;;  %5464 = vmatmul.mubr.bf16.vlgmr.msra.gmra.mxu0 %v5928_v26 }
 0x1a4   :  { %v5182_v28 = vpop.f32.mrf.mxu0  ;;  %v5203_v29 = vpop.f32.mrf.mxu1 }
 0x1a5   :  { %v5183_v30 = vadd.f32 %v5182_v28, %v5181_v27 }
 0x1a6   :  { %v5184_v31 = vpop.f32.mrf.mxu0  ;;  %v5204_v32 = vpop.f32.mrf.mxu1 }
 0x1a7   :  { %v3876_v33 = vadd.f32 %v5183_v30, %v3836_v18  ;;  %v5205_v34 = vadd.f32 %v5204_v32, %v5203_v29 }
 0x1a8   :  { %v5185_v35 = vpop.f32.mrf.mxu0  ;;  %v5206_v36 = vpop.f32.mrf.mxu1 }
 0x1a9   :  { %v3916_v37 = vadd.f32 %v5205_v34, %v3876_v33 }
 0x1aa   :  { %v5207_v38 = vpop.f32.mrf.mxu1 }
 0x1c2   :  { %v5225_v39 = vpop.f32.mrf.mxu0 }
 0x1c4   :  { %v5226_v40 = vpop.f32.mrf.mxu0  ;;  %v5247_v41 = vpop.f32.mrf.mxu1 }
 0x1c5   :  { %v5227_v42 = vadd.f32 %v5226_v40, %v5225_v39 }
 0x1c6   :  { %v5228_v43 = vpop.f32.mrf.mxu0  ;;  %v5248_v44 = vpop.f32.mrf.mxu1 }
 0x1c7   :  { %v3956_v45 = vadd.f32 %v5227_v42, %v3916_v37  ;;  %v5249_v46 = vadd.f32 %v5248_v44, %v5247_v41 }
 0x1c8   :  { %v5229_v47 = vpop.f32.mrf.mxu0  ;;  %v5250_v48 = vpop.f32.mrf.mxu1 }
 0x1c9   :  { %v3996_v49 = vadd.f32 %v5249_v46, %v3956_v45 }
 0x1ca   :  { %v5251_v50 = vpop.f32.mrf.mxu1 }
 0x1e2   :  { %v5269_v56 = vpop.f32.mrf.mxu0 }
 0x1e4   :  { %v5270_v58 = vpop.f32.mrf.mxu0  ;;  %v5291_v60 = vpop.f32.mrf.mxu1 }
 0x1e5   :  { %v5271_v59 = vadd.f32 %v5270_v58, %v5269_v56 }
 0x1e6   :  { %v5272_v62 = vpop.f32.mrf.mxu0  ;;  %v5292_v0 = vpop.f32.mrf.mxu1 }
 0x1e7   :  { %v4036_v63 = vadd.f32 %v5271_v59, %v3996_v49  ;;  %v5293_v2 = vadd.f32 %v5292_v0, %v5291_v60  ;;  %v4899_v49 = vld [vmem:[%s7282_s4] ss:$0 sm:$0xff] }
 0x1e8   :  { %v5273_v4 = vpop.f32.mrf.mxu0  ;;  %v5294_v5 = vpop.f32.mrf.mxu1 }
 0x1e9   :  { %v4076_v6 = vadd.f32 %v5293_v2, %v4036_v63 }
 0x1ea   :  { %v5295_v7 = vpop.f32.mrf.mxu1 }
 0x202   :  { %v5313_v8 = vpop.f32.mrf.mxu0 }
 0x204   :  { %v5314_v9 = vpop.f32.mrf.mxu0  ;;  %v5335_v10 = vpop.f32.mrf.mxu1 }
 0x205   :  { %v5315_v11 = vadd.f32 %v5314_v9, %v5313_v8 }
 0x206   :  { %v5316_v12 = vpop.f32.mrf.mxu0  ;;  %v5336_v13 = vpop.f32.mrf.mxu1 }
 0x207   :  { %v4116_v14 = vadd.f32 %v5315_v11, %v4076_v6  ;;  %v5337_v15 = vadd.f32 %v5336_v13, %v5335_v10 }
 0x208   :  { %v5317_v16 = vpop.f32.mrf.mxu0  ;;  %v5338_v3 = vpop.f32.mrf.mxu1 }
 0x209   :  { %v4156_v17 = vadd.f32 %v5337_v15, %v4116_v14 }
 0x20a   :  { %v5339_v18 = vpop.f32.mrf.mxu1 }
 0x222   :  { %v5357_v19 = vpop.f32.mrf.mxu0 }
 0x224   :  { %v5358_v20 = vpop.f32.mrf.mxu0  ;;  %v5379_v21 = vpop.f32.mrf.mxu1 }
 0x225   :  { %v5359_v35 = vadd.f32 %v5358_v20, %v5357_v19 }
 0x226   :  { %v5360_v22 = vpop.f32.mrf.mxu0  ;;  %v5380_v23 = vpop.f32.mrf.mxu1 }
 0x227   :  { %v4196_v36 = vadd.f32 %v5359_v35, %v4156_v17  ;;  %v5381_v37 = vadd.f32 %v5380_v23, %v5379_v21 }
 0x228   :  { %v5361_v24 = vpop.f32.mrf.mxu0  ;;  %v5382_v25 = vpop.f32.mrf.mxu1 }
 0x229   :  { %v4236_v39 = vadd.f32 %v5381_v37, %v4196_v36 }
 0x22a   :  { %v5383_v26 = vpop.f32.mrf.mxu1 }
 0x242   :  { %v5401_v27 = vpop.f32.mrf.mxu0 }
 0x244   :  { %v5402_v28 = vpop.f32.mrf.mxu0  ;;  %v5423_v29 = vpop.f32.mrf.mxu1 }
 0x245   :  { %v5403_v38 = vadd.f32 %v5402_v28, %v5401_v27 }
 0x246   :  { %v5404_v30 = vpop.f32.mrf.mxu0  ;;  %v5424_v31 = vpop.f32.mrf.mxu1 }
 0x247   :  { %v4276_v40 = vadd.f32 %v5403_v38, %v4236_v39  ;;  %v5425_v41 = vadd.f32 %v5424_v31, %v5423_v29 }
 0x248   :  { %v5405_v32 = vpop.f32.mrf.mxu0  ;;  %v5426_v33 = vpop.f32.mrf.mxu1 }
 0x249   :  { %v4316_v42 = vadd.f32 %v5425_v41, %v4276_v40 }
 0x24a   :  { %v5427_v34 = vpop.f32.mrf.mxu1 }
 0x262   :  { %v4355_v43 = vpop.f32.mrf.mxu0 }
 0x263   :  { %v4356_v44 = vadd.f32 %v4355_v43, %v4316_v42 }
 0x264   :  { %v5465_v45 = vpop.f32.mrf.mxu0 }
 0x265   :  { %v4361_v46 = vmax.f32 %v4356_v44, 0.0 }
 0x266   :  { %v4358_v47 = vpop.f32.mrf.mxu0 }
 0x267   :  { %5484 = vmatmul.mubr.msk.f32.vlgmr.msra.gmra.mxu1 %vm4377_vm1, %v4361_v46 }
 0x268   :  { %v5466_v48 = vpop.f32.mrf.mxu0 }
 0x327   :  { %v4447_v50 = vpop.f32.mrf.mxu1 }
 0x328   :  { %v4448_v51 = vadd.f32 %v4899_v49, %v4447_v50 }
 0x329   :  { %v5485_v52 = vpop.f32.mrf.mxu1 }
 0x32a   :  { %4452 = vst.msk [vmem:[%s7283_s5] sm:$0xff] %vm4451_vm2, %v4448_v51 }

</bundles_post_ra>
